<compile_context>
chip_gen: v7x
topology: tpu7x:2x2x1
jax: 0.10.0
libtpu: 0.0.40
codegen_flags: <defaults>
</compile_context>

<pallas_src>
import jax
import jax.numpy as jnp
from jax.experimental import pallas as pl
from jax.experimental.pallas import tpu as pltpu

# ---------------- configuration (small, forward-consistent shapes) ----------
B, S = 16, 8                   # batch, sequence length
BT = 16                        # batch tile per grid step (== B -> grid=(1,))
WORD_EMBED = 16                # word_embed_dim
DIST_EMBED = 8                 # distance_embed_dim
INPUT_DIM = WORD_EMBED + 2 * DIST_EMBED   # 32
HIDDEN = 2 * INPUT_DIM                    # 64  (bi-GRU output dim)
HDIR = HIDDEN // 2                        # 32  (per-direction hidden)
NFILT = 32                     # conv_filter_cnt
NCLASS = 5                     # len(relation_cls_label_map)
NCLS_PAD = 128                 # lane-padded classifier width
WORD_VOCAB = 50
DIST_VOCAB = 20

NEG_INF = -1e30


# ---------------------------- Pallas kernel ---------------------------------
def bgwa_kernel(
    x_ref,          # [BT, S, 2*INPUT_DIM]   (fwd | time-reversed), f32
    masks_ref,      # [4, BT, S]             words_mask / p1 / p2 / p3
    win_ref,        # [2*INPUT_DIM, 3*HIDDEN] bf16  fused input weights (r|z|n)
    bin_ref,        # [1, 3*HIDDEN]  f32  (b_ih + b_hr/b_hz folded; b_in for n)
    whh_ref,        # [2*HDIR, 3*HIDDEN] bf16 fused hidden weights (r|z|n)
    bhhn_ref,       # [1, HIDDEN]    f32  (b_hn only — stays inside r*(...))
    wa_ref,         # [HIDDEN, HIDDEN] bf16
    wr_ref,         # [1, HIDDEN]    f32
    convw_ref,      # [3*HIDDEN, NFILT] bf16  im2col conv weight
    convb_ref,      # [1, NFILT]     f32
    dw_ref,         # [3*NFILT, NCLS_PAD] bf16
    db_ref,         # [1, NCLS_PAD]  f32  (-1e30 in padded columns)
    out_ref,        # [BT, NCLS_PAD]
):
    f32 = jnp.float32
    bf16 = jnp.bfloat16

    # ---- hoisted GRU input projections: ONE matmul for all 3 gates x both
    # directions.  Lane layout: [r(64) | z(64) | n(64)]; within each gate the
    # first HDIR lanes are the forward direction, the rest the backward one.
    x2 = x_ref[...].reshape(BT * S, 2 * INPUT_DIM).astype(bf16)
    gi = (jnp.dot(x2, win_ref[...], preferred_element_type=f32)
          + bin_ref[...]).reshape(BT, S, 3 * HIDDEN)

    whh = whh_ref[...]          # bf16 [64, 192]
    bhh_n = bhhn_ref[...]       # f32  [1, 64]

    # ---- fused bidirectional recurrence (S small -> statically unrolled) ----
    # h = [h_fwd | h_bwd]; block-diag Whh keeps the directions independent.
    # One MXU push per step; per-step outputs stay in registers.
    h = jnp.zeros((BT, HIDDEN), f32)
    hs = []
    for t in range(S):
        gh = jnp.dot(h.astype(bf16), whh, preferred_element_type=f32)  # [BT,192]
        gi_t = gi[:, t, :]                                             # [BT,192]
        r = jax.nn.sigmoid(gi_t[:, :HIDDEN] + gh[:, :HIDDEN])
        z = jax.nn.sigmoid(gi_t[:, HIDDEN:2 * HIDDEN] + gh[:, HIDDEN:2 * HIDDEN])
        n = jnp.tanh(gi_t[:, 2 * HIDDEN:] + r * (gh[:, 2 * HIDDEN:] + bhh_n))
        h = (1.0 - z) * n + z * h
        hs.append(h)

    # Combine: lanes < HDIR are the forward hidden at original time t; lanes
    # >= HDIR are the backward hidden, produced at loop step S-1-t.
    lane = jax.lax.broadcasted_iota(jnp.int32, (BT, HIDDEN), 1)
    rows = [jnp.where(lane < HDIR, hs[t], hs[S - 1 - t]) for t in range(S)]
    gru_out = jnp.stack(rows, axis=1)                                  # [BT,S,HIDDEN]

    # ---- word attention: softmax(tanh(h Wa) . Wr) over the sequence ----
    g2 = gru_out.reshape(BT * S, HIDDEN).astype(bf16)
    a = jnp.tanh(jnp.dot(g2, wa_ref[...], preferred_element_type=f32))
    a3 = a.reshape(BT, S, HIDDEN)
    scores = jnp.sum(a3 * wr_ref[...][:, None, :], axis=2)             # [BT, S]
    wm = masks_ref[0]                                                  # [BT, S]
    scores = jnp.where(wm > 0.0, scores, NEG_INF)                      # masked_fill(-inf)
    scores = scores - jnp.max(scores, axis=1, keepdims=True)
    e = jnp.exp(scores)
    attn = e / jnp.sum(e, axis=1, keepdims=True)                       # exact softmax

    # attention-weighted vectors, then PCNN input masking (input * words_mask)
    masked_in = gru_out * (attn * wm)[:, :, None]                      # [BT,S,HIDDEN]

    # ---- PCNN layer: k=3, pad=1 Conv1d as a single im2col matmul ----
    zrow = jnp.zeros((BT, 1, HIDDEN), f32)
    x_m1 = jnp.concatenate([zrow, masked_in[:, :-1, :]], axis=1)       # t-1 (zero pad)
    x_p1 = jnp.concatenate([masked_in[:, 1:, :], zrow], axis=1)        # t+1 (zero pad)
    xcat = jnp.concatenate([x_m1, masked_in, x_p1], axis=2)            # [BT,S,3*HIDDEN]
    conv = (jnp.dot(xcat.reshape(BT * S, 3 * HIDDEN).astype(bf16), convw_ref[...],
                    preferred_element_type=f32)
            + convb_ref[...]).reshape(BT, S, NFILT)                    # [BT,S,NFILT]

    def piece_pool(pm):
        # keep positions where piece mask == 1, -inf elsewhere, max over seq, tanh
        m = jnp.where(pm[:, :, None] > 0.0, conv, NEG_INF)
        return jnp.tanh(jnp.max(m, axis=1))                            # [BT, NFILT]

    feat = jnp.concatenate(
        [piece_pool(masks_ref[1]), piece_pool(masks_ref[2]), piece_pool(masks_ref[3])],
        axis=1)                                                        # [BT, 3*NFILT]

    # ---- dense + softmax (inference path of BGWA.forward) ----
    # Padded columns have bias -1e30 -> exp underflows to exactly 0 probability.
    logits = (jnp.dot(feat.astype(bf16), dw_ref[...], preferred_element_type=f32)
              + db_ref[...])
    logits = logits - jnp.max(logits, axis=1, keepdims=True)
    el = jnp.exp(logits)
    out_ref[...] = el / jnp.sum(el, axis=1, keepdims=True)             # exact softmax


# ------------------------------ wrapper --------------------------------------
def bgwa_forward(gru_input, words_mask, p1, p2, p3, params):
    (wih_f, whh_f, bih_f, bhh_f,
     wih_b, whh_b, bih_b, bhh_b,
     wa, wr, convw, convb, dw, db) = params

    f32, bf16 = jnp.float32, jnp.bfloat16

    # -------- one-time parameter repacking (plain JAX glue) --------
    def gate_split(w):   # columns [r | z | n]
        return w[:, :HDIR], w[:, HDIR:2 * HDIR], w[:, 2 * HDIR:]

    def blkdiag(a, b):
        top = jnp.concatenate([a, jnp.zeros((a.shape[0], b.shape[1]), a.dtype)], axis=1)
        bot = jnp.concatenate([jnp.zeros((b.shape[0], a.shape[1]), b.dtype), b], axis=1)
        return jnp.concatenate([top, bot], axis=0)

    wih_f_g, wih_b_g = gate_split(wih_f), gate_split(wih_b)
    whh_f_g, whh_b_g = gate_split(whh_f), gate_split(whh_b)
    bih_f_g, bih_b_g = gate_split(bih_f), gate_split(bih_b)
    bhh_f_g, bhh_b_g = gate_split(bhh_f), gate_split(bhh_b)

    # fused weights: gates r|z|n side by side, each gate block-diag over (fwd,bwd)
    win_rzn = jnp.concatenate([blkdiag(wih_f_g[g], wih_b_g[g]) for g in range(3)],
                              axis=1)                     # [2*INPUT_DIM, 3*HIDDEN]
    whh_rzn = jnp.concatenate([blkdiag(whh_f_g[g], whh_b_g[g]) for g in range(3)],
                              axis=1)                     # [2*HDIR, 3*HIDDEN]

    # biases: fold b_hr/b_hz into the hoisted input-projection bias; keep b_hn apart
    bin_r = jnp.concatenate([bih_f_g[0] + bhh_f_g[0], bih_b_g[0] + bhh_b_g[0]], axis=1)
    bin_z = jnp.concatenate([bih_f_g[1] + bhh_f_g[1], bih_b_g[1] + bhh_b_g[1]], axis=1)
    bin_n = jnp.concatenate([bih_f_g[2], bih_b_g[2]], axis=1)
    bin_rzn = jnp.concatenate([bin_r, bin_z, bin_n], axis=1)          # [1, 3*HIDDEN]
    bhh_n = jnp.concatenate([bhh_f_g[2], bhh_b_g[2]], axis=1)         # [1, HIDDEN]

    wr_row = wr.reshape(1, HIDDEN)                 # [1, HIDDEN]
    convw_cat = convw.reshape(3 * HIDDEN, NFILT)   # taps (t-1, t, t+1) stacked

    # lane-pad classifier; padded logits get -1e30 bias -> exactly 0 probability
    dw_pad = jnp.concatenate(
        [dw, jnp.zeros((3 * NFILT, NCLS_PAD - NCLASS), f32)], axis=1)
    db_pad = jnp.concatenate(
        [db, jnp.full((1, NCLS_PAD - NCLASS), NEG_INF, f32)], axis=1)

    # bidirectional input: [x(t) | x(S-1-t)] so both directions' input projections
    # can be hoisted and indexed at loop step t.
    x_both = jnp.concatenate([gru_input, gru_input[:, ::-1, :]], axis=-1)

    # pack the four masks into a single array (one DMA / ref)
    masks = jnp.stack([words_mask, p1, p2, p3], axis=0).astype(f32)   # [4, B, S]

    args = (x_both.astype(f32), masks,
            win_rzn.astype(bf16), bin_rzn.astype(f32),
            whh_rzn.astype(bf16), bhh_n.astype(f32),
            wa.astype(bf16), wr_row.astype(f32),
            convw_cat.astype(bf16), convb.astype(f32),
            dw_pad.astype(bf16), db_pad.astype(f32))

    in_specs = [
        pl.BlockSpec((BT, S, 2 * INPUT_DIM), lambda i: (i, 0, 0)),    # x_both
        pl.BlockSpec((4, BT, S), lambda i: (0, i, 0)),                # packed masks
    ] + [
        # parameters: full block, constant index_map -> resident in VMEM
        pl.BlockSpec(a.shape, lambda i: (0, 0)) for a in args[2:]
    ]

    out = pl.pallas_call(
        bgwa_kernel,
        out_shape=jax.ShapeDtypeStruct((B, NCLS_PAD), jnp.float32),
        grid=(B // BT,),                   # (1,) here; set BT=B//2 on v7x if B grows
        in_specs=in_specs,
        out_specs=pl.BlockSpec((BT, NCLS_PAD), lambda i: (i, 0)),
        compiler_params=pltpu.CompilerParams(
            dimension_semantics=("parallel",)),
    )(*args)
    return out[:, :NCLASS]


# ------------------------------ main ------------------------------------------
if __name__ == "__main__":
    key = jax.random.PRNGKey(0)
    ks = jax.random.split(key, 16)

    # sequence lengths and piece boundaries (deterministic)
    lengths = 4 + (jnp.arange(B) % 5)                 # 4..8
    pos = jnp.arange(S)[None, :]
    words_mask = (pos < lengths[:, None]).astype(jnp.float32)
    l1 = jnp.maximum(lengths // 3, 1)
    l2 = jnp.maximum((2 * lengths) // 3, l1 + 1)
    p1_mask = (pos < l1[:, None]).astype(jnp.float32)
    p2_mask = ((pos >= l1[:, None]) & (pos < l2[:, None])).astype(jnp.float32)
    p3_mask = ((pos >= l2[:, None]) & (pos < lengths[:, None])).astype(jnp.float32)

    # token / distance id sequences (0 is padding id at padded positions)
    mask_i = words_mask.astype(jnp.int32)
    words_seq = jax.random.randint(ks[0], (B, S), 1, WORD_VOCAB) * mask_i
    d1_seq = jax.random.randint(ks[1], (B, S), 1, DIST_VOCAB) * mask_i
    d2_seq = jax.random.randint(ks[2], (B, S), 1, DIST_VOCAB) * mask_i

    # embedding tables (padding row 0 zeroed)
    word_tbl = (0.1 * jax.random.normal(ks[3], (WORD_VOCAB, WORD_EMBED))).at[0].set(0.0)
    d1_tbl = (0.1 * jax.random.normal(ks[4], (DIST_VOCAB, DIST_EMBED))).at[0].set(0.0)
    d2_tbl = (0.1 * jax.random.normal(ks[5], (DIST_VOCAB, DIST_EMBED))).at[0].set(0.0)

    # GRU parameters (pre-transposed so the kernel does x @ W; gate order r,z,n)
    def gru_params(k):
        k1, k2, k3, k4 = jax.random.split(k, 4)
        wih = 0.1 * jax.random.normal(k1, (INPUT_DIM, 3 * HDIR), jnp.float32)
        whh = 0.1 * jax.random.normal(k2, (HDIR, 3 * HDIR), jnp.float32)
        bih = 0.1 * jax.random.normal(k3, (1, 3 * HDIR), jnp.float32)
        bhh = 0.1 * jax.random.normal(k4, (1, 3 * HDIR), jnp.float32)
        return wih, whh, bih, bhh

    wih_f, whh_f, bih_f, bhh_f = gru_params(ks[6])
    wih_b, whh_b, bih_b, bhh_b = gru_params(ks[7])

    wa = 0.1 * jax.random.normal(ks[8], (HIDDEN, HIDDEN), jnp.float32)
    wr = 0.1 * jax.random.normal(ks[9], (HIDDEN, 1), jnp.float32)
    convw = 0.1 * jax.random.normal(ks[10], (3, HIDDEN, NFILT), jnp.float32)
    convb = 0.1 * jax.random.normal(ks[11], (1, NFILT), jnp.float32)
    dw = 0.1 * jax.random.normal(ks[12], (3 * NFILT, NCLASS), jnp.float32)
    db = 0.1 * jax.random.normal(ks[13], (1, NCLASS), jnp.float32)

    # embedding lookups + concat (glue, plain JAX); dropout is identity at inference
    word_embeds = jnp.take(word_tbl, words_seq, axis=0)
    d1_embeds = jnp.take(d1_tbl, d1_seq, axis=0)
    d2_embeds = jnp.take(d2_tbl, d2_seq, axis=0)
    gru_input = jnp.concatenate([word_embeds, d1_embeds, d2_embeds],
                                axis=2).astype(jnp.float32)

    params = (wih_f, whh_f, bih_f, bhh_f,
              wih_b, whh_b, bih_b, bhh_b,
              wa, wr, convw, convb, dw, db)

    rel_probs = bgwa_forward(gru_input, words_mask, p1_mask, p2_mask, p3_mask, params)
    jax.block_until_ready(rel_probs)

    assert rel_probs.shape == (B, NCLASS)
    assert bool(jnp.all(jnp.isfinite(rel_probs)))
    # rows of the softmax output must sum to ~1 (exact reciprocal used in-kernel)
    assert bool(jnp.allclose(jnp.sum(rel_probs, axis=1), 1.0, atol=1e-3))
    print("KERNEL_OK")
</pallas_src>

<mosaic_0001>
module attributes {stable_mosaic.version = 11 : i64} {
  func.func @bgwa_kernel(%arg0: i32, %arg1: memref<16x8x64xf32, #tpu.memory_space<vmem>>, %arg2: memref<4x16x8xf32, #tpu.memory_space<vmem>>, %arg3: memref<64x192xbf16, #tpu.memory_space<vmem>>, %arg4: memref<1x192xf32, #tpu.memory_space<vmem>>, %arg5: memref<64x192xbf16, #tpu.memory_space<vmem>>, %arg6: memref<1x64xf32, #tpu.memory_space<vmem>>, %arg7: memref<64x64xbf16, #tpu.memory_space<vmem>>, %arg8: memref<1x64xf32, #tpu.memory_space<vmem>>, %arg9: memref<192x32xbf16, #tpu.memory_space<vmem>>, %arg10: memref<1x32xf32, #tpu.memory_space<vmem>>, %arg11: memref<96x128xbf16, #tpu.memory_space<vmem>>, %arg12: memref<1x128xf32, #tpu.memory_space<vmem>>, %arg13: memref<16x128xf32, #tpu.memory_space<vmem>>) attributes {dimension_semantics = [#tpu.dimension_semantics<parallel>], iteration_bounds = array<i64: 1>, scalar_prefetch = 0 : i64, scratch_operands = 0 : i64, tpu.core_type = #tpu.core_type<tc>, window_params = [{transform_indices = @transform_0, window_bounds = array<i64: 16, 8, 64>}, {transform_indices = @transform_1, window_bounds = array<i64: 4, 16, 8>}, {pipeline_mode = #tpu.pipeline_mode<synchronous>, transform_indices = @transform_2, window_bounds = array<i64: 64, 192>}, {pipeline_mode = #tpu.pipeline_mode<synchronous>, transform_indices = @transform_3, window_bounds = array<i64: 1, 192>}, {pipeline_mode = #tpu.pipeline_mode<synchronous>, transform_indices = @transform_4, window_bounds = array<i64: 64, 192>}, {pipeline_mode = #tpu.pipeline_mode<synchronous>, transform_indices = @transform_5, window_bounds = array<i64: 1, 64>}, {pipeline_mode = #tpu.pipeline_mode<synchronous>, transform_indices = @transform_6, window_bounds = array<i64: 64, 64>}, {pipeline_mode = #tpu.pipeline_mode<synchronous>, transform_indices = @transform_7, window_bounds = array<i64: 1, 64>}, {pipeline_mode = #tpu.pipeline_mode<synchronous>, transform_indices = @transform_8, window_bounds = array<i64: 192, 32>}, {pipeline_mode = #tpu.pipeline_mode<synchronous>, transform_indices = @transform_9, window_bounds = array<i64: 1, 32>}, {pipeline_mode = #tpu.pipeline_mode<synchronous>, transform_indices = @transform_10, window_bounds = array<i64: 96, 128>}, {pipeline_mode = #tpu.pipeline_mode<synchronous>, transform_indices = @transform_11, window_bounds = array<i64: 1, 128>}, {transform_indices = @transform_12, window_bounds = array<i64: 16, 128>}]} {
    %c0 = arith.constant 0 : index
    %c0_0 = arith.constant 0 : index
    %c0_1 = arith.constant 0 : index
    %0 = vector.load %arg1[%c0, %c0_0, %c0_1] : memref<16x8x64xf32, #tpu.memory_space<vmem>>, vector<16x8x64xf32>
    %1 = vector.shape_cast %0 : vector<16x8x64xf32> to vector<128x64xf32>
    %2 = arith.truncf %1 : vector<128x64xf32> to vector<128x64xbf16>
    %c0_2 = arith.constant 0 : index
    %c0_3 = arith.constant 0 : index
    %3 = vector.load %arg3[%c0_2, %c0_3] : memref<64x192xbf16, #tpu.memory_space<vmem>>, vector<64x192xbf16>
    %cst = arith.constant dense<0.000000e+00> : vector<128x192xf32>
    %4 = tpu.matmul %2, %3, %cst {dimension_numbers = #tpu.dot_dimension_numbers<[1], [0], [0], [1], [0, 0, 1, 1], [], []>} : vector<128x64xbf16>, vector<64x192xbf16>, vector<128x192xf32> -> vector<128x192xf32>
    %c0_4 = arith.constant 0 : index
    %c0_5 = arith.constant 0 : index
    %5 = vector.load %arg4[%c0_4, %c0_5] : memref<1x192xf32, #tpu.memory_space<vmem>>, vector<1x192xf32>
    %6 = vector.broadcast %5 : vector<1x192xf32> to vector<128x192xf32>
    %7 = arith.addf %4, %6 : vector<128x192xf32>
    %8 = vector.shape_cast %7 : vector<128x192xf32> to vector<16x8x192xf32>
    %c0_6 = arith.constant 0 : index
    %c0_7 = arith.constant 0 : index
    %9 = vector.load %arg5[%c0_6, %c0_7] : memref<64x192xbf16, #tpu.memory_space<vmem>>, vector<64x192xbf16>
    %c0_8 = arith.constant 0 : index
    %c0_9 = arith.constant 0 : index
    %10 = vector.load %arg6[%c0_8, %c0_9] : memref<1x64xf32, #tpu.memory_space<vmem>>, vector<1x64xf32>
    %cst_10 = arith.constant 0.000000e+00 : f32
    %11 = vector.broadcast %cst_10 : f32 to vector<16x64xf32>
    %12 = arith.truncf %11 : vector<16x64xf32> to vector<16x64xbf16>
    %cst_11 = arith.constant dense<0.000000e+00> : vector<16x192xf32>
    %13 = tpu.matmul %12, %9, %cst_11 {dimension_numbers = #tpu.dot_dimension_numbers<[1], [0], [0], [1], [0, 0, 1, 1], [], []>} : vector<16x64xbf16>, vector<64x192xbf16>, vector<16x192xf32> -> vector<16x192xf32>
    %14 = vector.extract_strided_slice %8 {offsets = [0, 0, 0], sizes = [16, 1, 192], strides = [1, 1, 1]} : vector<16x8x192xf32> to vector<16x1x192xf32>
    %15 = vector.shape_cast %14 : vector<16x1x192xf32> to vector<16x192xf32>
    %16 = vector.extract_strided_slice %15 {offsets = [0, 0], sizes = [16, 64], strides = [1, 1]} : vector<16x192xf32> to vector<16x64xf32>
    %17 = vector.extract_strided_slice %13 {offsets = [0, 0], sizes = [16, 64], strides = [1, 1]} : vector<16x192xf32> to vector<16x64xf32>
    %18 = arith.addf %16, %17 : vector<16x64xf32>
    %19 = arith.negf %18 : vector<16x64xf32>
    %20 = math.exp %19 : vector<16x64xf32>
    %cst_12 = arith.constant 1.000000e+00 : f32
    %21 = vector.broadcast %cst_12 : f32 to vector<16x64xf32>
    %22 = arith.addf %21, %20 : vector<16x64xf32>
    %23 = arith.divf %21, %22 : vector<16x64xf32>
    %24 = vector.extract_strided_slice %15 {offsets = [0, 64], sizes = [16, 64], strides = [1, 1]} : vector<16x192xf32> to vector<16x64xf32>
    %25 = vector.extract_strided_slice %13 {offsets = [0, 64], sizes = [16, 64], strides = [1, 1]} : vector<16x192xf32> to vector<16x64xf32>
    %26 = arith.addf %24, %25 : vector<16x64xf32>
    %27 = arith.negf %26 : vector<16x64xf32>
    %28 = math.exp %27 : vector<16x64xf32>
    %cst_13 = arith.constant 1.000000e+00 : f32
    %29 = vector.broadcast %cst_13 : f32 to vector<16x64xf32>
    %30 = arith.addf %29, %28 : vector<16x64xf32>
    %31 = arith.divf %29, %30 : vector<16x64xf32>
    %32 = vector.extract_strided_slice %15 {offsets = [0, 128], sizes = [16, 64], strides = [1, 1]} : vector<16x192xf32> to vector<16x64xf32>
    %33 = vector.extract_strided_slice %13 {offsets = [0, 128], sizes = [16, 64], strides = [1, 1]} : vector<16x192xf32> to vector<16x64xf32>
    %34 = vector.broadcast %10 : vector<1x64xf32> to vector<16x64xf32>
    %35 = arith.addf %33, %34 : vector<16x64xf32>
    %36 = arith.mulf %23, %35 : vector<16x64xf32>
    %37 = arith.addf %32, %36 : vector<16x64xf32>
    %38 = math.tanh %37 : vector<16x64xf32>
    %cst_14 = arith.constant 1.000000e+00 : f32
    %39 = vector.broadcast %cst_14 : f32 to vector<16x64xf32>
    %40 = arith.subf %39, %31 : vector<16x64xf32>
    %41 = arith.mulf %40, %38 : vector<16x64xf32>
    %42 = arith.mulf %31, %11 : vector<16x64xf32>
    %43 = arith.addf %41, %42 : vector<16x64xf32>
    %44 = arith.truncf %43 : vector<16x64xf32> to vector<16x64xbf16>
    %cst_15 = arith.constant dense<0.000000e+00> : vector<16x192xf32>
    %45 = tpu.matmul %44, %9, %cst_15 {dimension_numbers = #tpu.dot_dimension_numbers<[1], [0], [0], [1], [0, 0, 1, 1], [], []>} : vector<16x64xbf16>, vector<64x192xbf16>, vector<16x192xf32> -> vector<16x192xf32>
    %46 = vector.extract_strided_slice %8 {offsets = [0, 1, 0], sizes = [16, 1, 192], strides = [1, 1, 1]} : vector<16x8x192xf32> to vector<16x1x192xf32>
    %47 = vector.shape_cast %46 : vector<16x1x192xf32> to vector<16x192xf32>
    %48 = vector.extract_strided_slice %47 {offsets = [0, 0], sizes = [16, 64], strides = [1, 1]} : vector<16x192xf32> to vector<16x64xf32>
    %49 = vector.extract_strided_slice %45 {offsets = [0, 0], sizes = [16, 64], strides = [1, 1]} : vector<16x192xf32> to vector<16x64xf32>
    %50 = arith.addf %48, %49 : vector<16x64xf32>
    %51 = arith.negf %50 : vector<16x64xf32>
    %52 = math.exp %51 : vector<16x64xf32>
    %cst_16 = arith.constant 1.000000e+00 : f32
    %53 = vector.broadcast %cst_16 : f32 to vector<16x64xf32>
    %54 = arith.addf %53, %52 : vector<16x64xf32>
    %55 = arith.divf %53, %54 : vector<16x64xf32>
    %56 = vector.extract_strided_slice %47 {offsets = [0, 64], sizes = [16, 64], strides = [1, 1]} : vector<16x192xf32> to vector<16x64xf32>
    %57 = vector.extract_strided_slice %45 {offsets = [0, 64], sizes = [16, 64], strides = [1, 1]} : vector<16x192xf32> to vector<16x64xf32>
    %58 = arith.addf %56, %57 : vector<16x64xf32>
    %59 = arith.negf %58 : vector<16x64xf32>
    %60 = math.exp %59 : vector<16x64xf32>
    %cst_17 = arith.constant 1.000000e+00 : f32
    %61 = vector.broadcast %cst_17 : f32 to vector<16x64xf32>
    %62 = arith.addf %61, %60 : vector<16x64xf32>
    %63 = arith.divf %61, %62 : vector<16x64xf32>
    %64 = vector.extract_strided_slice %47 {offsets = [0, 128], sizes = [16, 64], strides = [1, 1]} : vector<16x192xf32> to vector<16x64xf32>
    %65 = vector.extract_strided_slice %45 {offsets = [0, 128], sizes = [16, 64], strides = [1, 1]} : vector<16x192xf32> to vector<16x64xf32>
    %66 = vector.broadcast %10 : vector<1x64xf32> to vector<16x64xf32>
    %67 = arith.addf %65, %66 : vector<16x64xf32>
    %68 = arith.mulf %55, %67 : vector<16x64xf32>
    %69 = arith.addf %64, %68 : vector<16x64xf32>
    %70 = math.tanh %69 : vector<16x64xf32>
    %cst_18 = arith.constant 1.000000e+00 : f32
    %71 = vector.broadcast %cst_18 : f32 to vector<16x64xf32>
    %72 = arith.subf %71, %63 : vector<16x64xf32>
    %73 = arith.mulf %72, %70 : vector<16x64xf32>
    %74 = arith.mulf %63, %43 : vector<16x64xf32>
    %75 = arith.addf %73, %74 : vector<16x64xf32>
    %76 = arith.truncf %75 : vector<16x64xf32> to vector<16x64xbf16>
    %cst_19 = arith.constant dense<0.000000e+00> : vector<16x192xf32>
    %77 = tpu.matmul %76, %9, %cst_19 {dimension_numbers = #tpu.dot_dimension_numbers<[1], [0], [0], [1], [0, 0, 1, 1], [], []>} : vector<16x64xbf16>, vector<64x192xbf16>, vector<16x192xf32> -> vector<16x192xf32>
    %78 = vector.extract_strided_slice %8 {offsets = [0, 2, 0], sizes = [16, 1, 192], strides = [1, 1, 1]} : vector<16x8x192xf32> to vector<16x1x192xf32>
    %79 = vector.shape_cast %78 : vector<16x1x192xf32> to vector<16x192xf32>
    %80 = vector.extract_strided_slice %79 {offsets = [0, 0], sizes = [16, 64], strides = [1, 1]} : vector<16x192xf32> to vector<16x64xf32>
    %81 = vector.extract_strided_slice %77 {offsets = [0, 0], sizes = [16, 64], strides = [1, 1]} : vector<16x192xf32> to vector<16x64xf32>
    %82 = arith.addf %80, %81 : vector<16x64xf32>
    %83 = arith.negf %82 : vector<16x64xf32>
    %84 = math.exp %83 : vector<16x64xf32>
    %cst_20 = arith.constant 1.000000e+00 : f32
    %85 = vector.broadcast %cst_20 : f32 to vector<16x64xf32>
    %86 = arith.addf %85, %84 : vector<16x64xf32>
    %87 = arith.divf %85, %86 : vector<16x64xf32>
    %88 = vector.extract_strided_slice %79 {offsets = [0, 64], sizes = [16, 64], strides = [1, 1]} : vector<16x192xf32> to vector<16x64xf32>
    %89 = vector.extract_strided_slice %77 {offsets = [0, 64], sizes = [16, 64], strides = [1, 1]} : vector<16x192xf32> to vector<16x64xf32>
    %90 = arith.addf %88, %89 : vector<16x64xf32>
    %91 = arith.negf %90 : vector<16x64xf32>
    %92 = math.exp %91 : vector<16x64xf32>
    %cst_21 = arith.constant 1.000000e+00 : f32
    %93 = vector.broadcast %cst_21 : f32 to vector<16x64xf32>
    %94 = arith.addf %93, %92 : vector<16x64xf32>
    %95 = arith.divf %93, %94 : vector<16x64xf32>
    %96 = vector.extract_strided_slice %79 {offsets = [0, 128], sizes = [16, 64], strides = [1, 1]} : vector<16x192xf32> to vector<16x64xf32>
    %97 = vector.extract_strided_slice %77 {offsets = [0, 128], sizes = [16, 64], strides = [1, 1]} : vector<16x192xf32> to vector<16x64xf32>
    %98 = vector.broadcast %10 : vector<1x64xf32> to vector<16x64xf32>
    %99 = arith.addf %97, %98 : vector<16x64xf32>
    %100 = arith.mulf %87, %99 : vector<16x64xf32>
    %101 = arith.addf %96, %100 : vector<16x64xf32>
    %102 = math.tanh %101 : vector<16x64xf32>
    %cst_22 = arith.constant 1.000000e+00 : f32
    %103 = vector.broadcast %cst_22 : f32 to vector<16x64xf32>
    %104 = arith.subf %103, %95 : vector<16x64xf32>
    %105 = arith.mulf %104, %102 : vector<16x64xf32>
    %106 = arith.mulf %95, %75 : vector<16x64xf32>
    %107 = arith.addf %105, %106 : vector<16x64xf32>
    %108 = arith.truncf %107 : vector<16x64xf32> to vector<16x64xbf16>
    %cst_23 = arith.constant dense<0.000000e+00> : vector<16x192xf32>
    %109 = tpu.matmul %108, %9, %cst_23 {dimension_numbers = #tpu.dot_dimension_numbers<[1], [0], [0], [1], [0, 0, 1, 1], [], []>} : vector<16x64xbf16>, vector<64x192xbf16>, vector<16x192xf32> -> vector<16x192xf32>
    %110 = vector.extract_strided_slice %8 {offsets = [0, 3, 0], sizes = [16, 1, 192], strides = [1, 1, 1]} : vector<16x8x192xf32> to vector<16x1x192xf32>
    %111 = vector.shape_cast %110 : vector<16x1x192xf32> to vector<16x192xf32>
    %112 = vector.extract_strided_slice %111 {offsets = [0, 0], sizes = [16, 64], strides = [1, 1]} : vector<16x192xf32> to vector<16x64xf32>
    %113 = vector.extract_strided_slice %109 {offsets = [0, 0], sizes = [16, 64], strides = [1, 1]} : vector<16x192xf32> to vector<16x64xf32>
    %114 = arith.addf %112, %113 : vector<16x64xf32>
    %115 = arith.negf %114 : vector<16x64xf32>
    %116 = math.exp %115 : vector<16x64xf32>
    %cst_24 = arith.constant 1.000000e+00 : f32
    %117 = vector.broadcast %cst_24 : f32 to vector<16x64xf32>
    %118 = arith.addf %117, %116 : vector<16x64xf32>
    %119 = arith.divf %117, %118 : vector<16x64xf32>
    %120 = vector.extract_strided_slice %111 {offsets = [0, 64], sizes = [16, 64], strides = [1, 1]} : vector<16x192xf32> to vector<16x64xf32>
    %121 = vector.extract_strided_slice %109 {offsets = [0, 64], sizes = [16, 64], strides = [1, 1]} : vector<16x192xf32> to vector<16x64xf32>
    %122 = arith.addf %120, %121 : vector<16x64xf32>
    %123 = arith.negf %122 : vector<16x64xf32>
    %124 = math.exp %123 : vector<16x64xf32>
    %cst_25 = arith.constant 1.000000e+00 : f32
    %125 = vector.broadcast %cst_25 : f32 to vector<16x64xf32>
    %126 = arith.addf %125, %124 : vector<16x64xf32>
    %127 = arith.divf %125, %126 : vector<16x64xf32>
    %128 = vector.extract_strided_slice %111 {offsets = [0, 128], sizes = [16, 64], strides = [1, 1]} : vector<16x192xf32> to vector<16x64xf32>
    %129 = vector.extract_strided_slice %109 {offsets = [0, 128], sizes = [16, 64], strides = [1, 1]} : vector<16x192xf32> to vector<16x64xf32>
    %130 = vector.broadcast %10 : vector<1x64xf32> to vector<16x64xf32>
    %131 = arith.addf %129, %130 : vector<16x64xf32>
    %132 = arith.mulf %119, %131 : vector<16x64xf32>
    %133 = arith.addf %128, %132 : vector<16x64xf32>
    %134 = math.tanh %133 : vector<16x64xf32>
    %cst_26 = arith.constant 1.000000e+00 : f32
    %135 = vector.broadcast %cst_26 : f32 to vector<16x64xf32>
    %136 = arith.subf %135, %127 : vector<16x64xf32>
    %137 = arith.mulf %136, %134 : vector<16x64xf32>
    %138 = arith.mulf %127, %107 : vector<16x64xf32>
    %139 = arith.addf %137, %138 : vector<16x64xf32>
    %140 = arith.truncf %139 : vector<16x64xf32> to vector<16x64xbf16>
    %cst_27 = arith.constant dense<0.000000e+00> : vector<16x192xf32>
    %141 = tpu.matmul %140, %9, %cst_27 {dimension_numbers = #tpu.dot_dimension_numbers<[1], [0], [0], [1], [0, 0, 1, 1], [], []>} : vector<16x64xbf16>, vector<64x192xbf16>, vector<16x192xf32> -> vector<16x192xf32>
    %142 = vector.extract_strided_slice %8 {offsets = [0, 4, 0], sizes = [16, 1, 192], strides = [1, 1, 1]} : vector<16x8x192xf32> to vector<16x1x192xf32>
    %143 = vector.shape_cast %142 : vector<16x1x192xf32> to vector<16x192xf32>
    %144 = vector.extract_strided_slice %143 {offsets = [0, 0], sizes = [16, 64], strides = [1, 1]} : vector<16x192xf32> to vector<16x64xf32>
    %145 = vector.extract_strided_slice %141 {offsets = [0, 0], sizes = [16, 64], strides = [1, 1]} : vector<16x192xf32> to vector<16x64xf32>
    %146 = arith.addf %144, %145 : vector<16x64xf32>
    %147 = arith.negf %146 : vector<16x64xf32>
    %148 = math.exp %147 : vector<16x64xf32>
    %cst_28 = arith.constant 1.000000e+00 : f32
    %149 = vector.broadcast %cst_28 : f32 to vector<16x64xf32>
    %150 = arith.addf %149, %148 : vector<16x64xf32>
    %151 = arith.divf %149, %150 : vector<16x64xf32>
    %152 = vector.extract_strided_slice %143 {offsets = [0, 64], sizes = [16, 64], strides = [1, 1]} : vector<16x192xf32> to vector<16x64xf32>
    %153 = vector.extract_strided_slice %141 {offsets = [0, 64], sizes = [16, 64], strides = [1, 1]} : vector<16x192xf32> to vector<16x64xf32>
    %154 = arith.addf %152, %153 : vector<16x64xf32>
    %155 = arith.negf %154 : vector<16x64xf32>
    %156 = math.exp %155 : vector<16x64xf32>
    %cst_29 = arith.constant 1.000000e+00 : f32
    %157 = vector.broadcast %cst_29 : f32 to vector<16x64xf32>
    %158 = arith.addf %157, %156 : vector<16x64xf32>
    %159 = arith.divf %157, %158 : vector<16x64xf32>
    %160 = vector.extract_strided_slice %143 {offsets = [0, 128], sizes = [16, 64], strides = [1, 1]} : vector<16x192xf32> to vector<16x64xf32>
    %161 = vector.extract_strided_slice %141 {offsets = [0, 128], sizes = [16, 64], strides = [1, 1]} : vector<16x192xf32> to vector<16x64xf32>
    %162 = vector.broadcast %10 : vector<1x64xf32> to vector<16x64xf32>
    %163 = arith.addf %161, %162 : vector<16x64xf32>
    %164 = arith.mulf %151, %163 : vector<16x64xf32>
    %165 = arith.addf %160, %164 : vector<16x64xf32>
    %166 = math.tanh %165 : vector<16x64xf32>
    %cst_30 = arith.constant 1.000000e+00 : f32
    %167 = vector.broadcast %cst_30 : f32 to vector<16x64xf32>
    %168 = arith.subf %167, %159 : vector<16x64xf32>
    %169 = arith.mulf %168, %166 : vector<16x64xf32>
    %170 = arith.mulf %159, %139 : vector<16x64xf32>
    %171 = arith.addf %169, %170 : vector<16x64xf32>
    %172 = arith.truncf %171 : vector<16x64xf32> to vector<16x64xbf16>
    %cst_31 = arith.constant dense<0.000000e+00> : vector<16x192xf32>
    %173 = tpu.matmul %172, %9, %cst_31 {dimension_numbers = #tpu.dot_dimension_numbers<[1], [0], [0], [1], [0, 0, 1, 1], [], []>} : vector<16x64xbf16>, vector<64x192xbf16>, vector<16x192xf32> -> vector<16x192xf32>
    %174 = vector.extract_strided_slice %8 {offsets = [0, 5, 0], sizes = [16, 1, 192], strides = [1, 1, 1]} : vector<16x8x192xf32> to vector<16x1x192xf32>
    %175 = vector.shape_cast %174 : vector<16x1x192xf32> to vector<16x192xf32>
    %176 = vector.extract_strided_slice %175 {offsets = [0, 0], sizes = [16, 64], strides = [1, 1]} : vector<16x192xf32> to vector<16x64xf32>
    %177 = vector.extract_strided_slice %173 {offsets = [0, 0], sizes = [16, 64], strides = [1, 1]} : vector<16x192xf32> to vector<16x64xf32>
    %178 = arith.addf %176, %177 : vector<16x64xf32>
    %179 = arith.negf %178 : vector<16x64xf32>
    %180 = math.exp %179 : vector<16x64xf32>
    %cst_32 = arith.constant 1.000000e+00 : f32
    %181 = vector.broadcast %cst_32 : f32 to vector<16x64xf32>
    %182 = arith.addf %181, %180 : vector<16x64xf32>
    %183 = arith.divf %181, %182 : vector<16x64xf32>
    %184 = vector.extract_strided_slice %175 {offsets = [0, 64], sizes = [16, 64], strides = [1, 1]} : vector<16x192xf32> to vector<16x64xf32>
    %185 = vector.extract_strided_slice %173 {offsets = [0, 64], sizes = [16, 64], strides = [1, 1]} : vector<16x192xf32> to vector<16x64xf32>
    %186 = arith.addf %184, %185 : vector<16x64xf32>
    %187 = arith.negf %186 : vector<16x64xf32>
    %188 = math.exp %187 : vector<16x64xf32>
    %cst_33 = arith.constant 1.000000e+00 : f32
    %189 = vector.broadcast %cst_33 : f32 to vector<16x64xf32>
    %190 = arith.addf %189, %188 : vector<16x64xf32>
    %191 = arith.divf %189, %190 : vector<16x64xf32>
    %192 = vector.extract_strided_slice %175 {offsets = [0, 128], sizes = [16, 64], strides = [1, 1]} : vector<16x192xf32> to vector<16x64xf32>
    %193 = vector.extract_strided_slice %173 {offsets = [0, 128], sizes = [16, 64], strides = [1, 1]} : vector<16x192xf32> to vector<16x64xf32>
    %194 = vector.broadcast %10 : vector<1x64xf32> to vector<16x64xf32>
    %195 = arith.addf %193, %194 : vector<16x64xf32>
    %196 = arith.mulf %183, %195 : vector<16x64xf32>
    %197 = arith.addf %192, %196 : vector<16x64xf32>
    %198 = math.tanh %197 : vector<16x64xf32>
    %cst_34 = arith.constant 1.000000e+00 : f32
    %199 = vector.broadcast %cst_34 : f32 to vector<16x64xf32>
    %200 = arith.subf %199, %191 : vector<16x64xf32>
    %201 = arith.mulf %200, %198 : vector<16x64xf32>
    %202 = arith.mulf %191, %171 : vector<16x64xf32>
    %203 = arith.addf %201, %202 : vector<16x64xf32>
    %204 = arith.truncf %203 : vector<16x64xf32> to vector<16x64xbf16>
    %cst_35 = arith.constant dense<0.000000e+00> : vector<16x192xf32>
    %205 = tpu.matmul %204, %9, %cst_35 {dimension_numbers = #tpu.dot_dimension_numbers<[1], [0], [0], [1], [0, 0, 1, 1], [], []>} : vector<16x64xbf16>, vector<64x192xbf16>, vector<16x192xf32> -> vector<16x192xf32>
    %206 = vector.extract_strided_slice %8 {offsets = [0, 6, 0], sizes = [16, 1, 192], strides = [1, 1, 1]} : vector<16x8x192xf32> to vector<16x1x192xf32>
    %207 = vector.shape_cast %206 : vector<16x1x192xf32> to vector<16x192xf32>
    %208 = vector.extract_strided_slice %207 {offsets = [0, 0], sizes = [16, 64], strides = [1, 1]} : vector<16x192xf32> to vector<16x64xf32>
    %209 = vector.extract_strided_slice %205 {offsets = [0, 0], sizes = [16, 64], strides = [1, 1]} : vector<16x192xf32> to vector<16x64xf32>
    %210 = arith.addf %208, %209 : vector<16x64xf32>
    %211 = arith.negf %210 : vector<16x64xf32>
    %212 = math.exp %211 : vector<16x64xf32>
    %cst_36 = arith.constant 1.000000e+00 : f32
    %213 = vector.broadcast %cst_36 : f32 to vector<16x64xf32>
    %214 = arith.addf %213, %212 : vector<16x64xf32>
    %215 = arith.divf %213, %214 : vector<16x64xf32>
    %216 = vector.extract_strided_slice %207 {offsets = [0, 64], sizes = [16, 64], strides = [1, 1]} : vector<16x192xf32> to vector<16x64xf32>
    %217 = vector.extract_strided_slice %205 {offsets = [0, 64], sizes = [16, 64], strides = [1, 1]} : vector<16x192xf32> to vector<16x64xf32>
    %218 = arith.addf %216, %217 : vector<16x64xf32>
    %219 = arith.negf %218 : vector<16x64xf32>
    %220 = math.exp %219 : vector<16x64xf32>
    %cst_37 = arith.constant 1.000000e+00 : f32
    %221 = vector.broadcast %cst_37 : f32 to vector<16x64xf32>
    %222 = arith.addf %221, %220 : vector<16x64xf32>
    %223 = arith.divf %221, %222 : vector<16x64xf32>
    %224 = vector.extract_strided_slice %207 {offsets = [0, 128], sizes = [16, 64], strides = [1, 1]} : vector<16x192xf32> to vector<16x64xf32>
    %225 = vector.extract_strided_slice %205 {offsets = [0, 128], sizes = [16, 64], strides = [1, 1]} : vector<16x192xf32> to vector<16x64xf32>
    %226 = vector.broadcast %10 : vector<1x64xf32> to vector<16x64xf32>
    %227 = arith.addf %225, %226 : vector<16x64xf32>
    %228 = arith.mulf %215, %227 : vector<16x64xf32>
    %229 = arith.addf %224, %228 : vector<16x64xf32>
    %230 = math.tanh %229 : vector<16x64xf32>
    %cst_38 = arith.constant 1.000000e+00 : f32
    %231 = vector.broadcast %cst_38 : f32 to vector<16x64xf32>
    %232 = arith.subf %231, %223 : vector<16x64xf32>
    %233 = arith.mulf %232, %230 : vector<16x64xf32>
    %234 = arith.mulf %223, %203 : vector<16x64xf32>
    %235 = arith.addf %233, %234 : vector<16x64xf32>
    %236 = arith.truncf %235 : vector<16x64xf32> to vector<16x64xbf16>
    %cst_39 = arith.constant dense<0.000000e+00> : vector<16x192xf32>
    %237 = tpu.matmul %236, %9, %cst_39 {dimension_numbers = #tpu.dot_dimension_numbers<[1], [0], [0], [1], [0, 0, 1, 1], [], []>} : vector<16x64xbf16>, vector<64x192xbf16>, vector<16x192xf32> -> vector<16x192xf32>
    %238 = vector.extract_strided_slice %8 {offsets = [0, 7, 0], sizes = [16, 1, 192], strides = [1, 1, 1]} : vector<16x8x192xf32> to vector<16x1x192xf32>
    %239 = vector.shape_cast %238 : vector<16x1x192xf32> to vector<16x192xf32>
    %240 = vector.extract_strided_slice %239 {offsets = [0, 0], sizes = [16, 64], strides = [1, 1]} : vector<16x192xf32> to vector<16x64xf32>
    %241 = vector.extract_strided_slice %237 {offsets = [0, 0], sizes = [16, 64], strides = [1, 1]} : vector<16x192xf32> to vector<16x64xf32>
    %242 = arith.addf %240, %241 : vector<16x64xf32>
    %243 = arith.negf %242 : vector<16x64xf32>
    %244 = math.exp %243 : vector<16x64xf32>
    %cst_40 = arith.constant 1.000000e+00 : f32
    %245 = vector.broadcast %cst_40 : f32 to vector<16x64xf32>
    %246 = arith.addf %245, %244 : vector<16x64xf32>
    %247 = arith.divf %245, %246 : vector<16x64xf32>
    %248 = vector.extract_strided_slice %239 {offsets = [0, 64], sizes = [16, 64], strides = [1, 1]} : vector<16x192xf32> to vector<16x64xf32>
    %249 = vector.extract_strided_slice %237 {offsets = [0, 64], sizes = [16, 64], strides = [1, 1]} : vector<16x192xf32> to vector<16x64xf32>
    %250 = arith.addf %248, %249 : vector<16x64xf32>
    %251 = arith.negf %250 : vector<16x64xf32>
    %252 = math.exp %251 : vector<16x64xf32>
    %cst_41 = arith.constant 1.000000e+00 : f32
    %253 = vector.broadcast %cst_41 : f32 to vector<16x64xf32>
    %254 = arith.addf %253, %252 : vector<16x64xf32>
    %255 = arith.divf %253, %254 : vector<16x64xf32>
    %256 = vector.extract_strided_slice %239 {offsets = [0, 128], sizes = [16, 64], strides = [1, 1]} : vector<16x192xf32> to vector<16x64xf32>
    %257 = vector.extract_strided_slice %237 {offsets = [0, 128], sizes = [16, 64], strides = [1, 1]} : vector<16x192xf32> to vector<16x64xf32>
    %258 = vector.broadcast %10 : vector<1x64xf32> to vector<16x64xf32>
    %259 = arith.addf %257, %258 : vector<16x64xf32>
    %260 = arith.mulf %247, %259 : vector<16x64xf32>
    %261 = arith.addf %256, %260 : vector<16x64xf32>
    %262 = math.tanh %261 : vector<16x64xf32>
    %cst_42 = arith.constant 1.000000e+00 : f32
    %263 = vector.broadcast %cst_42 : f32 to vector<16x64xf32>
    %264 = arith.subf %263, %255 : vector<16x64xf32>
    %265 = arith.mulf %264, %262 : vector<16x64xf32>
    %266 = arith.mulf %255, %235 : vector<16x64xf32>
    %267 = arith.addf %265, %266 : vector<16x64xf32>
    %268 = tpu.iota {dimensions = array<i32: 1>} : vector<16x64xi32>
    %c32_i32 = arith.constant 32 : i32
    %269 = vector.broadcast %c32_i32 : i32 to vector<16x64xi32>
    %270 = arith.cmpi slt, %268, %269 : vector<16x64xi32>
    %271 = arith.select %270, %43, %267 : vector<16x64xi1>, vector<16x64xf32>
    %c32_i32_43 = arith.constant 32 : i32
    %272 = vector.broadcast %c32_i32_43 : i32 to vector<16x64xi32>
    %273 = arith.cmpi slt, %268, %272 : vector<16x64xi32>
    %274 = arith.select %273, %75, %235 : vector<16x64xi1>, vector<16x64xf32>
    %c32_i32_44 = arith.constant 32 : i32
    %275 = vector.broadcast %c32_i32_44 : i32 to vector<16x64xi32>
    %276 = arith.cmpi slt, %268, %275 : vector<16x64xi32>
    %277 = arith.select %276, %107, %203 : vector<16x64xi1>, vector<16x64xf32>
    %c32_i32_45 = arith.constant 32 : i32
    %278 = vector.broadcast %c32_i32_45 : i32 to vector<16x64xi32>
    %279 = arith.cmpi slt, %268, %278 : vector<16x64xi32>
    %280 = arith.select %279, %139, %171 : vector<16x64xi1>, vector<16x64xf32>
    %c32_i32_46 = arith.constant 32 : i32
    %281 = vector.broadcast %c32_i32_46 : i32 to vector<16x64xi32>
    %282 = arith.cmpi slt, %268, %281 : vector<16x64xi32>
    %283 = arith.select %282, %171, %139 : vector<16x64xi1>, vector<16x64xf32>
    %c32_i32_47 = arith.constant 32 : i32
    %284 = vector.broadcast %c32_i32_47 : i32 to vector<16x64xi32>
    %285 = arith.cmpi slt, %268, %284 : vector<16x64xi32>
    %286 = arith.select %285, %203, %107 : vector<16x64xi1>, vector<16x64xf32>
    %c32_i32_48 = arith.constant 32 : i32
    %287 = vector.broadcast %c32_i32_48 : i32 to vector<16x64xi32>
    %288 = arith.cmpi slt, %268, %287 : vector<16x64xi32>
    %289 = arith.select %288, %235, %75 : vector<16x64xi1>, vector<16x64xf32>
    %c32_i32_49 = arith.constant 32 : i32
    %290 = vector.broadcast %c32_i32_49 : i32 to vector<16x64xi32>
    %291 = arith.cmpi slt, %268, %290 : vector<16x64xi32>
    %292 = arith.select %291, %267, %43 : vector<16x64xi1>, vector<16x64xf32>
    %293 = vector.shape_cast %271 : vector<16x64xf32> to vector<16x1x64xf32>
    %294 = vector.shape_cast %274 : vector<16x64xf32> to vector<16x1x64xf32>
    %295 = vector.shape_cast %277 : vector<16x64xf32> to vector<16x1x64xf32>
    %296 = vector.shape_cast %280 : vector<16x64xf32> to vector<16x1x64xf32>
    %297 = vector.shape_cast %283 : vector<16x64xf32> to vector<16x1x64xf32>
    %298 = vector.shape_cast %286 : vector<16x64xf32> to vector<16x1x64xf32>
    %299 = vector.shape_cast %289 : vector<16x64xf32> to vector<16x1x64xf32>
    %300 = vector.shape_cast %292 : vector<16x64xf32> to vector<16x1x64xf32>
    %301 = tpu.concatenate %293, %294, %295, %296, %297, %298, %299, %300 in 1 : vector<16x1x64xf32>, vector<16x1x64xf32>, vector<16x1x64xf32>, vector<16x1x64xf32>, vector<16x1x64xf32>, vector<16x1x64xf32>, vector<16x1x64xf32>, vector<16x1x64xf32> -> vector<16x8x64xf32>
    %302 = vector.shape_cast %301 : vector<16x8x64xf32> to vector<128x64xf32>
    %303 = arith.truncf %302 : vector<128x64xf32> to vector<128x64xbf16>
    %c0_50 = arith.constant 0 : index
    %c0_51 = arith.constant 0 : index
    %304 = vector.load %arg7[%c0_50, %c0_51] : memref<64x64xbf16, #tpu.memory_space<vmem>>, vector<64x64xbf16>
    %cst_52 = arith.constant dense<0.000000e+00> : vector<128x64xf32>
    %305 = tpu.matmul %303, %304, %cst_52 {dimension_numbers = #tpu.dot_dimension_numbers<[1], [0], [0], [1], [0, 0, 1, 1], [], []>} : vector<128x64xbf16>, vector<64x64xbf16>, vector<128x64xf32> -> vector<128x64xf32>
    %306 = math.tanh %305 : vector<128x64xf32>
    %307 = vector.shape_cast %306 : vector<128x64xf32> to vector<16x8x64xf32>
    %c0_53 = arith.constant 0 : index
    %c0_54 = arith.constant 0 : index
    %308 = vector.load %arg8[%c0_53, %c0_54] : memref<1x64xf32, #tpu.memory_space<vmem>>, vector<1x64xf32>
    %309 = vector.shape_cast %308 : vector<1x64xf32> to vector<1x1x64xf32>
    %310 = vector.broadcast %309 : vector<1x1x64xf32> to vector<16x8x64xf32>
    %311 = arith.mulf %307, %310 : vector<16x8x64xf32>
    %cst_55 = arith.constant dense<0.000000e+00> : vector<16x8xf32>
    %312 = vector.multi_reduction <add>, %311, %cst_55 [2] : vector<16x8x64xf32> to vector<16x8xf32>
    %c0_56 = arith.constant 0 : index
    %c0_57 = arith.constant 0 : index
    %c0_58 = arith.constant 0 : index
    %313 = vector.load %arg2[%c0_56, %c0_57, %c0_58] : memref<4x16x8xf32, #tpu.memory_space<vmem>>, vector<1x16x8xf32>
    %314 = vector.shape_cast %313 : vector<1x16x8xf32> to vector<16x8xf32>
    %cst_59 = arith.constant 0.000000e+00 : f32
    %315 = vector.broadcast %cst_59 : f32 to vector<16x8xf32>
    %316 = arith.cmpf ogt, %314, %315 : vector<16x8xf32>
    %cst_60 = arith.constant -1.000000e+30 : f32
    %317 = vector.broadcast %cst_60 : f32 to vector<16x8xf32>
    %318 = arith.select %316, %312, %317 : vector<16x8xi1>, vector<16x8xf32>
    %cst_61 = arith.constant dense<0xFF800000> : vector<16xf32>
    %319 = vector.multi_reduction <maximumf>, %318, %cst_61 [1] : vector<16x8xf32> to vector<16xf32>
    %320 = vector.shape_cast %319 : vector<16xf32> to vector<16x1xf32>
    %321 = vector.broadcast %320 : vector<16x1xf32> to vector<16x8xf32>
    %322 = arith.subf %318, %321 : vector<16x8xf32>
    %323 = math.exp %322 : vector<16x8xf32>
    %cst_62 = arith.constant dense<0.000000e+00> : vector<16xf32>
    %324 = vector.multi_reduction <add>, %323, %cst_62 [1] : vector<16x8xf32> to vector<16xf32>
    %325 = vector.shape_cast %324 : vector<16xf32> to vector<16x1xf32>
    %326 = vector.broadcast %325 : vector<16x1xf32> to vector<16x8xf32>
    %327 = arith.divf %323, %326 : vector<16x8xf32>
    %328 = arith.mulf %327, %314 : vector<16x8xf32>
    %329 = vector.shape_cast %328 : vector<16x8xf32> to vector<16x8x1xf32>
    %330 = vector.broadcast %329 : vector<16x8x1xf32> to vector<16x8x64xf32>
    %331 = arith.mulf %301, %330 : vector<16x8x64xf32>
    %cst_63 = arith.constant 0.000000e+00 : f32
    %332 = vector.broadcast %cst_63 : f32 to vector<16x1x64xf32>
    %333 = vector.extract_strided_slice %331 {offsets = [0, 0, 0], sizes = [16, 7, 64], strides = [1, 1, 1]} : vector<16x8x64xf32> to vector<16x7x64xf32>
    %334 = tpu.concatenate %332, %333 in 1 : vector<16x1x64xf32>, vector<16x7x64xf32> -> vector<16x8x64xf32>
    %335 = vector.extract_strided_slice %331 {offsets = [0, 1, 0], sizes = [16, 7, 64], strides = [1, 1, 1]} : vector<16x8x64xf32> to vector<16x7x64xf32>
    %336 = tpu.concatenate %335, %332 in 1 : vector<16x7x64xf32>, vector<16x1x64xf32> -> vector<16x8x64xf32>
    %337 = tpu.concatenate %334, %331, %336 in 2 : vector<16x8x64xf32>, vector<16x8x64xf32>, vector<16x8x64xf32> -> vector<16x8x192xf32>
    %338 = vector.shape_cast %337 : vector<16x8x192xf32> to vector<128x192xf32>
    %339 = arith.truncf %338 : vector<128x192xf32> to vector<128x192xbf16>
    %c0_64 = arith.constant 0 : index
    %c0_65 = arith.constant 0 : index
    %340 = vector.load %arg9[%c0_64, %c0_65] : memref<192x32xbf16, #tpu.memory_space<vmem>>, vector<192x32xbf16>
    %cst_66 = arith.constant dense<0.000000e+00> : vector<128x32xf32>
    %341 = tpu.matmul %339, %340, %cst_66 {dimension_numbers = #tpu.dot_dimension_numbers<[1], [0], [0], [1], [0, 0, 1, 1], [], []>} : vector<128x192xbf16>, vector<192x32xbf16>, vector<128x32xf32> -> vector<128x32xf32>
    %c0_67 = arith.constant 0 : index
    %c0_68 = arith.constant 0 : index
    %342 = vector.load %arg10[%c0_67, %c0_68] : memref<1x32xf32, #tpu.memory_space<vmem>>, vector<1x32xf32>
    %343 = vector.broadcast %342 : vector<1x32xf32> to vector<128x32xf32>
    %344 = arith.addf %341, %343 : vector<128x32xf32>
    %345 = vector.shape_cast %344 : vector<128x32xf32> to vector<16x8x32xf32>
    %c1 = arith.constant 1 : index
    %c0_69 = arith.constant 0 : index
    %c0_70 = arith.constant 0 : index
    %346 = vector.load %arg2[%c1, %c0_69, %c0_70] : memref<4x16x8xf32, #tpu.memory_space<vmem>>, vector<1x16x8xf32>
    %347 = vector.shape_cast %346 : vector<1x16x8xf32> to vector<16x8xf32>
    %348 = vector.shape_cast %347 : vector<16x8xf32> to vector<16x8x1xf32>
    %cst_71 = arith.constant 0.000000e+00 : f32
    %349 = vector.broadcast %cst_71 : f32 to vector<16x8x1xf32>
    %350 = arith.cmpf ogt, %348, %349 : vector<16x8x1xf32>
    %cst_72 = arith.constant -1.000000e+30 : f32
    %351 = vector.shape_cast %350 : vector<16x8x1xi1> to vector<16x8x1xi1>
    %352 = vector.broadcast %351 : vector<16x8x1xi1> to vector<16x8x32xi1>
    %353 = vector.broadcast %cst_72 : f32 to vector<16x8x32xf32>
    %354 = arith.select %352, %345, %353 : vector<16x8x32xi1>, vector<16x8x32xf32>
    %cst_73 = arith.constant dense<0xFF800000> : vector<16x32xf32>
    %355 = vector.multi_reduction <maximumf>, %354, %cst_73 [1] : vector<16x8x32xf32> to vector<16x32xf32>
    %356 = math.tanh %355 : vector<16x32xf32>
    %c2 = arith.constant 2 : index
    %c0_74 = arith.constant 0 : index
    %c0_75 = arith.constant 0 : index
    %357 = vector.load %arg2[%c2, %c0_74, %c0_75] : memref<4x16x8xf32, #tpu.memory_space<vmem>>, vector<1x16x8xf32>
    %358 = vector.shape_cast %357 : vector<1x16x8xf32> to vector<16x8xf32>
    %359 = vector.shape_cast %358 : vector<16x8xf32> to vector<16x8x1xf32>
    %cst_76 = arith.constant 0.000000e+00 : f32
    %360 = vector.broadcast %cst_76 : f32 to vector<16x8x1xf32>
    %361 = arith.cmpf ogt, %359, %360 : vector<16x8x1xf32>
    %cst_77 = arith.constant -1.000000e+30 : f32
    %362 = vector.shape_cast %361 : vector<16x8x1xi1> to vector<16x8x1xi1>
    %363 = vector.broadcast %362 : vector<16x8x1xi1> to vector<16x8x32xi1>
    %364 = vector.broadcast %cst_77 : f32 to vector<16x8x32xf32>
    %365 = arith.select %363, %345, %364 : vector<16x8x32xi1>, vector<16x8x32xf32>
    %cst_78 = arith.constant dense<0xFF800000> : vector<16x32xf32>
    %366 = vector.multi_reduction <maximumf>, %365, %cst_78 [1] : vector<16x8x32xf32> to vector<16x32xf32>
    %367 = math.tanh %366 : vector<16x32xf32>
    %c3 = arith.constant 3 : index
    %c0_79 = arith.constant 0 : index
    %c0_80 = arith.constant 0 : index
    %368 = vector.load %arg2[%c3, %c0_79, %c0_80] : memref<4x16x8xf32, #tpu.memory_space<vmem>>, vector<1x16x8xf32>
    %369 = vector.shape_cast %368 : vector<1x16x8xf32> to vector<16x8xf32>
    %370 = vector.shape_cast %369 : vector<16x8xf32> to vector<16x8x1xf32>
    %cst_81 = arith.constant 0.000000e+00 : f32
    %371 = vector.broadcast %cst_81 : f32 to vector<16x8x1xf32>
    %372 = arith.cmpf ogt, %370, %371 : vector<16x8x1xf32>
    %cst_82 = arith.constant -1.000000e+30 : f32
    %373 = vector.shape_cast %372 : vector<16x8x1xi1> to vector<16x8x1xi1>
    %374 = vector.broadcast %373 : vector<16x8x1xi1> to vector<16x8x32xi1>
    %375 = vector.broadcast %cst_82 : f32 to vector<16x8x32xf32>
    %376 = arith.select %374, %345, %375 : vector<16x8x32xi1>, vector<16x8x32xf32>
    %cst_83 = arith.constant dense<0xFF800000> : vector<16x32xf32>
    %377 = vector.multi_reduction <maximumf>, %376, %cst_83 [1] : vector<16x8x32xf32> to vector<16x32xf32>
    %378 = math.tanh %377 : vector<16x32xf32>
    %379 = tpu.concatenate %356, %367, %378 in 1 : vector<16x32xf32>, vector<16x32xf32>, vector<16x32xf32> -> vector<16x96xf32>
    %380 = arith.truncf %379 : vector<16x96xf32> to vector<16x96xbf16>
    %c0_84 = arith.constant 0 : index
    %c0_85 = arith.constant 0 : index
    %381 = vector.load %arg11[%c0_84, %c0_85] : memref<96x128xbf16, #tpu.memory_space<vmem>>, vector<96x128xbf16>
    %cst_86 = arith.constant dense<0.000000e+00> : vector<16x128xf32>
    %382 = tpu.matmul %380, %381, %cst_86 {dimension_numbers = #tpu.dot_dimension_numbers<[1], [0], [0], [1], [0, 0, 1, 1], [], []>} : vector<16x96xbf16>, vector<96x128xbf16>, vector<16x128xf32> -> vector<16x128xf32>
    %c0_87 = arith.constant 0 : index
    %c0_88 = arith.constant 0 : index
    %383 = vector.load %arg12[%c0_87, %c0_88] : memref<1x128xf32, #tpu.memory_space<vmem>>, vector<1x128xf32>
    %384 = vector.broadcast %383 : vector<1x128xf32> to vector<16x128xf32>
    %385 = arith.addf %382, %384 : vector<16x128xf32>
    %cst_89 = arith.constant dense<0xFF800000> : vector<16xf32>
    %386 = vector.multi_reduction <maximumf>, %385, %cst_89 [1] : vector<16x128xf32> to vector<16xf32>
    %387 = vector.shape_cast %386 : vector<16xf32> to vector<16x1xf32>
    %388 = vector.broadcast %387 : vector<16x1xf32> to vector<16x128xf32>
    %389 = arith.subf %385, %388 : vector<16x128xf32>
    %390 = math.exp %389 : vector<16x128xf32>
    %cst_90 = arith.constant dense<0.000000e+00> : vector<16xf32>
    %391 = vector.multi_reduction <add>, %390, %cst_90 [1] : vector<16x128xf32> to vector<16xf32>
    %392 = vector.shape_cast %391 : vector<16xf32> to vector<16x1xf32>
    %393 = vector.broadcast %392 : vector<16x1xf32> to vector<16x128xf32>
    %394 = arith.divf %390, %393 : vector<16x128xf32>
    %c0_91 = arith.constant 0 : index
    %c0_92 = arith.constant 0 : index
    %395 = vector.load %arg13[%c0_91, %c0_92] : memref<16x128xf32, #tpu.memory_space<vmem>>, vector<16x128xf32>
    tpu.vector_store %arg13[%c0_91, %c0_92], %394 {strides = array<i32>} : memref<16x128xf32, #tpu.memory_space<vmem>>, vector<16x128xf32>,
    return
  }
  func.func @transform_0(%arg0: i32) -> (i32, i32, i32) {
    %c0_i32 = arith.constant 0 : i32
    %c0_i32_0 = arith.constant 0 : i32
    %c0_i32_1 = arith.constant 0 : i32
    return %arg0, %c0_i32, %c0_i32_0 : i32, i32, i32
  }
  func.func @transform_1(%arg0: i32) -> (i32, i32, i32) {
    %c0_i32 = arith.constant 0 : i32
    %c0_i32_0 = arith.constant 0 : i32
    %c0_i32_1 = arith.constant 0 : i32
    return %c0_i32, %arg0, %c0_i32_0 : i32, i32, i32
  }
  func.func @transform_2(%arg0: i32) -> (i32, i32) {
    %c0_i32 = arith.constant 0 : i32
    %c0_i32_0 = arith.constant 0 : i32
    %c0_i32_1 = arith.constant 0 : i32
    return %c0_i32, %c0_i32_0 : i32, i32
  }
  func.func @transform_3(%arg0: i32) -> (i32, i32) {
    %c0_i32 = arith.constant 0 : i32
    %c0_i32_0 = arith.constant 0 : i32
    %c0_i32_1 = arith.constant 0 : i32
    return %c0_i32, %c0_i32_0 : i32, i32
  }
  func.func @transform_4(%arg0: i32) -> (i32, i32) {
    %c0_i32 = arith.constant 0 : i32
    %c0_i32_0 = arith.constant 0 : i32
    %c0_i32_1 = arith.constant 0 : i32
    return %c0_i32, %c0_i32_0 : i32, i32
  }
  func.func @transform_5(%arg0: i32) -> (i32, i32) {
    %c0_i32 = arith.constant 0 : i32
    %c0_i32_0 = arith.constant 0 : i32
    %c0_i32_1 = arith.constant 0 : i32
    return %c0_i32, %c0_i32_0 : i32, i32
  }
  func.func @transform_6(%arg0: i32) -> (i32, i32) {
    %c0_i32 = arith.constant 0 : i32
    %c0_i32_0 = arith.constant 0 : i32
    %c0_i32_1 = arith.constant 0 : i32
    return %c0_i32, %c0_i32_0 : i32, i32
  }
  func.func @transform_7(%arg0: i32) -> (i32, i32) {
    %c0_i32 = arith.constant 0 : i32
    %c0_i32_0 = arith.constant 0 : i32
    %c0_i32_1 = arith.constant 0 : i32
    return %c0_i32, %c0_i32_0 : i32, i32
  }
  func.func @transform_8(%arg0: i32) -> (i32, i32) {
    %c0_i32 = arith.constant 0 : i32
    %c0_i32_0 = arith.constant 0 : i32
    %c0_i32_1 = arith.constant 0 : i32
    return %c0_i32, %c0_i32_0 : i32, i32
  }
  func.func @transform_9(%arg0: i32) -> (i32, i32) {
    %c0_i32 = arith.constant 0 : i32
    %c0_i32_0 = arith.constant 0 : i32
    %c0_i32_1 = arith.constant 0 : i32
    return %c0_i32, %c0_i32_0 : i32, i32
  }
  func.func @transform_10(%arg0: i32) -> (i32, i32) {
    %c0_i32 = arith.constant 0 : i32
    %c0_i32_0 = arith.constant 0 : i32
    %c0_i32_1 = arith.constant 0 : i32
    return %c0_i32, %c0_i32_0 : i32, i32
  }
  func.func @transform_11(%arg0: i32) -> (i32, i32) {
    %c0_i32 = arith.constant 0 : i32
    %c0_i32_0 = arith.constant 0 : i32
    %c0_i32_1 = arith.constant 0 : i32
    return %c0_i32, %c0_i32_0 : i32, i32
  }
  func.func @transform_12(%arg0: i32) -> (i32, i32) {
    %c0_i32 = arith.constant 0 : i32
    %c0_i32_0 = arith.constant 0 : i32
    return %arg0, %c0_i32 : i32, i32
  }
}

</mosaic_0001>

<bundles_post_ra>
// kernel: tpu_custom_call.1
= control target key start
LH: loop header
LB: loop body
LE: loop exit
PB: predicated region body
PF: predicated region fallthrough
CT: control target
= control target key end

     0   :  { %17 = vsyncpa [#allocation3], 0  ;;  %s14702_s0 = inlined_call_operand.vmem [shape: f32[16,8,64], index: 0, kind: input, shape index: {}]   ;;  %s14703_s1 = inlined_call_operand.vmem [shape: f32[4,16,8], index: 1, kind: input, shape index: {}]   ;;  %s14704_s2 = inlined_call_operand.vmem [shape: bf16[64,192], index: 2, kind: input, shape index: {}]   ;;  %s14705_s3 = inlined_call_operand.vmem [shape: f32[1,192], index: 3, kind: input, shape index: {}]   ;;  %s14706_s4 = inlined_call_operand.hbm [shape: bf16[64,192], index: 4, kind: input, shape index: {}]   ;;  %s14707_s5 = inlined_call_operand.hbm [shape: f32[1,64], index: 5, kind: input, shape index: {}]   ;;  %s14708_s6 = inlined_call_operand.hbm [shape: bf16[64,64], index: 6, kind: input, shape index: {}]   ;;  %s14709_s7 = inlined_call_operand.vmem [shape: f32[1,64], index: 7, kind: input, shape index: {}]   ;;  %s14710_s8 = inlined_call_operand.vmem [shape: bf16[192,32], index: 8, kind: input, shape index: {}]   ;;  %s14711_s9 = inlined_call_operand.vmem [shape: f32[1,32], index: 9, kind: input, shape index: {}]   ;;  %s14712_s10 = inlined_call_operand.vmem [shape: bf16[96,128], index: 10, kind: input, shape index: {}]   ;;  %s14713_s11 = inlined_call_operand.vmem [shape: f32[1,128], index: 11, kind: input, shape index: {}]   ;;  %s14714_s12 = inlined_call_operand.hbm [shape: f32[16,128], index: 12, kind: output, shape index: {}]  }
   0x1   :  { %18 = vsyncpa [#allocation6], 0 }
   0x2   :  { %19 = vsyncpa [#allocation4], 0  ;;  %s9740_s21 = smov [#allocation5]   ;;  %s9741_s23 = smov [#allocation2]  }
   0x3   :  { %s46_s22 = sshll.u32 %s9740_s21, 4  ;;  %s33_s24 = sshll.u32 %s9741_s23, 4  ;;  %s47_s22 = int_to_ptr.vmem [resolvable:$true] %s46_s22  ;;  %s9818_s24 = int_to_ptr.vmem [resolvable:$true] %s33_s24 }
   0x4   :  { %s9646_s27 = scalar_lea.hbm %s14707_s5, 16 }
   0x5   :  { %p9647_p0 = scmp.ne.s32.totalorder %s14707_s5, %s9646_s27  ;;  %p9650_p1 = scmp.lt.u32.totalorder %s9646_s27, %s14707_s5 }
   0x7   :  { %p9652_p2 = pnand %p9650_p1, %p9647_p0 }
   0x9   :  { %9655 = shalt.err (!%p9652_p2)
}
   0xa   :  { %s9656_s14 = scalar_lea.vmem %s47_s22, 16  ;;  %s9660_s15 = scalar_lea.vmem %s47_s22, 32 }
   0xb   :  { %p9657_p3 = scmp.ne.s32.totalorder %s47_s22, %s9656_s14  ;;  %p9661_p4 = scmp.lt.s32.totalorder %s47_s22, %s47_s22 }
   0xc   :  { %p9662_p5 = scmp.lt.s32.totalorder %s9660_s15, %s9656_s14 }
   0xe   :  { %p9663_p6 = por %p9662_p5, %p9661_p4 }
  0x10   :  { %p9664_p7 = pnand %p9663_p6, %p9657_p3 }
  0x12   :  { %9667 = shalt.err (!%p9664_p7)
}
  0x13   :  { %49 = dma.hbm_to_vmem [thread:$0]  %s14707_s5, 16, %s47_s22, [#allocation6]  }
  0x14   :  { %s9668_s20 = scalar_lea.hbm %s14706_s4, 1024 }
  0x15   :  { %p9669_p8 = scmp.ne.s32.totalorder %s14706_s4, %s9668_s20  ;;  %p9672_p9 = scmp.lt.u32.totalorder %s9668_s20, %s14706_s4 }
  0x17   :  { %p9674_p10 = pnand %p9672_p9, %p9669_p8 }
  0x19   :  { %9677 = shalt.err (!%p9674_p10)
}
  0x1a   :  { %s9678_s27 = scalar_lea.vmem %s9818_s24, 1024  ;;  %p9683_p12 = scmp.lt.s32.totalorder %s9818_s24, %s9818_s24 }
  0x1b   :  { %p9679_p11 = scmp.ne.s32.totalorder %s9818_s24, %s9678_s27  ;;  %p9684_p13 = scmp.lt.s32.totalorder %s9678_s27, %s9678_s27 }
  0x1d   :  { %p9685_p0 = por %p9684_p13, %p9683_p12 }
  0x1f   :  { %p9686_p1 = pnand %p9685_p0, %p9679_p11 }
  0x21   :  { %9689 = shalt.err (!%p9686_p1)
}
  0x22   :  { %s9742_s5 = smov 128   ;;  %s9743_s22 = smov 8  }
  0x23   :  { %39 = dma.hbm_to_vmem [thread:$0]  %s14706_s4, 1024, %s9818_s24, [#allocation3], %s9742_s5, %s9742_s5, %s9743_s22  }
  0x24   :  { %s9744_s30 = smov [#allocation7]   ;;  %s9690_s16 = scalar_lea.hbm %s14708_s6, 512 }
  0x25   :  { %s55_s13 = sshll.u32 %s9744_s30, 4  ;;  %p9691_p2 = scmp.ne.s32.totalorder %s14708_s6, %s9690_s16  ;;  %s56_s13 = int_to_ptr.vmem [resolvable:$true] %s55_s13 }
  0x26   :  { %p9694_p3 = scmp.lt.u32.totalorder %s9690_s16, %s14708_s6 }
  0x28   :  { %p9696_p4 = pnand %p9694_p3, %p9691_p2 }
  0x2a   :  { %9699 = shalt.err (!%p9696_p4)
}
  0x2b   :  { %s9700_s21 = scalar_lea.vmem %s56_s13, 512  ;;  %p9705_p6 = scmp.lt.s32.totalorder %s56_s13, %s56_s13 }
  0x2c   :  { %p9701_p5 = scmp.ne.s32.totalorder %s56_s13, %s9700_s21  ;;  %p9706_p7 = scmp.lt.s32.totalorder %s9700_s21, %s9700_s21 }
  0x2e   :  { %p9707_p8 = por %p9706_p7, %p9705_p6 }
  0x30   :  { %p9708_p9 = pnand %p9707_p8, %p9701_p5 }
  0x32   :  { %9711 = shalt.err (!%p9708_p9)
}
  0x33   :  { %s9745_s4 = smov 64   ;;  %s9746_s24 = smov 4  }
  0x34   :  { %61 = dma.hbm_to_vmem [thread:$0]  %s14708_s6, 512, %s56_s13, [#allocation6], %s9745_s4, %s9745_s4, %s9746_s24  }
  0x35   :  { %9734 = dma.done.wait [#allocation3], 1024  }
  0x36   :  { %9735 = vsyncadd [#allocation3], 4294966272 }
  0x37   :  { %9736 = dma.done.wait [#allocation6], 528  }
  0x38   :  { %9737 = vsyncadd [#allocation6], 4294966768  ;;  %v14716_v0 = vmov 0   ;;  %v8661_v1 = vld [vmem:[%s14704_s2 + $0x4] ss:$8 sps:$4 sm:$0xff]   ;;  %vm14832_vm0 = vcmask 523264  }
  0x39   :  { %223 = vmatprep.mubr.bf16.mxu0 %v14716_v0  ;;  %1407 = vmatprep.mubr.bf16.mxu1 %v14716_v0  ;;  %v8663_v2 = vld [vmem:[%s14704_s2] ss:$8 sps:$4 sm:$0xff]   ;;  %v8664_v3 = vld [vmem:[%s14704_s2 + $0x14] ss:$8 sps:$4 sm:$0xff]   ;;  %v8666_v4 = vld [vmem:[%s14704_s2 + $0x10] ss:$8 sps:$4 sm:$0xff]  }
  0x3a   :  { %191 = vmatprep.subr.bf16.mxu0 %v8661_v1  ;;  %v8667_v5 = vld [vmem:[%s14704_s2 + $0x24] ss:$8 sps:$4 sm:$0xff]   ;;  %v8669_v7 = vld [vmem:[%s14704_s2 + $0x20] ss:$8 sps:$4 sm:$0xff]   ;;  %v8670_v9 = vld [vmem:[%s14704_s2 + $0x34] ss:$8 sps:$4 sm:$0xff]  }
  0x3b   :  { %192 = vmatpush1.bf16.msra.mxu0 %v8663_v2  ;;  %v9883_v6 = vld [vmem:[#allocation2 + $0x4] ss:$8 sps:$4 sm:$0xff]   ;;  %v9888_v8 = vld [vmem:[#allocation2] ss:$8 sps:$4 sm:$0xff]   ;;  %v9894_v10 = vld [vmem:[#allocation2 + $0x14] ss:$8 sps:$4 sm:$0xff]   ;;  %v14715_v2 = vlaneseq }
  0x3c   :  { %193 = vmatprep.subr.bf16.mxu0 %v8664_v3  ;;  %1375 = vmatprep.subr.bf16.mxu1 %v9883_v6  ;;  %v8672_v11 = vld [vmem:[%s14704_s2 + $0x30] ss:$8 sps:$4 sm:$0xff]   ;;  %v82_v12 = vld [vmem:[%s14702_s0] sm:$0xff]  ;;  %v83_v13 = vld [vmem:[%s14702_s0 + $0x8] sm:$0xff]  ;;  %vm808_vm1 = vcmask 1041409   ;;  %vm811_vm2 = vcmask 1042434  }
  0x3d   :  { %1376 = vmatpush1.bf16.msra.mxu1 %v9888_v8  ;;  %v9906_v14 = vld [vmem:[#allocation2 + $0x10] ss:$8 sps:$4 sm:$0xff]   ;;  %v9909_v15 = vld [vmem:[#allocation2 + $0x24] ss:$8 sps:$4 sm:$0xff]   ;;  %v98_v16 = vpack.c.bf16 %v83_v13, %v82_v12  ;;  %v8681_v17 = vld [vmem:[#allocation2 + $0x20] ss:$8 sps:$4 sm:$0xff]  }
  0x3e   :  { %1377 = vmatprep.subr.bf16.mxu1 %v9894_v10  ;;  %v8682_v18 = vld [vmem:[#allocation2 + $0x34] ss:$8 sps:$4 sm:$0xff]   ;;  %v8684_v21 = vld [vmem:[#allocation2 + $0x30] ss:$8 sps:$4 sm:$0xff]   ;;  %v86_v23 = vld [vmem:[%s14702_s0 + $0x20] sm:$0xff]  ;;  %vm814_vm3 = vcmask 1043459  }
  0x3f   :  { %194 = vmatpush1.bf16.msra.mxu0 %v8666_v4  ;;  %v84_v19 = vld [vmem:[%s14702_s0 + $0x10] sm:$0xff]  ;;  %v85_v20 = vld [vmem:[%s14702_s0 + $0x18] sm:$0xff]  ;;  %v87_v24 = vld [vmem:[%s14702_s0 + $0x28] sm:$0xff]  ;;  %vm817_vm4 = vcmask 1044484   ;;  %vm820_vm5 = vcmask 1045509   ;;  %vm823_vm6 = vcmask 1046534  }
  0x40   :  { %195 = vmatprep.subr.bf16.mxu0 %v8667_v5  ;;  %v99_v22 = vpack.c.bf16 %v85_v20, %v84_v19  ;;  %v100_v25 = vpack.c.bf16 %v87_v24, %v86_v23  ;;  %v88_v26 = vld [vmem:[%s14702_s0 + $0x30] sm:$0xff]  ;;  %v89_v27 = vld [vmem:[%s14702_s0 + $0x38] sm:$0xff]  ;;  %v90_v29 = vld [vmem:[%s14702_s0 + $0x40] sm:$0xff]  ;;  %v10012_v5 = vshrl.u32 %v14715_v2, 7  ;;  %vm826_vm7 = vcmask 1047559  }
  0x41   :  { %1378 = vmatpush1.bf16.msra.mxu1 %v9906_v14  ;;  %v101_v28 = vpack.c.bf16 %v89_v27, %v88_v26  ;;  %v91_v30 = vld [vmem:[%s14702_s0 + $0x48] sm:$0xff]  ;;  %v92_v32 = vld [vmem:[%s14702_s0 + $0x50] sm:$0xff]  ;;  %v93_v33 = vld [vmem:[%s14702_s0 + $0x58] sm:$0xff]  ;;  %vm6124_vm9 = vcmask 1040384   ;;  %vm6141_vm10 = vcmask 1041408   ;;  %vm6158_vm11 = vcmask 1042432  }
  0x42   :  { %1379 = vmatprep.subr.bf16.mxu1 %v9909_v15  ;;  %v102_v31 = vpack.c.bf16 %v91_v30, %v90_v29  ;;  %v103_v34 = vpack.c.bf16 %v93_v33, %v92_v32  ;;  %v94_v35 = vld [vmem:[%s14702_s0 + $0x60] sm:$0xff]  ;;  %v95_v36 = vld [vmem:[%s14702_s0 + $0x68] sm:$0xff]  ;;  %v96_v38 = vld [vmem:[%s14702_s0 + $0x70] sm:$0xff]  ;;  %14834 = vst [vmem:[#allocation12_spill] sm:$0xff] %v10012_v5  ;;  %vm6175_vm12 = vcmask 1043456   ;;  %vm6192_vm13 = vcmask 1044480  }
  0x43   :  { %196 = vmatpush1.bf16.msra.mxu0 %v8669_v7  ;;  %v104_v37 = vpack.c.bf16 %v95_v36, %v94_v35  ;;  %v97_v39 = vld [vmem:[%s14702_s0 + $0x78] sm:$0xff]  ;;  %vm6209_vm14 = vcmask 1045504   ;;  %vm6226_vm15 = vcmask 1046528  }
  0x44   :  { %197 = vmatprep.subr.bf16.mxu0 %v8670_v9  ;;  %v105_v40 = vpack.c.bf16 %v97_v39, %v96_v38  ;;  %v10024_v9 = vld [vmem:[%s14705_s3] sm:$0x3] }
  0x45   :  { %1380 = vmatpush1.bf16.msra.mxu1 %v8681_v17 }
  0x46   :  { %1381 = vmatprep.subr.bf16.mxu1 %v8682_v18 }
  0x47   :  { %198 = vmatpush1.bf16.msra.mxu0 %v8672_v11 }
  0x48   :  { %356 = vmatprep.subr.bf16.mxu0 %v9883_v6 }
  0x49   :  { %1382 = vmatpush1.bf16.msra.mxu1 %v8684_v21 }
  0x4a   :  { %8339 = vmatmul.mubr.msk.bf16.vlgmr.msra.gmra.mrb[0].mxu0 %vm14832_vm0, %v98_v16  ;;  %1902 = vmatprep.subr.bf16.mxu1 %v9883_v6 }
  0x4b   :  { %357 = vmatpush1.bf16.msra.mxu0 %v9888_v8  ;;  %233 = vmatprep.mubr.bf16.mxu0 %v14716_v0 }
  0x4c   :  { %358 = vmatprep.subr.bf16.mxu0 %v9894_v10 }
  0x4f   :  { %359 = vmatpush1.bf16.msra.mxu0 %v9906_v14 }
  0x50   :  { %360 = vmatprep.subr.bf16.mxu0 %v9909_v15 }
  0x52   :  { %8340 = vmatmul.mubr.msk.bf16.gmra.mrb[4].mxu0 %vm14832_vm0, %v99_v22 }
  0x53   :  { %243 = vmatprep.mubr.bf16.mxu0 %v14716_v0  ;;  %361 = vmatpush1.bf16.msra.mxu0 %v8681_v17 }
  0x54   :  { %362 = vmatprep.subr.bf16.mxu0 %v8682_v18 }
  0x57   :  { %363 = vmatpush1.bf16.msra.mxu0 %v8684_v21 }
  0x58   :  { %848 = vmatprep.subr.bf16.mxu0 %v9883_v6 }
  0x5a   :  { %8341 = vmatmul.mubr.msk.bf16.gmra.mrb[8].mxu0 %vm14832_vm0, %v100_v25 }
  0x5b   :  { %253 = vmatprep.mubr.bf16.mxu0 %v14716_v0 }
  0x62   :  { %8342 = vmatmul.mubr.msk.bf16.gmra.mrb[12].mxu0 %vm14832_vm0, %v101_v28 }
  0x63   :  { %263 = vmatprep.mubr.bf16.mxu0 %v14716_v0 }
  0x6a   :  { %8343 = vmatmul.mubr.msk.bf16.gmra.mrb[16].mxu0 %vm14832_vm0, %v102_v31 }
  0x6b   :  { %273 = vmatprep.mubr.bf16.mxu0 %v14716_v0 }
  0x72   :  { %8344 = vmatmul.mubr.msk.bf16.gmra.mrb[20].mxu0 %vm14832_vm0, %v103_v34 }
  0x73   :  { %283 = vmatprep.mubr.bf16.mxu0 %v14716_v0 }
  0x7a   :  { %8345 = vmatmul.mubr.msk.bf16.gmra.mrb[24].mxu0 %vm14832_vm0, %v104_v37 }
  0x7b   :  { %293 = vmatprep.mubr.bf16.mxu0 %v14716_v0 }
  0x82   :  { %8346 = vmatmul.mubr.msk.bf16.gmra.mrb[28].mxu0 %vm14832_vm0, %v105_v40 }
  0x83   :  { %388 = vmatprep.mubr.bf16.mxu0 %v14716_v0 }
  0x8a   :  { %389 = vmatmul.mubr.bf16.vlgmr.msra.gmra.mrb[32].mxu0 %v14716_v0 }
  0x8b   :  { %849 = vmatpush1.bf16.msra.mxu0 %v9888_v8  ;;  %880 = vmatprep.mubr.bf16.mxu0 %v14716_v0  ;;  %v10019_v8 = vsub.s32 0, %v10012_v5 }
  0x8c   :  { %850 = vmatprep.subr.bf16.mxu0 %v9894_v10 }
  0x8d   :  { %14835 = vst [vmem:[#allocation13_spill] sm:$0xff] %v10019_v8  ;;  %v10032_v12 = vrot.slane %v10024_v9, %v10019_v8 }
  0x8f   :  { %851 = vmatpush1.bf16.msra.mxu0 %v9906_v14 }
  0x90   :  { %852 = vmatprep.subr.bf16.mxu0 %v9909_v15 }
  0x93   :  { %853 = vmatpush1.bf16.msra.mxu0 %v8681_v17 }
  0x94   :  { %854 = vmatprep.subr.bf16.mxu0 %v8682_v18 }
  0x97   :  { %855 = vmatpush1.bf16.msra.mxu0 %v8684_v21 }
  0x98   :  { %2429 = vmatprep.subr.bf16.mxu0 %v9883_v6 }
 0x11d   :  { %v225_v41 = vpop.f32.mrb[0].mxu0 }
 0x11e   :  { %v9985_v42 = vpop.f32.mrb[1].mxu0  ;;  %v10039_v15 = vadd.f32 %v225_v41, %v10032_v12 }
 0x11f   :  { %v229_v43 = vpop.f32.mrb[2].mxu0 }
 0x120   :  { %v9987_v44 = vpop.f32.mrb[3].mxu0  ;;  %v10042_v16 = vadd.f32 %v229_v43, %v10032_v12 }
 0x122   :  { %14836 = vst [vmem:[#allocation14_spill] sm:$0xff] %v10042_v16 }
 0x125   :  { %v235_v45 = vpop.f32.mrb[4].mxu0 }
 0x126   :  { %v9989_v46 = vpop.f32.mrb[5].mxu0  ;;  %v10045_v17 = vadd.f32 %v235_v45, %v10032_v12 }
 0x127   :  { %v239_v47 = vpop.f32.mrb[6].mxu0 }
 0x128   :  { %v9991_v48 = vpop.f32.mrb[7].mxu0  ;;  %v10048_v18 = vadd.f32 %v239_v47, %v10032_v12 }
 0x12a   :  { %14837 = vst [vmem:[#allocation15_spill] sm:$0xff] %v10048_v18 }
 0x12d   :  { %v245_v49 = vpop.f32.mrb[8].mxu0 }
 0x12e   :  { %v9993_v50 = vpop.f32.mrb[9].mxu0  ;;  %v10051_v19 = vadd.f32 %v245_v49, %v10032_v12 }
 0x12f   :  { %v249_v51 = vpop.f32.mrb[10].mxu0 }
 0x130   :  { %v9995_v52 = vpop.f32.mrb[11].mxu0  ;;  %14838 = vst [vmem:[#allocation16_spill] sm:$0xff] %v10051_v19  ;;  %v10054_v20 = vadd.f32 %v249_v51, %v10032_v12 }
 0x132   :  { %14839 = vst [vmem:[#allocation17_spill] sm:$0xff] %v10054_v20 }
 0x135   :  { %v255_v53 = vpop.f32.mrb[12].mxu0 }
 0x136   :  { %v9997_v54 = vpop.f32.mrb[13].mxu0  ;;  %v10057_v21 = vadd.f32 %v255_v53, %v10032_v12 }
 0x137   :  { %v259_v55 = vpop.f32.mrb[14].mxu0 }
 0x138   :  { %v9999_v56 = vpop.f32.mrb[15].mxu0  ;;  %14840 = vst [vmem:[#allocation18_spill] sm:$0xff] %v10057_v21  ;;  %v10060_v22 = vadd.f32 %v259_v55, %v10032_v12 }
 0x13a   :  { %14841 = vst [vmem:[#allocation19_spill] sm:$0xff] %v10060_v22 }
 0x13d   :  { %v265_v57 = vpop.f32.mrb[16].mxu0 }
 0x13e   :  { %v10001_v58 = vpop.f32.mrb[17].mxu0  ;;  %v10063_v23 = vadd.f32 %v265_v57, %v10032_v12 }
 0x13f   :  { %v269_v59 = vpop.f32.mrb[18].mxu0 }
 0x140   :  { %v10003_v60 = vpop.f32.mrb[19].mxu0  ;;  %14842 = vst [vmem:[#allocation20_spill] sm:$0xff] %v10063_v23  ;;  %v10077_v40 = vadd.f32 %v269_v59, %v10032_v12 }
 0x142   :  { %14843 = vst [vmem:[#allocation21_spill] sm:$0xff] %v10077_v40 }
 0x145   :  { %v275_v61 = vpop.f32.mrb[20].mxu0 }
 0x146   :  { %v10005_v62 = vpop.f32.mrb[21].mxu0  ;;  %v10083_v55 = vadd.f32 %v275_v61, %v10032_v12 }
 0x147   :  { %v279_v63 = vpop.f32.mrb[22].mxu0 }
 0x148   :  { %v10007_v1 = vpop.f32.mrb[23].mxu0  ;;  %14844 = vst [vmem:[#allocation22_spill] sm:$0xff] %v10083_v55  ;;  %v10086_v57 = vadd.f32 %v279_v63, %v10032_v12 }
 0x14a   :  { %14845 = vst [vmem:[#allocation23_spill] sm:$0xff] %v10086_v57 }
 0x14d   :  { %v285_v3 = vpop.f32.mrb[24].mxu0 }
 0x14e   :  { %v10009_v4 = vpop.f32.mrb[25].mxu0  ;;  %v10093_v61 = vadd.f32 %v285_v3, %v10032_v12 }
 0x14f   :  { %v10014_v6 = vpop.f32.mrb[26].mxu0 }
 0x150   :  { %v10016_v7 = vpop.f32.mrb[27].mxu0  ;;  %14846 = vst [vmem:[#allocation24_spill] sm:$0xff] %v10093_v61 }
 0x155   :  { %v10026_v10 = vpop.f32.mrb[28].mxu0 }
 0x156   :  { %v10028_v11 = vpop.f32.mrb[29].mxu0 }
 0x157   :  { %v10034_v13 = vpop.f32.mrb[30].mxu0 }
 0x158   :  { %v10036_v14 = vpop.f32.mrb[31].mxu0 }
 0x15d   :  { %v390_v24 = vpop.f32.mrb[32].mxu0 }
 0x15e   :  { %v401_v25 = vrot.slane %v390_v24, 1  ;;  %v402_v26 = vrot.slane %v390_v24, 2  ;;  %v403_v27 = vrot.slane %v390_v24, 3  ;;  %v404_v28 = vrot.slane %v390_v24, 4  ;;  %v10065_v29 = vpop.f32.mrb[33].mxu0 }
 0x15f   :  { %v405_v30 = vrot.slane %v390_v24, 5  ;;  %v406_v31 = vrot.slane %v390_v24, 6  ;;  %v407_v32 = vrot.slane %v390_v24, 7  ;;  %v431_v33 = vadd.f32 %v390_v24, %v10039_v15  ;;  %v10068_v34 = vpop.f32.mrb[34].mxu0 }
 0x160   :  { %v432_v35 = vadd.f32 %v401_v25, %v10042_v16  ;;  %v433_v36 = vadd.f32 %v402_v26, %v10045_v17  ;;  %v434_v37 = vadd.f32 %v403_v27, %v10048_v18  ;;  %v435_v38 = vadd.f32 %v404_v28, %v10051_v19  ;;  %v10074_v39 = vpop.f32.mrb[35].mxu0 }
 0x161   :  { %v436_v41 = vadd.f32 %v405_v30, %v10054_v20  ;;  %v437_v43 = vadd.f32 %v406_v31, %v10057_v21  ;;  %v8355_v45 = vmul.f32 -1.442695, %v431_v33  ;;  %v438_v47 = vadd.f32 %v407_v32, %v10060_v22 }
 0x162   :  { %v8356_v49 = vmul.f32 -1.442695, %v432_v35  ;;  %v8357_v51 = vmul.f32 -1.442695, %v433_v36  ;;  %v8358_v53 = vmul.f32 -1.442695, %v434_v37  ;;  %v439_v31 = vadd.f32 %v10068_v34, %v10063_v23 }
 0x163   :  { %8707 = vpow2.f32 %v8355_v45  ;;  %v8359_v24 = vmul.f32 -1.442695, %v435_v38  ;;  %v8360_v59 = vmul.f32 -1.442695, %v436_v41  ;;  %v408_v25 = vrot.slane %v10068_v34, 1 }
 0x164   :  { %8709 = vpow2.f32 %v8356_v49  ;;  %v409_v26 = vrot.slane %v10068_v34, 2  ;;  %v8361_v27 = vmul.f32 -1.442695, %v437_v43  ;;  %v410_v28 = vrot.slane %v10068_v34, 3 }
 0x165   :  { %8711 = vpow2.f32 %v8357_v51  ;;  %v411_v30 = vrot.slane %v10068_v34, 4  ;;  %v8362_v63 = vmul.f32 -1.442695, %v438_v47  ;;  %v440_v32 = vadd.f32 %v408_v25, %v10077_v40 }
 0x166   :  { %8713 = vpow2.f32 %v8358_v53  ;;  %v441_v33 = vadd.f32 %v409_v26, %v10083_v55  ;;  %v442_v35 = vadd.f32 %v410_v28, %v10086_v57  ;;  %v8363_v37 = vmul.f32 -1.442695, %v439_v31 }
 0x167   :  { %8715 = vpow2.f32 %v8359_v24  ;;  %v443_v36 = vadd.f32 %v411_v30, %v10093_v61  ;;  %v8364_v38 = vmul.f32 -1.442695, %v440_v32  ;;  %v412_v45 = vrot.slane %v10068_v34, 5 }
 0x168   :  { %8717 = vpow2.f32 %v8360_v59  ;;  %v8365_v3 = vmul.f32 -1.442695, %v441_v33  ;;  %v8366_v41 = vmul.f32 -1.442695, %v442_v35  ;;  %v413_v49 = vrot.slane %v10068_v34, 6 }
 0x169   :  { %8719 = vpow2.f32 %v8361_v27  ;;  %v8367_v43 = vmul.f32 -1.442695, %v443_v36  ;;  %v10105_v53 = vadd.f32 %v10014_v6, %v10032_v12  ;;  %v414_v59 = vrot.slane %v10068_v34, 7 }
 0x16a   :  { %8721 = vpow2.f32 %v8362_v63  ;;  %v10110_v26 = vadd.f32 %v10026_v10, %v10032_v12  ;;  %v10114_v30 = vadd.f32 %v10034_v13, %v10032_v12  ;;  %v10118_v34 = vsub.s32 1, %v10012_v5  ;;  %v10122_v13 = vld [vmem:[#allocation5] ss:$0 sm:$0xff] }
 0x16b   :  { %8723 = vpow2.f32 %v8363_v37  ;;  %14847 = vst [vmem:[#allocation25_spill] sm:$0xff] %v10105_v53  ;;  %v444_v6 = vadd.f32 %v412_v45, %v10105_v53 }
 0x16c   :  { %8725 = vpow2.f32 %v8364_v38  ;;  %14848 = vst [vmem:[#allocation26_spill] sm:$0xff] %v10110_v26  ;;  %14849 = vst [vmem:[#allocation27_spill] sm:$0xff] %v10114_v30  ;;  %v445_v10 = vadd.f32 %v413_v49, %v10110_v26  ;;  %v446_v36 = vadd.f32 %v414_v59, %v10114_v30  ;;  %v10126_v45 = vrot.slane %v10024_v9, %v10118_v34 }
 0x16d   :  { %v8708_v47 = vpop.eup %8707  ;;  %8727 = vpow2.f32 %v8365_v3  ;;  %14850 = vst [vmem:[#allocation28_spill] sm:$0xff] %v10118_v34 }
 0x16e   :  { %v8710_v51 = vpop.eup %8709  ;;  %v495_v24 = vadd.f32 1.0, %v8708_v47  ;;  %8729 = vpow2.f32 %v8366_v41  ;;  %v8368_v41 = vmul.f32 -1.442695, %v444_v6  ;;  %v8369_v49 = vmul.f32 -1.442695, %v445_v10 }
 0x16f   :  { %v8712_v25 = vpop.eup %8711  ;;  %v496_v27 = vadd.f32 1.0, %v8710_v51  ;;  %8731 = vpow2.f32 %v8367_v43  ;;  %v8370_v59 = vmul.f32 -1.442695, %v446_v36  ;;  %v10132_v9 = vadd.f32 %v9985_v42, %v10126_v45 }
 0x170   :  { %v8714_v28 = vpop.eup %8713  ;;  %v497_v63 = vadd.f32 1.0, %v8712_v25  ;;  %8733 = vrcp.f32 %v495_v24  ;;  %v549_v24 = vadd.f32 %v10122_v13, %v10065_v29  ;;  %v10142_v29 = vadd.f32 %v9989_v46, %v10126_v45 }
 0x171   :  { %v8716_v31 = vpop.eup %8715  ;;  %v498_v32 = vadd.f32 1.0, %v8714_v28  ;;  %8735 = vrcp.f32 %v496_v27  ;;  %14851 = vst [vmem:[#allocation29_spill] sm:$0xff] %v10132_v9 }
 0x172   :  { %v8718_v33 = vpop.eup %8717  ;;  %v499_v35 = vadd.f32 1.0, %v8716_v31  ;;  %8737 = vrcp.f32 %v497_v63  ;;  %v10136_v31 = vadd.f32 %v9987_v44, %v10126_v45  ;;  %14853 = vst [vmem:[#allocation31_spill] sm:$0xff] %v10142_v29 }
 0x173   :  { %v8720_v37 = vpop.eup %8719  ;;  %v500_v12 = vadd.f32 1.0, %v8718_v33  ;;  %8739 = vrcp.f32 %v498_v32 }
 0x174   :  { %v8722_v38 = vpop.eup %8721  ;;  %v501_v3 = vadd.f32 1.0, %v8720_v37  ;;  %8741 = vrcp.f32 %v499_v35  ;;  %14852 = vst [vmem:[#allocation30_spill] sm:$0xff] %v10136_v31  ;;  %v553_v35 = vrot.slane %v549_v24, 1 }
 0x175   :  { %v8724_v43 = vpop.eup %8723  ;;  %v502_v47 = vadd.f32 1.0, %v8722_v38  ;;  %8743 = vrcp.f32 %v500_v12  ;;  %v554_v12 = vrot.slane %v549_v24, 2  ;;  %v10151_v38 = vadd.f32 %v9991_v48, %v10126_v45 }
 0x176   :  { %v8726_v51 = vpop.eup %8725  ;;  %8745 = vrcp.f32 %v501_v3  ;;  %v503_v27 = vadd.f32 1.0, %v8724_v43  ;;  %v555_v3 = vrot.slane %v549_v24, 3  ;;  %v558_v48 = vrot.slane %v549_v24, 6 }
 0x177   :  { %v8728_v25 = vpop.eup %8727  ;;  %8747 = vrcp.f32 %v502_v47  ;;  %v504_v63 = vadd.f32 1.0, %v8726_v51  ;;  %14854 = vst [vmem:[#allocation32_spill] sm:$0xff] %v10151_v38 }
 0x178   :  { %v8730_v28 = vpop.eup %8729  ;;  %8749 = vpow2.f32 %v8368_v41  ;;  %v505_v32 = vadd.f32 1.0, %v8728_v25  ;;  %v557_v25 = vrot.slane %v549_v24, 5 }
 0x179   :  { %v8732_v6 = vpop.eup %8731  ;;  %8751 = vpow2.f32 %v8369_v49  ;;  %v506_v33 = vadd.f32 1.0, %v8730_v28  ;;  %v556_v49 = vrot.slane %v549_v24, 4 }
 0x17a   :  { %v10138_v10 = vpop.eup %8733  ;;  %8753 = vpow2.f32 %v8370_v59  ;;  %v507_v37 = vadd.f32 1.0, %v8732_v6 }
 0x17b   :  { %v10144_v36 = vpop.eup %8735  ;;  %8755 = vrcp.f32 %v503_v27  ;;  %v583_v42 = vmul.f32 %v10138_v10, %v549_v24 }
 0x17c   :  { %v10147_v44 = vpop.eup %8737  ;;  %8757 = vrcp.f32 %v504_v63  ;;  %v584_v46 = vmul.f32 %v10144_v36, %v553_v35 }
 0x17d   :  { %v10154_v41 = vpop.eup %8739  ;;  %8759 = vrcp.f32 %v505_v32  ;;  %v599_v43 = vadd.f32 %v583_v42, %v10132_v9  ;;  %v585_v47 = vmul.f32 %v10147_v44, %v554_v12  ;;  %v559_v42 = vrot.slane %v549_v24, 7 }
 0x17e   :  { %v10158_v51 = vpop.eup %8741  ;;  %8761 = vrcp.f32 %v506_v33  ;;  %v586_v59 = vmul.f32 %v10154_v41, %v555_v3  ;;  %v600_v63 = vadd.f32 %v584_v46, %v10136_v31  ;;  %v10174_v3 = vadd.f32 %v10122_v13, %v10074_v39 }
 0x17f   :  { %v10161_v27 = vpop.eup %8743  ;;  %8763 = vrcp.f32 %v507_v37  ;;  %v601_v28 = vadd.f32 %v585_v47, %v10142_v29  ;;  %v587_v6 = vmul.f32 %v10158_v51, %v556_v49 }
 0x180   :  { %v10166_v32 = vpop.eup %8745  ;;  %8765 = vtanh.f32 %v599_v43  ;;  %v602_v35 = vadd.f32 %v586_v59, %v10151_v38  ;;  %v588_v33 = vmul.f32 %v10161_v27, %v557_v25  ;;  %v560_v39 = vrot.slane %v10174_v3, 1 }
 0x181   :  { %v10170_v12 = vpop.eup %8747  ;;  %8767 = vtanh.f32 %v601_v28  ;;  %v10177_v37 = vmul.f32 %v10166_v32, %v558_v48  ;;  %v10189_v48 = vadd.f32 %v10001_v58, %v10126_v45  ;;  %v10206_v58 = vadd.f32 %v10005_v62, %v10126_v45 }
 0x182   :  { %v8750_v46 = vpop.eup %8749  ;;  %v10180_v47 = vmul.f32 %v10170_v12, %v559_v42  ;;  %8769 = vtanh.f32 %v600_v63  ;;  %v561_v63 = vrot.slane %v10174_v3, 2  ;;  %v563_v34 = vrot.slane %v10174_v3, 4 }
 0x183   :  { %v8752_v43 = vpop.eup %8751  ;;  %v508_v49 = vadd.f32 1.0, %v8750_v46  ;;  %8771 = vtanh.f32 %v602_v35  ;;  %14855 = vst [vmem:[#allocation33_spill] sm:$0xff] %v10189_v48  ;;  %v10198_v35 = vadd.f32 %v9993_v50, %v10126_v45  ;;  %14857 = vst [vmem:[#allocation35_spill] sm:$0xff] %v10206_v58  ;;  %v10215_v50 = vadd.f32 %v10007_v1, %v10126_v45 }
 0x184   :  { %v8754_v59 = vpop.eup %8753  ;;  %v509_v25 = vadd.f32 1.0, %v8752_v43  ;;  %v562_v43 = vrot.slane %v10174_v3, 3 }
 0x185   :  { %v10182_v24 = vpop.eup %8755  ;;  %v510_v2 = vadd.f32 1.0, %v8754_v59  ;;  %8773 = vrcp.f32 %v508_v49  ;;  %14856 = vst [vmem:[#allocation34_spill] sm:$0xff] %v10198_v35  ;;  %14858 = vst [vmem:[#allocation36_spill] sm:$0xff] %v10215_v50  ;;  %v603_v62 = vadd.f32 %v587_v6, %v10198_v35  ;;  %v564_v6 = vrot.slane %v10174_v3, 5 }
 0x186   :  { %v10185_v28 = vpop.eup %8757  ;;  %8775 = vrcp.f32 %v509_v25  ;;  %v591_v42 = vmul.f32 %v10182_v24, %v10174_v3 }
 0x187   :  { %v10194_v46 = vpop.eup %8759  ;;  %8777 = vrcp.f32 %v510_v2  ;;  %v592_v49 = vmul.f32 %v10185_v28, %v560_v39 }
 0x188   :  { %v10202_v59 = vpop.eup %8761  ;;  %v607_v25 = vadd.f32 %v591_v42, %v10189_v48  ;;  %v593_v0 = vmul.f32 %v10194_v46, %v561_v63  ;;  %v10224_v63 = vadd.f32 %v9995_v52, %v10126_v45  ;;  %v10238_v52 = vadd.f32 %v10003_v60, %v10126_v45 }
 0x189   :  { %v10211_v8 = vpop.eup %8763  ;;  %v594_v2 = vmul.f32 %v10202_v59, %v562_v43  ;;  %v642_v35 = vsub.f32 1.0, %v10202_v59 }
 0x18a   :  { %v8766_v39 = vpop.eup %8765  ;;  %8779 = vtanh.f32 %v607_v25  ;;  %v609_v5 = vadd.f32 %v593_v0, %v10206_v58  ;;  %v595_v42 = vmul.f32 %v10211_v8, %v563_v34  ;;  %14859 = vst [vmem:[#allocation37_spill] sm:$0xff] %v10224_v63  ;;  %v10230_v0 = vadd.f32 %v10009_v4, %v10126_v45  ;;  %14861 = vst [vmem:[#allocation39_spill] sm:$0xff] %v10238_v52 }
 0x18b   :  { %v8768_v48 = vpop.eup %8767  ;;  %663 = vrot.lane.b32.xlu0 %v8766_v39, %s9745_s4  ;;  %v610_v1 = vadd.f32 %v594_v2, %v10215_v50  ;;  %v604_v34 = vadd.f32 %v588_v33, %v10224_v63  ;;  %v566_v2 = vrot.slane %v10174_v3, 7  ;;  %v608_v63 = vadd.f32 %v592_v49, %v10238_v52 }
 0x18c   :  { %667 = vrot.lane.b32.xlu1 %v8768_v48, %s9745_s4  ;;  %8781 = vtanh.f32 %v609_v5  ;;  %v8770_v43 = vpop.eup %8769  ;;  %14860 = vst [vmem:[#allocation38_spill] sm:$0xff] %v10230_v0  ;;  %v565_v5 = vrot.slane %v10174_v3, 6  ;;  %v611_v4 = vadd.f32 %v595_v42, %v10230_v0  ;;  %v10259_v42 = vadd.f32 %v9997_v54, %v10126_v45 }
 0x18d   :  { %v8772_v25 = vpop.eup %8771  ;;  %8783 = vtanh.f32 %v603_v62  ;;  %v10272_v54 = vadd.f32 %v9999_v56, %v10126_v45  ;;  %v737_v50 = vmul.f32 0.0, %v10194_v46 }
 0x18e   :  { %8785 = vtanh.f32 %v610_v1  ;;  %14863 = vst [vmem:[#allocation41_spill] sm:$0xff] %v10259_v42  ;;  %v605_v49 = vadd.f32 %v10177_v37, %v10259_v42 }
 0x18f   :  { %v10234_v39 = vpop.eup %8773  ;;  %665 = vrot.lane.b32.xlu0 %v8770_v43, %s9745_s4  ;;  %v10253_v43 = vadd.f32 %v10016_v7, %v10126_v45  ;;  %8787 = vtanh.f32 %v604_v34  ;;  %v10265_v7 = vadd.f32 %v10028_v11, %v10126_v45  ;;  %14865 = vst [vmem:[#allocation43_spill] sm:$0xff] %v10272_v54  ;;  %v10278_v11 = vadd.f32 %v10036_v14, %v10126_v45 }
 0x190   :  { %v10242_v48 = vpop.eup %8775  ;;  %669 = vrot.lane.b32.xlu1 %v8772_v25, %s9745_s4  ;;  %v596_v33 = vmul.f32 %v10234_v39, %v564_v6  ;;  %8789 = vtanh.f32 %v611_v4  ;;  %v606_v37 = vadd.f32 %v10180_v47, %v10272_v54 }
 0x191   :  { %v10248_v62 = vpop.eup %8777  ;;  %v597_v60 = vmul.f32 %v10242_v48, %v565_v5  ;;  %14862 = vst [vmem:[#allocation40_spill] sm:$0xff] %v10253_v43  ;;  %14864 = vst [vmem:[#allocation42_spill] sm:$0xff] %v10265_v7  ;;  %8791 = vtanh.f32 %v608_v63 }
 0x192   :  { %v598_v25 = vmul.f32 %v10248_v62, %v566_v2  ;;  %v612_v3 = vadd.f32 %v596_v33, %v10253_v43  ;;  %14866 = vst [vmem:[#allocation44_spill] sm:$0xff] %v10278_v11 }
 0x193   :  { %v613_v5 = vadd.f32 %v597_v60, %v10265_v7  ;;  %v10332_v7 = vmul.f32 0.0, %v10166_v32 }
 0x194   :  { %v8780_v1 = vpop.eup %8779  ;;  %8793 = vtanh.f32 %v612_v3  ;;  %v614_v56 = vadd.f32 %v598_v25, %v10278_v11 }
 0x195   :  { %679 = vrot.lane.b32.xlu0 %v8780_v1, %s9745_s4  ;;  %8795 = vtanh.f32 %v605_v49  ;;  %v631_v1 = vsub.f32 1.0, %v10138_v10 }
 0x196   :  { %v8782_v6 = vpop.eup %8781  ;;  %8797 = vtanh.f32 %v613_v5  ;;  %v729_v5 = vmul.f32 0.0, %v10147_v44 }
 0x197   :  { %683 = vrot.lane.b32.xlu1 %v8782_v6, %s9745_s4  ;;  %v8784_v34 = vpop.eup %8783  ;;  %8799 = vtanh.f32 %v606_v37  ;;  %v633_v6 = vsub.f32 1.0, %v10147_v44  ;;  %v727_v37 = vmul.f32 0.0, %v10138_v10  ;;  %v730_v44 = vmul.f32 0.0, %v10154_v41 }
 0x198   :  { %v8786_v4 = vpop.eup %8785  ;;  %8801 = vtanh.f32 %v614_v56 }
 0x199   :  { %671 = vrot.lane.b32.xlu0 %v8784_v34, %s9745_s4  ;;  %v8788_v63 = vpop.eup %8787 }
 0x19a   :  { %v8790_v33 = vpop.eup %8789 }
 0x19b   :  { %685 = vrot.lane.b32.xlu1 %v8786_v4, %s9745_s4  ;;  %v8792_v2 = vpop.eup %8791 }
 0x19d   :  { %673 = vrot.lane.b32.xlu0 %v8788_v63, %s9745_s4  ;;  %v632_v63 = vsub.f32 1.0, %v10144_v36 }
 0x19e   :  { %v8794_v14 = vpop.eup %8793 }
 0x19f   :  { %687 = vrot.lane.b32.xlu1 %v8790_v33, %s9745_s4  ;;  %v8796_v45 = vpop.eup %8795 }
 0x1a0   :  { %v8798_v47 = vpop.eup %8797 }
 0x1a1   :  { %681 = vrot.lane.b32.xlu0 %v8792_v2, %s9745_s4  ;;  %v8800_v60 = vpop.eup %8799  ;;  %v634_v2 = vsub.f32 1.0, %v10154_v41 }
 0x1a2   :  { %v8802_v25 = vpop.eup %8801 }
 0x1a3   :  { %689 = vrot.lane.b32.xlu1 %v8794_v14, %s9745_s4 }
 0x1a5   :  { %675 = vrot.lane.b32.xlu0 %v8796_v45, %s9745_s4  ;;  %v728_v45 = vmul.f32 0.0, %v10144_v36  ;;  %v732_v36 = vmul.f32 0.0, %v10161_v27 }
 0x1a7   :  { %691 = vrot.lane.b32.xlu1 %v8798_v47, %s9745_s4 }
 0x1a9   :  { %677 = vrot.lane.b32.xlu0 %v8800_v60, %s9745_s4 }
 0x1ab   :  { %693 = vrot.lane.b32.xlu1 %v8802_v25, %s9745_s4 }
 0x1fd   :  { %v664_v3 = vpop.permute.xlu0 %663 }
 0x1fe   :  { %v711_v49 = vmul.f32 %v664_v3, %v631_v1  ;;  %v668_v34 = vpop.permute.xlu1 %667  ;;  %v635_v3 = vsub.f32 1.0, %v10158_v51 }
 0x1ff   :  { %v713_v4 = vmul.f32 %v668_v34, %v633_v6  ;;  %v731_v6 = vmul.f32 0.0, %v10158_v51  ;;  %v636_v34 = vsub.f32 1.0, %v10161_v27 }
 0x200   :  { %v10300_v14 = vadd.f32 %v727_v37, %v711_v49 }
 0x201   :  { %v10297_v56 = vadd.f32 %v729_v5, %v713_v4  ;;  %v666_v33 = vpop.permute.xlu0 %665 }
 0x202   :  { %v712_v47 = vmul.f32 %v666_v33, %v632_v63  ;;  %v670_v60 = vpop.permute.xlu1 %669  ;;  %v759_v5 = vpack.c.bf16 %v10300_v14, %v10300_v14 }
 0x203   :  { %v761_v25 = vpack.c.bf16 %v10297_v56, %v10297_v56  ;;  %v714_v1 = vmul.f32 %v670_v60, %v634_v2  ;;  %v4459_v51 = vrot.slane %v10297_v56, 6 }
 0x204   :  { %v10306_v10 = vadd.f32 %v728_v45, %v712_v47  ;;  %v641_v47 = vsub.f32 1.0, %v10194_v46  ;;  %v791_v54 = vunpack.c.l.b16 %v759_v5  ;;  %v739_v46 = vmul.f32 0.0, %v10211_v8 }
 0x205   :  { %v10311_v49 = vadd.f32 %v730_v44, %v714_v1  ;;  %v793_v37 = vunpack.c.l.b16 %v761_v25  ;;  %v639_v1 = vsub.f32 1.0, %v10182_v24 }
 0x206   :  { %14867 = vst [vmem:[#allocation45_spill] sm:$0xff] %v10306_v10  ;;  %v760_v41 = vpack.c.bf16 %v10306_v10, %v10306_v10  ;;  %v14739_v4 = vrot.slane %v10306_v10, 7 }
 0x207   :  { %v762_v63 = vpack.c.bf16 %v10311_v49, %v10311_v49  ;;  %v4461_v33 = vrot.slane %v10311_v49, 5  ;;  %v680_v2 = vpop.permute.xlu0 %679  ;;  %v810_v42 = vrot.slane %v793_v37, 6  ;;  %v643_v37 = vsub.f32 1.0, %v10211_v8 }
 0x208   :  { %v792_v45 = vunpack.c.l.b16 %v760_v41  ;;  %v4458_v27 = vsel %vm808_vm1, %v14739_v4, %v10300_v14  ;;  %v719_v0 = vmul.f32 %v680_v2, %v639_v1 }
 0x209   :  { %v4460_v25 = vsel %vm811_vm2, %v4459_v51, %v4458_v27  ;;  %v794_v44 = vunpack.c.l.b16 %v762_v63  ;;  %v684_v11 = vpop.permute.xlu1 %683  ;;  %v735_v63 = vmul.f32 0.0, %v10182_v24  ;;  %v736_v24 = vmul.f32 0.0, %v10185_v28 }
 0x20a   :  { %v807_v41 = vrot.slane %v792_v45, 7  ;;  %v721_v43 = vmul.f32 %v684_v11, %v641_v47  ;;  %v4462_v10 = vsel %vm814_vm3, %v4461_v33, %v4460_v25  ;;  %v738_v11 = vmul.f32 0.0, %v10202_v59 }
 0x20b   :  { %v813_v4 = vrot.slane %v794_v44, 5  ;;  %v672_v60 = vpop.permute.xlu0 %671 }
 0x20c   :  { %v809_v51 = vsel %vm808_vm1, %v807_v41, %v791_v54  ;;  %v715_v27 = vmul.f32 %v672_v60, %v635_v3  ;;  %v10340_v5 = vadd.f32 %v737_v50, %v721_v43  ;;  %v640_v54 = vsub.f32 1.0, %v10185_v28 }
 0x20d   :  { %v812_v58 = vsel %vm811_vm2, %v810_v42, %v809_v51  ;;  %v686_v33 = vpop.permute.xlu1 %685  ;;  %v10349_v3 = vadd.f32 %v735_v63, %v719_v0  ;;  %v644_v28 = vsub.f32 1.0, %v10234_v39  ;;  %v10361_v0 = vmul.f32 0.0, %v10170_v12 }
 0x20e   :  { %v10344_v2 = vadd.f32 %v731_v6, %v715_v27  ;;  %v722_v45 = vmul.f32 %v686_v33, %v642_v35  ;;  %v815_v43 = vsel %vm814_vm3, %v813_v4, %v812_v58  ;;  %v769_v8 = vpack.c.bf16 %v10340_v5, %v10340_v5 }
 0x20f   :  { %v674_v47 = vpop.permute.xlu0 %673  ;;  %v740_v35 = vmul.f32 0.0, %v10234_v39  ;;  %v645_v41 = vsub.f32 1.0, %v10242_v48  ;;  %v741_v51 = vmul.f32 0.0, %v10242_v48  ;;  %v14870_v50 = vsub.f32 1.0, %v10166_v32 }
 0x210   :  { %v763_v59 = vpack.c.bf16 %v10344_v2, %v10344_v2  ;;  %v4463_v42 = vrot.slane %v10344_v2, 4  ;;  %v716_v6 = vmul.f32 %v674_v47, %v636_v34  ;;  %v10363_v58 = vadd.f32 %v738_v11, %v722_v45 }
 0x211   :  { %v688_v60 = vpop.permute.xlu1 %687  ;;  %v767_v34 = vpack.c.bf16 %v10349_v3, %v10349_v3  ;;  %v801_v11 = vunpack.c.l.b16 %v769_v8 }
 0x212   :  { %v795_v25 = vunpack.c.l.b16 %v763_v59  ;;  %v10365_v4 = vadd.f32 %v732_v36, %v716_v6  ;;  %v723_v44 = vmul.f32 %v688_v60, %v643_v37  ;;  %v4464_v63 = vsel %vm817_vm4, %v4463_v42, %v4462_v10 }
 0x213   :  { %v682_v1 = vpop.permute.xlu0 %681  ;;  %v646_v36 = vsub.f32 1.0, %v10248_v62  ;;  %v770_v59 = vpack.c.bf16 %v10363_v58, %v10363_v58  ;;  %v799_v6 = vunpack.c.l.b16 %v767_v34  ;;  %v830_v52 = vrot.slane %v801_v11, 6 }
 0x214   :  { %v816_v39 = vrot.slane %v795_v25, 4  ;;  %v764_v27 = vpack.c.bf16 %v10365_v4, %v10365_v4  ;;  %v10374_v33 = vadd.f32 %v739_v46, %v723_v44  ;;  %v4465_v37 = vrot.slane %v10365_v4, 3 }
 0x215   :  { %v720_v45 = vmul.f32 %v682_v1, %v640_v54  ;;  %v690_v47 = vpop.permute.xlu1 %689  ;;  %v742_v25 = vmul.f32 0.0, %v10248_v62  ;;  %v4472_v54 = vrot.slane %v10340_v5, 6 }
 0x216   :  { %14868 = vst [vmem:[#allocation46_spill] sm:$0xff] %v10374_v33  ;;  %v796_v48 = vunpack.c.l.b16 %v764_v27  ;;  %v771_v10 = vpack.c.bf16 %v10374_v33, %v10374_v33  ;;  %v724_v42 = vmul.f32 %v690_v47, %v644_v28  ;;  %v818_v8 = vsel %vm817_vm4, %v816_v39, %v815_v43 }
 0x217   :  { %v10382_v60 = vadd.f32 %v736_v24, %v720_v45  ;;  %v676_v46 = vpop.permute.xlu0 %675  ;;  %v4466_v62 = vsel %vm820_vm5, %v4465_v37, %v4464_v63  ;;  %v802_v45 = vunpack.c.l.b16 %v770_v59  ;;  %v4474_v63 = vrot.slane %v10363_v58, 5 }
 0x218   :  { %v819_v44 = vrot.slane %v796_v48, 3  ;;  %v10387_v1 = vadd.f32 %v740_v35, %v724_v42  ;;  %v717_v27 = vmul.f32 %v676_v46, %v14870_v50  ;;  %v803_v43 = vunpack.c.l.b16 %v771_v10 }
 0x219   :  { %14869 = vst [vmem:[#allocation47_spill] sm:$0xff] %v10382_v60  ;;  %v768_v28 = vpack.c.bf16 %v10382_v60, %v10382_v60  ;;  %v14750_v24 = vrot.slane %v10382_v60, 7  ;;  %v692_v34 = vpop.permute.xlu1 %691  ;;  %v4476_v37 = vrot.slane %v10374_v33, 4 }
 0x21a   :  { %v772_v39 = vpack.c.bf16 %v10387_v1, %v10387_v1  ;;  %v10398_v35 = vadd.f32 %v10332_v7, %v717_v27  ;;  %v725_v11 = vmul.f32 %v692_v34, %v645_v41  ;;  %v821_v48 = vsel %vm820_vm5, %v819_v44, %v818_v8 }
 0x21b   :  { %v800_v32 = vunpack.c.l.b16 %v768_v28  ;;  %v4471_v50 = vsel %vm808_vm1, %v14750_v24, %v10349_v3  ;;  %v678_v47 = vpop.permute.xlu0 %677  ;;  %v14871_v27 = vsub.f32 1.0, %v10170_v12  ;;  %v832_v34 = vrot.slane %v802_v45, 5 }
 0x21c   :  { %v4473_v59 = vsel %vm811_vm2, %v4472_v54, %v4471_v50  ;;  %v765_v7 = vpack.c.bf16 %v10398_v35, %v10398_v35  ;;  %v804_v42 = vunpack.c.l.b16 %v772_v39  ;;  %v10410_v46 = vadd.f32 %v741_v51, %v725_v11 }
 0x21d   :  { %v828_v10 = vrot.slane %v800_v32, 7  ;;  %v718_v41 = vmul.f32 %v678_v47, %v14871_v27  ;;  %v694_v28 = vpop.permute.xlu1 %693  ;;  %v834_v8 = vrot.slane %v803_v43, 4  ;;  %v4467_v33 = vrot.slane %v10398_v35, 2 }
 0x21e   :  { %v797_v44 = vunpack.c.l.b16 %v765_v7  ;;  %v726_v24 = vmul.f32 %v694_v28, %v646_v36  ;;  %v773_v54 = vpack.c.bf16 %v10410_v46, %v10410_v46  ;;  %v4478_v12 = vrot.slane %v10387_v1, 3 }
 0x21f   :  { %v829_v60 = vsel %vm808_vm1, %v828_v10, %v799_v6  ;;  %v10419_v32 = vadd.f32 %v10361_v0, %v718_v41  ;;  %v836_v43 = vrot.slane %v804_v42, 3  ;;  %v4480_v11 = vrot.slane %v10410_v46, 2 }
 0x220   :  { %v831_v51 = vsel %vm811_vm2, %v830_v52, %v829_v60  ;;  %v10423_v39 = vadd.f32 %v742_v25, %v726_v24  ;;  %v822_v45 = vrot.slane %v797_v44, 2  ;;  %v805_v50 = vunpack.c.l.b16 %v773_v54 }
 0x221   :  { %v766_v36 = vpack.c.bf16 %v10419_v32, %v10419_v32  ;;  %v833_v6 = vsel %vm814_vm3, %v832_v34, %v831_v51  ;;  %v4468_v7 = vsel %vm823_vm6, %v4467_v33, %v4466_v62  ;;  %v4469_v42 = vrot.slane %v10419_v32, 1 }
 0x222   :  { %v774_v0 = vpack.c.bf16 %v10423_v39, %v10423_v39  ;;  %v824_v47 = vsel %vm823_vm6, %v822_v45, %v821_v48  ;;  %v835_v52 = vsel %vm817_vm4, %v834_v8, %v833_v6  ;;  %v838_v24 = vrot.slane %v805_v50, 2  ;;  %v10459_v50 = vld [vmem:[#allocation2 + $0x10] ss:$8 sps:$4 sm:$0xff]   ;;  %v10465_v6 = vld [vmem:[#allocation2 + $0x20] ss:$8 sps:$4 sm:$0xff]  }
 0x223   :  { %v798_v60 = vunpack.c.l.b16 %v766_v36  ;;  %v837_v25 = vsel %vm820_vm5, %v836_v43, %v835_v52  ;;  %v4475_v27 = vsel %vm814_vm3, %v4474_v63, %v4473_v59  ;;  %v4482_v41 = vrot.slane %v10423_v39, 1  ;;  %v10456_v43 = vld [vmem:[#allocation2 + $0x14] ss:$8 sps:$4 sm:$0xff]   ;;  %v10462_v36 = vld [vmem:[#allocation2 + $0x24] ss:$8 sps:$4 sm:$0xff]  }
 0x224   :  { %v806_v10 = vunpack.c.l.b16 %v774_v0  ;;  %v839_v34 = vsel %vm823_vm6, %v838_v24, %v837_v25  ;;  %v4477_v48 = vsel %vm817_vm4, %v4476_v37, %v4475_v27  ;;  %v10441_v8 = vsel %vm826_vm7, %v4469_v42, %v4468_v7  ;;  %v10452_v37 = vld [vmem:[#allocation2] ss:$8 sps:$4 sm:$0xff]   ;;  %v10471_v0 = vld [vmem:[#allocation2 + $0x30] ss:$8 sps:$4 sm:$0xff]  }
 0x225   :  { %v825_v28 = vrot.slane %v798_v60, 1  ;;  %14872 = vst [vmem:[#allocation48_spill] sm:$0xff] %v10441_v8  ;;  %v4479_v54 = vsel %vm820_vm5, %v4478_v12, %v4477_v48  ;;  %v14874_v12 = vmov 0  }
 0x226   :  { %v840_v44 = vrot.slane %v806_v10, 1  ;;  %v4481_v62 = vsel %vm823_vm6, %v4480_v11, %v4479_v54  ;;  %v10468_v11 = vld [vmem:[#allocation2 + $0x34] ss:$8 sps:$4 sm:$0xff]  }
 0x227   :  { %v827_v33 = vsel %vm826_vm7, %v825_v28, %v824_v47  ;;  %v10448_v63 = vsel %vm826_vm7, %v4482_v41, %v4481_v62  ;;  %v10474_v47 = vld [vmem:[#allocation2 + $0x4] ss:$8 sps:$4 sm:$0xff]  }
 0x228   :  { %v841_v51 = vsel %vm826_vm7, %v840_v44, %v839_v34  ;;  %14873 = vst [vmem:[#allocation49_spill] sm:$0xff] %v10448_v63 }
 0x229   :  { %v842_v59 = vpack.c.b16 %v841_v51, %v827_v33 }
 0x22b   :  { %843 = vrot.lane.b32.xlu0 %v842_v59, %s9745_s4 }
 0x29d   :  { %v844_v45 = vpop.permute.xlu0 %843 }
 0x29e   :  { %8372 = vmatmul.mubr.msk.bf16.vlgmr.msra.gmra.mrb[36].mxu0 %vm14832_vm0, %v844_v45 }
 0x29f   :  { %2430 = vmatpush1.bf16.msra.mxu0 %v10452_v37  ;;  %2461 = vmatprep.mubr.bf16.mxu0 %v14874_v12 }
 0x2a0   :  { %2431 = vmatprep.subr.bf16.mxu0 %v10456_v43 }
 0x2a3   :  { %2432 = vmatpush1.bf16.msra.mxu0 %v10459_v50 }
 0x2a4   :  { %2433 = vmatprep.subr.bf16.mxu0 %v10462_v36 }
 0x2a7   :  { %2434 = vmatpush1.bf16.msra.mxu0 %v10465_v6 }
 0x2a8   :  { %2435 = vmatprep.subr.bf16.mxu0 %v10468_v11 }
 0x2ab   :  { %2436 = vmatpush1.bf16.msra.mxu0 %v10471_v0 }
 0x2ac   :  { %3483 = vmatprep.subr.bf16.mxu0 %v10474_v47 }
 0x371   :  { %v882_v52 = vpop.f32.mrb[36].mxu0 }
 0x372   :  { %v893_v60 = vrot.slane %v882_v52, 7  ;;  %v894_v25 = vrot.slane %v882_v52, 1  ;;  %v895_v24 = vrot.slane %v882_v52, 2  ;;  %v896_v7 = vrot.slane %v882_v52, 3  ;;  %v10477_v10 = vpop.f32.mrb[37].mxu0 }
 0x373   :  { %v897_v42 = vrot.slane %v882_v52, 4  ;;  %v898_v27 = vrot.slane %v882_v52, 5  ;;  %v899_v41 = vrot.slane %v882_v52, 6  ;;  %v924_v28 = vadd.f32 %v882_v52, %v10042_v16  ;;  %v10480_v34 = vpop.f32.mrb[38].mxu0 }
 0x374   :  { %v923_v48 = vadd.f32 %v893_v60, %v10039_v15  ;;  %v925_v44 = vadd.f32 %v894_v25, %v10045_v17  ;;  %v926_v54 = vadd.f32 %v895_v24, %v10048_v18  ;;  %v927_v33 = vadd.f32 %v896_v7, %v10051_v19  ;;  %v10486_v62 = vpop.f32.mrb[39].mxu0 }
 0x375   :  { %v928_v51 = vadd.f32 %v897_v42, %v10054_v20  ;;  %v929_v59 = vadd.f32 %v898_v27, %v10057_v21  ;;  %v8374_v45 = vmul.f32 -1.442695, %v924_v28  ;;  %v930_v63 = vadd.f32 %v899_v41, %v10060_v22 }
 0x376   :  { %v8373_v52 = vmul.f32 -1.442695, %v923_v48  ;;  %v8375_v8 = vmul.f32 -1.442695, %v925_v44  ;;  %v8376_v16 = vmul.f32 -1.442695, %v926_v54  ;;  %v932_v48 = vadd.f32 %v10480_v34, %v10077_v40 }
 0x377   :  { %8803 = vpow2.f32 %v8374_v45  ;;  %v8377_v60 = vmul.f32 -1.442695, %v927_v33  ;;  %v8378_v25 = vmul.f32 -1.442695, %v928_v51  ;;  %v900_v24 = vrot.slane %v10480_v34, 7 }
 0x378   :  { %8805 = vpow2.f32 %v8373_v52  ;;  %v901_v7 = vrot.slane %v10480_v34, 1  ;;  %v8379_v19 = vmul.f32 -1.442695, %v929_v59  ;;  %v902_v42 = vrot.slane %v10480_v34, 2 }
 0x379   :  { %8807 = vpow2.f32 %v8375_v8  ;;  %v903_v27 = vrot.slane %v10480_v34, 3  ;;  %v8380_v28 = vmul.f32 -1.442695, %v930_v63  ;;  %v931_v41 = vadd.f32 %v900_v24, %v10063_v23 }
 0x37a   :  { %8809 = vpow2.f32 %v8376_v16  ;;  %v933_v44 = vadd.f32 %v901_v7, %v10083_v55  ;;  %v934_v54 = vadd.f32 %v902_v42, %v10086_v57  ;;  %v8382_v51 = vmul.f32 -1.442695, %v932_v48  ;;  %v14877_v55 = vld [vmem:[#allocation35_spill] sm:$0xff] }
 0x37b   :  { %8811 = vpow2.f32 %v8377_v60  ;;  %v935_v8 = vadd.f32 %v903_v27, %v10093_v61  ;;  %v8381_v33 = vmul.f32 -1.442695, %v931_v41  ;;  %v904_v45 = vrot.slane %v10480_v34, 4 }
 0x37c   :  { %8813 = vpow2.f32 %v8378_v25  ;;  %v8383_v59 = vmul.f32 -1.442695, %v933_v44  ;;  %v8384_v16 = vmul.f32 -1.442695, %v934_v54  ;;  %v905_v60 = vrot.slane %v10480_v34, 5 }
 0x37d   :  { %8815 = vpow2.f32 %v8379_v19  ;;  %v8385_v63 = vmul.f32 -1.442695, %v935_v8  ;;  %v906_v25 = vrot.slane %v10480_v34, 6  ;;  %v936_v41 = vadd.f32 %v904_v45, %v10105_v53 }
 0x37e   :  { %8817 = vpow2.f32 %v8380_v28  ;;  %v937_v54 = vadd.f32 %v905_v60, %v10110_v26  ;;  %v1035_v60 = vadd.f32 %v10122_v13, %v10477_v10  ;;  %v1233_v10 = vrot.slane %v10344_v2, 7  ;;  %v14876_v26 = vld [vmem:[#allocation39_spill] sm:$0xff] }
 0x37f   :  { %8819 = vpow2.f32 %v8381_v33 }
 0x380   :  { %8821 = vpow2.f32 %v8382_v51  ;;  %v938_v51 = vadd.f32 %v906_v25, %v10114_v30  ;;  %v8387_v45 = vmul.f32 -1.442695, %v937_v54 }
 0x381   :  { %v8804_v52 = vpop.eup %8803  ;;  %8823 = vpow2.f32 %v8383_v59 }
 0x382   :  { %v8806_v24 = vpop.eup %8805  ;;  %v988_v7 = vadd.f32 1.0, %v8804_v52  ;;  %8825 = vpow2.f32 %v8384_v16  ;;  %v8386_v52 = vmul.f32 -1.442695, %v936_v41  ;;  %v1232_v41 = vrot.slane %v10311_v49, 7 }
 0x383   :  { %v8808_v19 = vpop.eup %8807  ;;  %v987_v42 = vadd.f32 1.0, %v8806_v24  ;;  %8827 = vpow2.f32 %v8385_v63 }
 0x384   :  { %v8810_v27 = vpop.eup %8809  ;;  %v989_v28 = vadd.f32 1.0, %v8808_v19  ;;  %8829 = vrcp.f32 %v988_v7 }
 0x385   :  { %v8812_v48 = vpop.eup %8811  ;;  %v990_v44 = vadd.f32 1.0, %v8810_v27  ;;  %8831 = vrcp.f32 %v987_v42  ;;  %v8388_v42 = vmul.f32 -1.442695, %v938_v51 }
 0x386   :  { %v8814_v8 = vpop.eup %8813  ;;  %v991_v33 = vadd.f32 1.0, %v8812_v48  ;;  %8833 = vrcp.f32 %v989_v28  ;;  %v1229_v28 = vrot.slane %v10300_v14, 7 }
 0x387   :  { %v8816_v34 = vpop.eup %8815  ;;  %v992_v59 = vadd.f32 1.0, %v8814_v8  ;;  %8835 = vrcp.f32 %v990_v44  ;;  %v1231_v8 = vrot.slane %v10297_v56, 7 }
 0x388   :  { %v8818_v16 = vpop.eup %8817  ;;  %v993_v63 = vadd.f32 1.0, %v8816_v34  ;;  %8837 = vrcp.f32 %v991_v33  ;;  %v10514_v34 = vadd.f32 %v10122_v13, %v10486_v62  ;;  %v1042_v62 = vrot.slane %v1035_v60, 3 }
 0x389   :  { %v8820_v24 = vpop.eup %8819  ;;  %v994_v7 = vadd.f32 1.0, %v8818_v16  ;;  %8839 = vrcp.f32 %v992_v59  ;;  %v1041_v59 = vrot.slane %v1035_v60, 2  ;;  %v1039_v16 = vrot.slane %v1035_v60, 7 }
 0x38a   :  { %v8822_v19 = vpop.eup %8821  ;;  %8841 = vrcp.f32 %v993_v63  ;;  %v995_v25 = vadd.f32 1.0, %v8820_v24 }
 0x38b   :  { %v8824_v27 = vpop.eup %8823  ;;  %8843 = vrcp.f32 %v994_v7  ;;  %v996_v44 = vadd.f32 1.0, %v8822_v19 }
 0x38c   :  { %v8826_v48 = vpop.eup %8825  ;;  %8845 = vpow2.f32 %v8386_v52  ;;  %v997_v54 = vadd.f32 1.0, %v8824_v27  ;;  %v1040_v52 = vrot.slane %v1035_v60, 1 }
 0x38d   :  { %v8828_v33 = vpop.eup %8827  ;;  %8847 = vpow2.f32 %v8387_v45  ;;  %v998_v14 = vadd.f32 1.0, %v8826_v48  ;;  %v1044_v48 = vrot.slane %v1035_v60, 5 }
 0x38e   :  { %v10517_v51 = vpop.eup %8829  ;;  %8849 = vpow2.f32 %v8388_v42  ;;  %v999_v49 = vadd.f32 1.0, %v8828_v33  ;;  %v1043_v42 = vrot.slane %v1035_v60, 4 }
 0x38f   :  { %v10519_v63 = vpop.eup %8831  ;;  %8851 = vrcp.f32 %v995_v25  ;;  %v1070_v56 = vmul.f32 %v10517_v51, %v1035_v60 }
 0x390   :  { %v10522_v24 = vpop.eup %8833  ;;  %8853 = vrcp.f32 %v996_v44  ;;  %v1069_v13 = vmul.f32 %v10519_v63, %v1039_v16  ;;  %v10526_v2 = vmul.f32 %v10519_v63, %v1229_v28  ;;  %v1045_v44 = vrot.slane %v1035_v60, 6 }
 0x391   :  { %v10528_v7 = vpop.eup %8835  ;;  %8855 = vrcp.f32 %v997_v54  ;;  %v1086_v45 = vadd.f32 %v1070_v56, %v10136_v31  ;;  %v1071_v19 = vmul.f32 %v10522_v24, %v1040_v52  ;;  %v10549_v60 = vmul.f32 %v10522_v24, %v1231_v8 }
 0x392   :  { %v10532_v27 = vpop.eup %8837  ;;  %8857 = vrcp.f32 %v998_v14  ;;  %v1072_v25 = vmul.f32 %v10528_v7, %v1041_v59  ;;  %v1085_v28 = vadd.f32 %v1069_v13, %v10132_v9  ;;  %v10540_v54 = vmul.f32 %v10528_v7, %v1232_v41 }
 0x393   :  { %v10535_v33 = vpop.eup %8839  ;;  %8859 = vrcp.f32 %v999_v49  ;;  %v1073_v16 = vmul.f32 %v10532_v27, %v1042_v62  ;;  %v10560_v62 = vmul.f32 %v10532_v27, %v1233_v10  ;;  %v1046_v8 = vrot.slane %v10514_v34, 7 }
 0x394   :  { %v10542_v56 = vpop.eup %8841  ;;  %8861 = vtanh.f32 %v1086_v45  ;;  %v1088_v52 = vadd.f32 %v1072_v25, %v10151_v38  ;;  %v10546_v14 = vmul.f32 %v10535_v33, %v1043_v42  ;;  %v1234_v45 = vrot.slane %v10365_v4, 7 }
 0x395   :  { %v10551_v59 = vpop.eup %8843  ;;  %v10554_v49 = vmul.f32 %v10542_v56, %v1044_v48  ;;  %v1237_v38 = vrot.slane %v10349_v3, 7  ;;  %v1235_v9 = vrot.slane %v10398_v35, 7  ;;  %v1047_v35 = vrot.slane %v10514_v34, 1 }
 0x396   :  { %v8846_v13 = vpop.eup %8845  ;;  %8863 = vtanh.f32 %v1088_v52  ;;  %v10557_v41 = vmul.f32 %v10551_v59, %v1045_v44  ;;  %v1087_v52 = vadd.f32 %v1071_v19, %v10142_v29  ;;  %v10568_v44 = vmul.f32 %v10535_v33, %v1234_v45 }
 0x397   :  { %v8848_v42 = vpop.eup %8847  ;;  %v1000_v25 = vadd.f32 1.0, %v8846_v13  ;;  %8865 = vtanh.f32 %v1085_v28  ;;  %v10573_v4 = vmul.f32 %v10542_v56, %v1235_v9  ;;  %v1239_v9 = vrot.slane %v10340_v5, 7 }
 0x398   :  { %v8850_v48 = vpop.eup %8849  ;;  %v1001_v31 = vadd.f32 1.0, %v8848_v42  ;;  %v1048_v42 = vrot.slane %v10514_v34, 2  ;;  %v1240_v5 = vrot.slane %v10363_v58, 7 }
 0x399   :  { %v10570_v10 = vpop.eup %8851  ;;  %v1002_v30 = vadd.f32 1.0, %v8850_v48  ;;  %8867 = vrcp.f32 %v1000_v25 }
 0x39a   :  { %v10575_v13 = vpop.eup %8853  ;;  %8869 = vrcp.f32 %v1001_v31  ;;  %v1077_v3 = vmul.f32 %v10570_v10, %v1046_v8  ;;  %v10580_v28 = vmul.f32 %v10570_v10, %v1237_v38  ;;  %v14875_v31 = vld [vmem:[#allocation33_spill] sm:$0xff]  ;;  %v1049_v38 = vrot.slane %v10514_v34, 3 }
 0x39b   :  { %v10582_v19 = vpop.eup %8855  ;;  %8871 = vrcp.f32 %v1002_v30  ;;  %v1078_v45 = vmul.f32 %v10575_v13, %v10514_v34 }
 0x39c   :  { %v10588_v25 = vpop.eup %8857  ;;  %v1093_v48 = vadd.f32 %v1077_v3, %v14875_v31  ;;  %8873 = vtanh.f32 %v1087_v52  ;;  %v1079_v8 = vmul.f32 %v10582_v19, %v1047_v35  ;;  %v10598_v61 = vmul.f32 %v10582_v19, %v1239_v9  ;;  %v14878_v35 = vld [vmem:[#allocation46_spill] sm:$0xff] }
 0x39d   :  { %v10593_v29 = vpop.eup %8859  ;;  %v1094_v30 = vadd.f32 %v1078_v45, %v14876_v26  ;;  %v1080_v53 = vmul.f32 %v10588_v25, %v1048_v42  ;;  %v1241_v31 = vrot.slane %v14878_v35, 7  ;;  %v10606_v40 = vmul.f32 %v10588_v25, %v1240_v5  ;;  %v14879_v9 = vld [vmem:[#allocation34_spill] sm:$0xff] }
 0x39e   :  { %v8862_v57 = vpop.eup %8861  ;;  %8875 = vtanh.f32 %v1093_v48  ;;  %v1095_v3 = vadd.f32 %v1079_v8, %v14877_v55  ;;  %v1081_v52 = vmul.f32 %v10593_v29, %v1049_v38  ;;  %v1236_v45 = vrot.slane %v10419_v32, 7 }
 0x39f   :  { %1151 = vrot.lane.b32.xlu1 %v8862_v57, %s9745_s4  ;;  %8877 = vtanh.f32 %v1094_v30  ;;  %v1089_v26 = vadd.f32 %v1073_v16, %v14879_v9  ;;  %v10611_v58 = vmul.f32 %v10593_v29, %v1241_v31  ;;  %v14880_v57 = vld [vmem:[#allocation36_spill] sm:$0xff]  ;;  %v1050_v5 = vrot.slane %v10514_v34, 4 }
 0x3a0   :  { %v8864_v42 = vpop.eup %8863  ;;  %v10615_v48 = vmul.f32 %v10551_v59, %v1236_v45  ;;  %8879 = vtanh.f32 %v1095_v3  ;;  %v1096_v38 = vadd.f32 %v1080_v53, %v14880_v57  ;;  %v1242_v32 = vrot.slane %v10387_v1, 7  ;;  %v14881_v53 = vld [vmem:[#allocation37_spill] sm:$0xff] }
 0x3a1   :  { %1155 = vrot.lane.b32.xlu0 %v8864_v42, %s9745_s4  ;;  %v8866_v8 = vpop.eup %8865  ;;  %v1051_v16 = vrot.slane %v10514_v34, 5  ;;  %v1052_v31 = vrot.slane %v10514_v34, 6  ;;  %v1243_v30 = vrot.slane %v10410_v46, 7  ;;  %v1244_v45 = vrot.slane %v10423_v39, 7  ;;  %v14882_v39 = vld [vmem:[#allocation38_spill] sm:$0xff] }
 0x3a2   :  { %8881 = vtanh.f32 %v1089_v26  ;;  %v1090_v3 = vadd.f32 %v10546_v14, %v14881_v53  ;;  %v1097_v9 = vadd.f32 %v1081_v52, %v14882_v39 }
 0x3a3   :  { %v10620_v35 = vpop.eup %8867  ;;  %1149 = vrot.lane.b32.xlu1 %v8866_v8, %s9745_s4  ;;  %8883 = vtanh.f32 %v1096_v38 }
 0x3a4   :  { %v10627_v42 = vpop.eup %8869  ;;  %v1082_v1 = vmul.f32 %v10620_v35, %v1050_v5  ;;  %v10633_v57 = vmul.f32 %v10620_v35, %v1242_v32  ;;  %8885 = vtanh.f32 %v1090_v3  ;;  %v14883_v32 = vld [vmem:[#allocation41_spill] sm:$0xff]  ;;  %v14886_v3 = vld [vmem:[#allocation42_spill] sm:$0xff] }
 0x3a5   :  { %v10635_v8 = vpop.eup %8871  ;;  %v1083_v55 = vmul.f32 %v10627_v42, %v1051_v16  ;;  %v10639_v34 = vmul.f32 %v10627_v42, %v1243_v30  ;;  %v1091_v53 = vadd.f32 %v10554_v49, %v14883_v32  ;;  %8887 = vtanh.f32 %v1097_v9  ;;  %v14884_v30 = vld [vmem:[#allocation40_spill] sm:$0xff] }
 0x3a6   :  { %v8874_v46 = vpop.eup %8873  ;;  %v1084_v26 = vmul.f32 %v10635_v8, %v1052_v31  ;;  %v10644_v14 = vmul.f32 %v10635_v8, %v1244_v45  ;;  %v1098_v38 = vadd.f32 %v1082_v1, %v14884_v30  ;;  %v14885_v31 = vld [vmem:[#allocation43_spill] sm:$0xff]  ;;  %v14887_v1 = vld [vmem:[#allocation44_spill] sm:$0xff] }
 0x3a7   :  { %1153 = vrot.lane.b32.xlu1 %v8874_v46, %s9745_s4  ;;  %8889 = vtanh.f32 %v1091_v53  ;;  %v1092_v45 = vadd.f32 %v10557_v41, %v14885_v31  ;;  %v1099_v39 = vadd.f32 %v1083_v55, %v14886_v3 }
 0x3a8   :  { %v8876_v5 = vpop.eup %8875  ;;  %8891 = vtanh.f32 %v1098_v38 }
 0x3a9   :  { %1165 = vrot.lane.b32.xlu0 %v8876_v5, %s9745_s4  ;;  %v8878_v16 = vpop.eup %8877  ;;  %8893 = vtanh.f32 %v1092_v45  ;;  %v1100_v5 = vadd.f32 %v1084_v26, %v14887_v1  ;;  %v1118_v26 = vsub.f32 1.0, %v10517_v51 }
 0x3aa   :  { %v8880_v52 = vpop.eup %8879  ;;  %8895 = vtanh.f32 %v1099_v39 }
 0x3ab   :  { %1167 = vrot.lane.b32.xlu1 %v8878_v16, %s9745_s4  ;;  %8897 = vtanh.f32 %v1100_v5 }
 0x3ac   :  { %v8882_v46 = vpop.eup %8881 }
 0x3ad   :  { %1169 = vrot.lane.b32.xlu0 %v8880_v52, %s9745_s4  ;;  %v8884_v49 = vpop.eup %8883 }
 0x3ae   :  { %v8886_v9 = vpop.eup %8885 }
 0x3af   :  { %1157 = vrot.lane.b32.xlu1 %v8882_v46, %s9745_s4  ;;  %v8888_v53 = vpop.eup %8887  ;;  %v1120_v46 = vsub.f32 1.0, %v10528_v7  ;;  %v1119_v7 = vsub.f32 1.0, %v10522_v24 }
 0x3b1   :  { %1171 = vrot.lane.b32.xlu0 %v8884_v49, %s9745_s4  ;;  %v8890_v41 = vpop.eup %8889 }
 0x3b2   :  { %v8892_v55 = vpop.eup %8891 }
 0x3b3   :  { %1159 = vrot.lane.b32.xlu1 %v8886_v9, %s9745_s4  ;;  %v8894_v16 = vpop.eup %8893  ;;  %v14888_v9 = vld [vmem:[#allocation45_spill] sm:$0xff] }
 0x3b4   :  { %v8896_v38 = vpop.eup %8895  ;;  %v14889_v5 = vrot.slane %v14888_v9, 7 }
 0x3b5   :  { %1173 = vrot.lane.b32.xlu0 %v8888_v53, %s9745_s4  ;;  %v8898_v39 = vpop.eup %8897 }
 0x3b6   :  { %v1262_v53 = vmul.f32 %v10517_v51, %v14889_v5 }
 0x3b7   :  { %1161 = vrot.lane.b32.xlu1 %v8890_v41, %s9745_s4 }
 0x3b9   :  { %1175 = vrot.lane.b32.xlu0 %v8892_v55, %s9745_s4  ;;  %v1117_v55 = vsub.f32 1.0, %v10519_v63 }
 0x3bb   :  { %1163 = vrot.lane.b32.xlu1 %v8894_v16, %s9745_s4 }
 0x3bd   :  { %1177 = vrot.lane.b32.xlu0 %v8896_v38, %s9745_s4 }
 0x3c1   :  { %1179 = vrot.lane.b32.xlu0 %v8898_v39, %s9745_s4 }
 0x411   :  { %v1152_v52 = vpop.permute.xlu1 %1151 }
 0x412   :  { %v1198_v45 = vmul.f32 %v1152_v52, %v1118_v26  ;;  %v1125_v26 = vsub.f32 1.0, %v10570_v10 }
 0x413   :  { %v1156_v49 = vpop.permute.xlu0 %1155 }
 0x414   :  { %v1200_v41 = vmul.f32 %v1156_v49, %v1120_v46  ;;  %v10672_v1 = vadd.f32 %v1262_v53, %v1198_v45  ;;  %v1126_v49 = vsub.f32 1.0, %v10575_v13  ;;  %v1127_v53 = vsub.f32 1.0, %v10582_v19 }
 0x415   :  { %v1150_v16 = vpop.permute.xlu1 %1149 }
 0x416   :  { %v10675_v38 = vadd.f32 %v10540_v54, %v1200_v41  ;;  %v1197_v39 = vmul.f32 %v1150_v16, %v1117_v55  ;;  %v1294_v51 = vpack.c.bf16 %v10672_v1, %v10672_v1  ;;  %v14890_v41 = vld [vmem:[#allocation47_spill] sm:$0xff] }
 0x417   :  { %v14891_v55 = vrot.slane %v14890_v41, 7 }
 0x418   :  { %v10678_v31 = vadd.f32 %v10526_v2, %v1197_v39  ;;  %v1296_v2 = vpack.c.bf16 %v10675_v38, %v10675_v38 }
 0x419   :  { %v1154_v52 = vpop.permute.xlu1 %1153  ;;  %v1270_v16 = vmul.f32 %v10575_v13, %v14891_v55 }
 0x41a   :  { %v1293_v63 = vpack.c.bf16 %v10678_v31, %v10678_v31  ;;  %v4542_v45 = vrot.slane %v10678_v31, 1  ;;  %v1199_v46 = vmul.f32 %v1154_v52, %v1119_v7  ;;  %v1121_v7 = vsub.f32 1.0, %v10532_v27 }
 0x41b   :  { %v1166_v54 = vpop.permute.xlu0 %1165  ;;  %v1326_v52 = vunpack.c.l.b16 %v1294_v51  ;;  %v1328_v13 = vunpack.c.l.b16 %v1296_v2 }
 0x41c   :  { %v1325_v9 = vunpack.c.l.b16 %v1293_v63  ;;  %v1205_v24 = vmul.f32 %v1166_v54, %v1125_v26  ;;  %v4543_v10 = vsel %vm808_vm1, %v10672_v1, %v4542_v45  ;;  %v10693_v5 = vadd.f32 %v10549_v60, %v1199_v46 }
 0x41d   :  { %v1168_v39 = vpop.permute.xlu1 %1167  ;;  %v4545_v45 = vrot.slane %v10675_v38, 6  ;;  %v1128_v54 = vsub.f32 1.0, %v10588_v25 }
 0x41e   :  { %v1341_v3 = vrot.slane %v1325_v9, 1  ;;  %v10701_v63 = vadd.f32 %v10580_v28, %v1205_v24  ;;  %v1206_v26 = vmul.f32 %v1168_v39, %v1126_v49  ;;  %v1295_v60 = vpack.c.bf16 %v10693_v5, %v10693_v5 }
 0x41f   :  { %v14780_v19 = vrot.slane %v10693_v5, 7  ;;  %v1170_v46 = vpop.permute.xlu0 %1169 }
 0x420   :  { %v1301_v27 = vpack.c.bf16 %v10701_v63, %v10701_v63  ;;  %v1342_v51 = vsel %vm808_vm1, %v1326_v52, %v1341_v3  ;;  %v1207_v9 = vmul.f32 %v1170_v46, %v1127_v53  ;;  %v4555_v28 = vrot.slane %v10701_v63, 1 }
 0x421   :  { %v1327_v49 = vunpack.c.l.b16 %v1295_v60  ;;  %v4544_v24 = vsel %vm811_vm2, %v14780_v19, %v4543_v10  ;;  %v10715_v41 = vadd.f32 %v1270_v16, %v1206_v26  ;;  %v1158_v55 = vpop.permute.xlu1 %1157  ;;  %v1345_v10 = vrot.slane %v1328_v13, 6 }
 0x422   :  { %v1333_v39 = vunpack.c.l.b16 %v1301_v27  ;;  %v10718_v25 = vadd.f32 %v10598_v61, %v1207_v9  ;;  %v1201_v2 = vmul.f32 %v1158_v55, %v1121_v7  ;;  %v10721_v32 = vsel %vm814_vm3, %v4545_v45, %v4544_v24 }
 0x423   :  { %v1343_v3 = vrot.slane %v1327_v49, 7  ;;  %v1302_v53 = vpack.c.bf16 %v10715_v41, %v10715_v41  ;;  %v4556_v52 = vsel %vm808_vm1, %v10715_v41, %v4555_v28  ;;  %v1172_v60 = vpop.permute.xlu0 %1171  ;;  %v1122_v61 = vsub.f32 1.0, %v10535_v33 }
 0x424   :  { %v1303_v16 = vpack.c.bf16 %v10718_v25, %v10718_v25  ;;  %v1208_v26 = vmul.f32 %v1172_v60, %v1128_v54  ;;  %v1355_v46 = vrot.slane %v1333_v39, 1  ;;  %v10732_v27 = vadd.f32 %v10560_v62, %v1201_v2 }
 0x425   :  { %v1344_v7 = vsel %vm811_vm2, %v1343_v3, %v1342_v51  ;;  %v1334_v45 = vunpack.c.l.b16 %v1302_v53  ;;  %v1160_v9 = vpop.permute.xlu1 %1159  ;;  %v1129_v13 = vsub.f32 1.0, %v10593_v29  ;;  %v1123_v3 = vsub.f32 1.0, %v10542_v56 }
 0x426   :  { %v1335_v49 = vunpack.c.l.b16 %v1303_v16  ;;  %v10735_v24 = vadd.f32 %v10606_v40, %v1208_v26  ;;  %v1202_v28 = vmul.f32 %v1160_v9, %v1122_v61  ;;  %v1297_v33 = vpack.c.bf16 %v10732_v27, %v10732_v27 }
 0x427   :  { %v1356_v55 = vsel %vm808_vm1, %v1334_v45, %v1355_v46  ;;  %v1174_v54 = vpop.permute.xlu0 %1173  ;;  %v1346_v51 = vsel %vm814_vm3, %v1345_v10, %v1344_v7  ;;  %v1130_v29 = vsub.f32 1.0, %v10620_v35  ;;  %v1131_v56 = vsub.f32 1.0, %v10627_v42 }
 0x428   :  { %v1357_v39 = vrot.slane %v1335_v49, 7  ;;  %v1304_v62 = vpack.c.bf16 %v10735_v24, %v10735_v24  ;;  %v1209_v2 = vmul.f32 %v1174_v54, %v1129_v13  ;;  %v1329_v40 = vunpack.c.l.b16 %v1297_v33 }
 0x429   :  { %v10746_v53 = vadd.f32 %v10568_v44, %v1202_v28  ;;  %v1162_v60 = vpop.permute.xlu1 %1161  ;;  %v1124_v44 = vsub.f32 1.0, %v10551_v59  ;;  %v14779_v9 = vrot.slane %v10718_v25, 7  ;;  %v4547_v13 = vrot.slane %v10732_v27, 5 }
 0x42a   :  { %v1336_v16 = vunpack.c.l.b16 %v1304_v62  ;;  %v10750_v26 = vadd.f32 %v10611_v58, %v1209_v2  ;;  %v1203_v61 = vmul.f32 %v1162_v60, %v1123_v3  ;;  %v1358_v10 = vsel %vm811_vm2, %v1357_v39, %v1356_v55 }
 0x42b   :  { %v1347_v46 = vrot.slane %v1329_v40, 5  ;;  %v1298_v7 = vpack.c.bf16 %v10746_v53, %v10746_v53  ;;  %v1176_v45 = vpop.permute.xlu0 %1175  ;;  %v4549_v3 = vrot.slane %v10746_v53, 4 }
 0x42c   :  { %v1359_v35 = vrot.slane %v1336_v16, 6  ;;  %v1305_v49 = vpack.c.bf16 %v10750_v26, %v10750_v26  ;;  %v1210_v58 = vmul.f32 %v1176_v45, %v1130_v29  ;;  %v10762_v55 = vadd.f32 %v10573_v4, %v1203_v61 }
 0x42d   :  { %v1330_v28 = vunpack.c.l.b16 %v1298_v7  ;;  %v1164_v33 = vpop.permute.xlu1 %1163  ;;  %v1348_v54 = vsel %vm817_vm4, %v1347_v46, %v1346_v51  ;;  %v1132_v4 = vsub.f32 1.0, %v10635_v8  ;;  %v4557_v51 = vsel %vm811_vm2, %v14779_v9, %v4556_v52 }
 0x42e   :  { %v1337_v39 = vunpack.c.l.b16 %v1305_v49  ;;  %v10766_v42 = vadd.f32 %v10633_v57, %v1210_v58  ;;  %v1204_v59 = vmul.f32 %v1164_v33, %v1124_v44  ;;  %v1360_v62 = vsel %vm814_vm3, %v1359_v35, %v1358_v10 }
 0x42f   :  { %v1349_v2 = vrot.slane %v1330_v28, 4  ;;  %v1299_v40 = vpack.c.bf16 %v10762_v55, %v10762_v55  ;;  %v1178_v29 = vpop.permute.xlu0 %1177  ;;  %v4551_v10 = vrot.slane %v10762_v55, 3  ;;  %v4548_v52 = vsel %vm817_vm4, %v4547_v13, %v10721_v32 }
 0x430   :  { %v1361_v60 = vrot.slane %v1337_v39, 5  ;;  %v1306_v57 = vpack.c.bf16 %v10766_v42, %v10766_v42  ;;  %v1211_v16 = vmul.f32 %v1178_v29, %v1131_v56  ;;  %v10780_v46 = vadd.f32 %v10615_v48, %v1204_v59 }
 0x431   :  { %v1331_v61 = vunpack.c.l.b16 %v1299_v40  ;;  %v1350_v7 = vsel %vm820_vm5, %v1349_v2, %v1348_v54  ;;  %v4558_v35 = vrot.slane %v10735_v24, 6  ;;  %v4550_v48 = vsel %vm820_vm5, %v4549_v3, %v4548_v52 }
 0x432   :  { %v1338_v45 = vunpack.c.l.b16 %v1306_v57  ;;  %v10784_v8 = vadd.f32 %v10639_v34, %v1211_v16  ;;  %v1362_v44 = vsel %vm817_vm4, %v1361_v60, %v1360_v62  ;;  %v1300_v49 = vpack.c.bf16 %v10780_v46, %v10780_v46 }
 0x433   :  { %v1180_v56 = vpop.permute.xlu0 %1179  ;;  %v1351_v58 = vrot.slane %v1331_v61, 3  ;;  %v4560_v28 = vrot.slane %v10750_v26, 5  ;;  %v4562_v39 = vrot.slane %v10766_v42, 4  ;;  %v4552_v13 = vsel %vm823_vm6, %v4551_v10, %v4550_v48 }
 0x434   :  { %v1363_v33 = vrot.slane %v1338_v45, 4  ;;  %v1307_v34 = vpack.c.bf16 %v10784_v8, %v10784_v8  ;;  %v1212_v54 = vmul.f32 %v1180_v56, %v1132_v4  ;;  %v1332_v59 = vunpack.c.l.b16 %v1300_v49 }
 0x435   :  { %v1352_v32 = vsel %vm823_vm6, %v1351_v58, %v1350_v7  ;;  %v4553_v40 = vrot.slane %v10780_v46, 2  ;;  %v4564_v29 = vrot.slane %v10784_v8, 3  ;;  %v4559_v4 = vsel %vm814_vm3, %v4558_v35, %v4557_v51 }
 0x436   :  { %v1339_v62 = vunpack.c.l.b16 %v1307_v34  ;;  %v10800_v2 = vadd.f32 %v10644_v14, %v1212_v54  ;;  %v1364_v3 = vsel %vm820_vm5, %v1363_v33, %v1362_v44  ;;  %v1353_v60 = vrot.slane %v1332_v59, 2 }
 0x437   :  { %v10809_v61 = vsel %vm826_vm7, %v4553_v40, %v4552_v13  ;;  %v4561_v14 = vsel %vm817_vm4, %v4560_v28, %v4559_v4  ;;  %v14895_v13 = vld [vmem:[#allocation16_spill] sm:$0xff] }
 0x438   :  { %v1308_v57 = vpack.c.bf16 %v10800_v2, %v10800_v2  ;;  %v1365_v16 = vrot.slane %v1339_v62, 3  ;;  %14892 = vst [vmem:[#allocation46_spill] sm:$0xff] %v10809_v61  ;;  %v1354_v10 = vsel %vm826_vm7, %v1353_v60, %v1352_v32  ;;  %v4566_v7 = vrot.slane %v10800_v2, 2 }
 0x439   :  { %v4563_v52 = vsel %vm820_vm5, %v4562_v39, %v4561_v14 }
 0x43a   :  { %v1340_v45 = vunpack.c.l.b16 %v1308_v57  ;;  %v1366_v44 = vsel %vm823_vm6, %v1365_v16, %v1364_v3  ;;  %v4565_v51 = vsel %vm823_vm6, %v4564_v29, %v4563_v52 }
 0x43b   :  { %v10818_v56 = vsel %vm826_vm7, %v4566_v7, %v4565_v51 }
 0x43c   :  { %v1367_v35 = vrot.slane %v1340_v45, 2  ;;  %14893 = vst [vmem:[#allocation40_spill] sm:$0xff] %v10818_v56  ;;  %v14907_v56 = vld [vmem:[#allocation34_spill] sm:$0xff] }
 0x43e   :  { %v1368_v49 = vsel %vm826_vm7, %v1367_v35, %v1366_v44 }
 0x43f   :  { %v1369_v58 = vpack.c.b16 %v1368_v49, %v1354_v10 }
 0x441   :  { %1370 = vrot.lane.b32.xlu1 %v1369_v58, %s9745_s4 }
 0x4b3   :  { %v1371_v48 = vpop.permute.xlu1 %1370 }
 0x4b4   :  { %8389 = vmatmul.mubr.msk.bf16.vlgmr.msra.gmra.mrb[0].mxu1 %vm14832_vm0, %v1371_v48  ;;  %v14896_v48 = vld [vmem:[#allocation21_spill] sm:$0xff] }
 0x4b5   :  { %1903 = vmatpush1.bf16.msra.mxu1 %v10452_v37  ;;  %1934 = vmatprep.mubr.bf16.mxu1 %v14874_v12 }
 0x4b6   :  { %1904 = vmatprep.subr.bf16.mxu1 %v10456_v43 }
 0x4b9   :  { %1905 = vmatpush1.bf16.msra.mxu1 %v10459_v50 }
 0x4ba   :  { %1906 = vmatprep.subr.bf16.mxu1 %v10462_v36 }
 0x4bd   :  { %1907 = vmatpush1.bf16.msra.mxu1 %v10465_v6 }
 0x4be   :  { %1908 = vmatprep.subr.bf16.mxu1 %v10468_v11  ;;  %v14894_v11 = vld [vmem:[#allocation14_spill] sm:$0xff] }
 0x4c1   :  { %1909 = vmatpush1.bf16.msra.mxu1 %v10471_v0 }
 0x4c2   :  { %2956 = vmatprep.subr.bf16.mxu1 %v10474_v47 }
 0x587   :  { %v1409_v28 = vpop.f32.mrb[0].mxu1 }
 0x588   :  { %v1420_v33 = vrot.slane %v1409_v28, 6  ;;  %v1421_v34 = vrot.slane %v1409_v28, 7  ;;  %v1422_v37 = vrot.slane %v1409_v28, 1  ;;  %v1423_v54 = vrot.slane %v1409_v28, 2  ;;  %v10832_v39 = vpop.f32.mrb[1].mxu1 }
 0x589   :  { %v1424_v43 = vrot.slane %v1409_v28, 3  ;;  %v1425_v59 = vrot.slane %v1409_v28, 4  ;;  %v1426_v50 = vrot.slane %v1409_v28, 5  ;;  %v1452_v36 = vadd.f32 %v1409_v28, %v10045_v17  ;;  %v10835_v32 = vpop.f32.mrb[2].mxu1 }
 0x58a   :  { %v1450_v6 = vadd.f32 %v1420_v33, %v10039_v15  ;;  %v1451_v0 = vadd.f32 %v1421_v34, %v14894_v11  ;;  %v1453_v47 = vadd.f32 %v1422_v37, %v10048_v18  ;;  %v1454_v62 = vadd.f32 %v1423_v54, %v14895_v13  ;;  %v10841_v3 = vpop.f32.mrb[3].mxu1  ;;  %v14897_v33 = vld [vmem:[#allocation22_spill] sm:$0xff]  ;;  %v14898_v37 = vld [vmem:[#allocation23_spill] sm:$0xff] }
 0x58b   :  { %v1455_v40 = vadd.f32 %v1424_v43, %v10054_v20  ;;  %v1456_v29 = vadd.f32 %v1425_v59, %v10057_v21  ;;  %v8392_v60 = vmul.f32 -1.442695, %v1452_v36  ;;  %v1457_v4 = vadd.f32 %v1426_v50, %v10060_v22  ;;  %v14899_v43 = vld [vmem:[#allocation24_spill] sm:$0xff] }
 0x58c   :  { %v8390_v57 = vmul.f32 -1.442695, %v1450_v6  ;;  %v8391_v16 = vmul.f32 -1.442695, %v1451_v0  ;;  %v8393_v10 = vmul.f32 -1.442695, %v1453_v47  ;;  %v1460_v34 = vadd.f32 %v10835_v32, %v14897_v33 }
 0x58d   :  { %8899 = vpow2.f32 %v8392_v60  ;;  %v8394_v14 = vmul.f32 -1.442695, %v1454_v62  ;;  %v8395_v7 = vmul.f32 -1.442695, %v1455_v40  ;;  %v1427_v45 = vrot.slane %v10835_v32, 6 }
 0x58e   :  { %8901 = vpow2.f32 %v8390_v57  ;;  %v1428_v44 = vrot.slane %v10835_v32, 7  ;;  %v8396_v52 = vmul.f32 -1.442695, %v1456_v29  ;;  %v1429_v51 = vrot.slane %v10835_v32, 1 }
 0x58f   :  { %8903 = vpow2.f32 %v8391_v16  ;;  %v1430_v35 = vrot.slane %v10835_v32, 2  ;;  %v8397_v49 = vmul.f32 -1.442695, %v1457_v4  ;;  %v1458_v58 = vadd.f32 %v1427_v45, %v10063_v23  ;;  %v14900_v45 = vld [vmem:[#allocation25_spill] sm:$0xff] }
 0x590   :  { %8905 = vpow2.f32 %v8393_v10  ;;  %v1459_v28 = vadd.f32 %v1428_v44, %v14896_v48  ;;  %v1461_v54 = vadd.f32 %v1429_v51, %v14898_v37  ;;  %v8400_v6 = vmul.f32 -1.442695, %v1460_v34  ;;  %v14902_v34 = vld [vmem:[#allocation27_spill] sm:$0xff] }
 0x591   :  { %8907 = vpow2.f32 %v8394_v14  ;;  %v1462_v59 = vadd.f32 %v1430_v35, %v14899_v43  ;;  %v8398_v50 = vmul.f32 -1.442695, %v1458_v58  ;;  %v1431_v62 = vrot.slane %v10835_v32, 3  ;;  %v14901_v35 = vld [vmem:[#allocation26_spill] sm:$0xff] }
 0x592   :  { %8909 = vpow2.f32 %v8395_v7  ;;  %v8399_v36 = vmul.f32 -1.442695, %v1459_v28  ;;  %v8401_v0 = vmul.f32 -1.442695, %v1461_v54  ;;  %v1432_v29 = vrot.slane %v10835_v32, 4 }
 0x593   :  { %8911 = vpow2.f32 %v8396_v52  ;;  %v8402_v47 = vmul.f32 -1.442695, %v1462_v59  ;;  %v1433_v57 = vrot.slane %v10835_v32, 5  ;;  %v1463_v44 = vadd.f32 %v1431_v62, %v14900_v45  ;;  %v14911_v45 = vld [vmem:[#allocation36_spill] sm:$0xff] }
 0x594   :  { %8913 = vpow2.f32 %v8397_v49  ;;  %v1464_v49 = vadd.f32 %v1432_v29, %v14901_v35 }
 0x595   :  { %8915 = vpow2.f32 %v8398_v50  ;;  %v1465_v54 = vadd.f32 %v1433_v57, %v14902_v34 }
 0x596   :  { %8917 = vpow2.f32 %v8399_v36  ;;  %v8404_v62 = vmul.f32 -1.442695, %v1464_v49 }
 0x597   :  { %v8900_v40 = vpop.eup %8899  ;;  %8919 = vpow2.f32 %v8400_v6  ;;  %v8403_v6 = vmul.f32 -1.442695, %v1463_v44  ;;  %v1756_v44 = vrot.slane %v10678_v31, 7 }
 0x598   :  { %v8902_v60 = vpop.eup %8901  ;;  %v1516_v4 = vadd.f32 1.0, %v8900_v40  ;;  %8921 = vpow2.f32 %v8401_v0 }
 0x599   :  { %v8904_v16 = vpop.eup %8903  ;;  %v1514_v10 = vadd.f32 1.0, %v8902_v60  ;;  %8923 = vpow2.f32 %v8402_v47  ;;  %v10862_v60 = vld [vmem:[#allocation5] ss:$0 sm:$0xff] }
 0x59a   :  { %v8906_v14 = vpop.eup %8905  ;;  %v1515_v7 = vadd.f32 1.0, %v8904_v16  ;;  %8925 = vrcp.f32 %v1516_v4  ;;  %14903 = vst [vmem:[#allocation45_spill] sm:$0xff] %v10862_v60  ;;  %v1562_v29 = vadd.f32 %v10862_v60, %v10832_v39  ;;  %v8405_v4 = vmul.f32 -1.442695, %v1465_v54 }
 0x59b   :  { %v8908_v52 = vpop.eup %8907  ;;  %v1517_v51 = vadd.f32 1.0, %v8906_v14  ;;  %8927 = vrcp.f32 %v1514_v10  ;;  %v1757_v10 = vrot.slane %v10672_v1, 7  ;;  %v1760_v39 = vrot.slane %v10732_v27, 7 }
 0x59c   :  { %v8910_v58 = vpop.eup %8909  ;;  %v1518_v28 = vadd.f32 1.0, %v8908_v52  ;;  %8929 = vrcp.f32 %v1515_v7  ;;  %v1759_v52 = vrot.slane %v10675_v38, 7  ;;  %v1567_v54 = vrot.slane %v1562_v29, 7 }
 0x59d   :  { %v8912_v32 = vpop.eup %8911  ;;  %v1519_v59 = vadd.f32 1.0, %v8910_v58  ;;  %8931 = vrcp.f32 %v1517_v51  ;;  %v10871_v58 = vadd.f32 %v10862_v60, %v10841_v3  ;;  %v1572_v19 = vrot.slane %v1562_v29, 5  ;;  %v14910_v60 = vld [vmem:[#allocation35_spill] sm:$0xff] }
 0x59e   :  { %v8914_v50 = vpop.eup %8913  ;;  %v1520_v36 = vadd.f32 1.0, %v8912_v32  ;;  %8933 = vrcp.f32 %v1518_v28  ;;  %v1566_v32 = vrot.slane %v1562_v29, 6 }
 0x59f   :  { %v8916_v0 = vpop.eup %8915  ;;  %v1521_v47 = vadd.f32 1.0, %v8914_v50  ;;  %8935 = vrcp.f32 %v1519_v59  ;;  %v1569_v50 = vrot.slane %v1562_v29, 2 }
 0x5a0   :  { %v8918_v40 = vpop.eup %8917  ;;  %8937 = vrcp.f32 %v1520_v36  ;;  %v1522_v16 = vadd.f32 1.0, %v8916_v0 }
 0x5a1   :  { %v8920_v57 = vpop.eup %8919  ;;  %8939 = vrcp.f32 %v1521_v47  ;;  %v1523_v7 = vadd.f32 1.0, %v8918_v40  ;;  %v14904_v47 = vld [vmem:[#allocation31_spill] sm:$0xff] }
 0x5a2   :  { %v8922_v14 = vpop.eup %8921  ;;  %8941 = vpow2.f32 %v8403_v6  ;;  %v1524_v49 = vadd.f32 1.0, %v8920_v57  ;;  %v1568_v6 = vrot.slane %v1562_v29, 1 }
 0x5a3   :  { %v8924_v51 = vpop.eup %8923  ;;  %8943 = vpow2.f32 %v8404_v62  ;;  %v1525_v1 = vadd.f32 1.0, %v8922_v14  ;;  %v1571_v14 = vrot.slane %v1562_v29, 4 }
 0x5a4   :  { %v10874_v28 = vpop.eup %8925  ;;  %8945 = vpow2.f32 %v8405_v4  ;;  %v1526_v31 = vadd.f32 1.0, %v8924_v51  ;;  %v1570_v4 = vrot.slane %v1562_v29, 3 }
 0x5a5   :  { %v10876_v59 = vpop.eup %8927  ;;  %8947 = vrcp.f32 %v1522_v16  ;;  %v1598_v38 = vmul.f32 %v10874_v28, %v1562_v29  ;;  %v1765_v29 = vrot.slane %v10715_v41, 7 }
 0x5a6   :  { %v10879_v36 = vpop.eup %8929  ;;  %8949 = vrcp.f32 %v1523_v7  ;;  %v1596_v3 = vmul.f32 %v10876_v59, %v1566_v32  ;;  %v10883_v27 = vmul.f32 %v10876_v59, %v1756_v44  ;;  %v14905_v44 = vld [vmem:[#allocation30_spill] sm:$0xff] }
 0x5a7   :  { %v10885_v0 = vpop.eup %8931  ;;  %8951 = vrcp.f32 %v1524_v49  ;;  %v1614_v62 = vadd.f32 %v1598_v38, %v14904_v47  ;;  %v1597_v40 = vmul.f32 %v10879_v36, %v1567_v54  ;;  %v10893_v7 = vmul.f32 %v10879_v36, %v1757_v10  ;;  %v14906_v49 = vld [vmem:[#allocation29_spill] sm:$0xff]  ;;  %v14908_v47 = vld [vmem:[#allocation32_spill] sm:$0xff] }
 0x5a8   :  { %v10889_v57 = vpop.eup %8933  ;;  %8953 = vrcp.f32 %v1525_v1  ;;  %v1599_v16 = vmul.f32 %v10885_v0, %v1568_v6  ;;  %v1612_v9 = vadd.f32 %v1596_v3, %v14906_v49  ;;  %v1764_v3 = vrot.slane %v10701_v63, 7 }
 0x5a9   :  { %v10895_v51 = vpop.eup %8935  ;;  %8955 = vrcp.f32 %v1526_v31  ;;  %v1613_v32 = vadd.f32 %v1597_v40, %v14905_v44  ;;  %v1600_v38 = vmul.f32 %v10889_v57, %v1569_v50  ;;  %v10904_v6 = vmul.f32 %v10889_v57, %v1760_v39 }
 0x5aa   :  { %v10900_v54 = vpop.eup %8937  ;;  %8957 = vtanh.f32 %v1614_v62  ;;  %v1601_v1 = vmul.f32 %v10895_v51, %v1570_v4  ;;  %v10917_v62 = vmul.f32 %v10885_v0, %v1759_v52  ;;  %v1761_v39 = vrot.slane %v10746_v53, 7 }
 0x5ab   :  { %v10906_v10 = vpop.eup %8939  ;;  %8959 = vtanh.f32 %v1613_v32  ;;  %v1616_v31 = vadd.f32 %v1600_v38, %v14907_v56  ;;  %v10910_v40 = vmul.f32 %v10900_v54, %v1571_v14  ;;  %v1573_v38 = vrot.slane %v10871_v58, 6 }
 0x5ac   :  { %v8942_v50 = vpop.eup %8941  ;;  %v10914_v61 = vmul.f32 %v10906_v10, %v1572_v19  ;;  %8961 = vtanh.f32 %v1612_v9  ;;  %v1762_v14 = vrot.slane %v10762_v55, 7  ;;  %v1615_v19 = vadd.f32 %v1599_v16, %v14908_v47 }
 0x5ad   :  { %v8944_v4 = vpop.eup %8943  ;;  %v1527_v32 = vadd.f32 1.0, %v8942_v50  ;;  %8963 = vtanh.f32 %v1616_v31  ;;  %v10925_v49 = vmul.f32 %v10895_v51, %v1761_v39  ;;  %v1574_v53 = vrot.slane %v10871_v58, 7 }
 0x5ae   :  { %v8946_v56 = vpop.eup %8945  ;;  %v1528_v63 = vadd.f32 1.0, %v8944_v4  ;;  %v10931_v9 = vmul.f32 %v10900_v54, %v1762_v14 }
 0x5af   :  { %v10927_v52 = vpop.eup %8947  ;;  %v1529_v41 = vadd.f32 1.0, %v8946_v56  ;;  %8965 = vrcp.f32 %v1527_v32  ;;  %v1575_v56 = vrot.slane %v10871_v58, 1 }
 0x5b0   :  { %v10933_v50 = vpop.eup %8949  ;;  %8967 = vrcp.f32 %v1528_v63  ;;  %v1604_v55 = vmul.f32 %v10927_v52, %v1573_v38  ;;  %v10937_v31 = vmul.f32 %v10927_v52, %v1764_v3  ;;  %v1576_v38 = vrot.slane %v10871_v58, 2  ;;  %v14909_v63 = vld [vmem:[#allocation39_spill] sm:$0xff] }
 0x5b1   :  { %v10939_v16 = vpop.eup %8951  ;;  %8969 = vrcp.f32 %v1529_v41  ;;  %v1605_v39 = vmul.f32 %v10933_v50, %v1574_v53  ;;  %v10944_v4 = vmul.f32 %v10933_v50, %v1765_v29  ;;  %v1767_v53 = vrot.slane %v10735_v24, 7  ;;  %v14912_v24 = vld [vmem:[#allocation37_spill] sm:$0xff] }
 0x5b2   :  { %v10946_v32 = vpop.eup %8953  ;;  %8971 = vtanh.f32 %v1615_v19  ;;  %v1606_v14 = vmul.f32 %v10939_v16, %v10871_v58  ;;  %v1768_v19 = vrot.slane %v10750_v26, 7 }
 0x5b3   :  { %v10951_v3 = vpop.eup %8955  ;;  %v1621_v44 = vadd.f32 %v1605_v39, %v14909_v63  ;;  %v1607_v41 = vmul.f32 %v10946_v32, %v1575_v56  ;;  %v10962_v37 = vmul.f32 %v10946_v32, %v1767_v53  ;;  %v1763_v39 = vrot.slane %v10780_v46, 7 }
 0x5b4   :  { %v8958_v47 = vpop.eup %8957  ;;  %v1622_v29 = vadd.f32 %v1606_v14, %v14910_v60  ;;  %v1608_v34 = vmul.f32 %v10951_v3, %v1576_v38  ;;  %v1617_v56 = vadd.f32 %v1601_v1, %v14912_v24  ;;  %v10968_v14 = vmul.f32 %v10951_v3, %v1768_v19  ;;  %v14913_v1 = vld [vmem:[#allocation38_spill] sm:$0xff] }
 0x5b5   :  { %v8960_v35 = vpop.eup %8959  ;;  %1680 = vrot.lane.b32.xlu0 %v8958_v47, %s9745_s4  ;;  %8973 = vtanh.f32 %v1621_v44  ;;  %v1623_v43 = vadd.f32 %v1607_v41, %v14911_v45  ;;  %v10971_v38 = vmul.f32 %v10906_v10, %v1763_v39  ;;  %v1577_v44 = vrot.slane %v10871_v58, 3 }
 0x5b6   :  { %1678 = vrot.lane.b32.xlu1 %v8960_v35, %s9745_s4  ;;  %8975 = vtanh.f32 %v1622_v29  ;;  %v8962_v26 = vpop.eup %8961  ;;  %v1769_v41 = vrot.slane %v10766_v42, 7  ;;  %v1770_v53 = vrot.slane %v10784_v8, 7  ;;  %v1771_v46 = vrot.slane %v10800_v2, 7  ;;  %v14914_v42 = vld [vmem:[#allocation33_spill] sm:$0xff] }
 0x5b7   :  { %v8964_v47 = vpop.eup %8963  ;;  %8977 = vtanh.f32 %v1623_v43  ;;  %v1624_v29 = vadd.f32 %v1608_v34, %v14913_v1  ;;  %v1578_v19 = vrot.slane %v10871_v58, 4  ;;  %v1579_v39 = vrot.slane %v10871_v58, 5 }
 0x5b8   :  { %8979 = vtanh.f32 %v1617_v56  ;;  %v1620_v8 = vadd.f32 %v1604_v55, %v14914_v42  ;;  %v14915_v56 = vld [vmem:[#allocation41_spill] sm:$0xff] }
 0x5b9   :  { %v10977_v35 = vpop.eup %8965  ;;  %1676 = vrot.lane.b32.xlu0 %v8962_v26, %s9745_s4  ;;  %8981 = vtanh.f32 %v1624_v29 }
 0x5ba   :  { %v10983_v45 = vpop.eup %8967  ;;  %1684 = vrot.lane.b32.xlu1 %v8964_v47, %s9745_s4  ;;  %v1609_v2 = vmul.f32 %v10977_v35, %v1577_v44  ;;  %v10989_v60 = vmul.f32 %v10977_v35, %v1769_v41  ;;  %8983 = vtanh.f32 %v1620_v8  ;;  %v1618_v44 = vadd.f32 %v10910_v40, %v14915_v56  ;;  %v14918_v40 = vld [vmem:[#allocation44_spill] sm:$0xff] }
 0x5bb   :  { %v10991_v26 = vpop.eup %8969  ;;  %v1610_v43 = vmul.f32 %v10983_v45, %v1578_v19  ;;  %v10995_v34 = vmul.f32 %v10983_v45, %v1770_v53  ;;  %v14916_v53 = vld [vmem:[#allocation42_spill] sm:$0xff] }
 0x5bc   :  { %v8972_v58 = vpop.eup %8971  ;;  %v1611_v1 = vmul.f32 %v10991_v26, %v1579_v39  ;;  %v10999_v47 = vmul.f32 %v10991_v26, %v1771_v46  ;;  %v1625_v55 = vadd.f32 %v1609_v2, %v14884_v30  ;;  %v14917_v46 = vld [vmem:[#allocation43_spill] sm:$0xff] }
 0x5bd   :  { %1682 = vrot.lane.b32.xlu0 %v8972_v58, %s9745_s4  ;;  %v1626_v39 = vadd.f32 %v1610_v43, %v14916_v53  ;;  %v1619_v58 = vadd.f32 %v10914_v61, %v14917_v46 }
 0x5be   :  { %8985 = vtanh.f32 %v1625_v55  ;;  %v1627_v8 = vadd.f32 %v1611_v1, %v14918_v40 }
 0x5bf   :  { %v8974_v41 = vpop.eup %8973  ;;  %8987 = vtanh.f32 %v1618_v44 }
 0x5c0   :  { %v8976_v19 = vpop.eup %8975  ;;  %1694 = vrot.lane.b32.xlu1 %v8974_v41, %s9745_s4  ;;  %8989 = vtanh.f32 %v1626_v39  ;;  %v1645_v39 = vsub.f32 1.0, %v10879_v36 }
 0x5c1   :  { %1696 = vrot.lane.b32.xlu0 %v8976_v19, %s9745_s4  ;;  %v8978_v29 = vpop.eup %8977  ;;  %8991 = vtanh.f32 %v1619_v58 }
 0x5c2   :  { %v8980_v42 = vpop.eup %8979  ;;  %8993 = vtanh.f32 %v1627_v8 }
 0x5c3   :  { %v8982_v2 = vpop.eup %8981 }
 0x5c4   :  { %1698 = vrot.lane.b32.xlu1 %v8978_v29, %s9745_s4  ;;  %v8984_v41 = vpop.eup %8983 }
 0x5c5   :  { %1686 = vrot.lane.b32.xlu0 %v8980_v42, %s9745_s4  ;;  %v1646_v42 = vsub.f32 1.0, %v10874_v28 }
 0x5c8   :  { %1700 = vrot.lane.b32.xlu1 %v8982_v2, %s9745_s4  ;;  %v8986_v43 = vpop.eup %8985  ;;  %v1644_v2 = vsub.f32 1.0, %v10876_v59 }
 0x5c9   :  { %1692 = vrot.lane.b32.xlu0 %v8984_v41, %s9745_s4  ;;  %v8988_v55 = vpop.eup %8987  ;;  %v14919_v41 = vrot.slane %v10693_v5, 7  ;;  %v1647_v5 = vsub.f32 1.0, %v10885_v0 }
 0x5ca   :  { %v8990_v61 = vpop.eup %8989 }
 0x5cb   :  { %v8992_v44 = vpop.eup %8991 }
 0x5cc   :  { %1702 = vrot.lane.b32.xlu1 %v8986_v43, %s9745_s4  ;;  %v8994_v1 = vpop.eup %8993  ;;  %v1790_v43 = vmul.f32 %v10874_v28, %v14919_v41 }
 0x5cd   :  { %1688 = vrot.lane.b32.xlu0 %v8988_v55, %s9745_s4 }
 0x5d0   :  { %1704 = vrot.lane.b32.xlu1 %v8990_v61, %s9745_s4 }
 0x5d1   :  { %1690 = vrot.lane.b32.xlu0 %v8992_v44, %s9745_s4  ;;  %v1648_v44 = vsub.f32 1.0, %v10889_v57 }
 0x5d4   :  { %1706 = vrot.lane.b32.xlu1 %v8994_v1, %s9745_s4 }
 0x627   :  { %v1681_v19 = vpop.permute.xlu0 %1680 }
 0x628   :  { %v1679_v58 = vpop.permute.xlu1 %1678  ;;  %v1726_v29 = vmul.f32 %v1681_v19, %v1646_v42 }
 0x629   :  { %v1725_v8 = vmul.f32 %v1679_v58, %v1645_v39 }
 0x62a   :  { %v11030_v46 = vadd.f32 %v1790_v43, %v1726_v29 }
 0x62b   :  { %v11027_v55 = vadd.f32 %v10893_v7, %v1725_v8  ;;  %v1677_v61 = vpop.permute.xlu0 %1676 }
 0x62c   :  { %v1724_v1 = vmul.f32 %v1677_v61, %v1644_v2  ;;  %v1685_v40 = vpop.permute.xlu1 %1684 }
 0x62d   :  { %v1821_v36 = vpack.c.bf16 %v11027_v55, %v11027_v55  ;;  %v1728_v42 = vmul.f32 %v1685_v40, %v1648_v44  ;;  %v4609_v28 = vrot.slane %v11027_v55, 1  ;;  %v1822_v40 = vpack.c.bf16 %v11030_v46, %v11030_v46 }
 0x62e   :  { %v11035_v59 = vadd.f32 %v10883_v27, %v1724_v1  ;;  %v1653_v27 = vsub.f32 1.0, %v10933_v50 }
 0x62f   :  { %v11040_v7 = vadd.f32 %v10904_v6, %v1728_v42  ;;  %v1683_v19 = vpop.permute.xlu0 %1682  ;;  %v1853_v57 = vunpack.c.l.b16 %v1821_v36 }
 0x630   :  { %v1820_v39 = vpack.c.bf16 %v11035_v59, %v11035_v59  ;;  %v4608_v58 = vrot.slane %v11035_v59, 2  ;;  %v1727_v29 = vmul.f32 %v1683_v19, %v1647_v5  ;;  %v1854_v5 = vunpack.c.l.b16 %v1822_v40 }
 0x631   :  { %v1824_v6 = vpack.c.bf16 %v11040_v7, %v11040_v7  ;;  %v1869_v1 = vrot.slane %v1853_v57, 1  ;;  %v1649_v19 = vsub.f32 1.0, %v10895_v51  ;;  %v1656_v51 = vsub.f32 1.0, %v10951_v3 }
 0x632   :  { %v1852_v8 = vunpack.c.l.b16 %v1820_v39  ;;  %v4610_v0 = vsel %vm808_vm1, %v4609_v28, %v4608_v58  ;;  %v11052_v2 = vadd.f32 %v10917_v62, %v1727_v29  ;;  %v1695_v41 = vpop.permute.xlu1 %1694  ;;  %v1655_v62 = vsub.f32 1.0, %v10946_v32 }
 0x633   :  { %v4611_v43 = vsel %vm811_vm2, %v11030_v46, %v4610_v0  ;;  %v1733_v61 = vmul.f32 %v1695_v41, %v1653_v27  ;;  %v1697_v44 = vpop.permute.xlu0 %1696  ;;  %v1856_v58 = vunpack.c.l.b16 %v1824_v6  ;;  %v14920_v3 = vrot.slane %v10718_v25, 7 }
 0x634   :  { %v1868_v36 = vrot.slane %v1852_v8, 2  ;;  %v1823_v50 = vpack.c.bf16 %v11052_v2, %v11052_v2  ;;  %v14784_v42 = vrot.slane %v11052_v2, 7  ;;  %v4613_v8 = vrot.slane %v11040_v7, 6 }
 0x635   :  { %v11060_v28 = vadd.f32 %v10944_v4, %v1733_v61  ;;  %v1654_v4 = vsub.f32 1.0, %v10939_v16 }
 0x636   :  { %v1870_v39 = vsel %vm808_vm1, %v1869_v1, %v1868_v36  ;;  %v1855_v29 = vunpack.c.l.b16 %v1823_v50  ;;  %v4612_v57 = vsel %vm814_vm3, %v14784_v42, %v4611_v43  ;;  %v1699_v27 = vpop.permute.xlu1 %1698  ;;  %v1874_v50 = vrot.slane %v1856_v58, 6 }
 0x637   :  { %v1871_v40 = vsel %vm811_vm2, %v1854_v5, %v1870_v39  ;;  %v1735_v0 = vmul.f32 %v1699_v27, %v1655_v62  ;;  %v1687_v41 = vpop.permute.xlu0 %1686  ;;  %v1829_v6 = vpack.c.bf16 %v11060_v28, %v11060_v28  ;;  %v1734_v1 = vmul.f32 %v1697_v44, %v1654_v4 }
 0x638   :  { %v1872_v32 = vrot.slane %v1855_v29, 7  ;;  %v1729_v61 = vmul.f32 %v1687_v41, %v1649_v19  ;;  %v4614_v43 = vsel %vm817_vm4, %v4613_v8, %v4612_v57  ;;  %v1652_v19 = vsub.f32 1.0, %v10927_v52 }
 0x639   :  { %v11075_v36 = vadd.f32 %v10962_v37, %v1735_v0  ;;  %v1798_v29 = vmul.f32 %v10939_v16, %v14920_v3  ;;  %v1650_v37 = vsub.f32 1.0, %v10900_v54  ;;  %v1651_v4 = vsub.f32 1.0, %v10906_v10 }
 0x63a   :  { %v1873_v5 = vsel %vm814_vm3, %v1872_v32, %v1871_v40  ;;  %v11080_v39 = vadd.f32 %v10925_v49, %v1729_v61  ;;  %v1701_v62 = vpop.permute.xlu1 %1700  ;;  %v1861_v40 = vunpack.c.l.b16 %v1829_v6  ;;  %v1657_v16 = vsub.f32 1.0, %v10977_v35 }
 0x63b   :  { %v1736_v27 = vmul.f32 %v1701_v62, %v1656_v51  ;;  %v1693_v44 = vpop.permute.xlu0 %1692  ;;  %v1875_v8 = vsel %vm817_vm4, %v1874_v50, %v1873_v5  ;;  %v11092_v52 = vadd.f32 %v1798_v29, %v1734_v1  ;;  %v1658_v41 = vsub.f32 1.0, %v10983_v45 }
 0x63c   :  { %v1825_v58 = vpack.c.bf16 %v11080_v39, %v11080_v39  ;;  %v4615_v57 = vrot.slane %v11080_v39, 5  ;;  %v1732_v49 = vmul.f32 %v1693_v44, %v1652_v19  ;;  %v4622_v61 = vrot.slane %v11060_v28, 1 }
 0x63d   :  { %v11095_v25 = vadd.f32 %v10968_v14, %v1736_v27  ;;  %v1831_v51 = vpack.c.bf16 %v11075_v36, %v11075_v36  ;;  %v1883_v45 = vrot.slane %v1861_v40, 1  ;;  %v1659_v19 = vsub.f32 1.0, %v10991_v26 }
 0x63e   :  { %v1857_v0 = vunpack.c.l.b16 %v1825_v58  ;;  %v11099_v54 = vadd.f32 %v10937_v31, %v1732_v49  ;;  %v1703_v10 = vpop.permute.xlu1 %1702  ;;  %v4616_v32 = vsel %vm820_vm5, %v4615_v57, %v4614_v43  ;;  %v1830_v43 = vpack.c.bf16 %v11092_v52, %v11092_v52 }
 0x63f   :  { %v1832_v14 = vpack.c.bf16 %v11095_v25, %v11095_v25  ;;  %v1737_v6 = vmul.f32 %v1703_v10, %v1657_v16  ;;  %v1689_v1 = vpop.permute.xlu0 %1688  ;;  %v1863_v57 = vunpack.c.l.b16 %v1831_v51 }
 0x640   :  { %v1876_v35 = vrot.slane %v1857_v0, 5  ;;  %v1828_v31 = vpack.c.bf16 %v11099_v54, %v11099_v54  ;;  %v4621_v50 = vrot.slane %v11099_v54, 2  ;;  %v1730_v5 = vmul.f32 %v1689_v1, %v1650_v37 }
 0x641   :  { %v11114_v62 = vadd.f32 %v10989_v60, %v1737_v6  ;;  %v1864_v37 = vunpack.c.l.b16 %v1832_v14 }
 0x642   :  { %v1860_v3 = vunpack.c.l.b16 %v1828_v31  ;;  %v4623_v29 = vsel %vm808_vm1, %v4622_v61, %v4621_v50  ;;  %v11119_v27 = vadd.f32 %v10931_v9, %v1730_v5  ;;  %v1705_v44 = vpop.permute.xlu1 %1704  ;;  %v1877_v58 = vsel %vm820_vm5, %v1876_v35, %v1875_v8 }
 0x643   :  { %v1833_v49 = vpack.c.bf16 %v11114_v62, %v11114_v62  ;;  %v1738_v40 = vmul.f32 %v1705_v44, %v1658_v41  ;;  %v1691_v16 = vpop.permute.xlu0 %1690  ;;  %v1862_v61 = vunpack.c.l.b16 %v1830_v43  ;;  %v14783_v9 = vrot.slane %v11075_v36, 7 }
 0x644   :  { %v1882_v60 = vrot.slane %v1860_v3, 2  ;;  %v1826_v26 = vpack.c.bf16 %v11119_v27, %v11119_v27  ;;  %v4617_v0 = vrot.slane %v11119_v27, 4  ;;  %v1731_v10 = vmul.f32 %v1691_v16, %v1651_v4 }
 0x645   :  { %v1865_v6 = vunpack.c.l.b16 %v1833_v49  ;;  %v11129_v8 = vadd.f32 %v10995_v34, %v1738_v40  ;;  %v1886_v31 = vrot.slane %v1863_v57, 7  ;;  %v4626_v50 = vrot.slane %v11095_v25, 6 }
 0x646   :  { %v1884_v51 = vsel %vm808_vm1, %v1883_v45, %v1882_v60  ;;  %v1858_v14 = vunpack.c.l.b16 %v1826_v26  ;;  %v11133_v41 = vadd.f32 %v10971_v38, %v1731_v10  ;;  %v1707_v1 = vpop.permute.xlu1 %1706  ;;  %v4618_v35 = vsel %vm823_vm6, %v4617_v0, %v4616_v32 }
 0x647   :  { %v1834_v4 = vpack.c.bf16 %v11129_v8, %v11129_v8  ;;  %v1739_v5 = vmul.f32 %v1707_v1, %v1659_v19  ;;  %v1888_v43 = vrot.slane %v1864_v37, 6  ;;  %v1885_v45 = vsel %vm811_vm2, %v1862_v61, %v1884_v51 }
 0x648   :  { %v1827_v34 = vpack.c.bf16 %v11133_v41, %v11133_v41  ;;  %v1878_v3 = vrot.slane %v1858_v14, 4  ;;  %v1890_v44 = vrot.slane %v1865_v6, 5  ;;  %v1887_v32 = vsel %vm814_vm3, %v1886_v31, %v1885_v45 }
 0x649   :  { %v1866_v38 = vunpack.c.l.b16 %v1834_v4  ;;  %v11143_v49 = vadd.f32 %v10999_v47, %v1739_v5  ;;  %v1889_v16 = vsel %vm817_vm4, %v1888_v43, %v1887_v32  ;;  %v4619_v19 = vrot.slane %v11133_v41, 3  ;;  %v11184_v32 = vld [vmem:[#allocation2 + $0x24] ss:$8 sps:$4 sm:$0xff]  }
 0x64a   :  { %v1859_v57 = vunpack.c.l.b16 %v1827_v34  ;;  %v1879_v40 = vsel %vm823_vm6, %v1878_v3, %v1877_v58  ;;  %v4628_v37 = vrot.slane %v11114_v62, 5  ;;  %v1891_v26 = vsel %vm820_vm5, %v1890_v44, %v1889_v16  ;;  %v11174_v44 = vld [vmem:[#allocation2] ss:$8 sps:$4 sm:$0xff]   ;;  %v11193_v16 = vld [vmem:[#allocation2 + $0x30] ss:$8 sps:$4 sm:$0xff]  }
 0x64b   :  { %v1835_v60 = vpack.c.bf16 %v11143_v49, %v11143_v49  ;;  %v1892_v0 = vrot.slane %v1866_v38, 4  ;;  %v4630_v47 = vrot.slane %v11129_v8, 4  ;;  %v11155_v61 = vsel %vm826_vm7, %v4619_v19, %v4618_v35  ;;  %v11181_v38 = vld [vmem:[#allocation2 + $0x10] ss:$8 sps:$4 sm:$0xff]   ;;  %v9635_v19 = vld [vmem:[#allocation2 + $0x4] ss:$8 sps:$4 sm:$0xff]  }
 0x64c   :  { %v1880_v10 = vrot.slane %v1859_v57, 3  ;;  %14921 = vst [vmem:[#allocation47_spill] sm:$0xff] %v11155_v61  ;;  %v4624_v58 = vsel %vm811_vm2, %v11092_v52, %v4623_v29  ;;  %v4632_v1 = vrot.slane %v11143_v49, 3  ;;  %v11187_v57 = vld [vmem:[#allocation2 + $0x20] ss:$8 sps:$4 sm:$0xff]  }
 0x64d   :  { %v1867_v6 = vunpack.c.l.b16 %v1835_v60  ;;  %v1893_v51 = vsel %vm823_vm6, %v1892_v0, %v1891_v26  ;;  %v4625_v14 = vsel %vm814_vm3, %v14783_v9, %v4624_v58 }
 0x64e   :  { %v1881_v31 = vsel %vm826_vm7, %v1880_v10, %v1879_v40  ;;  %v4627_v4 = vsel %vm817_vm4, %v4626_v50, %v4625_v14  ;;  %v11178_v50 = vld [vmem:[#allocation2 + $0x14] ss:$8 sps:$4 sm:$0xff]  }
 0x64f   :  { %v1894_v5 = vrot.slane %v1867_v6, 3  ;;  %v4629_v35 = vsel %vm820_vm5, %v4628_v37, %v4627_v4  ;;  %v11190_v40 = vld [vmem:[#allocation2 + $0x34] ss:$8 sps:$4 sm:$0xff]  }
 0x650   :  { %v4631_v43 = vsel %vm823_vm6, %v4630_v47, %v4629_v35 }
 0x651   :  { %v1895_v29 = vsel %vm826_vm7, %v1894_v5, %v1893_v51  ;;  %v11170_v34 = vsel %vm826_vm7, %v4632_v1, %v4631_v43 }
 0x652   :  { %14922 = vst [vmem:[#allocation14_spill] sm:$0xff] %v11170_v34  ;;  %v1896_v3 = vpack.c.b16 %v1895_v29, %v1881_v31 }
 0x654   :  { %1897 = vrot.lane.b32.xlu0 %v1896_v3, %s9745_s4 }
 0x6c6   :  { %v1898_v45 = vpop.permute.xlu0 %1897 }
 0x6c7   :  { %8406 = vmatmul.mubr.msk.bf16.vlgmr.msra.gmra.mrb[4].mxu1 %vm14832_vm0, %v1898_v45 }
 0x6c8   :  { %2957 = vmatpush1.bf16.msra.mxu1 %v11174_v44  ;;  %2988 = vmatprep.mubr.bf16.mxu1 %v14874_v12 }
 0x6c9   :  { %2958 = vmatprep.subr.bf16.mxu1 %v11178_v50 }
 0x6cc   :  { %2959 = vmatpush1.bf16.msra.mxu1 %v11181_v38 }
 0x6cd   :  { %2960 = vmatprep.subr.bf16.mxu1 %v11184_v32 }
 0x6d0   :  { %2961 = vmatpush1.bf16.msra.mxu1 %v11187_v57 }
 0x6d1   :  { %2962 = vmatprep.subr.bf16.mxu1 %v11190_v40 }
 0x6d4   :  { %2963 = vmatpush1.bf16.msra.mxu1 %v11193_v16 }
 0x6d5   :  { %4010 = vmatprep.subr.bf16.mxu1 %v9635_v19 }
 0x79a   :  { %v1936_v37 = vpop.f32.mrb[4].mxu1 }
 0x79b   :  { %v1947_v60 = vrot.slane %v1936_v37, 5  ;;  %v1948_v26 = vrot.slane %v1936_v37, 6  ;;  %v1949_v0 = vrot.slane %v1936_v37, 7  ;;  %v1950_v47 = vrot.slane %v1936_v37, 1  ;;  %v11196_v10 = vpop.f32.mrb[5].mxu1 }
 0x79c   :  { %v1951_v58 = vrot.slane %v1936_v37, 2  ;;  %v1952_v6 = vrot.slane %v1936_v37, 3  ;;  %v1953_v51 = vrot.slane %v1936_v37, 4  ;;  %v1980_v14 = vadd.f32 %v1936_v37, %v10048_v18  ;;  %v11199_v1 = vpop.f32.mrb[6].mxu1 }
 0x79d   :  { %v1977_v31 = vadd.f32 %v1947_v60, %v10039_v15  ;;  %v1978_v4 = vadd.f32 %v1948_v26, %v14894_v11  ;;  %v1979_v5 = vadd.f32 %v1949_v0, %v10045_v17  ;;  %v1981_v35 = vadd.f32 %v1950_v47, %v14895_v13  ;;  %v11205_v43 = vpop.f32.mrb[7].mxu1 }
 0x79e   :  { %v1982_v29 = vadd.f32 %v1951_v58, %v10054_v20  ;;  %v1983_v3 = vadd.f32 %v1952_v6, %v10057_v21  ;;  %v8410_v45 = vmul.f32 -1.442695, %v1980_v14  ;;  %v1984_v19 = vadd.f32 %v1953_v51, %v10060_v22 }
 0x79f   :  { %v8407_v37 = vmul.f32 -1.442695, %v1977_v31  ;;  %v8408_v9 = vmul.f32 -1.442695, %v1978_v4  ;;  %v8409_v42 = vmul.f32 -1.442695, %v1979_v5 }
 0x7a0   :  { %8995 = vpow2.f32 %v8410_v45  ;;  %v8411_v60 = vmul.f32 -1.442695, %v1981_v35  ;;  %v8412_v26 = vmul.f32 -1.442695, %v1982_v29  ;;  %v1954_v0 = vrot.slane %v11199_v1, 5  ;;  %v14923_v5 = vld [vmem:[#allocation23_spill] sm:$0xff] }
 0x7a1   :  { %8997 = vpow2.f32 %v8407_v37  ;;  %v1955_v47 = vrot.slane %v11199_v1, 6  ;;  %v8413_v34 = vmul.f32 -1.442695, %v1983_v3  ;;  %v1956_v58 = vrot.slane %v11199_v1, 7  ;;  %v14924_v29 = vld [vmem:[#allocation24_spill] sm:$0xff] }
 0x7a2   :  { %8999 = vpow2.f32 %v8408_v9  ;;  %v1957_v6 = vrot.slane %v11199_v1, 1  ;;  %v8414_v14 = vmul.f32 -1.442695, %v1984_v19  ;;  %v1985_v51 = vadd.f32 %v1954_v0, %v10063_v23 }
 0x7a3   :  { %9001 = vpow2.f32 %v8409_v42  ;;  %v1986_v31 = vadd.f32 %v1955_v47, %v14896_v48  ;;  %v1987_v4 = vadd.f32 %v1956_v58, %v14897_v33  ;;  %v1988_v35 = vadd.f32 %v11199_v1, %v14923_v5 }
 0x7a4   :  { %9003 = vpow2.f32 %v8411_v60  ;;  %v1989_v9 = vadd.f32 %v1957_v6, %v14924_v29  ;;  %v8415_v3 = vmul.f32 -1.442695, %v1985_v51  ;;  %v1958_v60 = vrot.slane %v11199_v1, 2 }
 0x7a5   :  { %9005 = vpow2.f32 %v8412_v26  ;;  %v8416_v45 = vmul.f32 -1.442695, %v1986_v31  ;;  %v8417_v37 = vmul.f32 -1.442695, %v1987_v4  ;;  %v8418_v42 = vmul.f32 -1.442695, %v1988_v35 }
 0x7a6   :  { %9007 = vpow2.f32 %v8413_v34  ;;  %v8419_v19 = vmul.f32 -1.442695, %v1989_v9  ;;  %v1959_v47 = vrot.slane %v11199_v1, 3  ;;  %v1960_v26 = vrot.slane %v11199_v1, 4  ;;  %v14925_v31 = vld [vmem:[#allocation25_spill] sm:$0xff] }
 0x7a7   :  { %9009 = vpow2.f32 %v8414_v14  ;;  %v1990_v4 = vadd.f32 %v1958_v60, %v14925_v31  ;;  %v2290_v20 = vrot.slane %v11133_v41, 7  ;;  %v2298_v41 = vrot.slane %v11143_v49, 7 }
 0x7a8   :  { %9011 = vpow2.f32 %v8415_v3  ;;  %v14926_v3 = vld [vmem:[#allocation26_spill] sm:$0xff] }
 0x7a9   :  { %9013 = vpow2.f32 %v8416_v45  ;;  %v1991_v45 = vadd.f32 %v1959_v47, %v14926_v3  ;;  %v14928_v47 = vld [vmem:[#allocation45_spill] sm:$0xff] }
 0x7aa   :  { %v8996_v0 = vpop.eup %8995  ;;  %9015 = vpow2.f32 %v8417_v37 }
 0x7ab   :  { %v8998_v58 = vpop.eup %8997  ;;  %v2044_v61 = vadd.f32 1.0, %v8996_v0  ;;  %9017 = vpow2.f32 %v8418_v42  ;;  %v14927_v0 = vld [vmem:[#allocation27_spill] sm:$0xff]  ;;  %v8421_v60 = vmul.f32 -1.442695, %v1991_v45 }
 0x7ac   :  { %v9000_v34 = vpop.eup %8999  ;;  %v2041_v6 = vadd.f32 1.0, %v8998_v58  ;;  %9019 = vpow2.f32 %v8419_v19  ;;  %v1992_v5 = vadd.f32 %v1960_v26, %v14927_v0 }
 0x7ad   :  { %v9002_v14 = vpop.eup %9001  ;;  %v2042_v51 = vadd.f32 1.0, %v9000_v34  ;;  %9021 = vrcp.f32 %v2044_v61  ;;  %v8420_v34 = vmul.f32 -1.442695, %v1990_v4  ;;  %v2284_v4 = vrot.slane %v11027_v55, 7 }
 0x7ae   :  { %v9004_v35 = vpop.eup %9003  ;;  %v2043_v9 = vadd.f32 1.0, %v9002_v14  ;;  %9023 = vrcp.f32 %v2041_v6  ;;  %v2089_v6 = vadd.f32 %v14928_v47, %v11196_v10  ;;  %v2288_v10 = vrot.slane %v11080_v39, 7 }
 0x7af   :  { %v9006_v29 = vpop.eup %9005  ;;  %v2045_v37 = vadd.f32 1.0, %v9004_v35  ;;  %9025 = vrcp.f32 %v2042_v51  ;;  %v8422_v35 = vmul.f32 -1.442695, %v1992_v5 }
 0x7b0   :  { %v9008_v1 = vpop.eup %9007  ;;  %v2046_v42 = vadd.f32 1.0, %v9006_v29  ;;  %9027 = vrcp.f32 %v2043_v9  ;;  %v2285_v29 = vrot.slane %v11030_v46, 7  ;;  %v2094_v5 = vrot.slane %v2089_v6, 6 }
 0x7b1   :  { %v9010_v58 = vpop.eup %9009  ;;  %v2047_v19 = vadd.f32 1.0, %v9008_v1  ;;  %9029 = vrcp.f32 %v2045_v37  ;;  %v2283_v37 = vrot.slane %v11035_v59, 7 }
 0x7b2   :  { %v9012_v61 = vpop.eup %9011  ;;  %v2048_v33 = vadd.f32 1.0, %v9010_v58  ;;  %9031 = vrcp.f32 %v2046_v42  ;;  %v11233_v58 = vadd.f32 %v14928_v47, %v11205_v43 }
 0x7b3   :  { %v9014_v14 = vpop.eup %9013  ;;  %9033 = vrcp.f32 %v2047_v19  ;;  %v2049_v26 = vadd.f32 1.0, %v9012_v61  ;;  %v2093_v19 = vrot.slane %v2089_v6, 5  ;;  %v2097_v61 = vrot.slane %v2089_v6, 2 }
 0x7b4   :  { %v9016_v51 = vpop.eup %9015  ;;  %9035 = vrcp.f32 %v2048_v33  ;;  %v2050_v1 = vadd.f32 1.0, %v9014_v14  ;;  %v2095_v14 = vrot.slane %v2089_v6, 7 }
 0x7b5   :  { %v9018_v9 = vpop.eup %9017  ;;  %9037 = vpow2.f32 %v8420_v34  ;;  %v2051_v45 = vadd.f32 1.0, %v9016_v51 }
 0x7b6   :  { %v9020_v42 = vpop.eup %9019  ;;  %9039 = vpow2.f32 %v8421_v60  ;;  %v2052_v46 = vadd.f32 1.0, %v9018_v9 }
 0x7b7   :  { %v11236_v33 = vpop.eup %9021  ;;  %9041 = vpow2.f32 %v8422_v35  ;;  %v2053_v55 = vadd.f32 1.0, %v9020_v42  ;;  %v14929_v35 = vld [vmem:[#allocation32_spill] sm:$0xff] }
 0x7b8   :  { %v11238_v34 = vpop.eup %9023  ;;  %9043 = vrcp.f32 %v2049_v26  ;;  %v2126_v59 = vmul.f32 %v11236_v33, %v2089_v6  ;;  %v2096_v26 = vrot.slane %v2089_v6, 1 }
 0x7b9   :  { %v11241_v60 = vpop.eup %9025  ;;  %9045 = vrcp.f32 %v2050_v1  ;;  %v2123_v43 = vmul.f32 %v11238_v34, %v2093_v19  ;;  %v11245_v39 = vmul.f32 %v11238_v34, %v2283_v37  ;;  %v2098_v1 = vrot.slane %v2089_v6, 3  ;;  %v14930_v37 = vld [vmem:[#allocation30_spill] sm:$0xff] }
 0x7ba   :  { %v11247_v47 = vpop.eup %9027  ;;  %9047 = vrcp.f32 %v2051_v45  ;;  %v2142_v51 = vadd.f32 %v2126_v59, %v14929_v35  ;;  %v2124_v9 = vmul.f32 %v11241_v60, %v2094_v5  ;;  %v11255_v19 = vmul.f32 %v11241_v60, %v2284_v4  ;;  %v14931_v45 = vld [vmem:[#allocation29_spill] sm:$0xff] }
 0x7bb   :  { %v11251_v42 = vpop.eup %9029  ;;  %9049 = vrcp.f32 %v2052_v46  ;;  %v2125_v0 = vmul.f32 %v11247_v47, %v2095_v14  ;;  %v2139_v48 = vadd.f32 %v2123_v43, %v14931_v45  ;;  %v2099_v35 = vrot.slane %v2089_v6, 4 }
 0x7bc   :  { %v11257_v3 = vpop.eup %9031  ;;  %9051 = vrcp.f32 %v2053_v55  ;;  %v2140_v31 = vadd.f32 %v2124_v9, %v14930_v37  ;;  %v2127_v59 = vmul.f32 %v11251_v42, %v2096_v26  ;;  %v2287_v14 = vrot.slane %v11040_v7, 7  ;;  %v14932_v37 = vld [vmem:[#allocation31_spill] sm:$0xff] }
 0x7bd   :  { %v11262_v5 = vpop.eup %9033  ;;  %9053 = vtanh.f32 %v2142_v51  ;;  %v2128_v46 = vmul.f32 %v11257_v3, %v2097_v61  ;;  %v11272_v55 = vmul.f32 %v11257_v3, %v2288_v10  ;;  %v2292_v43 = vrot.slane %v11060_v28, 7 }
 0x7be   :  { %v11266_v23 = vpop.eup %9035  ;;  %9055 = vtanh.f32 %v2140_v31  ;;  %v11269_v4 = vmul.f32 %v11262_v5, %v2098_v1  ;;  %v11280_v6 = vmul.f32 %v11247_v47, %v2285_v29  ;;  %v2291_v7 = vrot.slane %v11099_v54, 7 }
 0x7bf   :  { %v9038_v9 = vpop.eup %9037  ;;  %v2144_v26 = vadd.f32 %v2128_v46, %v14912_v24  ;;  %v11277_v51 = vmul.f32 %v11266_v23, %v2099_v35  ;;  %9057 = vtanh.f32 %v2139_v48  ;;  %v2100_v1 = vrot.slane %v11233_v58, 5 }
 0x7c0   :  { %v9040_v31 = vpop.eup %9039  ;;  %v2054_v61 = vadd.f32 1.0, %v9038_v9  ;;  %v2289_v10 = vrot.slane %v11119_v27, 7  ;;  %v2141_v46 = vadd.f32 %v2125_v0, %v14932_v37  ;;  %v11287_v35 = vmul.f32 %v11251_v42, %v2287_v14 }
 0x7c1   :  { %v9042_v45 = vpop.eup %9041  ;;  %v2055_v28 = vadd.f32 1.0, %v9040_v31  ;;  %9059 = vtanh.f32 %v2144_v26  ;;  %v2101_v54 = vrot.slane %v11233_v58, 6  ;;  %v2102_v27 = vrot.slane %v11233_v58, 7 }
 0x7c2   :  { %v11289_v24 = vpop.eup %9043  ;;  %v2056_v29 = vadd.f32 1.0, %v9042_v45  ;;  %9061 = vrcp.f32 %v2054_v61  ;;  %v11293_v48 = vmul.f32 %v11262_v5, %v2289_v10  ;;  %v2293_v61 = vrot.slane %v11092_v52, 7 }
 0x7c3   :  { %v11295_v9 = vpop.eup %9045  ;;  %9063 = vrcp.f32 %v2055_v28  ;;  %v2131_v26 = vmul.f32 %v11289_v24, %v2100_v1  ;;  %v11300_v0 = vmul.f32 %v11289_v24, %v2291_v7  ;;  %v14933_v28 = vld [vmem:[#allocation34_spill] sm:$0xff]  ;;  %v2103_v7 = vrot.slane %v11233_v58, 1 }
 0x7c4   :  { %v11302_v14 = vpop.eup %9047  ;;  %9065 = vrcp.f32 %v2056_v29  ;;  %v2132_v45 = vmul.f32 %v11295_v9, %v2101_v54  ;;  %v11306_v31 = vmul.f32 %v11295_v9, %v2292_v43  ;;  %v2143_v37 = vadd.f32 %v2127_v59, %v14933_v28 }
 0x7c5   :  { %v11309_v10 = vpop.eup %9049  ;;  %9067 = vtanh.f32 %v2141_v46  ;;  %v2133_v1 = vmul.f32 %v11302_v14, %v2102_v27  ;;  %v11320_v43 = vmul.f32 %v11302_v14, %v2293_v61  ;;  %v2295_v46 = vrot.slane %v11095_v25, 7  ;;  %v14934_v27 = vld [vmem:[#allocation35_spill] sm:$0xff] }
 0x7c6   :  { %v11314_v22 = vpop.eup %9051  ;;  %v2148_v29 = vadd.f32 %v2132_v45, %v14909_v63  ;;  %v2134_v54 = vmul.f32 %v11309_v10, %v11233_v58  ;;  %v14935_v45 = vld [vmem:[#allocation36_spill] sm:$0xff] }
 0x7c7   :  { %v9054_v52 = vpop.eup %9053  ;;  %v2135_v21 = vmul.f32 %v11314_v22, %v2103_v7  ;;  %v2149_v28 = vadd.f32 %v2133_v1, %v14934_v27  ;;  %v11330_v61 = vmul.f32 %v11314_v22, %v2295_v46  ;;  %v11333_v7 = vmul.f32 %v11266_v23, %v2290_v20 }
 0x7c8   :  { %v9056_v59 = vpop.eup %9055  ;;  %2209 = vrot.lane.b32.xlu1 %v9054_v52, %s9745_s4  ;;  %9069 = vtanh.f32 %v2148_v29  ;;  %v2150_v63 = vadd.f32 %v2134_v54, %v14935_v45  ;;  %v2104_v52 = vrot.slane %v11233_v58, 2  ;;  %v2296_v29 = vrot.slane %v11114_v62, 7  ;;  %v14937_v62 = vld [vmem:[#allocation33_spill] sm:$0xff] }
 0x7c9   :  { %2205 = vrot.lane.b32.xlu0 %v9056_v59, %s9745_s4  ;;  %9071 = vtanh.f32 %v2143_v37  ;;  %v9058_v18 = vpop.eup %9057  ;;  %v2297_v1 = vrot.slane %v11129_v8, 7  ;;  %v14936_v37 = vld [vmem:[#allocation38_spill] sm:$0xff]  ;;  %v2105_v46 = vrot.slane %v11233_v58, 3  ;;  %v2106_v20 = vrot.slane %v11233_v58, 4 }
 0x7ca   :  { %9073 = vtanh.f32 %v2149_v28  ;;  %v2151_v54 = vadd.f32 %v2135_v21, %v14936_v37  ;;  %v2147_v8 = vadd.f32 %v2131_v26, %v14937_v62  ;;  %v2145_v26 = vadd.f32 %v11269_v4, %v14915_v56  ;;  %v14939_v4 = vld [vmem:[#allocation44_spill] sm:$0xff] }
 0x7cb   :  { %v9060_v25 = vpop.eup %9059  ;;  %9075 = vtanh.f32 %v2150_v63 }
 0x7cc   :  { %v11339_v59 = vpop.eup %9061  ;;  %2203 = vrot.lane.b32.xlu1 %v9058_v18, %s9745_s4  ;;  %9077 = vtanh.f32 %v2151_v54 }
 0x7cd   :  { %v11345_v45 = vpop.eup %9063  ;;  %2213 = vrot.lane.b32.xlu0 %v9060_v25, %s9745_s4  ;;  %v2136_v49 = vmul.f32 %v11339_v59, %v2104_v52  ;;  %v11351_v27 = vmul.f32 %v11339_v59, %v2296_v29  ;;  %9079 = vtanh.f32 %v2147_v8 }
 0x7ce   :  { %v11353_v18 = vpop.eup %9065  ;;  %v2137_v21 = vmul.f32 %v11345_v45, %v2105_v46  ;;  %v11357_v28 = vmul.f32 %v11345_v45, %v2297_v1 }
 0x7cf   :  { %v9068_v58 = vpop.eup %9067  ;;  %v2138_v37 = vmul.f32 %v11353_v18, %v2106_v20  ;;  %v11361_v25 = vmul.f32 %v11353_v18, %v2298_v41  ;;  %v2152_v63 = vadd.f32 %v2136_v49, %v14884_v30  ;;  %v14938_v41 = vld [vmem:[#allocation43_spill] sm:$0xff] }
 0x7d0   :  { %2207 = vrot.lane.b32.xlu1 %v9068_v58, %s9745_s4  ;;  %v2153_v1 = vadd.f32 %v2137_v21, %v14916_v53  ;;  %v2146_v46 = vadd.f32 %v11277_v51, %v14938_v41 }
 0x7d1   :  { %9081 = vtanh.f32 %v2152_v63  ;;  %v2154_v8 = vadd.f32 %v2138_v37, %v14939_v4 }
 0x7d2   :  { %v9070_v52 = vpop.eup %9069  ;;  %9083 = vtanh.f32 %v2145_v26 }
 0x7d3   :  { %v9072_v29 = vpop.eup %9071  ;;  %2221 = vrot.lane.b32.xlu0 %v9070_v52, %s9745_s4  ;;  %9085 = vtanh.f32 %v2153_v1 }
 0x7d4   :  { %2211 = vrot.lane.b32.xlu1 %v9072_v29, %s9745_s4  ;;  %v9074_v54 = vpop.eup %9073  ;;  %9087 = vtanh.f32 %v2146_v46  ;;  %v2172_v29 = vsub.f32 1.0, %v11241_v60 }
 0x7d5   :  { %v9076_v20 = vpop.eup %9075  ;;  %9089 = vtanh.f32 %v2154_v8 }
 0x7d6   :  { %v9078_v49 = vpop.eup %9077 }
 0x7d7   :  { %2223 = vrot.lane.b32.xlu0 %v9074_v54, %s9745_s4  ;;  %v9080_v58 = vpop.eup %9079  ;;  %v2171_v54 = vsub.f32 1.0, %v11238_v34  ;;  %v2173_v34 = vsub.f32 1.0, %v11247_v47  ;;  %v2180_v47 = vsub.f32 1.0, %v11295_v9 }
 0x7d8   :  { %2225 = vrot.lane.b32.xlu1 %v9076_v20, %s9745_s4  ;;  %v2174_v20 = vsub.f32 1.0, %v11236_v33 }
 0x7db   :  { %2227 = vrot.lane.b32.xlu0 %v9078_v49, %s9745_s4  ;;  %v9082_v21 = vpop.eup %9081 }
 0x7dc   :  { %2219 = vrot.lane.b32.xlu1 %v9080_v58, %s9745_s4  ;;  %v9084_v63 = vpop.eup %9083  ;;  %v2176_v58 = vsub.f32 1.0, %v11257_v3 }
 0x7dd   :  { %v9086_v51 = vpop.eup %9085 }
 0x7de   :  { %v9088_v26 = vpop.eup %9087 }
 0x7df   :  { %2229 = vrot.lane.b32.xlu0 %v9082_v21, %s9745_s4  ;;  %v9090_v37 = vpop.eup %9089 }
 0x7e0   :  { %2215 = vrot.lane.b32.xlu1 %v9084_v63, %s9745_s4 }
 0x7e3   :  { %2231 = vrot.lane.b32.xlu0 %v9086_v51, %s9745_s4 }
 0x7e4   :  { %2217 = vrot.lane.b32.xlu1 %v9088_v26, %s9745_s4 }
 0x7e7   :  { %2233 = vrot.lane.b32.xlu0 %v9090_v37, %s9745_s4 }
 0x83a   :  { %v2210_v52 = vpop.permute.xlu1 %2209 }
 0x83b   :  { %v2206_v1 = vpop.permute.xlu0 %2205  ;;  %v2254_v51 = vmul.f32 %v2210_v52, %v2174_v20 }
 0x83c   :  { %v2252_v46 = vmul.f32 %v2206_v1, %v2172_v29  ;;  %v14940_v29 = vrot.slane %v11052_v2, 7 }
 0x83e   :  { %v11386_v8 = vadd.f32 %v11255_v19, %v2252_v46  ;;  %v2204_v49 = vpop.permute.xlu1 %2203  ;;  %v2318_v19 = vmul.f32 %v11236_v33, %v14940_v29 }
 0x83f   :  { %v2251_v21 = vmul.f32 %v2204_v49, %v2171_v54  ;;  %v2214_v63 = vpop.permute.xlu0 %2213 }
 0x840   :  { %v2348_v26 = vpack.c.bf16 %v11386_v8, %v11386_v8  ;;  %v2256_v37 = vmul.f32 %v2214_v63, %v2176_v58  ;;  %v4675_v52 = vrot.slane %v11386_v8, 2  ;;  %v11405_v49 = vadd.f32 %v2318_v19, %v2254_v51 }
 0x841   :  { %v11392_v60 = vadd.f32 %v11245_v39, %v2251_v21  ;;  %v2175_v21 = vsub.f32 1.0, %v11251_v42  ;;  %v2181_v42 = vsub.f32 1.0, %v11302_v14 }
 0x842   :  { %v2380_v1 = vunpack.c.l.b16 %v2348_v26  ;;  %v11399_v46 = vadd.f32 %v11272_v55, %v2256_v37  ;;  %v2208_v3 = vpop.permute.xlu1 %2207  ;;  %v2350_v9 = vpack.c.bf16 %v11405_v49, %v11405_v49 }
 0x843   :  { %v2347_v54 = vpack.c.bf16 %v11392_v60, %v11392_v60  ;;  %v4674_v20 = vrot.slane %v11392_v60, 3  ;;  %v2253_v39 = vmul.f32 %v2208_v3, %v2173_v34 }
 0x844   :  { %v2396_v63 = vrot.slane %v2380_v1, 2 }
 0x845   :  { %v2379_v2 = vunpack.c.l.b16 %v2347_v54  ;;  %v4676_v33 = vsel %vm808_vm1, %v4675_v52, %v4674_v20  ;;  %v11410_v58 = vadd.f32 %v11280_v6, %v2253_v39  ;;  %v2222_v55 = vpop.permute.xlu0 %2221  ;;  %v2352_v6 = vpack.c.bf16 %v11399_v46, %v11399_v46 }
 0x846   :  { %v2260_v26 = vmul.f32 %v2222_v55, %v2180_v47  ;;  %v2212_v37 = vpop.permute.xlu1 %2211 }
 0x847   :  { %v2395_v29 = vrot.slane %v2379_v2, 3  ;;  %v2349_v34 = vpack.c.bf16 %v11410_v58, %v11410_v58  ;;  %v4677_v51 = vrot.slane %v11410_v58, 1  ;;  %v2255_v19 = vmul.f32 %v2212_v37, %v2175_v21 }
 0x848   :  { %v11421_v3 = vadd.f32 %v11306_v31, %v2260_v26  ;;  %v2182_v2 = vsub.f32 1.0, %v11309_v10  ;;  %v2179_v21 = vsub.f32 1.0, %v11289_v24  ;;  %v2177_v31 = vsub.f32 1.0, %v11262_v5 }
 0x849   :  { %v2397_v1 = vsel %vm808_vm1, %v2396_v63, %v2395_v29  ;;  %v2381_v52 = vunpack.c.l.b16 %v2349_v34  ;;  %v4678_v54 = vsel %vm811_vm2, %v4677_v51, %v4676_v33  ;;  %v11427_v20 = vadd.f32 %v11287_v35, %v2255_v19  ;;  %v2224_v39 = vpop.permute.xlu0 %2223 }
 0x84a   :  { %v2261_v47 = vmul.f32 %v2224_v39, %v2181_v42  ;;  %v2226_v55 = vpop.permute.xlu1 %2225  ;;  %v14941_v33 = vrot.slane %v11075_v36, 7  ;;  %v2384_v37 = vunpack.c.l.b16 %v2352_v6  ;;  %v2183_v34 = vsub.f32 1.0, %v11314_v22 }
 0x84b   :  { %v2398_v26 = vrot.slane %v2381_v52, 1  ;;  %v2351_v14 = vpack.c.bf16 %v11427_v20, %v11427_v20  ;;  %v14800_v63 = vrot.slane %v11427_v20, 7  ;;  %v4679_v24 = vsel %vm814_vm3, %v11405_v49, %v4678_v54 }
 0x84c   :  { %v2326_v35 = vmul.f32 %v11309_v10, %v14941_v33  ;;  %v11439_v29 = vadd.f32 %v11320_v43, %v2261_v47  ;;  %v2382_v5 = vunpack.c.l.b16 %v2350_v9  ;;  %v2356_v51 = vpack.c.bf16 %v11421_v3, %v11421_v3 }
 0x84d   :  { %v2383_v19 = vunpack.c.l.b16 %v2351_v14  ;;  %v2228_v42 = vpop.permute.xlu0 %2227  ;;  %v2399_v52 = vsel %vm811_vm2, %v2398_v26, %v2397_v1  ;;  %v2262_v36 = vmul.f32 %v2226_v55, %v2182_v2  ;;  %v2178_v6 = vsub.f32 1.0, %v11266_v23 }
 0x84e   :  { %v2263_v39 = vmul.f32 %v2228_v42, %v2183_v34  ;;  %v2220_v10 = vpop.permute.xlu1 %2219  ;;  %v4680_v22 = vsel %vm817_vm4, %v14800_v63, %v4679_v24  ;;  %v4681_v43 = vrot.slane %v11399_v46, 6  ;;  %v2400_v47 = vsel %vm814_vm3, %v2382_v5, %v2399_v52 }
 0x84f   :  { %v2401_v54 = vrot.slane %v2383_v19, 7  ;;  %v2259_v9 = vmul.f32 %v2220_v10, %v2179_v21  ;;  %v2403_v33 = vrot.slane %v2384_v37, 6  ;;  %v2357_v14 = vpack.c.bf16 %v11439_v29, %v11439_v29 }
 0x850   :  { %v11456_v1 = vadd.f32 %v11330_v61, %v2263_v39  ;;  %v2184_v2 = vsub.f32 1.0, %v11339_v59  ;;  %v2388_v23 = vunpack.c.l.b16 %v2356_v51  ;;  %v4682_v21 = vsel %vm820_vm5, %v4681_v43, %v4680_v22 }
 0x851   :  { %v11460_v55 = vadd.f32 %v11300_v0, %v2259_v9  ;;  %v2230_v26 = vpop.permute.xlu0 %2229  ;;  %v2402_v34 = vsel %vm817_vm4, %v2401_v54, %v2400_v47  ;;  %v4688_v24 = vrot.slane %v11421_v3, 2  ;;  %v11465_v37 = vadd.f32 %v2326_v35, %v2262_v36 }
 0x852   :  { %v2359_v5 = vpack.c.bf16 %v11456_v1, %v11456_v1  ;;  %v2264_v61 = vmul.f32 %v2230_v26, %v2184_v2  ;;  %v2216_v19 = vpop.permute.xlu1 %2215  ;;  %v2404_v42 = vsel %vm820_vm5, %v2403_v33, %v2402_v34  ;;  %v2389_v52 = vunpack.c.l.b16 %v2357_v14 }
 0x853   :  { %v2355_v59 = vpack.c.bf16 %v11460_v55, %v11460_v55  ;;  %v4687_v0 = vrot.slane %v11460_v55, 3  ;;  %v2257_v51 = vmul.f32 %v2216_v19, %v2177_v31  ;;  %v2185_v35 = vsub.f32 1.0, %v11345_v45 }
 0x854   :  { %v11474_v39 = vadd.f32 %v11351_v27, %v2264_v61  ;;  %v2186_v36 = vsub.f32 1.0, %v11353_v18  ;;  %v2410_v10 = vrot.slane %v2388_v23, 2  ;;  %v2358_v31 = vpack.c.bf16 %v11465_v37, %v11465_v37 }
 0x855   :  { %v2387_v22 = vunpack.c.l.b16 %v2355_v59  ;;  %v4689_v43 = vsel %vm808_vm1, %v4688_v24, %v4687_v0  ;;  %v11480_v54 = vadd.f32 %v11293_v48, %v2257_v51  ;;  %v2232_v9 = vpop.permute.xlu0 %2231  ;;  %v2391_v47 = vunpack.c.l.b16 %v2359_v5 }
 0x856   :  { %v2360_v27 = vpack.c.bf16 %v11474_v39, %v11474_v39  ;;  %v2265_v33 = vmul.f32 %v2232_v9, %v2185_v35  ;;  %v2218_v14 = vpop.permute.xlu1 %2217  ;;  %v2412_v26 = vrot.slane %v2389_v52, 1  ;;  %v4690_v48 = vrot.slane %v11439_v29, 1 }
 0x857   :  { %v2409_v45 = vrot.slane %v2387_v22, 3  ;;  %v2353_v18 = vpack.c.bf16 %v11480_v54, %v11480_v54  ;;  %v4683_v2 = vrot.slane %v11480_v54, 5  ;;  %v2258_v23 = vmul.f32 %v2218_v14, %v2178_v6 }
 0x858   :  { %v2392_v34 = vunpack.c.l.b16 %v2360_v27  ;;  %v11491_v24 = vadd.f32 %v11357_v28, %v2265_v33  ;;  %v2390_v51 = vunpack.c.l.b16 %v2358_v31  ;;  %v14799_v35 = vrot.slane %v11456_v1, 7 }
 0x859   :  { %v2411_v5 = vsel %vm808_vm1, %v2410_v10, %v2409_v45  ;;  %v2385_v61 = vunpack.c.l.b16 %v2353_v18  ;;  %v11495_v19 = vadd.f32 %v11333_v7, %v2258_v23  ;;  %v2234_v59 = vpop.permute.xlu0 %2233  ;;  %v4684_v0 = vsel %vm823_vm6, %v4683_v2, %v4682_v21 }
 0x85a   :  { %v2361_v6 = vpack.c.bf16 %v11491_v24, %v11491_v24  ;;  %v2266_v52 = vmul.f32 %v2234_v59, %v2186_v36  ;;  %v2415_v22 = vrot.slane %v2391_v47, 7  ;;  %v2413_v10 = vsel %vm811_vm2, %v2412_v26, %v2411_v5 }
 0x85b   :  { %v2354_v28 = vpack.c.bf16 %v11495_v19, %v11495_v19  ;;  %v2405_v9 = vrot.slane %v2385_v61, 5  ;;  %v2417_v27 = vrot.slane %v2392_v34, 6  ;;  %v2414_v21 = vsel %vm814_vm3, %v2390_v51, %v2413_v10 }
 0x85c   :  { %v2393_v7 = vunpack.c.l.b16 %v2361_v6  ;;  %v11505_v33 = vadd.f32 %v11361_v25, %v2266_v52  ;;  %v2416_v45 = vsel %vm817_vm4, %v2415_v22, %v2414_v21  ;;  %v4685_v36 = vrot.slane %v11495_v19, 4 }
 0x85d   :  { %v2386_v31 = vunpack.c.l.b16 %v2354_v28  ;;  %v2406_v14 = vsel %vm823_vm6, %v2405_v9, %v2404_v42  ;;  %v4694_v47 = vrot.slane %v11474_v39, 6  ;;  %v2418_v2 = vsel %vm820_vm5, %v2417_v27, %v2416_v45 }
 0x85e   :  { %v2362_v18 = vpack.c.bf16 %v11505_v33, %v11505_v33  ;;  %v2419_v23 = vrot.slane %v2393_v7, 5  ;;  %v4696_v25 = vrot.slane %v11491_v24, 5  ;;  %v11517_v34 = vsel %vm826_vm7, %v4685_v36, %v4684_v0 }
 0x85f   :  { %v2407_v26 = vrot.slane %v2386_v31, 4  ;;  %14942 = vst [vmem:[#allocation16_spill] sm:$0xff] %v11517_v34  ;;  %v4691_v42 = vsel %vm811_vm2, %v4690_v48, %v4689_v43  ;;  %v4698_v51 = vrot.slane %v11505_v33, 4 }
 0x860   :  { %v2394_v5 = vunpack.c.l.b16 %v2362_v18  ;;  %v2420_v61 = vsel %vm823_vm6, %v2419_v23, %v2418_v2  ;;  %v4692_v59 = vsel %vm814_vm3, %v11465_v37, %v4691_v42  ;;  %v14945_v23 = vld [vmem:[#allocation17_spill] sm:$0xff] }
 0x861   :  { %v2408_v6 = vsel %vm826_vm7, %v2407_v26, %v2406_v14  ;;  %v4693_v52 = vsel %vm817_vm4, %v14799_v35, %v4692_v59  ;;  %v14946_v26 = vld [vmem:[#allocation18_spill] sm:$0xff] }
 0x862   :  { %v2421_v22 = vrot.slane %v2394_v5, 4  ;;  %v4695_v0 = vsel %vm820_vm5, %v4694_v47, %v4693_v52 }
 0x863   :  { %v4697_v28 = vsel %vm823_vm6, %v4696_v25, %v4695_v0 }
 0x864   :  { %v2422_v43 = vsel %vm826_vm7, %v2421_v22, %v2420_v61  ;;  %v11532_v48 = vsel %vm826_vm7, %v4698_v51, %v4697_v28  ;;  %v14947_v61 = vld [vmem:[#allocation19_spill] sm:$0xff] }
 0x865   :  { %14943 = vst [vmem:[#allocation42_spill] sm:$0xff] %v11532_v48  ;;  %v2423_v9 = vpack.c.b16 %v2422_v43, %v2408_v6 }
 0x867   :  { %2424 = vrot.lane.b32.xlu1 %v2423_v9, %s9745_s4 }
 0x8d9   :  { %v2425_v10 = vpop.permute.xlu1 %2424 }
 0x8da   :  { %8423 = vmatmul.mubr.msk.bf16.vlgmr.msra.gmra.mrb[40].mxu0 %vm14832_vm0, %v2425_v10 }
 0x8db   :  { %3484 = vmatpush1.bf16.msra.mxu0 %v11174_v44  ;;  %3515 = vmatprep.mubr.bf16.mxu0 %v14874_v12 }
 0x8dc   :  { %3485 = vmatprep.subr.bf16.mxu0 %v11178_v50 }
 0x8df   :  { %3486 = vmatpush1.bf16.msra.mxu0 %v11181_v38 }
 0x8e0   :  { %3487 = vmatprep.subr.bf16.mxu0 %v11184_v32 }
 0x8e3   :  { %3488 = vmatpush1.bf16.msra.mxu0 %v11187_v57 }
 0x8e4   :  { %3489 = vmatprep.subr.bf16.mxu0 %v11190_v40 }
 0x8e7   :  { %3490 = vmatpush1.bf16.msra.mxu0 %v11193_v16  ;;  %v14944_v16 = vld [vmem:[#allocation15_spill] sm:$0xff] }
 0x9ad   :  { %v2463_v27 = vpop.f32.mrb[40].mxu0 }
 0x9ae   :  { %v2474_v7 = vrot.slane %v2463_v27, 4  ;;  %v2475_v21 = vrot.slane %v2463_v27, 5  ;;  %v2476_v31 = vrot.slane %v2463_v27, 6  ;;  %v2477_v14 = vrot.slane %v2463_v27, 7  ;;  %v11544_v44 = vpop.f32.mrb[41].mxu0 }
 0x9af   :  { %v2478_v45 = vrot.slane %v2463_v27, 1  ;;  %v2479_v36 = vrot.slane %v2463_v27, 2  ;;  %v2480_v50 = vrot.slane %v2463_v27, 3  ;;  %v2508_v38 = vadd.f32 %v2463_v27, %v14895_v13  ;;  %v11547_v47 = vpop.f32.mrb[42].mxu0 }
 0x9b0   :  { %v2504_v32 = vadd.f32 %v2474_v7, %v10039_v15  ;;  %v2505_v57 = vadd.f32 %v2475_v21, %v14894_v11  ;;  %v2506_v40 = vadd.f32 %v2476_v31, %v10045_v17  ;;  %v2507_v18 = vadd.f32 %v2477_v14, %v14944_v16  ;;  %v11553_v2 = vpop.f32.mrb[43].mxu0  ;;  %v14948_v21 = vld [vmem:[#allocation20_spill] sm:$0xff]  ;;  %v14949_v14 = vld [vmem:[#allocation21_spill] sm:$0xff] }
 0x9b1   :  { %v2509_v25 = vadd.f32 %v2478_v45, %v14945_v23  ;;  %v2510_v42 = vadd.f32 %v2479_v36, %v14946_v26  ;;  %v8428_v5 = vmul.f32 -1.442695, %v2508_v38  ;;  %v2511_v59 = vadd.f32 %v2480_v50, %v14947_v61  ;;  %v14950_v36 = vld [vmem:[#allocation22_spill] sm:$0xff]  ;;  %v14951_v38 = vld [vmem:[#allocation23_spill] sm:$0xff] }
 0x9b2   :  { %v8424_v51 = vmul.f32 -1.442695, %v2504_v32  ;;  %v8425_v6 = vmul.f32 -1.442695, %v2505_v57  ;;  %v8426_v52 = vmul.f32 -1.442695, %v2506_v40 }
 0x9b3   :  { %v8427_v22 = vmul.f32 -1.442695, %v2507_v18  ;;  %9091 = vpow2.f32 %v8428_v5  ;;  %v8429_v0 = vmul.f32 -1.442695, %v2509_v25  ;;  %v2481_v28 = vrot.slane %v11547_v47, 4  ;;  %v14952_v57 = vld [vmem:[#allocation24_spill] sm:$0xff] }
 0x9b4   :  { %9093 = vpow2.f32 %v8424_v51  ;;  %v2482_v43 = vrot.slane %v11547_v47, 5  ;;  %v8430_v9 = vmul.f32 -1.442695, %v2510_v42  ;;  %v2483_v10 = vrot.slane %v11547_v47, 6 }
 0x9b5   :  { %9095 = vpow2.f32 %v8425_v6  ;;  %v2484_v27 = vrot.slane %v11547_v47, 7  ;;  %v8431_v7 = vmul.f32 -1.442695, %v2511_v59  ;;  %v2512_v31 = vadd.f32 %v2481_v28, %v14948_v21 }
 0x9b6   :  { %9097 = vpow2.f32 %v8426_v52  ;;  %v2513_v45 = vadd.f32 %v2482_v43, %v14949_v14  ;;  %v2514_v50 = vadd.f32 %v2483_v10, %v14950_v36  ;;  %v2516_v40 = vadd.f32 %v11547_v47, %v14952_v57 }
 0x9b7   :  { %9099 = vpow2.f32 %v8427_v22  ;;  %v2515_v32 = vadd.f32 %v2484_v27, %v14951_v38  ;;  %v8432_v18 = vmul.f32 -1.442695, %v2512_v31  ;;  %v2485_v51 = vrot.slane %v11547_v47, 1 }
 0x9b8   :  { %9101 = vpow2.f32 %v8429_v0  ;;  %v8433_v25 = vmul.f32 -1.442695, %v2513_v45  ;;  %v8434_v42 = vmul.f32 -1.442695, %v2514_v50  ;;  %v8436_v59 = vmul.f32 -1.442695, %v2516_v40 }
 0x9b9   :  { %9103 = vpow2.f32 %v8430_v9  ;;  %v8435_v5 = vmul.f32 -1.442695, %v2515_v32  ;;  %v2486_v52 = vrot.slane %v11547_v47, 2  ;;  %v2487_v28 = vrot.slane %v11547_v47, 3  ;;  %v14954_v32 = vld [vmem:[#allocation26_spill] sm:$0xff] }
 0x9ba   :  { %9105 = vpow2.f32 %v8431_v7  ;;  %v14953_v7 = vld [vmem:[#allocation25_spill] sm:$0xff] }
 0x9bb   :  { %9107 = vpow2.f32 %v8432_v18  ;;  %v2517_v31 = vadd.f32 %v2485_v51, %v14953_v7  ;;  %v2518_v40 = vadd.f32 %v2486_v52, %v14954_v32  ;;  %v11574_v51 = vld [vmem:[#allocation5] ss:$0 sm:$0xff] }
 0x9bc   :  { %9109 = vpow2.f32 %v8433_v25  ;;  %14956 = vst [vmem:[#allocation45_spill] sm:$0xff] %v11574_v51  ;;  %v11578_v52 = vadd.f32 %v11574_v51, %v11544_v44  ;;  %v2812_v44 = vrot.slane %v11410_v58, 7 }
 0x9bd   :  { %v9092_v6 = vpop.eup %9091  ;;  %9111 = vpow2.f32 %v8434_v42  ;;  %v14955_v42 = vld [vmem:[#allocation27_spill] sm:$0xff] }
 0x9be   :  { %v9094_v22 = vpop.eup %9093  ;;  %v2572_v0 = vadd.f32 1.0, %v9092_v6  ;;  %9113 = vpow2.f32 %v8435_v5  ;;  %v2519_v6 = vadd.f32 %v2487_v28, %v14955_v42 }
 0x9bf   :  { %v9096_v43 = vpop.eup %9095  ;;  %v2568_v9 = vadd.f32 1.0, %v9094_v22  ;;  %9115 = vpow2.f32 %v8436_v59 }
 0x9c0   :  { %v9098_v10 = vpop.eup %9097  ;;  %v2569_v27 = vadd.f32 1.0, %v9096_v43  ;;  %9117 = vrcp.f32 %v2572_v0  ;;  %v8437_v43 = vmul.f32 -1.442695, %v2517_v31  ;;  %v8439_v28 = vmul.f32 -1.442695, %v2519_v6 }
 0x9c1   :  { %v9100_v45 = vpop.eup %9099  ;;  %v2570_v50 = vadd.f32 1.0, %v9098_v10  ;;  %9119 = vrcp.f32 %v2568_v9  ;;  %v8438_v9 = vmul.f32 -1.442695, %v2518_v40  ;;  %v2811_v31 = vrot.slane %v11386_v8, 7 }
 0x9c2   :  { %v9102_v18 = vpop.eup %9101  ;;  %v2571_v25 = vadd.f32 1.0, %v9100_v45  ;;  %9121 = vrcp.f32 %v2569_v27  ;;  %v11587_v6 = vadd.f32 %v11574_v51, %v11553_v2  ;;  %v2622_v2 = vrot.slane %v11578_v52, 6 }
 0x9c3   :  { %v9104_v47 = vpop.eup %9103  ;;  %v2573_v5 = vadd.f32 1.0, %v9102_v18  ;;  %9123 = vrcp.f32 %v2570_v50  ;;  %v2810_v18 = vrot.slane %v11392_v60, 7  ;;  %v2620_v60 = vrot.slane %v11578_v52, 4 }
 0x9c4   :  { %v9106_v22 = vpop.eup %9105  ;;  %v2574_v59 = vadd.f32 1.0, %v9104_v47  ;;  %9125 = vrcp.f32 %v2571_v25  ;;  %v2624_v27 = vrot.slane %v11578_v52, 1 }
 0x9c5   :  { %v9108_v0 = vpop.eup %9107  ;;  %v2575_v35 = vadd.f32 1.0, %v9106_v22  ;;  %9127 = vrcp.f32 %v2573_v5  ;;  %v2816_v5 = vrot.slane %v11480_v54, 7 }
 0x9c6   :  { %v9110_v10 = vpop.eup %9109  ;;  %9129 = vrcp.f32 %v2574_v59  ;;  %v2576_v50 = vadd.f32 1.0, %v9108_v0 }
 0x9c7   :  { %v9112_v45 = vpop.eup %9111  ;;  %9131 = vrcp.f32 %v2575_v35  ;;  %v2577_v47 = vadd.f32 1.0, %v9110_v10  ;;  %v2621_v35 = vrot.slane %v11578_v52, 5 }
 0x9c8   :  { %v9114_v25 = vpop.eup %9113  ;;  %9133 = vpow2.f32 %v8437_v43  ;;  %v2578_v22 = vadd.f32 1.0, %v9112_v45  ;;  %v2625_v43 = vrot.slane %v11578_v52, 2 }
 0x9c9   :  { %v9116_v40 = vpop.eup %9115  ;;  %9135 = vpow2.f32 %v8438_v9  ;;  %v2579_v8 = vadd.f32 1.0, %v9114_v25 }
 0x9ca   :  { %v11590_v59 = vpop.eup %9117  ;;  %9137 = vpow2.f32 %v8439_v28  ;;  %v2580_v58 = vadd.f32 1.0, %v9116_v40  ;;  %v2623_v28 = vrot.slane %v11578_v52, 7  ;;  %v14957_v40 = vld [vmem:[#allocation34_spill] sm:$0xff] }
 0x9cb   :  { %v11594_v54 = vpop.eup %9119  ;;  %9139 = vrcp.f32 %v2576_v50  ;;  %v2654_v0 = vmul.f32 %v11590_v59, %v11578_v52 }
 0x9cc   :  { %v11599_v9 = vpop.eup %9121  ;;  %9141 = vrcp.f32 %v2577_v47  ;;  %v2650_v10 = vmul.f32 %v11594_v54, %v2620_v60  ;;  %v11604_v45 = vmul.f32 %v11594_v54, %v2810_v18  ;;  %v2626_v60 = vrot.slane %v11578_v52, 3 }
 0x9cd   :  { %v11606_v25 = vpop.eup %9123  ;;  %9143 = vrcp.f32 %v2578_v22  ;;  %v2670_v50 = vadd.f32 %v2654_v0, %v14957_v40  ;;  %v2651_v63 = vmul.f32 %v11599_v9, %v2621_v35  ;;  %v11616_v34 = vmul.f32 %v11599_v9, %v2811_v31  ;;  %v14958_v22 = vld [vmem:[#allocation30_spill] sm:$0xff]  ;;  %v14959_v0 = vld [vmem:[#allocation29_spill] sm:$0xff] }
 0x9ce   :  { %v11611_v48 = vpop.eup %9125  ;;  %9145 = vrcp.f32 %v2579_v8  ;;  %v2652_v47 = vmul.f32 %v11606_v25, %v2622_v2  ;;  %v2666_v40 = vadd.f32 %v2650_v10, %v14959_v0  ;;  %v14960_v8 = vld [vmem:[#allocation31_spill] sm:$0xff]  ;;  %v11628_v52 = vmul.f32 %v11606_v25, %v2812_v44 }
 0x9cf   :  { %v11618_v18 = vpop.eup %9127  ;;  %9147 = vrcp.f32 %v2580_v58  ;;  %v2667_v51 = vadd.f32 %v2651_v63, %v14958_v22  ;;  %v2653_v35 = vmul.f32 %v11611_v48, %v2623_v28  ;;  %v2819_v63 = vrot.slane %v11421_v3, 7 }
 0x9d0   :  { %v11623_v42 = vpop.eup %9129  ;;  %9149 = vtanh.f32 %v2670_v50  ;;  %v2668_v32 = vadd.f32 %v2652_v47, %v14960_v8  ;;  %v2655_v2 = vmul.f32 %v11618_v18, %v2624_v27  ;;  %v2815_v10 = vrot.slane %v11399_v46, 7 }
 0x9d1   :  { %v11630_v31 = vpop.eup %9131  ;;  %9151 = vtanh.f32 %v2667_v51  ;;  %v2656_v58 = vmul.f32 %v11623_v42, %v2625_v43  ;;  %v11639_v50 = vmul.f32 %v11623_v42, %v2816_v5  ;;  %v2820_v27 = vrot.slane %v11439_v29, 7 }
 0x9d2   :  { %v9134_v28 = vpop.eup %9133  ;;  %v11636_v22 = vmul.f32 %v11630_v31, %v2626_v60  ;;  %v2818_v44 = vrot.slane %v11460_v55, 7  ;;  %9153 = vtanh.f32 %v2666_v40  ;;  %v2628_v51 = vrot.slane %v11587_v6, 5 }
 0x9d3   :  { %v9136_v47 = vpop.eup %9135  ;;  %v2581_v8 = vadd.f32 1.0, %v9134_v28  ;;  %v2627_v3 = vrot.slane %v11587_v6, 4  ;;  %v2672_v0 = vadd.f32 %v2656_v58, %v14915_v56  ;;  %9155 = vtanh.f32 %v2668_v32 }
 0x9d4   :  { %v9138_v43 = vpop.eup %9137  ;;  %v2582_v46 = vadd.f32 1.0, %v9136_v47  ;;  %v14961_v60 = vrot.slane %v11405_v49, 7  ;;  %v2629_v40 = vrot.slane %v11587_v6, 6  ;;  %v11655_v28 = vmul.f32 %v11618_v18, %v2815_v10 }
 0x9d5   :  { %v11651_v29 = vpop.eup %9139  ;;  %v2583_v55 = vadd.f32 1.0, %v9138_v43  ;;  %9157 = vrcp.f32 %v2581_v8  ;;  %v2630_v58 = vrot.slane %v11587_v6, 7  ;;  %v14962_v43 = vld [vmem:[#allocation32_spill] sm:$0xff] }
 0x9d6   :  { %v11649_v5 = vmul.f32 %v11611_v48, %v14961_v60  ;;  %v11657_v7 = vpop.eup %9141  ;;  %9159 = vrcp.f32 %v2582_v46  ;;  %v2658_v32 = vmul.f32 %v11651_v29, %v2627_v3  ;;  %v11662_v49 = vmul.f32 %v11651_v29, %v2818_v44  ;;  %v14963_v3 = vld [vmem:[#allocation39_spill] sm:$0xff] }
 0x9d7   :  { %v11664_v47 = vpop.eup %9143  ;;  %9161 = vrcp.f32 %v2583_v55  ;;  %v2659_v8 = vmul.f32 %v11657_v7, %v2628_v51  ;;  %v2669_v60 = vadd.f32 %v2653_v35, %v14962_v43  ;;  %v11669_v10 = vmul.f32 %v11657_v7, %v2819_v63 }
 0x9d8   :  { %v11671_v56 = vpop.eup %9145  ;;  %9163 = vtanh.f32 %v2672_v0  ;;  %v2660_v46 = vmul.f32 %v11664_v47, %v2629_v40  ;;  %v11679_v55 = vmul.f32 %v11664_v47, %v2820_v27  ;;  %v2821_v51 = vrot.slane %v11465_v37, 7  ;;  %v14964_v0 = vld [vmem:[#allocation37_spill] sm:$0xff]  ;;  %v14965_v27 = vld [vmem:[#allocation35_spill] sm:$0xff] }
 0x9d9   :  { %v11674_v57 = vpop.eup %9147  ;;  %v2675_v44 = vadd.f32 %v2659_v8, %v14963_v3  ;;  %v2661_v38 = vmul.f32 %v11671_v56, %v2630_v58  ;;  %9165 = vtanh.f32 %v2669_v60  ;;  %v2671_v40 = vadd.f32 %v2655_v2, %v14964_v0 }
 0x9da   :  { %v9150_v35 = vpop.eup %9149  ;;  %v2662_v63 = vmul.f32 %v11674_v57, %v11587_v6  ;;  %v11687_v36 = vmul.f32 %v11671_v56, %v2821_v51  ;;  %v2817_v58 = vrot.slane %v11495_v19, 7  ;;  %v2676_v37 = vadd.f32 %v2660_v46, %v14965_v27 }
 0x9db   :  { %v9152_v43 = vpop.eup %9151  ;;  %2738 = vrot.lane.b32.xlu0 %v9150_v35, %s9745_s4  ;;  %9167 = vtanh.f32 %v2675_v44  ;;  %v2631_v35 = vrot.slane %v11587_v6, 1  ;;  %v2823_v60 = vrot.slane %v11474_v39, 7  ;;  %v2824_v2 = vrot.slane %v11491_v24, 7 }
 0x9dc   :  { %2732 = vrot.lane.b32.xlu1 %v9152_v43, %s9745_s4  ;;  %v9154_v8 = vpop.eup %9153  ;;  %v11693_v3 = vmul.f32 %v11630_v31, %v2817_v58  ;;  %v2825_v51 = vrot.slane %v11505_v33, 7  ;;  %9169 = vtanh.f32 %v2671_v40  ;;  %v2674_v19 = vadd.f32 %v2658_v32, %v14937_v62  ;;  %v14966_v58 = vld [vmem:[#allocation36_spill] sm:$0xff] }
 0x9dd   :  { %v9156_v14 = vpop.eup %9155  ;;  %v2632_v43 = vrot.slane %v11587_v6, 2  ;;  %v2633_v46 = vrot.slane %v11587_v6, 3  ;;  %9171 = vtanh.f32 %v2676_v37  ;;  %v2677_v39 = vadd.f32 %v2661_v38, %v14966_v58  ;;  %v14967_v38 = vld [vmem:[#allocation38_spill] sm:$0xff] }
 0x9de   :  { %9173 = vtanh.f32 %v2674_v19  ;;  %v2678_v37 = vadd.f32 %v2662_v63, %v14967_v38 }
 0x9df   :  { %v11699_v0 = vpop.eup %9157  ;;  %2730 = vrot.lane.b32.xlu0 %v9154_v8, %s9745_s4  ;;  %9175 = vtanh.f32 %v2677_v39 }
 0x9e0   :  { %v11705_v44 = vpop.eup %9159  ;;  %v2663_v24 = vmul.f32 %v11699_v0, %v2631_v35  ;;  %v11710_v33 = vmul.f32 %v11699_v0, %v2823_v60  ;;  %9177 = vtanh.f32 %v2678_v37 }
 0x9e1   :  { %v11712_v27 = vpop.eup %9161  ;;  %v2664_v40 = vmul.f32 %v11705_v44, %v2632_v43  ;;  %v11716_v32 = vmul.f32 %v11705_v44, %v2824_v2  ;;  %v2673_v2 = vadd.f32 %v11636_v22, %v14938_v41 }
 0x9e2   :  { %v9164_v8 = vpop.eup %9163  ;;  %v2665_v6 = vmul.f32 %v11712_v27, %v2633_v46  ;;  %v11720_v62 = vmul.f32 %v11712_v27, %v2825_v51  ;;  %v2679_v35 = vadd.f32 %v2663_v24, %v14884_v30 }
 0x9e3   :  { %2742 = vrot.lane.b32.xlu1 %v9164_v8, %s9745_s4  ;;  %2734 = vrot.lane.b32.xlu0 %v9156_v14, %s9745_s4  ;;  %v9166_v60 = vpop.eup %9165  ;;  %v2680_v51 = vadd.f32 %v2664_v40, %v14916_v53 }
 0x9e4   :  { %9179 = vtanh.f32 %v2679_v35  ;;  %v2681_v63 = vadd.f32 %v2665_v6, %v14939_v4  ;;  %v2699_v35 = vsub.f32 1.0, %v11599_v9  ;;  %v2700_v9 = vsub.f32 1.0, %v11606_v25 }
 0x9e5   :  { %v9168_v43 = vpop.eup %9167  ;;  %9181 = vtanh.f32 %v2673_v2  ;;  %v2698_v2 = vsub.f32 1.0, %v11594_v54 }
 0x9e6   :  { %v9170_v14 = vpop.eup %9169  ;;  %9183 = vtanh.f32 %v2680_v51 }
 0x9e7   :  { %2748 = vrot.lane.b32.xlu1 %v9168_v43, %s9745_s4  ;;  %2736 = vrot.lane.b32.xlu0 %v9166_v60, %s9745_s4  ;;  %v9172_v19 = vpop.eup %9171  ;;  %9185 = vtanh.f32 %v2681_v63  ;;  %v2702_v63 = vsub.f32 1.0, %v11590_v59 }
 0x9e8   :  { %v9174_v46 = vpop.eup %9173 }
 0x9e9   :  { %v9176_v39 = vpop.eup %9175 }
 0x9ea   :  { %v9178_v22 = vpop.eup %9177 }
 0x9eb   :  { %2750 = vrot.lane.b32.xlu1 %v9172_v19, %s9745_s4  ;;  %2740 = vrot.lane.b32.xlu0 %v9170_v14, %s9745_s4 }
 0x9ee   :  { %v9180_v24 = vpop.eup %9179 }
 0x9ef   :  { %2752 = vrot.lane.b32.xlu1 %v9176_v39, %s9745_s4  ;;  %2746 = vrot.lane.b32.xlu0 %v9174_v46, %s9745_s4  ;;  %v9182_v40 = vpop.eup %9181 }
 0x9f0   :  { %v9184_v8 = vpop.eup %9183 }
 0x9f1   :  { %v9186_v6 = vpop.eup %9185 }
 0x9f3   :  { %2756 = vrot.lane.b32.xlu1 %v9180_v24, %s9745_s4  ;;  %2754 = vrot.lane.b32.xlu0 %v9178_v22, %s9745_s4  ;;  %v2704_v22 = vsub.f32 1.0, %v11623_v42  ;;  %v2701_v42 = vsub.f32 1.0, %v11611_v48 }
 0x9f7   :  { %2758 = vrot.lane.b32.xlu1 %v9184_v8, %s9745_s4  ;;  %2744 = vrot.lane.b32.xlu0 %v9182_v40, %s9745_s4 }
 0x9fb   :  { %2760 = vrot.lane.b32.xlu1 %v9186_v6, %s9745_s4 }
 0xa4d   :  { %v2739_v37 = vpop.permute.xlu0 %2738 }
 0xa4e   :  { %v2733_v60 = vpop.permute.xlu1 %2732  ;;  %v2782_v24 = vmul.f32 %v2739_v37, %v2702_v63 }
 0xa4f   :  { %v2779_v43 = vmul.f32 %v2733_v60, %v2699_v35 }
 0xa51   :  { %v11744_v51 = vadd.f32 %v11616_v34, %v2779_v43  ;;  %v2731_v14 = vpop.permute.xlu0 %2730 }
 0xa52   :  { %v2778_v19 = vmul.f32 %v2731_v14, %v2698_v2 }
 0xa53   :  { %v2875_v46 = vpack.c.bf16 %v11744_v51, %v11744_v51  ;;  %v4707_v54 = vrot.slane %v11744_v51, 3 }
 0xa54   :  { %v11750_v39 = vadd.f32 %v11604_v45, %v2778_v19  ;;  %v14968_v45 = vrot.slane %v11427_v20, 7  ;;  %v2703_v20 = vsub.f32 1.0, %v11618_v18  ;;  %v2709_v18 = vsub.f32 1.0, %v11671_v56 }
 0xa55   :  { %v2907_v40 = vunpack.c.l.b16 %v2875_v46  ;;  %v2743_v34 = vpop.permute.xlu1 %2742  ;;  %v2735_v8 = vpop.permute.xlu0 %2734  ;;  %v2707_v46 = vsub.f32 1.0, %v11657_v7  ;;  %v2708_v7 = vsub.f32 1.0, %v11664_v47 }
 0xa56   :  { %v2874_v6 = vpack.c.bf16 %v11750_v39, %v11750_v39  ;;  %v4706_v35 = vrot.slane %v11750_v39, 4  ;;  %v2784_v60 = vmul.f32 %v2743_v34, %v2704_v22  ;;  %v2780_v43 = vmul.f32 %v2735_v8, %v2700_v9 }
 0xa57   :  { %v2846_v2 = vmul.f32 %v11590_v59, %v14968_v45  ;;  %v2706_v59 = vsub.f32 1.0, %v11651_v29  ;;  %v2923_v48 = vrot.slane %v2907_v40, 3  ;;  %v2710_v29 = vsub.f32 1.0, %v11674_v57 }
 0xa58   :  { %v2906_v25 = vunpack.c.l.b16 %v2874_v6  ;;  %v4708_v37 = vsel %vm808_vm1, %v4707_v54, %v4706_v35  ;;  %v11764_v14 = vadd.f32 %v11639_v50, %v2784_v60  ;;  %v11767_v19 = vadd.f32 %v11628_v52, %v2780_v43 }
 0xa59   :  { %v11769_v63 = vadd.f32 %v2846_v2, %v2782_v24  ;;  %v2749_v22 = vpop.permute.xlu1 %2748  ;;  %v2737_v9 = vpop.permute.xlu0 %2736 }
 0xa5a   :  { %v2922_v34 = vrot.slane %v2906_v25, 4  ;;  %v2880_v54 = vpack.c.bf16 %v11764_v14, %v11764_v14  ;;  %v2876_v50 = vpack.c.bf16 %v11767_v19, %v11767_v19  ;;  %v4709_v52 = vrot.slane %v11767_v19, 2 }
 0xa5b   :  { %v2787_v24 = vmul.f32 %v2749_v22, %v2707_v46  ;;  %v2781_v8 = vmul.f32 %v2737_v9, %v2701_v42  ;;  %v2878_v40 = vpack.c.bf16 %v11769_v63, %v11769_v63 }
 0xa5c   :  { %v2924_v6 = vsel %vm808_vm1, %v2923_v48, %v2922_v34  ;;  %v2908_v35 = vunpack.c.l.b16 %v2876_v50  ;;  %v4710_v60 = vsel %vm811_vm2, %v4709_v52, %v4708_v37  ;;  %v11792_v42 = vunpack.c.l.b16 %v2880_v54 }
 0xa5d   :  { %v11787_v43 = vadd.f32 %v11669_v10, %v2787_v24  ;;  %v11790_v45 = vadd.f32 %v11649_v5, %v2781_v8  ;;  %v2751_v2 = vpop.permute.xlu1 %2750  ;;  %v2741_v47 = vpop.permute.xlu0 %2740  ;;  %v14969_v37 = vrot.slane %v11456_v1, 7  ;;  %v2705_v48 = vsub.f32 1.0, %v11630_v31 }
 0xa5e   :  { %v2925_v25 = vrot.slane %v2908_v35, 2  ;;  %v2788_v46 = vmul.f32 %v2751_v2, %v2708_v7  ;;  %v2783_v56 = vmul.f32 %v2741_v47, %v2703_v20  ;;  %v2711_v1 = vsub.f32 1.0, %v11699_v0 }
 0xa5f   :  { %v2877_v22 = vpack.c.bf16 %v11790_v45, %v11790_v45  ;;  %v4711_v9 = vrot.slane %v11790_v45, 1  ;;  %v2854_v10 = vmul.f32 %v11674_v57, %v14969_v37  ;;  %v2883_v5 = vpack.c.bf16 %v11787_v43, %v11787_v43 }
 0xa60   :  { %v11804_v34 = vadd.f32 %v11679_v55, %v2788_v46  ;;  %v11807_v54 = vadd.f32 %v11655_v28, %v2783_v56  ;;  %v2926_v20 = vsel %vm811_vm2, %v2925_v25, %v2924_v6  ;;  %v2712_v57 = vsub.f32 1.0, %v11705_v44 }
 0xa61   :  { %v2909_v50 = vunpack.c.l.b16 %v2877_v22  ;;  %v2753_v52 = vpop.permute.xlu1 %2752  ;;  %v2747_v24 = vpop.permute.xlu0 %2746  ;;  %v4712_v31 = vsel %vm814_vm3, %v4711_v9, %v4710_v60  ;;  %v2910_v8 = vunpack.c.l.b16 %v2878_v40  ;;  %v2713_v55 = vsub.f32 1.0, %v11712_v27 }
 0xa62   :  { %v2879_v7 = vpack.c.bf16 %v11807_v54, %v11807_v54  ;;  %v2932_v28 = vrot.slane %v11792_v42, 6  ;;  %v2884_v6 = vpack.c.bf16 %v11804_v34, %v11804_v34  ;;  %v2789_v2 = vmul.f32 %v2753_v52, %v2709_v18 }
 0xa63   :  { %v2927_v35 = vrot.slane %v2909_v50, 1  ;;  %v2786_v47 = vmul.f32 %v2747_v24, %v2706_v59  ;;  %v2915_v25 = vunpack.c.l.b16 %v2883_v5  ;;  %v4720_v0 = vrot.slane %v11787_v43, 3 }
 0xa64   :  { %v2911_v44 = vunpack.c.l.b16 %v2879_v7  ;;  %v4713_v40 = vsel %vm817_vm4, %v11769_v63, %v4712_v31  ;;  %v4722_v60 = vrot.slane %v11804_v34, 2  ;;  %v11824_v46 = vadd.f32 %v11687_v36, %v2789_v2 }
 0xa65   :  { %v11827_v27 = vadd.f32 %v11662_v49, %v2786_v47  ;;  %v2757_v42 = vpop.permute.xlu1 %2756  ;;  %v2755_v56 = vpop.permute.xlu0 %2754  ;;  %v2928_v18 = vsel %vm814_vm3, %v2927_v35, %v2926_v20  ;;  %v14806_v22 = vrot.slane %v11807_v54, 7  ;;  %v2916_v5 = vunpack.c.l.b16 %v2884_v6 }
 0xa66   :  { %v2930_v59 = vrot.slane %v2911_v44, 7  ;;  %v2791_v9 = vmul.f32 %v2757_v42, %v2711_v1  ;;  %v2790_v37 = vmul.f32 %v2755_v56, %v2710_v29  ;;  %v2885_v50 = vpack.c.bf16 %v11824_v46, %v11824_v46 }
 0xa67   :  { %v2882_v36 = vpack.c.bf16 %v11827_v27, %v11827_v27  ;;  %v4719_v52 = vrot.slane %v11827_v27, 4  ;;  %v4724_v49 = vrot.slane %v11824_v46, 1  ;;  %v2929_v31 = vsel %vm817_vm4, %v2910_v8, %v2928_v18 }
 0xa68   :  { %v11838_v24 = vadd.f32 %v11710_v33, %v2791_v9  ;;  %v11840_v20 = vadd.f32 %v2854_v10, %v2790_v37  ;;  %v2917_v1 = vunpack.c.l.b16 %v2885_v50  ;;  %v2931_v2 = vsel %vm820_vm5, %v2930_v59, %v2929_v31 }
 0xa69   :  { %v2914_v29 = vunpack.c.l.b16 %v2882_v36  ;;  %v4721_v7 = vsel %vm808_vm1, %v4720_v0, %v4719_v52  ;;  %v2759_v35 = vpop.permute.xlu1 %2758  ;;  %v2745_v6 = vpop.permute.xlu0 %2744  ;;  %v2937_v47 = vrot.slane %v2915_v25, 3  ;;  %v2939_v10 = vrot.slane %v2916_v5, 2 }
 0xa6a   :  { %v2887_v44 = vpack.c.bf16 %v11838_v24, %v11838_v24  ;;  %v4723_v42 = vsel %vm811_vm2, %v4722_v60, %v4721_v7  ;;  %v2886_v33 = vpack.c.bf16 %v11840_v20, %v11840_v20  ;;  %v2792_v18 = vmul.f32 %v2759_v35, %v2712_v57 }
 0xa6b   :  { %v2936_v56 = vrot.slane %v2914_v29, 4  ;;  %v4725_v8 = vsel %vm814_vm3, %v4724_v49, %v4723_v42  ;;  %v2785_v59 = vmul.f32 %v2745_v6, %v2705_v48  ;;  %v2941_v25 = vrot.slane %v2917_v1, 1 }
 0xa6c   :  { %v2919_v9 = vunpack.c.l.b16 %v2887_v44  ;;  %v2918_v0 = vunpack.c.l.b16 %v2886_v33  ;;  %v4726_v37 = vsel %vm817_vm4, %v11840_v20, %v4725_v8  ;;  %v11855_v36 = vadd.f32 %v11716_v32, %v2792_v18 }
 0xa6d   :  { %v2938_v50 = vsel %vm808_vm1, %v2937_v47, %v2936_v56  ;;  %v2761_v60 = vpop.permute.xlu1 %2760  ;;  %v2933_v52 = vsel %vm823_vm6, %v2932_v28, %v2931_v2  ;;  %v11859_v5 = vadd.f32 %v11693_v3, %v2785_v59  ;;  %v4714_v31 = vsel %vm820_vm5, %v14806_v22, %v4713_v40 }
 0xa6e   :  { %v2793_v49 = vmul.f32 %v2761_v60, %v2713_v55  ;;  %v2940_v57 = vsel %vm811_vm2, %v2939_v10, %v2938_v50  ;;  %v4715_v48 = vrot.slane %v11764_v14, 6  ;;  %v2944_v1 = vrot.slane %v2919_v9, 7 }
 0xa6f   :  { %v2888_v32 = vpack.c.bf16 %v11855_v36, %v11855_v36  ;;  %v2942_v29 = vsel %vm814_vm3, %v2941_v25, %v2940_v57  ;;  %v4728_v28 = vrot.slane %v11855_v36, 6  ;;  %v2881_v55 = vpack.c.bf16 %v11859_v5, %v11859_v5  ;;  %v9637_v57 = vld [vmem:[#allocation2] ss:$8 sps:$4 sm:$0xff]  }
 0xa70   :  { %v11871_v3 = vadd.f32 %v11720_v62, %v2793_v49  ;;  %v2943_v7 = vsel %vm817_vm4, %v2918_v0, %v2942_v29  ;;  %v14805_v40 = vrot.slane %v11838_v24, 7  ;;  %v4716_v2 = vsel %vm823_vm6, %v4715_v48, %v4714_v31  ;;  %v9638_v31 = vld [vmem:[#allocation2 + $0x14] ss:$8 sps:$4 sm:$0xff]   ;;  %v9639_v48 = vld [vmem:[#allocation2 + $0x10] ss:$8 sps:$4 sm:$0xff]  }
 0xa71   :  { %v2920_v35 = vunpack.c.l.b16 %v2888_v32  ;;  %v2945_v6 = vsel %vm820_vm5, %v2944_v1, %v2943_v7  ;;  %v2913_v44 = vunpack.c.l.b16 %v2881_v55  ;;  %v4717_v42 = vrot.slane %v11859_v5, 5  ;;  %v9640_v1 = vld [vmem:[#allocation2 + $0x24] ss:$8 sps:$4 sm:$0xff]   ;;  %v9642_v32 = vld [vmem:[#allocation2 + $0x34] ss:$8 sps:$4 sm:$0xff]  }
 0xa72   :  { %v2889_v47 = vpack.c.bf16 %v11871_v3, %v11871_v3  ;;  %v4727_v33 = vsel %vm820_vm5, %v14805_v40, %v4726_v37  ;;  %v4730_v10 = vrot.slane %v11871_v3, 5  ;;  %v9643_v29 = vld [vmem:[#allocation2 + $0x30] ss:$8 sps:$4 sm:$0xff]  }
 0xa73   :  { %v2946_v62 = vrot.slane %v2920_v35, 6  ;;  %v2934_v8 = vrot.slane %v2913_v44, 5  ;;  %v11887_v18 = vsel %vm826_vm7, %v4717_v42, %v4716_v2  ;;  %v4729_v9 = vsel %vm823_vm6, %v4728_v28, %v4727_v33 }
 0xa74   :  { %v2921_v56 = vunpack.c.l.b16 %v2889_v47  ;;  %14970 = vst [vmem:[#allocation44_spill] sm:$0xff] %v11887_v18  ;;  %v11892_v59 = vsel %vm826_vm7, %v4730_v10, %v4729_v9 }
 0xa75   :  { %v2947_v0 = vsel %vm823_vm6, %v2946_v62, %v2945_v6  ;;  %14971 = vst [vmem:[#allocation15_spill] sm:$0xff] %v11892_v59  ;;  %v2935_v25 = vsel %vm826_vm7, %v2934_v8, %v2933_v52  ;;  %v9641_v52 = vld [vmem:[#allocation2 + $0x20] ss:$8 sps:$4 sm:$0xff]  }
 0xa76   :  { %v2948_v50 = vrot.slane %v2921_v56, 5 }
 0xa78   :  { %v2949_v60 = vsel %vm826_vm7, %v2948_v50, %v2947_v0 }
 0xa79   :  { %v2950_v37 = vpack.c.b16 %v2949_v60, %v2935_v25 }
 0xa7b   :  { %2951 = vrot.lane.b32.xlu0 %v2950_v37, %s9745_s4 }
 0xaed   :  { %v2952_v49 = vpop.permute.xlu0 %2951 }
 0xaee   :  { %8440 = vmatmul.mubr.msk.bf16.vlgmr.msra.gmra.mrb[8].mxu1 %vm14832_vm0, %v2952_v49 }
 0xaef   :  { %4011 = vmatpush1.bf16.msra.mxu1 %v9637_v57  ;;  %4042 = vmatprep.mubr.bf16.mxu1 %v14874_v12 }
 0xaf0   :  { %4012 = vmatprep.subr.bf16.mxu1 %v9638_v31 }
 0xaf3   :  { %4013 = vmatpush1.bf16.msra.mxu1 %v9639_v48 }
 0xaf4   :  { %4014 = vmatprep.subr.bf16.mxu1 %v9640_v1 }
 0xaf7   :  { %4015 = vmatpush1.bf16.msra.mxu1 %v9641_v52 }
 0xaf8   :  { %4016 = vmatprep.subr.bf16.mxu1 %v9642_v32 }
 0xafb   :  { %4017 = vmatpush1.bf16.msra.mxu1 %v9643_v29 }
 0xafc   :  { %7065 = vmatprep.subr.bf16.mxu1 %v14874_v12 }
 0xbc1   :  { %v2990_v28 = vpop.f32.mrb[8].mxu1 }
 0xbc2   :  { %v3001_v55 = vrot.slane %v2990_v28, 3  ;;  %v3002_v7 = vrot.slane %v2990_v28, 4  ;;  %v3003_v35 = vrot.slane %v2990_v28, 5  ;;  %v3004_v6 = vrot.slane %v2990_v28, 6  ;;  %v11900_v2 = vpop.f32.mrb[9].mxu1 }
 0xbc3   :  { %v3005_v47 = vrot.slane %v2990_v28, 7  ;;  %v3006_v44 = vrot.slane %v2990_v28, 1  ;;  %v3007_v42 = vrot.slane %v2990_v28, 2  ;;  %v3036_v62 = vadd.f32 %v2990_v28, %v14945_v23  ;;  %v11903_v33 = vpop.f32.mrb[10].mxu1 }
 0xbc4   :  { %v3031_v10 = vadd.f32 %v3001_v55, %v10039_v15  ;;  %v3032_v56 = vadd.f32 %v3002_v7, %v14894_v11  ;;  %v3033_v8 = vadd.f32 %v3003_v35, %v10045_v17  ;;  %v3034_v9 = vadd.f32 %v3004_v6, %v14944_v16  ;;  %v11909_v0 = vpop.f32.mrb[11].mxu1 }
 0xbc5   :  { %v3035_v25 = vadd.f32 %v3005_v47, %v14895_v13  ;;  %v3037_v50 = vadd.f32 %v3006_v44, %v14946_v26  ;;  %v8446_v60 = vmul.f32 -1.442695, %v3036_v62  ;;  %v3038_v37 = vadd.f32 %v3007_v42, %v14947_v61  ;;  %v14972_v47 = vld [vmem:[#allocation21_spill] sm:$0xff]  ;;  %v14973_v42 = vld [vmem:[#allocation22_spill] sm:$0xff] }
 0xbc6   :  { %v8441_v49 = vmul.f32 -1.442695, %v3031_v10  ;;  %v8442_v57 = vmul.f32 -1.442695, %v3032_v56  ;;  %v8443_v31 = vmul.f32 -1.442695, %v3033_v8 }
 0xbc7   :  { %v8444_v48 = vmul.f32 -1.442695, %v3034_v9  ;;  %v8445_v1 = vmul.f32 -1.442695, %v3035_v25  ;;  %9187 = vpow2.f32 %v8446_v60  ;;  %v8447_v52 = vmul.f32 -1.442695, %v3037_v50 }
 0xbc8   :  { %9189 = vpow2.f32 %v8441_v49  ;;  %v3008_v32 = vrot.slane %v11903_v33, 3  ;;  %v3009_v29 = vrot.slane %v11903_v33, 4  ;;  %v3010_v28 = vrot.slane %v11903_v33, 5  ;;  %v14974_v10 = vld [vmem:[#allocation23_spill] sm:$0xff]  ;;  %v14975_v8 = vld [vmem:[#allocation24_spill] sm:$0xff] }
 0xbc9   :  { %9191 = vpow2.f32 %v8442_v57  ;;  %v3011_v55 = vrot.slane %v11903_v33, 6  ;;  %v3012_v7 = vrot.slane %v11903_v33, 7  ;;  %v8448_v35 = vmul.f32 -1.442695, %v3038_v37 }
 0xbca   :  { %9193 = vpow2.f32 %v8443_v31  ;;  %v3039_v6 = vadd.f32 %v3008_v32, %v14948_v21  ;;  %v3040_v44 = vadd.f32 %v3009_v29, %v14972_v47  ;;  %v3041_v62 = vadd.f32 %v3010_v28, %v14973_v42 }
 0xbcb   :  { %9195 = vpow2.f32 %v8444_v48  ;;  %v3042_v56 = vadd.f32 %v3011_v55, %v14974_v10  ;;  %v3043_v9 = vadd.f32 %v3012_v7, %v14975_v8  ;;  %v3013_v31 = vrot.slane %v11903_v33, 1  ;;  %v14976_v7 = vld [vmem:[#allocation25_spill] sm:$0xff] }
 0xbcc   :  { %9197 = vpow2.f32 %v8445_v1  ;;  %v8449_v25 = vmul.f32 -1.442695, %v3039_v6  ;;  %v8450_v50 = vmul.f32 -1.442695, %v3040_v44  ;;  %v8451_v60 = vmul.f32 -1.442695, %v3041_v62 }
 0xbcd   :  { %9199 = vpow2.f32 %v8447_v52  ;;  %v8452_v49 = vmul.f32 -1.442695, %v3042_v56  ;;  %v8453_v37 = vmul.f32 -1.442695, %v3043_v9  ;;  %v3014_v29 = vrot.slane %v11903_v33, 2  ;;  %v14977_v62 = vld [vmem:[#allocation26_spill] sm:$0xff] }
 0xbce   :  { %9201 = vpow2.f32 %v8448_v35  ;;  %v3044_v35 = vadd.f32 %v11903_v33, %v14976_v7  ;;  %v3045_v56 = vadd.f32 %v3013_v31, %v14977_v62  ;;  %v14979_v31 = vld [vmem:[#allocation45_spill] sm:$0xff] }
 0xbcf   :  { %9203 = vpow2.f32 %v8449_v25 }
 0xbd0   :  { %9205 = vpow2.f32 %v8450_v50  ;;  %v14978_v50 = vld [vmem:[#allocation27_spill] sm:$0xff]  ;;  %v8455_v33 = vmul.f32 -1.442695, %v3045_v56  ;;  %v3339_v56 = vrot.slane %v11767_v19, 7 }
 0xbd1   :  { %v9188_v57 = vpop.eup %9187  ;;  %9207 = vpow2.f32 %v8451_v60  ;;  %v3046_v60 = vadd.f32 %v3014_v29, %v14978_v50  ;;  %v14982_v50 = vld [vmem:[#allocation31_spill] sm:$0xff] }
 0xbd2   :  { %v9190_v48 = vpop.eup %9189  ;;  %v3100_v32 = vadd.f32 1.0, %v9188_v57  ;;  %9209 = vpow2.f32 %v8452_v49 }
 0xbd3   :  { %v9192_v1 = vpop.eup %9191  ;;  %v3095_v28 = vadd.f32 1.0, %v9190_v48  ;;  %9211 = vpow2.f32 %v8453_v37 }
 0xbd4   :  { %v9194_v52 = vpop.eup %9193  ;;  %v3096_v55 = vadd.f32 1.0, %v9192_v1  ;;  %9213 = vrcp.f32 %v3100_v32  ;;  %v8454_v32 = vmul.f32 -1.442695, %v3044_v35 }
 0xbd5   :  { %v9196_v6 = vpop.eup %9195  ;;  %v3097_v44 = vadd.f32 1.0, %v9194_v52  ;;  %9215 = vrcp.f32 %v3095_v28  ;;  %v3143_v28 = vadd.f32 %v14979_v31, %v11900_v2 }
 0xbd6   :  { %v9198_v9 = vpop.eup %9197  ;;  %v3098_v25 = vadd.f32 1.0, %v9196_v6  ;;  %9217 = vrcp.f32 %v3096_v55  ;;  %v8456_v6 = vmul.f32 -1.442695, %v3046_v60  ;;  %v11939_v60 = vadd.f32 %v14979_v31, %v11909_v0 }
 0xbd7   :  { %v9200_v49 = vpop.eup %9199  ;;  %v3099_v57 = vadd.f32 1.0, %v9198_v9  ;;  %9219 = vrcp.f32 %v3097_v44  ;;  %v3338_v44 = vrot.slane %v11744_v51, 7 }
 0xbd8   :  { %v9202_v37 = vpop.eup %9201  ;;  %v3101_v48 = vadd.f32 1.0, %v9200_v49  ;;  %9221 = vrcp.f32 %v3098_v25  ;;  %v3337_v25 = vrot.slane %v11750_v39, 7  ;;  %v3148_v39 = vrot.slane %v3143_v28, 4 }
 0xbd9   :  { %v9204_v1 = vpop.eup %9203  ;;  %v3102_v40 = vadd.f32 1.0, %v9202_v37  ;;  %9223 = vrcp.f32 %v3099_v57  ;;  %v14980_v57 = vld [vmem:[#allocation29_spill] sm:$0xff] }
 0xbda   :  { %v9206_v52 = vpop.eup %9205  ;;  %9225 = vrcp.f32 %v3101_v48  ;;  %v3103_v9 = vadd.f32 1.0, %v9204_v1 }
 0xbdb   :  { %v9208_v29 = vpop.eup %9207  ;;  %9227 = vrcp.f32 %v3102_v40  ;;  %v3104_v49 = vadd.f32 1.0, %v9206_v52  ;;  %v3340_v40 = vrot.slane %v11790_v45, 7  ;;  %v3153_v52 = vrot.slane %v3143_v28, 2 }
 0xbdc   :  { %v9210_v35 = vpop.eup %9209  ;;  %9229 = vpow2.f32 %v8454_v32  ;;  %v3105_v2 = vadd.f32 1.0, %v9208_v29  ;;  %v3147_v32 = vrot.slane %v3143_v28, 3  ;;  %v3149_v45 = vrot.slane %v3143_v28, 5 }
 0xbdd   :  { %v9212_v37 = vpop.eup %9211  ;;  %9231 = vpow2.f32 %v8455_v33  ;;  %v3106_v51 = vadd.f32 1.0, %v9210_v35 }
 0xbde   :  { %v11942_v48 = vpop.eup %9213  ;;  %9233 = vpow2.f32 %v8456_v6  ;;  %v3107_v19 = vadd.f32 1.0, %v9212_v37  ;;  %v3150_v37 = vrot.slane %v3143_v28, 6 }
 0xbdf   :  { %v11944_v1 = vpop.eup %9215  ;;  %9235 = vrcp.f32 %v3103_v9  ;;  %v11947_v33 = vmul.f32 %v11942_v48, %v3143_v28  ;;  %v3151_v9 = vrot.slane %v3143_v28, 7 }
 0xbe0   :  { %v11949_v29 = vpop.eup %9217  ;;  %9237 = vrcp.f32 %v3104_v49  ;;  %v3177_v0 = vmul.f32 %v11944_v1, %v3147_v32  ;;  %v11953_v31 = vmul.f32 %v11944_v1, %v3337_v25  ;;  %v14981_v25 = vld [vmem:[#allocation30_spill] sm:$0xff] }
 0xbe1   :  { %v11955_v6 = vpop.eup %9219  ;;  %9239 = vrcp.f32 %v3105_v2  ;;  %v3178_v35 = vmul.f32 %v11949_v29, %v3148_v39  ;;  %v11963_v32 = vmul.f32 %v11949_v29, %v3338_v44  ;;  %v3152_v39 = vrot.slane %v3143_v28, 1 }
 0xbe2   :  { %v11958_v22 = vpop.eup %9221  ;;  %9241 = vrcp.f32 %v3106_v51  ;;  %v3193_v55 = vadd.f32 %v3177_v0, %v14980_v57  ;;  %v3179_v49 = vmul.f32 %v11955_v6, %v3149_v45  ;;  %v11974_v45 = vmul.f32 %v11955_v6, %v3339_v56  ;;  %v14983_v57 = vld [vmem:[#allocation32_spill] sm:$0xff] }
 0xbe3   :  { %v11965_v12 = vpop.eup %9223  ;;  %9243 = vrcp.f32 %v3107_v19  ;;  %v3194_v59 = vadd.f32 %v3178_v35, %v14981_v25  ;;  %v3180_v2 = vmul.f32 %v11958_v22, %v3150_v37  ;;  %v3344_v37 = vrot.slane %v11859_v5, 7 }
 0xbe4   :  { %v11969_v18 = vpop.eup %9225  ;;  %9245 = vtanh.f32 %v3193_v55  ;;  %v3195_v51 = vadd.f32 %v3179_v49, %v14982_v50  ;;  %v3181_v0 = vmul.f32 %v11965_v12, %v3151_v9  ;;  %v3155_v55 = vrot.slane %v11939_v60, 4 }
 0xbe5   :  { %v11976_v44 = vpop.eup %9227  ;;  %9247 = vtanh.f32 %v3194_v59  ;;  %v3196_v19 = vadd.f32 %v3180_v2, %v14983_v57  ;;  %v3183_v35 = vmul.f32 %v11969_v18, %v3152_v39  ;;  %v3346_v49 = vrot.slane %v11787_v43, 7 }
 0xbe6   :  { %v9230_v28 = vpop.eup %9229  ;;  %v3184_v25 = vmul.f32 %v11976_v44, %v3153_v52  ;;  %v3347_v9 = vrot.slane %v11804_v34, 7  ;;  %9249 = vtanh.f32 %v3195_v51  ;;  %v3154_v59 = vrot.slane %v11939_v60, 3 }
 0xbe7   :  { %v9232_v56 = vpop.eup %9231  ;;  %v3108_v50 = vadd.f32 1.0, %v9230_v28  ;;  %v11987_v2 = vmul.f32 %v11976_v44, %v3344_v37  ;;  %9251 = vtanh.f32 %v3196_v19  ;;  %v11991_v52 = vmul.f32 %v11958_v22, %v3340_v40 }
 0xbe8   :  { %v9234_v39 = vpop.eup %9233  ;;  %v3109_v57 = vadd.f32 1.0, %v9232_v56  ;;  %v3200_v5 = vadd.f32 %v3184_v25, %v14938_v41  ;;  %v3156_v34 = vrot.slane %v11939_v60, 5  ;;  %v14984_v51 = vrot.slane %v11769_v63, 7 }
 0xbe9   :  { %v11993_v62 = vpop.eup %9235  ;;  %v3110_v43 = vadd.f32 1.0, %v9234_v39  ;;  %9253 = vrcp.f32 %v3108_v50  ;;  %v3157_v25 = vrot.slane %v11939_v60, 6  ;;  %v14985_v40 = vrot.slane %v11764_v14, 7  ;;  %v14986_v39 = vld [vmem:[#allocation34_spill] sm:$0xff] }
 0xbea   :  { %v11999_v28 = vmul.f32 %v11965_v12, %v14984_v51  ;;  %v12001_v37 = vpop.eup %9237  ;;  %9255 = vrcp.f32 %v3109_v57  ;;  %v3185_v19 = vmul.f32 %v11993_v62, %v3154_v59  ;;  %v3197_v51 = vadd.f32 %v3181_v0, %v14986_v39 }
 0xbeb   :  { %v12008_v56 = vmul.f32 %v11969_v18, %v14985_v40  ;;  %v12010_v50 = vpop.eup %9239  ;;  %9257 = vrcp.f32 %v3110_v43  ;;  %v3186_v63 = vmul.f32 %v12001_v37, %v3155_v55  ;;  %v12015_v41 = vmul.f32 %v12001_v37, %v3346_v49  ;;  %v14987_v40 = vld [vmem:[#allocation39_spill] sm:$0xff] }
 0xbec   :  { %v12017_v57 = vpop.eup %9241  ;;  %9259 = vtanh.f32 %v3200_v5  ;;  %v3187_v59 = vmul.f32 %v12010_v50, %v3156_v34  ;;  %v3158_v14 = vrot.slane %v11939_v60, 7  ;;  %v12026_v55 = vmul.f32 %v12010_v50, %v3347_v9  ;;  %v14988_v34 = vld [vmem:[#allocation41_spill] sm:$0xff] }
 0xbed   :  { %v12021_v7 = vpop.eup %9243  ;;  %v3202_v8 = vadd.f32 %v3186_v63, %v14987_v40  ;;  %v3188_v43 = vmul.f32 %v12017_v57, %v3157_v25  ;;  %v3348_v0 = vrot.slane %v11824_v46, 7  ;;  %v3349_v5 = vrot.slane %v11840_v20, 7  ;;  %v14989_v46 = vld [vmem:[#allocation35_spill] sm:$0xff] }
 0xbee   :  { %v9246_v49 = vpop.eup %9245  ;;  %v3189_v39 = vmul.f32 %v12021_v7, %v3158_v14  ;;  %9261 = vtanh.f32 %v3197_v51  ;;  %v3199_v42 = vadd.f32 %v3183_v35, %v14988_v34  ;;  %v3345_v25 = vrot.slane %v11827_v27, 7  ;;  %v14990_v27 = vld [vmem:[#allocation33_spill] sm:$0xff] }
 0xbef   :  { %v9248_v10 = vpop.eup %9247  ;;  %3257 = vrot.lane.b32.xlu1 %v9246_v49, %s9745_s4  ;;  %v12034_v63 = vmul.f32 %v12017_v57, %v3348_v0  ;;  %9263 = vtanh.f32 %v3202_v8  ;;  %v3203_v9 = vadd.f32 %v3187_v59, %v14989_v46  ;;  %v12040_v14 = vmul.f32 %v12021_v7, %v3349_v5 }
 0xbf0   :  { %3259 = vrot.lane.b32.xlu0 %v9248_v10, %s9745_s4  ;;  %v9250_v20 = vpop.eup %9249  ;;  %v12043_v40 = vmul.f32 %v11993_v62, %v3345_v25  ;;  %v3351_v35 = vrot.slane %v11855_v36, 7  ;;  %9265 = vtanh.f32 %v3199_v42  ;;  %v3201_v10 = vadd.f32 %v3185_v19, %v14990_v27 }
 0xbf1   :  { %v9252_v51 = vpop.eup %9251  ;;  %v3159_v8 = vrot.slane %v11939_v60, 1  ;;  %v3352_v59 = vrot.slane %v11871_v3, 7  ;;  %9267 = vtanh.f32 %v3203_v9  ;;  %v3204_v5 = vadd.f32 %v3188_v43, %v14966_v58 }
 0xbf2   :  { %v3160_v25 = vrot.slane %v11939_v60, 2  ;;  %v3205_v43 = vadd.f32 %v3189_v39, %v14967_v38  ;;  %9269 = vtanh.f32 %v3201_v10 }
 0xbf3   :  { %v12046_v49 = vpop.eup %9253  ;;  %3261 = vrot.lane.b32.xlu1 %v9250_v20, %s9745_s4  ;;  %9271 = vtanh.f32 %v3204_v5 }
 0xbf4   :  { %v12052_v0 = vpop.eup %9255  ;;  %v3190_v36 = vmul.f32 %v12046_v49, %v11939_v60  ;;  %v14991_v60 = vld [vmem:[#allocation37_spill] sm:$0xff]  ;;  %9273 = vtanh.f32 %v3205_v43 }
 0xbf5   :  { %v12058_v34 = vpop.eup %9257  ;;  %v3191_v42 = vmul.f32 %v12052_v0, %v3159_v8  ;;  %v12062_v19 = vmul.f32 %v12052_v0, %v3351_v35  ;;  %v3198_v9 = vadd.f32 %v11947_v33, %v14991_v60 }
 0xbf6   :  { %v9260_v20 = vpop.eup %9259  ;;  %v3192_v3 = vmul.f32 %v12058_v34, %v3160_v25  ;;  %v12066_v27 = vmul.f32 %v12058_v34, %v3352_v59  ;;  %v3206_v59 = vadd.f32 %v3190_v36, %v14884_v30 }
 0xbf7   :  { %3271 = vrot.lane.b32.xlu0 %v9260_v20, %s9745_s4  ;;  %3263 = vrot.lane.b32.xlu1 %v9252_v51, %s9745_s4  ;;  %v3207_v25 = vadd.f32 %v3191_v42, %v14916_v53  ;;  %9275 = vtanh.f32 %v3198_v9  ;;  %v3225_v9 = vsub.f32 1.0, %v11944_v1 }
 0xbf8   :  { %v9262_v8 = vpop.eup %9261  ;;  %9277 = vtanh.f32 %v3206_v59  ;;  %v3208_v33 = vadd.f32 %v3192_v3, %v14939_v4 }
 0xbf9   :  { %v9264_v35 = vpop.eup %9263  ;;  %9279 = vtanh.f32 %v3207_v25 }
 0xbfa   :  { %v9266_v51 = vpop.eup %9265  ;;  %9281 = vtanh.f32 %v3208_v33  ;;  %v3227_v33 = vsub.f32 1.0, %v11955_v6 }
 0xbfb   :  { %3275 = vrot.lane.b32.xlu0 %v9264_v35, %s9745_s4  ;;  %3265 = vrot.lane.b32.xlu1 %v9262_v8, %s9745_s4  ;;  %v9268_v20 = vpop.eup %9267  ;;  %v3226_v8 = vsub.f32 1.0, %v11949_v29 }
 0xbfc   :  { %v9270_v39 = vpop.eup %9269 }
 0xbfd   :  { %v9272_v10 = vpop.eup %9271 }
 0xbfe   :  { %v9274_v5 = vpop.eup %9273 }
 0xbff   :  { %3277 = vrot.lane.b32.xlu0 %v9268_v20, %s9745_s4  ;;  %3269 = vrot.lane.b32.xlu1 %v9266_v51, %s9745_s4 }
 0xc01   :  { %v9276_v36 = vpop.eup %9275 }
 0xc02   :  { %v9278_v42 = vpop.eup %9277 }
 0xc03   :  { %3279 = vrot.lane.b32.xlu0 %v9272_v10, %s9745_s4  ;;  %3273 = vrot.lane.b32.xlu1 %v9270_v39, %s9745_s4  ;;  %v9280_v43 = vpop.eup %9279 }
 0xc04   :  { %v9282_v3 = vpop.eup %9281 }
 0xc07   :  { %3281 = vrot.lane.b32.xlu0 %v9274_v5, %s9745_s4  ;;  %3267 = vrot.lane.b32.xlu1 %v9276_v36, %s9745_s4 }
 0xc0b   :  { %3285 = vrot.lane.b32.xlu0 %v9280_v43, %s9745_s4  ;;  %3283 = vrot.lane.b32.xlu1 %v9278_v42, %s9745_s4 }
 0xc0f   :  { %3287 = vrot.lane.b32.xlu0 %v9282_v3, %s9745_s4 }
 0xc61   :  { %v3258_v35 = vpop.permute.xlu1 %3257 }
 0xc62   :  { %v3260_v59 = vpop.permute.xlu0 %3259  ;;  %v3305_v25 = vmul.f32 %v3258_v35, %v3225_v9 }
 0xc63   :  { %v3306_v51 = vmul.f32 %v3260_v59, %v3226_v8  ;;  %v3228_v8 = vsub.f32 1.0, %v11958_v22  ;;  %v3234_v22 = vsub.f32 1.0, %v12001_v37 }
 0xc64   :  { %v12090_v20 = vadd.f32 %v11953_v31, %v3305_v25  ;;  %v3232_v31 = vsub.f32 1.0, %v11976_v44  ;;  %v3229_v44 = vsub.f32 1.0, %v11965_v12 }
 0xc65   :  { %v12094_v39 = vadd.f32 %v11963_v32, %v3306_v51  ;;  %v3262_v10 = vpop.permute.xlu1 %3261 }
 0xc66   :  { %v3401_v5 = vpack.c.bf16 %v12090_v20, %v12090_v20  ;;  %v4640_v1 = vrot.slane %v12090_v20, 5  ;;  %v3307_v36 = vmul.f32 %v3262_v10, %v3227_v33 }
 0xc67   :  { %v3402_v29 = vpack.c.bf16 %v12094_v39, %v12094_v39  ;;  %v4641_v42 = vrot.slane %v12094_v39, 4 }
 0xc68   :  { %v3433_v43 = vunpack.c.l.b16 %v3401_v5  ;;  %v12104_v6 = vadd.f32 %v11974_v45, %v3307_v36 }
 0xc69   :  { %v3434_v32 = vunpack.c.l.b16 %v3402_v29  ;;  %v4642_v3 = vsel %vm808_vm1, %v4641_v42, %v4640_v1  ;;  %v3272_v9 = vpop.permute.xlu0 %3271  ;;  %v3264_v35 = vpop.permute.xlu1 %3263 }
 0xc6a   :  { %v3449_v59 = vrot.slane %v3433_v43, 5  ;;  %v3312_v25 = vmul.f32 %v3272_v9, %v3232_v31  ;;  %v3403_v51 = vpack.c.bf16 %v12104_v6, %v12104_v6  ;;  %v4643_v33 = vrot.slane %v12104_v6, 3 }
 0xc6b   :  { %v3450_v10 = vrot.slane %v3434_v32, 4  ;;  %v3308_v5 = vmul.f32 %v3264_v35, %v3228_v8 }
 0xc6c   :  { %v12113_v45 = vadd.f32 %v11987_v2, %v3312_v25  ;;  %v3435_v36 = vunpack.c.l.b16 %v3403_v51  ;;  %v4644_v1 = vsel %vm811_vm2, %v4643_v33, %v4642_v3  ;;  %v3231_v51 = vsub.f32 1.0, %v11969_v18 }
 0xc6d   :  { %v3451_v29 = vsel %vm808_vm1, %v3450_v10, %v3449_v59  ;;  %v12119_v42 = vadd.f32 %v11991_v52, %v3308_v5  ;;  %v3276_v43 = vpop.permute.xlu0 %3275  ;;  %v3266_v31 = vpop.permute.xlu1 %3265  ;;  %v3235_v59 = vsub.f32 1.0, %v12010_v50 }
 0xc6e   :  { %v3452_v9 = vrot.slane %v3435_v36, 3  ;;  %v3314_v32 = vmul.f32 %v3276_v43, %v3234_v22  ;;  %v3309_v8 = vmul.f32 %v3266_v31, %v3229_v44  ;;  %v3236_v44 = vsub.f32 1.0, %v12017_v57 }
 0xc6f   :  { %v3404_v12 = vpack.c.bf16 %v12119_v42, %v12119_v42  ;;  %v4645_v2 = vrot.slane %v12119_v42, 2  ;;  %v3408_v50 = vpack.c.bf16 %v12113_v45, %v12113_v45 }
 0xc70   :  { %v3453_v35 = vsel %vm811_vm2, %v3452_v9, %v3451_v29  ;;  %v12126_v3 = vadd.f32 %v12015_v41, %v3314_v32  ;;  %v12129_v37 = vadd.f32 %v11999_v28, %v3309_v8  ;;  %v3230_v41 = vsub.f32 1.0, %v11942_v48 }
 0xc71   :  { %v3436_v52 = vunpack.c.l.b16 %v3404_v12  ;;  %v3278_v25 = vpop.permute.xlu0 %3277  ;;  %v3270_v33 = vpop.permute.xlu1 %3269  ;;  %v4646_v10 = vsel %vm814_vm3, %v4645_v2, %v4644_v1  ;;  %v3233_v1 = vsub.f32 1.0, %v11993_v62 }
 0xc72   :  { %v3405_v5 = vpack.c.bf16 %v12129_v37, %v12129_v37  ;;  %v4647_v28 = vrot.slane %v12129_v37, 1  ;;  %v3315_v22 = vmul.f32 %v3278_v25, %v3235_v59  ;;  %v3311_v29 = vmul.f32 %v3270_v33, %v3231_v51 }
 0xc73   :  { %v3454_v36 = vrot.slane %v3436_v52, 2  ;;  %v3410_v18 = vpack.c.bf16 %v12126_v3, %v12126_v3  ;;  %v14992_v25 = vrot.slane %v11807_v54, 7  ;;  %v14993_v54 = vrot.slane %v11838_v24, 7 }
 0xc74   :  { %v3437_v43 = vunpack.c.l.b16 %v3405_v5  ;;  %v12146_v57 = vadd.f32 %v12026_v55, %v3315_v22  ;;  %v12149_v9 = vadd.f32 %v12008_v56, %v3311_v29  ;;  %v4648_v12 = vsel %vm817_vm4, %v4647_v28, %v4646_v10 }
 0xc75   :  { %v3455_v31 = vsel %vm814_vm3, %v3454_v36, %v3453_v35  ;;  %v3280_v32 = vpop.permute.xlu0 %3279  ;;  %v3274_v8 = vpop.permute.xlu1 %3273  ;;  %v3374_v51 = vmul.f32 %v11942_v48, %v14992_v25  ;;  %v3237_v56 = vsub.f32 1.0, %v12021_v7  ;;  %v3238_v35 = vsub.f32 1.0, %v12046_v49 }
 0xc76   :  { %v3456_v2 = vrot.slane %v3437_v43, 1  ;;  %v3316_v52 = vmul.f32 %v3280_v32, %v3236_v44  ;;  %v3313_v59 = vmul.f32 %v3274_v8, %v3233_v1  ;;  %v3411_v62 = vpack.c.bf16 %v12146_v57, %v12146_v57 }
 0xc77   :  { %v3407_v55 = vpack.c.bf16 %v12149_v9, %v12149_v9  ;;  %v3382_v48 = vmul.f32 %v12046_v49, %v14993_v54  ;;  %v3440_v44 = vunpack.c.l.b16 %v3408_v50  ;;  %v3442_v36 = vunpack.c.l.b16 %v3410_v18 }
 0xc78   :  { %v12162_v33 = vadd.f32 %v12034_v63, %v3316_v52  ;;  %v12165_v10 = vadd.f32 %v12043_v40, %v3313_v59  ;;  %v3457_v5 = vsel %vm817_vm4, %v3456_v2, %v3455_v31  ;;  %v3239_v22 = vsub.f32 1.0, %v12052_v0 }
 0xc79   :  { %v3282_v28 = vpop.permute.xlu0 %3281  ;;  %v3268_v7 = vpop.permute.xlu1 %3267  ;;  %v3240_v29 = vsub.f32 1.0, %v12058_v34  ;;  %v3443_v43 = vunpack.c.l.b16 %v3411_v62  ;;  %v4654_v49 = vrot.slane %v12126_v3, 4  ;;  %v3439_v1 = vunpack.c.l.b16 %v3407_v55 }
 0xc7a   :  { %v3412_v63 = vpack.c.bf16 %v12162_v33, %v12162_v33  ;;  %v3317_v40 = vmul.f32 %v3282_v28, %v3237_v56  ;;  %v3409_v24 = vpack.c.bf16 %v12165_v10, %v12165_v10  ;;  %v4653_v50 = vrot.slane %v12165_v10, 5 }
 0xc7b   :  { %v3310_v18 = vmul.f32 %v3268_v7, %v3230_v41  ;;  %v4651_v34 = vrot.slane %v12113_v45, 6  ;;  %v3461_v8 = vrot.slane %v3440_v44, 6  ;;  %v3464_v2 = vrot.slane %v3442_v36, 4 }
 0xc7c   :  { %v3444_v31 = vunpack.c.l.b16 %v3412_v63  ;;  %v12180_v0 = vadd.f32 %v12040_v14, %v3317_v40  ;;  %v3441_v32 = vunpack.c.l.b16 %v3409_v24  ;;  %v4655_v52 = vsel %vm808_vm1, %v4654_v49, %v4653_v50 }
 0xc7d   :  { %v3286_v59 = vpop.permute.xlu0 %3285  ;;  %v12184_v25 = vadd.f32 %v3374_v51, %v3310_v18  ;;  %v3284_v62 = vpop.permute.xlu1 %3283  ;;  %v3466_v56 = vrot.slane %v3443_v43, 3  ;;  %v14810_v55 = vrot.slane %v12149_v9, 7  ;;  %v3459_v14 = vrot.slane %v3439_v1, 7 }
 0xc7e   :  { %v3413_v41 = vpack.c.bf16 %v12180_v0, %v12180_v0  ;;  %v3463_v54 = vrot.slane %v3441_v32, 5  ;;  %v3319_v28 = vmul.f32 %v3286_v59, %v3239_v22  ;;  %v3318_v44 = vmul.f32 %v3284_v62, %v3238_v35 }
 0xc7f   :  { %v3406_v7 = vpack.c.bf16 %v12184_v25, %v12184_v25  ;;  %v3468_v36 = vrot.slane %v3444_v31, 2  ;;  %v4649_v51 = vsel %vm820_vm5, %v12184_v25, %v4648_v12  ;;  %v4656_v32 = vrot.slane %v12146_v57, 3 }
 0xc80   :  { %v3445_v63 = vunpack.c.l.b16 %v3413_v41  ;;  %v3465_v40 = vsel %vm808_vm1, %v3464_v2, %v3463_v54  ;;  %v12196_v24 = vadd.f32 %v12062_v19, %v3319_v28  ;;  %v12198_v1 = vadd.f32 %v3382_v48, %v3318_v44 }
 0xc81   :  { %v3467_v43 = vsel %vm811_vm2, %v3466_v56, %v3465_v40  ;;  %v3438_v49 = vunpack.c.l.b16 %v3406_v7  ;;  %v3288_v50 = vpop.permute.xlu0 %3287  ;;  %v4650_v31 = vsel %vm823_vm6, %v14810_v55, %v4649_v51  ;;  %v4658_v48 = vrot.slane %v12162_v33, 2  ;;  %v15003_v55 = vld [vmem:[#allocation29_spill] sm:$0xff] }
 0xc82   :  { %v3470_v22 = vrot.slane %v3445_v63, 1  ;;  %v3320_v18 = vmul.f32 %v3288_v50, %v3240_v29  ;;  %v3469_v35 = vsel %vm814_vm3, %v3468_v36, %v3467_v43  ;;  %v3415_v12 = vpack.c.bf16 %v12196_v24, %v12196_v24 }
 0xc83   :  { %v3414_v19 = vpack.c.bf16 %v12198_v1, %v12198_v1  ;;  %v3458_v2 = vsel %vm820_vm5, %v3438_v49, %v3457_v5  ;;  %v12218_v28 = vsel %vm826_vm7, %v4651_v34, %v4650_v31  ;;  %v4660_v7 = vrot.slane %v12180_v0, 1 }
 0xc84   :  { %v12212_v29 = vadd.f32 %v12066_v27, %v3320_v18  ;;  %v3460_v59 = vsel %vm823_vm6, %v3459_v14, %v3458_v2  ;;  %v3471_v62 = vsel %vm817_vm4, %v3470_v22, %v3469_v35  ;;  %v3447_v56 = vunpack.c.l.b16 %v3415_v12  ;;  %14994 = vst [vmem:[#allocation17_spill] sm:$0xff] %v12218_v28 }
 0xc85   :  { %v3446_v41 = vunpack.c.l.b16 %v3414_v19  ;;  %v3462_v54 = vsel %vm826_vm7, %v3461_v8, %v3460_v59  ;;  %v4657_v44 = vsel %vm811_vm2, %v4656_v32, %v4655_v52  ;;  %v14809_v40 = vrot.slane %v12196_v24, 7 }
 0xc86   :  { %v3416_v5 = vpack.c.bf16 %v12212_v29, %v12212_v29  ;;  %v3473_v27 = vrot.slane %v3447_v56, 7  ;;  %v4659_v14 = vsel %vm814_vm3, %v4658_v48, %v4657_v44  ;;  %v4664_v63 = vrot.slane %v12212_v29, 6 }
 0xc87   :  { %v3472_v36 = vsel %vm820_vm5, %v3446_v41, %v3471_v62  ;;  %v4661_v34 = vsel %vm817_vm4, %v4660_v7, %v4659_v14 }
 0xc88   :  { %v3448_v8 = vunpack.c.l.b16 %v3416_v5  ;;  %v3474_v51 = vsel %vm823_vm6, %v3473_v27, %v3472_v36  ;;  %v4662_v43 = vsel %vm820_vm5, %v12198_v1, %v4661_v34 }
 0xc89   :  { %v4663_v52 = vsel %vm823_vm6, %v14809_v40, %v4662_v43  ;;  %v12271_v40 = vld [vmem:[#allocation5] ss:$0 sm:$0xff] }
 0xc8a   :  { %v3475_v49 = vrot.slane %v3448_v8, 6  ;;  %v12236_v50 = vsel %vm826_vm7, %v4664_v63, %v4663_v52  ;;  %15002 = vst [vmem:[#allocation38_spill] sm:$0xff] %v12271_v40 }
 0xc8b   :  { %14995 = vst [vmem:[#allocation19_spill] sm:$0xff] %v12236_v50 }
 0xc8c   :  { %v3476_v22 = vsel %vm826_vm7, %v3475_v49, %v3474_v51 }
 0xc8d   :  { %v3477_v18 = vpack.c.b16 %v3476_v22, %v3462_v54 }
 0xc8f   :  { %3478 = vrot.lane.b32.xlu1 %v3477_v18, %s9745_s4 }
 0xd01   :  { %v3479_v35 = vpop.permute.xlu1 %3478 }
 0xd02   :  { %8457 = vmatmul.mubr.msk.bf16.vlgmr.msra.gmra.mrb[44].mxu0 %vm14832_vm0, %v3479_v35 }
 0xdd5   :  { %v3517_v31 = vpop.f32.mrb[44].mxu0 }
 0xdd6   :  { %v3528_v32 = vrot.slane %v3517_v31, 2  ;;  %v3529_v12 = vrot.slane %v3517_v31, 3  ;;  %v3530_v19 = vrot.slane %v3517_v31, 4  ;;  %v3531_v2 = vrot.slane %v3517_v31, 5  ;;  %v12241_v48 = vpop.f32.mrb[45].mxu0 }
 0xdd7   :  { %v3532_v59 = vrot.slane %v3517_v31, 6  ;;  %v3533_v62 = vrot.slane %v3517_v31, 7  ;;  %v3534_v56 = vrot.slane %v3517_v31, 1  ;;  %v3564_v41 = vadd.f32 %v3517_v31, %v14946_v26  ;;  %v12244_v7 = vpop.f32.mrb[46].mxu0 }
 0xdd8   :  { %v3558_v54 = vadd.f32 %v3528_v32, %v10039_v15  ;;  %v3559_v5 = vadd.f32 %v3529_v12, %v14894_v11  ;;  %v3560_v44 = vadd.f32 %v3530_v19, %v10045_v17  ;;  %v3561_v27 = vadd.f32 %v3531_v2, %v14944_v16  ;;  %v12250_v36 = vpop.f32.mrb[47].mxu0 }
 0xdd9   :  { %v3562_v14 = vadd.f32 %v3532_v59, %v14895_v13  ;;  %v3563_v63 = vadd.f32 %v3533_v62, %v14945_v23  ;;  %v8464_v8 = vmul.f32 -1.442695, %v3564_v41  ;;  %v3565_v34 = vadd.f32 %v3534_v56, %v14947_v61  ;;  %v14996_v56 = vld [vmem:[#allocation22_spill] sm:$0xff] }
 0xdda   :  { %v8458_v51 = vmul.f32 -1.442695, %v3558_v54  ;;  %v8459_v43 = vmul.f32 -1.442695, %v3559_v5  ;;  %v8460_v49 = vmul.f32 -1.442695, %v3560_v44 }
 0xddb   :  { %v8461_v52 = vmul.f32 -1.442695, %v3561_v27  ;;  %v8462_v22 = vmul.f32 -1.442695, %v3562_v14  ;;  %9283 = vpow2.f32 %v8464_v8  ;;  %v8463_v18 = vmul.f32 -1.442695, %v3563_v63 }
 0xddc   :  { %9285 = vpow2.f32 %v8458_v51  ;;  %v3535_v35 = vrot.slane %v12244_v7, 2  ;;  %v3536_v31 = vrot.slane %v12244_v7, 3  ;;  %v3537_v32 = vrot.slane %v12244_v7, 4  ;;  %v14997_v54 = vld [vmem:[#allocation23_spill] sm:$0xff]  ;;  %v14998_v44 = vld [vmem:[#allocation24_spill] sm:$0xff] }
 0xddd   :  { %9287 = vpow2.f32 %v8459_v43  ;;  %v3538_v12 = vrot.slane %v12244_v7, 5  ;;  %v3539_v19 = vrot.slane %v12244_v7, 6  ;;  %v8465_v2 = vmul.f32 -1.442695, %v3565_v34 }
 0xdde   :  { %9289 = vpow2.f32 %v8460_v49  ;;  %v3566_v59 = vadd.f32 %v3535_v35, %v14948_v21  ;;  %v3567_v62 = vadd.f32 %v3536_v31, %v14972_v47  ;;  %v3568_v41 = vadd.f32 %v3537_v32, %v14996_v56  ;;  %v15008_v56 = vld [vmem:[#allocation39_spill] sm:$0xff] }
 0xddf   :  { %9291 = vpow2.f32 %v8461_v52  ;;  %v3569_v5 = vadd.f32 %v3538_v12, %v14997_v54  ;;  %v3570_v27 = vadd.f32 %v3539_v19, %v14998_v44  ;;  %v3540_v43 = vrot.slane %v12244_v7, 7  ;;  %v14999_v19 = vld [vmem:[#allocation25_spill] sm:$0xff] }
 0xde0   :  { %9293 = vpow2.f32 %v8462_v22  ;;  %v8466_v14 = vmul.f32 -1.442695, %v3566_v59  ;;  %v8467_v63 = vmul.f32 -1.442695, %v3567_v62  ;;  %v8468_v8 = vmul.f32 -1.442695, %v3568_v41 }
 0xde1   :  { %9295 = vpow2.f32 %v8463_v18  ;;  %v8469_v51 = vmul.f32 -1.442695, %v3569_v5  ;;  %v8470_v34 = vmul.f32 -1.442695, %v3570_v27  ;;  %v3541_v31 = vrot.slane %v12244_v7, 1  ;;  %v15000_v41 = vld [vmem:[#allocation26_spill] sm:$0xff] }
 0xde2   :  { %9297 = vpow2.f32 %v8465_v2  ;;  %v3571_v2 = vadd.f32 %v3540_v43, %v14999_v19  ;;  %v3572_v5 = vadd.f32 %v12244_v7, %v15000_v41  ;;  %v3670_v7 = vadd.f32 %v12271_v40, %v12241_v48  ;;  %v15005_v41 = vld [vmem:[#allocation31_spill] sm:$0xff] }
 0xde3   :  { %9299 = vpow2.f32 %v8466_v14  ;;  %v3867_v48 = vrot.slane %v12119_v42, 7 }
 0xde4   :  { %9301 = vpow2.f32 %v8467_v63  ;;  %v15001_v63 = vld [vmem:[#allocation27_spill] sm:$0xff]  ;;  %v3677_v42 = vrot.slane %v3670_v7, 5 }
 0xde5   :  { %v9284_v49 = vpop.eup %9283  ;;  %9303 = vpow2.f32 %v8468_v8  ;;  %v3573_v8 = vadd.f32 %v3541_v31, %v15001_v63 }
 0xde6   :  { %v9286_v52 = vpop.eup %9285  ;;  %v3628_v35 = vadd.f32 1.0, %v9284_v49  ;;  %9305 = vpow2.f32 %v8469_v51 }
 0xde7   :  { %v9288_v22 = vpop.eup %9287  ;;  %v3622_v32 = vadd.f32 1.0, %v9286_v52  ;;  %9307 = vpow2.f32 %v8470_v34 }
 0xde8   :  { %v9290_v18 = vpop.eup %9289  ;;  %v3623_v12 = vadd.f32 1.0, %v9288_v22  ;;  %9309 = vrcp.f32 %v3628_v35  ;;  %v8471_v35 = vmul.f32 -1.442695, %v3571_v2 }
 0xde9   :  { %v9292_v59 = vpop.eup %9291  ;;  %v3624_v62 = vadd.f32 1.0, %v9290_v18  ;;  %9311 = vrcp.f32 %v3622_v32  ;;  %v8472_v18 = vmul.f32 -1.442695, %v3572_v5  ;;  %v3866_v5 = vrot.slane %v12104_v6, 7 }
 0xdea   :  { %v9294_v27 = vpop.eup %9293  ;;  %v3625_v14 = vadd.f32 1.0, %v9292_v59  ;;  %9313 = vrcp.f32 %v3623_v12  ;;  %v8473_v12 = vmul.f32 -1.442695, %v3573_v8  ;;  %v3676_v6 = vrot.slane %v3670_v7, 4 }
 0xdeb   :  { %v9296_v51 = vpop.eup %9295  ;;  %v3626_v49 = vadd.f32 1.0, %v9294_v27  ;;  %9315 = vrcp.f32 %v3624_v62  ;;  %v3864_v62 = vrot.slane %v12090_v20, 7 }
 0xdec   :  { %v9298_v34 = vpop.eup %9297  ;;  %v3627_v52 = vadd.f32 1.0, %v9296_v51  ;;  %9317 = vrcp.f32 %v3625_v14  ;;  %v3865_v14 = vrot.slane %v12094_v39, 7 }
 0xded   :  { %v9300_v22 = vpop.eup %9299  ;;  %v3629_v43 = vadd.f32 1.0, %v9298_v34  ;;  %9319 = vrcp.f32 %v3626_v49  ;;  %v12280_v34 = vadd.f32 %v12271_v40, %v12250_v36 }
 0xdee   :  { %v9302_v32 = vpop.eup %9301  ;;  %9321 = vrcp.f32 %v3627_v52  ;;  %v3630_v59 = vadd.f32 1.0, %v9300_v22  ;;  %v3675_v52 = vrot.slane %v3670_v7, 3 }
 0xdef   :  { %v9304_v31 = vpop.eup %9303  ;;  %9323 = vrcp.f32 %v3629_v43  ;;  %v3631_v2 = vadd.f32 1.0, %v9302_v32 }
 0xdf0   :  { %v9306_v27 = vpop.eup %9305  ;;  %9325 = vpow2.f32 %v8471_v35  ;;  %v3632_v49 = vadd.f32 1.0, %v9304_v31  ;;  %v3674_v35 = vrot.slane %v3670_v7, 2 }
 0xdf1   :  { %v9308_v51 = vpop.eup %9307  ;;  %9327 = vpow2.f32 %v8472_v18  ;;  %v3633_v20 = vadd.f32 1.0, %v9306_v27  ;;  %v3678_v27 = vrot.slane %v3670_v7, 6 }
 0xdf2   :  { %v12283_v8 = vpop.eup %9309  ;;  %9329 = vpow2.f32 %v8473_v12  ;;  %v3634_v39 = vadd.f32 1.0, %v9308_v51 }
 0xdf3   :  { %v12285_v22 = vpop.eup %9311  ;;  %9331 = vrcp.f32 %v3630_v59  ;;  %v12288_v43 = vmul.f32 %v12283_v8, %v3670_v7  ;;  %v3679_v59 = vrot.slane %v3670_v7, 7 }
 0xdf4   :  { %v12290_v18 = vpop.eup %9313  ;;  %9333 = vrcp.f32 %v3631_v2  ;;  %v3704_v36 = vmul.f32 %v12285_v22, %v3674_v35  ;;  %v12294_v32 = vmul.f32 %v12285_v22, %v3864_v62  ;;  %v15004_v62 = vld [vmem:[#allocation30_spill] sm:$0xff] }
 0xdf5   :  { %v12296_v12 = vpop.eup %9315  ;;  %9335 = vrcp.f32 %v3632_v49  ;;  %v3705_v31 = vmul.f32 %v12290_v18, %v3675_v52  ;;  %v12304_v35 = vmul.f32 %v12290_v18, %v3865_v14  ;;  %v3680_v52 = vrot.slane %v3670_v7, 1 }
 0xdf6   :  { %v12299_v51 = vpop.eup %9317  ;;  %9337 = vrcp.f32 %v3633_v20  ;;  %v3720_v50 = vadd.f32 %v3704_v36, %v15003_v55  ;;  %v3706_v2 = vmul.f32 %v12296_v12, %v3676_v6  ;;  %v12315_v6 = vmul.f32 %v12296_v12, %v3866_v5 }
 0xdf7   :  { %v12306_v28 = vpop.eup %9319  ;;  %9339 = vrcp.f32 %v3634_v39  ;;  %v3721_v40 = vadd.f32 %v3705_v31, %v15004_v62  ;;  %v3707_v49 = vmul.f32 %v12299_v51, %v3677_v42  ;;  %v3873_v31 = vrot.slane %v12126_v3, 7 }
 0xdf8   :  { %v12310_v63 = vpop.eup %9321  ;;  %9341 = vtanh.f32 %v3720_v50  ;;  %v3722_v20 = vadd.f32 %v3706_v2, %v15005_v41  ;;  %v3708_v36 = vmul.f32 %v12306_v28, %v3678_v27  ;;  %v12325_v50 = vmul.f32 %v12299_v51, %v3867_v48 }
 0xdf9   :  { %v12317_v14 = vpop.eup %9323  ;;  %9343 = vtanh.f32 %v3721_v40  ;;  %v3709_v39 = vmul.f32 %v12310_v63, %v3679_v59  ;;  %v3874_v42 = vrot.slane %v12146_v57, 7  ;;  %v3868_v27 = vrot.slane %v12129_v37, 7 }
 0xdfa   :  { %v9326_v62 = vpop.eup %9325  ;;  %v12322_v7 = vmul.f32 %v12317_v14, %v3680_v52  ;;  %v3681_v41 = vrot.slane %v12280_v34, 2  ;;  %v3869_v40 = vrot.slane %v12184_v25, 7  ;;  %v3872_v59 = vrot.slane %v12165_v10, 7  ;;  %v15006_v52 = vld [vmem:[#allocation32_spill] sm:$0xff] }
 0xdfb   :  { %v9328_v5 = vpop.eup %9327  ;;  %v3635_v2 = vadd.f32 1.0, %v9326_v62  ;;  %9345 = vtanh.f32 %v3722_v20  ;;  %v3723_v19 = vadd.f32 %v3707_v49, %v15006_v52  ;;  %v12334_v48 = vmul.f32 %v12306_v28, %v3868_v27  ;;  %v15007_v52 = vld [vmem:[#allocation34_spill] sm:$0xff] }
 0xdfc   :  { %v9330_v3 = vpop.eup %9329  ;;  %v3636_v55 = vadd.f32 1.0, %v9328_v5  ;;  %v3682_v37 = vrot.slane %v12280_v34, 3  ;;  %v12340_v62 = vmul.f32 %v12310_v63, %v3869_v40  ;;  %v3683_v10 = vrot.slane %v12280_v34, 4 }
 0xdfd   :  { %v12336_v44 = vpop.eup %9331  ;;  %v3637_v57 = vadd.f32 1.0, %v9330_v3  ;;  %9347 = vrcp.f32 %v3635_v2  ;;  %v3684_v2 = vrot.slane %v12280_v34, 5 }
 0xdfe   :  { %v12342_v25 = vpop.eup %9333  ;;  %9349 = vrcp.f32 %v3636_v55  ;;  %v3712_v20 = vmul.f32 %v12336_v44, %v3681_v41  ;;  %v12347_v49 = vmul.f32 %v12336_v44, %v3872_v59  ;;  %v3724_v41 = vadd.f32 %v3708_v36, %v15007_v52 }
 0xdff   :  { %v12349_v27 = vpop.eup %9335  ;;  %9351 = vrcp.f32 %v3637_v57  ;;  %v3713_v5 = vmul.f32 %v12342_v25, %v3682_v37  ;;  %v12354_v40 = vmul.f32 %v12342_v25, %v3873_v31  ;;  %v3685_v59 = vrot.slane %v12280_v34, 6 }
 0xe00   :  { %v12356_v3 = vpop.eup %9337  ;;  %9353 = vtanh.f32 %v3723_v19  ;;  %v3714_v55 = vmul.f32 %v12349_v27, %v3683_v10  ;;  %v12366_v47 = vmul.f32 %v12349_v27, %v3874_v42  ;;  %v3875_v31 = vrot.slane %v12162_v33, 7 }
 0xe01   :  { %v12361_v54 = vpop.eup %9339  ;;  %v3729_v57 = vadd.f32 %v3713_v5, %v15008_v56  ;;  %v3715_v37 = vmul.f32 %v12356_v3, %v3684_v2  ;;  %v3876_v10 = vrot.slane %v12180_v0, 7  ;;  %v3871_v2 = vrot.slane %v12113_v45, 7 }
 0xe02   :  { %v9342_v21 = vpop.eup %9341  ;;  %v3716_v19 = vmul.f32 %v12361_v54, %v3685_v59  ;;  %v3730_v36 = vadd.f32 %v3714_v55, %v14989_v46  ;;  %v12374_v5 = vmul.f32 %v12356_v3, %v3875_v31  ;;  %v3725_v33 = vadd.f32 %v3709_v39, %v14991_v60 }
 0xe03   :  { %v9344_v26 = vpop.eup %9343  ;;  %3784 = vrot.lane.b32.xlu0 %v9342_v21, %s9745_s4  ;;  %9355 = vtanh.f32 %v3729_v57  ;;  %v12380_v42 = vmul.f32 %v12361_v54, %v3876_v10  ;;  %v12383_v0 = vmul.f32 %v12317_v14, %v3871_v2  ;;  %v3686_v59 = vrot.slane %v12280_v34, 7  ;;  %v15009_v10 = vld [vmem:[#allocation33_spill] sm:$0xff] }
 0xe04   :  { %3786 = vrot.lane.b32.xlu1 %v9344_v26, %s9745_s4  ;;  %9357 = vtanh.f32 %v3724_v41  ;;  %v3877_v55 = vrot.slane %v12198_v1, 7  ;;  %v3731_v26 = vadd.f32 %v3715_v37, %v14966_v58  ;;  %v3687_v45 = vrot.slane %v12280_v34, 1 }
 0xe05   :  { %v9346_v21 = vpop.eup %9345  ;;  %9359 = vtanh.f32 %v3730_v36  ;;  %v3879_v39 = vrot.slane %v12212_v29, 7  ;;  %v3728_v2 = vadd.f32 %v3712_v20, %v15009_v10  ;;  %v15010_v20 = vld [vmem:[#allocation43_spill] sm:$0xff] }
 0xe06   :  { %9361 = vtanh.f32 %v3725_v33  ;;  %v3732_v33 = vadd.f32 %v3716_v19, %v14967_v38 }
 0xe07   :  { %v12387_v57 = vpop.eup %9347  ;;  %3788 = vrot.lane.b32.xlu0 %v9346_v21, %s9745_s4  ;;  %9363 = vtanh.f32 %v3731_v26 }
 0xe08   :  { %v12393_v41 = vpop.eup %9349  ;;  %v3717_v31 = vmul.f32 %v12387_v57, %v3686_v59  ;;  %v12398_v1 = vmul.f32 %v12387_v57, %v3877_v55  ;;  %9365 = vtanh.f32 %v3728_v2  ;;  %v3727_v59 = vadd.f32 %v12322_v7, %v15010_v20 }
 0xe09   :  { %v12400_v46 = vpop.eup %9351  ;;  %v3718_v36 = vmul.f32 %v12393_v41, %v12280_v34  ;;  %9367 = vtanh.f32 %v3732_v33 }
 0xe0a   :  { %v9354_v37 = vpop.eup %9353  ;;  %v3719_v21 = vmul.f32 %v12400_v46, %v3687_v45  ;;  %v12406_v29 = vmul.f32 %v12400_v46, %v3879_v39  ;;  %v3733_v34 = vadd.f32 %v3717_v31, %v14884_v30  ;;  %9369 = vtanh.f32 %v3727_v59  ;;  %v15011_v45 = vld [vmem:[#allocation41_spill] sm:$0xff] }
 0xe0b   :  { %3790 = vrot.lane.b32.xlu0 %v9354_v37, %s9745_s4  ;;  %v3726_v39 = vadd.f32 %v12288_v43, %v15011_v45 }
 0xe0c   :  { %9371 = vtanh.f32 %v3733_v34  ;;  %v3735_v7 = vadd.f32 %v3719_v21, %v14939_v4  ;;  %v3753_v34 = vsub.f32 1.0, %v12290_v18 }
 0xe0d   :  { %v9356_v55 = vpop.eup %9355  ;;  %9373 = vtanh.f32 %v3726_v39 }
 0xe0e   :  { %v9358_v58 = vpop.eup %9357  ;;  %3802 = vrot.lane.b32.xlu1 %v9356_v55, %s9745_s4  ;;  %9375 = vtanh.f32 %v3735_v7 }
 0xe0f   :  { %3792 = vrot.lane.b32.xlu0 %v9358_v58, %s9745_s4  ;;  %v9360_v26 = vpop.eup %9359  ;;  %v3734_v58 = vadd.f32 %v3718_v36, %v14916_v53  ;;  %v3752_v36 = vsub.f32 1.0, %v12285_v22 }
 0xe10   :  { %v9362_v37 = vpop.eup %9361 }
 0xe11   :  { %v9364_v19 = vpop.eup %9363  ;;  %9377 = vtanh.f32 %v3734_v58 }
 0xe12   :  { %3804 = vrot.lane.b32.xlu1 %v9360_v26, %s9745_s4  ;;  %v9366_v2 = vpop.eup %9365 }
 0xe13   :  { %3794 = vrot.lane.b32.xlu0 %v9362_v37, %s9745_s4  ;;  %v9368_v43 = vpop.eup %9367 }
 0xe14   :  { %v9370_v31 = vpop.eup %9369 }
 0xe16   :  { %3806 = vrot.lane.b32.xlu1 %v9364_v19, %s9745_s4  ;;  %v9372_v33 = vpop.eup %9371 }
 0xe17   :  { %3800 = vrot.lane.b32.xlu0 %v9366_v2, %s9745_s4  ;;  %v9374_v59 = vpop.eup %9373  ;;  %v3754_v2 = vsub.f32 1.0, %v12296_v12  ;;  %v3755_v12 = vsub.f32 1.0, %v12299_v51 }
 0xe18   :  { %v9376_v21 = vpop.eup %9375 }
 0xe1a   :  { %3808 = vrot.lane.b32.xlu1 %v9368_v43, %s9745_s4 }
 0xe1b   :  { %3798 = vrot.lane.b32.xlu0 %v9370_v31, %s9745_s4  ;;  %v9378_v55 = vpop.eup %9377 }
 0xe1e   :  { %3810 = vrot.lane.b32.xlu1 %v9372_v33, %s9745_s4 }
 0xe1f   :  { %3796 = vrot.lane.b32.xlu0 %v9374_v59, %s9745_s4 }
 0xe22   :  { %3814 = vrot.lane.b32.xlu1 %v9376_v21, %s9745_s4 }
 0xe26   :  { %3812 = vrot.lane.b32.xlu1 %v9378_v55, %s9745_s4 }
 0xe75   :  { %v3785_v39 = vpop.permute.xlu0 %3784 }
 0xe76   :  { %v3787_v26 = vpop.permute.xlu1 %3786  ;;  %v3832_v37 = vmul.f32 %v3785_v39, %v3752_v36 }
 0xe77   :  { %v3833_v7 = vmul.f32 %v3787_v26, %v3753_v34 }
 0xe78   :  { %v12432_v19 = vadd.f32 %v12294_v32, %v3832_v37 }
 0xe79   :  { %v12436_v58 = vadd.f32 %v12304_v35, %v3833_v7  ;;  %v3789_v43 = vpop.permute.xlu0 %3788 }
 0xe7a   :  { %v3928_v31 = vpack.c.bf16 %v12432_v19, %v12432_v19  ;;  %v4574_v22 = vrot.slane %v12432_v19, 6  ;;  %v3834_v33 = vmul.f32 %v3789_v43, %v3754_v2  ;;  %v3761_v2 = vsub.f32 1.0, %v12342_v25 }
 0xe7b   :  { %v3929_v18 = vpack.c.bf16 %v12436_v58, %v12436_v58  ;;  %v4575_v59 = vrot.slane %v12436_v58, 5 }
 0xe7c   :  { %v3960_v21 = vunpack.c.l.b16 %v3928_v31  ;;  %v12445_v32 = vadd.f32 %v12315_v6, %v3834_v33 }
 0xe7d   :  { %v3961_v35 = vunpack.c.l.b16 %v3929_v18  ;;  %v4576_v55 = vsel %vm808_vm1, %v4575_v59, %v4574_v22  ;;  %v3791_v36 = vpop.permute.xlu0 %3790  ;;  %v3756_v22 = vsub.f32 1.0, %v12306_v28 }
 0xe7e   :  { %v3976_v34 = vrot.slane %v3960_v21, 6  ;;  %v3930_v39 = vpack.c.bf16 %v12445_v32, %v12445_v32  ;;  %v4577_v26 = vrot.slane %v12445_v32, 4  ;;  %v3835_v37 = vmul.f32 %v3791_v36, %v3755_v12 }
 0xe7f   :  { %v3977_v7 = vrot.slane %v3961_v35, 5 }
 0xe80   :  { %v3962_v43 = vunpack.c.l.b16 %v3930_v39  ;;  %v4578_v6 = vsel %vm811_vm2, %v4577_v26, %v4576_v55  ;;  %v3803_v31 = vpop.permute.xlu1 %3802  ;;  %v12455_v51 = vadd.f32 %v12325_v50, %v3835_v37  ;;  %v3762_v55 = vsub.f32 1.0, %v12349_v27 }
 0xe81   :  { %v3978_v33 = vsel %vm808_vm1, %v3977_v7, %v3976_v34  ;;  %v3841_v18 = vmul.f32 %v3803_v31, %v3761_v2  ;;  %v3793_v59 = vpop.permute.xlu0 %3792  ;;  %v3757_v50 = vsub.f32 1.0, %v12310_v63 }
 0xe82   :  { %v3979_v21 = vrot.slane %v3962_v43, 4  ;;  %v3931_v12 = vpack.c.bf16 %v12455_v51, %v12455_v51  ;;  %v4579_v35 = vrot.slane %v12455_v51, 3  ;;  %v3836_v25 = vmul.f32 %v3793_v59, %v3756_v22 }
 0xe83   :  { %v12463_v36 = vadd.f32 %v12354_v40, %v3841_v18  ;;  %v3763_v22 = vsub.f32 1.0, %v12356_v3 }
 0xe84   :  { %v3980_v28 = vsel %vm811_vm2, %v3979_v21, %v3978_v33  ;;  %v3963_v39 = vunpack.c.l.b16 %v3931_v12  ;;  %v3805_v34 = vpop.permute.xlu1 %3804  ;;  %v12469_v26 = vadd.f32 %v12334_v48, %v3836_v25  ;;  %v4580_v37 = vsel %vm814_vm3, %v4579_v35, %v4578_v6 }
 0xe85   :  { %v3842_v7 = vmul.f32 %v3805_v34, %v3762_v55  ;;  %v3795_v2 = vpop.permute.xlu0 %3794  ;;  %v3760_v33 = vsub.f32 1.0, %v12336_v44  ;;  %v3758_v48 = vsub.f32 1.0, %v12283_v8  ;;  %v3937_v35 = vpack.c.bf16 %v12463_v36, %v12463_v36 }
 0xe86   :  { %v3981_v43 = vrot.slane %v3963_v39, 3  ;;  %v3932_v40 = vpack.c.bf16 %v12469_v26, %v12469_v26  ;;  %v4581_v31 = vrot.slane %v12469_v26, 2  ;;  %v3837_v27 = vmul.f32 %v3795_v2, %v3757_v50 }
 0xe87   :  { %v12476_v63 = vadd.f32 %v12366_v47, %v3842_v7  ;;  %v3764_v25 = vsub.f32 1.0, %v12361_v54  ;;  %v15012_v44 = vrot.slane %v12149_v9, 7  ;;  %v3765_v54 = vsub.f32 1.0, %v12387_v57 }
 0xe88   :  { %v3982_v6 = vsel %vm814_vm3, %v3981_v43, %v3980_v28  ;;  %v3964_v18 = vunpack.c.l.b16 %v3932_v40  ;;  %v3807_v59 = vpop.permute.xlu1 %3806  ;;  %v12483_v21 = vadd.f32 %v12340_v62, %v3837_v27  ;;  %v4582_v12 = vsel %vm817_vm4, %v4581_v31, %v4580_v37 }
 0xe89   :  { %v3843_v47 = vmul.f32 %v3807_v59, %v3763_v22  ;;  %v3801_v3 = vpop.permute.xlu0 %3800  ;;  %v3902_v55 = vmul.f32 %v12283_v8, %v15012_v44  ;;  %v3938_v34 = vpack.c.bf16 %v12476_v63, %v12476_v63  ;;  %v3759_v7 = vsub.f32 1.0, %v12317_v14 }
 0xe8a   :  { %v3983_v50 = vrot.slane %v3964_v18, 2  ;;  %v3933_v28 = vpack.c.bf16 %v12483_v21, %v12483_v21  ;;  %v4583_v62 = vrot.slane %v12483_v21, 1  ;;  %v3840_v39 = vmul.f32 %v3801_v3, %v3760_v33 }
 0xe8b   :  { %v12498_v37 = vadd.f32 %v12374_v5, %v3843_v47  ;;  %v3969_v31 = vunpack.c.l.b16 %v3937_v35  ;;  %v4588_v27 = vrot.slane %v12463_v36, 5  ;;  %v3970_v59 = vunpack.c.l.b16 %v3938_v34 }
 0xe8c   :  { %v3965_v9 = vunpack.c.l.b16 %v3933_v28  ;;  %v3809_v2 = vpop.permute.xlu1 %3808  ;;  %v12503_v8 = vadd.f32 %v12347_v49, %v3840_v39  ;;  %v3984_v43 = vsel %vm817_vm4, %v3983_v50, %v3982_v6  ;;  %v4584_v40 = vsel %vm820_vm5, %v4583_v62, %v4582_v12 }
 0xe8d   :  { %v3939_v5 = vpack.c.bf16 %v12498_v37, %v12498_v37  ;;  %v3844_v22 = vmul.f32 %v3809_v2, %v3764_v25  ;;  %v3799_v33 = vpop.permute.xlu0 %3798  ;;  %v3767_v12 = vsub.f32 1.0, %v12400_v46  ;;  %v3991_v28 = vrot.slane %v3969_v31, 5 }
 0xe8e   :  { %v3985_v57 = vrot.slane %v3965_v9, 1  ;;  %v3936_v14 = vpack.c.bf16 %v12503_v8, %v12503_v8  ;;  %v4587_v18 = vrot.slane %v12503_v8, 6  ;;  %v3839_v49 = vmul.f32 %v3799_v33, %v3759_v7 }
 0xe8f   :  { %v3971_v47 = vunpack.c.l.b16 %v3939_v5  ;;  %v12514_v6 = vadd.f32 %v12380_v42, %v3844_v22  ;;  %v4590_v62 = vrot.slane %v12476_v63, 4  ;;  %v4592_v7 = vrot.slane %v12498_v37, 3 }
 0xe90   :  { %v3811_v35 = vpop.permute.xlu1 %3810  ;;  %v3968_v3 = vunpack.c.l.b16 %v3936_v14  ;;  %v4589_v44 = vsel %vm808_vm1, %v4588_v27, %v4587_v18  ;;  %v12519_v25 = vadd.f32 %v12383_v0, %v3839_v49  ;;  %v3986_v50 = vsel %vm820_vm5, %v3985_v57, %v3984_v43 }
 0xe91   :  { %v3940_v39 = vpack.c.bf16 %v12514_v6, %v12514_v6  ;;  %v3845_v34 = vmul.f32 %v3811_v35, %v3765_v54  ;;  %v3797_v42 = vpop.permute.xlu0 %3796  ;;  %v3993_v27 = vrot.slane %v3970_v59, 4  ;;  %v4591_v43 = vsel %vm811_vm2, %v4590_v62, %v4589_v44 }
 0xe92   :  { %v3990_v46 = vrot.slane %v3968_v3, 6  ;;  %v3935_v9 = vpack.c.bf16 %v12519_v25, %v12519_v25  ;;  %v3838_v2 = vmul.f32 %v3797_v42, %v3758_v48  ;;  %v3995_v31 = vrot.slane %v3971_v47, 3 }
 0xe93   :  { %v3972_v0 = vunpack.c.l.b16 %v3940_v39  ;;  %v12529_v5 = vadd.f32 %v12398_v1, %v3845_v34  ;;  %v4593_v57 = vsel %vm814_vm3, %v4592_v7, %v4591_v43  ;;  %v3766_v1 = vsub.f32 1.0, %v12393_v41 }
 0xe94   :  { %v3992_v22 = vsel %vm808_vm1, %v3991_v28, %v3990_v46  ;;  %v3815_v33 = vpop.permute.xlu1 %3814  ;;  %v12533_v54 = vadd.f32 %v3902_v55, %v3838_v2  ;;  %v3967_v49 = vunpack.c.l.b16 %v3935_v9  ;;  %v4594_v55 = vrot.slane %v12514_v6, 2 }
 0xe95   :  { %v3997_v14 = vrot.slane %v3972_v0, 2  ;;  %v3941_v18 = vpack.c.bf16 %v12529_v5, %v12529_v5  ;;  %v3994_v48 = vsel %vm811_vm2, %v3993_v27, %v3992_v22  ;;  %v3847_v59 = vmul.f32 %v3815_v33, %v3767_v12 }
 0xe96   :  { %v3934_v47 = vpack.c.bf16 %v12533_v54, %v12533_v54  ;;  %v3996_v35 = vsel %vm814_vm3, %v3995_v31, %v3994_v48  ;;  %v12547_v28 = vsel %vm823_vm6, %v12533_v54, %v4584_v40  ;;  %v4596_v62 = vrot.slane %v12529_v5, 1 }
 0xe97   :  { %v3973_v3 = vunpack.c.l.b16 %v3941_v18  ;;  %v3998_v44 = vsel %vm817_vm4, %v3997_v14, %v3996_v35  ;;  %v12551_v12 = vadd.f32 %v12406_v29, %v3847_v59  ;;  %v15013_v39 = vrot.slane %v12196_v24, 7 }
 0xe98   :  { %v3813_v42 = vpop.permute.xlu1 %3812  ;;  %v3966_v7 = vunpack.c.l.b16 %v3934_v47  ;;  %v3988_v9 = vrot.slane %v3967_v49, 7  ;;  %v4595_v27 = vsel %vm817_vm4, %v4594_v55, %v4593_v57 }
 0xe99   :  { %v3910_v34 = vmul.f32 %v12393_v41, %v15013_v39  ;;  %v3999_v46 = vrot.slane %v3973_v3, 1  ;;  %v3846_v2 = vmul.f32 %v3813_v42, %v3766_v1  ;;  %v3943_v40 = vpack.c.bf16 %v12551_v12, %v12551_v12 }
 0xe9a   :  { %v3987_v0 = vsel %vm823_vm6, %v3966_v7, %v3986_v50  ;;  %v4597_v43 = vsel %vm820_vm5, %v4596_v62, %v4595_v27  ;;  %v4406_v22 = vrot.slane %v12551_v12, 7 }
 0xe9b   :  { %v12561_v29 = vadd.f32 %v3910_v34, %v3846_v2  ;;  %v3989_v24 = vsel %vm826_vm7, %v3988_v9, %v3987_v0  ;;  %v4000_v41 = vsel %vm820_vm5, %v3999_v46, %v3998_v44  ;;  %v3975_v31 = vunpack.c.l.b16 %v3943_v40 }
 0xe9d   :  { %v3942_v33 = vpack.c.bf16 %v12561_v29, %v12561_v29  ;;  %v4598_v57 = vsel %vm823_vm6, %v12561_v29, %v4597_v43  ;;  %v4002_v18 = vrot.slane %v3975_v31, 7  ;;  %v15014_v31 = vld [vmem:[#allocation18_spill] sm:$0xff] }
 0xe9e   :  { %v12573_v50 = vsel %vm826_vm7, %v4406_v22, %v4598_v57 }
 0xe9f   :  { %v3974_v14 = vunpack.c.l.b16 %v3942_v33 }
 0xea1   :  { %v4001_v48 = vsel %vm823_vm6, %v3974_v14, %v4000_v41 }
 0xea2   :  { %v4003_v49 = vsel %vm826_vm7, %v4002_v18, %v4001_v48 }
 0xea3   :  { %v4004_v59 = vpack.c.b16 %v4003_v49, %v3989_v24 }
 0xea5   :  { %4005 = vrot.lane.b32.xlu0 %v4004_v59, %s9745_s4  ;;  %v15015_v59 = vld [vmem:[#allocation20_spill] sm:$0xff] }
 0xf17   :  { %v4006_v1 = vpop.permute.xlu0 %4005 }
 0xf18   :  { %8474 = vmatmul.mubr.msk.bf16.vlgmr.msra.gmra.mrb[12].mxu1 %vm14832_vm0, %v4006_v1 }
 0xfeb   :  { %v4044_v47 = vpop.f32.mrb[12].mxu1 }
 0xfec   :  { %v4055_v35 = vrot.slane %v4044_v47, 1  ;;  %v4056_v55 = vrot.slane %v4044_v47, 2  ;;  %v4057_v3 = vrot.slane %v4044_v47, 3  ;;  %v4058_v44 = vrot.slane %v4044_v47, 4  ;;  %v12579_v62 = vpop.f32.mrb[13].mxu1 }
 0xfed   :  { %v4059_v39 = vrot.slane %v4044_v47, 5  ;;  %v4060_v34 = vrot.slane %v4044_v47, 6  ;;  %v4061_v42 = vrot.slane %v4044_v47, 7  ;;  %v4092_v7 = vadd.f32 %v4044_v47, %v14947_v61  ;;  %v12582_v46 = vpop.f32.mrb[14].mxu1  ;;  %v15016_v47 = vld [vmem:[#allocation21_spill] sm:$0xff] }
 0xfee   :  { %v4085_v9 = vadd.f32 %v4055_v35, %v10039_v15  ;;  %v4086_v2 = vadd.f32 %v4056_v55, %v14894_v11  ;;  %v4087_v27 = vadd.f32 %v4057_v3, %v10045_v17  ;;  %v4088_v40 = vadd.f32 %v4058_v44, %v14944_v16  ;;  %v12588_v0 = vpop.f32.mrb[15].mxu1  ;;  %v15017_v55 = vld [vmem:[#allocation22_spill] sm:$0xff]  ;;  %v15018_v44 = vld [vmem:[#allocation23_spill] sm:$0xff] }
 0xfef   :  { %v4089_v43 = vadd.f32 %v4059_v39, %v14895_v13  ;;  %v4090_v24 = vadd.f32 %v4060_v34, %v14945_v23  ;;  %v8482_v41 = vmul.f32 -1.442695, %v4092_v7  ;;  %v4091_v33 = vadd.f32 %v4061_v42, %v15014_v31  ;;  %v15019_v34 = vld [vmem:[#allocation24_spill] sm:$0xff] }
 0xff0   :  { %v8475_v61 = vmul.f32 -1.442695, %v4085_v9  ;;  %v8476_v57 = vmul.f32 -1.442695, %v4086_v2  ;;  %v8477_v14 = vmul.f32 -1.442695, %v4087_v27 }
 0xff1   :  { %v8478_v18 = vmul.f32 -1.442695, %v4088_v40  ;;  %v8479_v15 = vmul.f32 -1.442695, %v4089_v43  ;;  %9379 = vpow2.f32 %v8482_v41  ;;  %v8480_v11 = vmul.f32 -1.442695, %v4090_v24 }
 0xff2   :  { %9381 = vpow2.f32 %v8475_v61  ;;  %v4062_v17 = vrot.slane %v12582_v46, 1  ;;  %v4063_v16 = vrot.slane %v12582_v46, 2  ;;  %v4064_v13 = vrot.slane %v12582_v46, 3 }
 0xff3   :  { %9383 = vpow2.f32 %v8476_v57  ;;  %v4065_v23 = vrot.slane %v12582_v46, 4  ;;  %v4066_v48 = vrot.slane %v12582_v46, 5  ;;  %v8481_v49 = vmul.f32 -1.442695, %v4091_v33 }
 0xff4   :  { %9385 = vpow2.f32 %v8477_v14  ;;  %v4093_v1 = vadd.f32 %v4062_v17, %v15015_v59  ;;  %v4094_v35 = vadd.f32 %v4063_v16, %v15016_v47  ;;  %v4095_v3 = vadd.f32 %v4064_v13, %v15017_v55  ;;  %v15021_v13 = vld [vmem:[#allocation26_spill] sm:$0xff]  ;;  %v15022_v59 = vld [vmem:[#allocation27_spill] sm:$0xff] }
 0xff5   :  { %9387 = vpow2.f32 %v8478_v18  ;;  %v4096_v39 = vadd.f32 %v4065_v23, %v15018_v44  ;;  %v4097_v42 = vadd.f32 %v4066_v48, %v15019_v34  ;;  %v4067_v43 = vrot.slane %v12582_v46, 6 }
 0xff6   :  { %9389 = vpow2.f32 %v8479_v15  ;;  %v8483_v7 = vmul.f32 -1.442695, %v4093_v1  ;;  %v8484_v9 = vmul.f32 -1.442695, %v4094_v35  ;;  %v8485_v2 = vmul.f32 -1.442695, %v4095_v3 }
 0xff7   :  { %9391 = vpow2.f32 %v8480_v11  ;;  %v8486_v27 = vmul.f32 -1.442695, %v4096_v39  ;;  %v8487_v40 = vmul.f32 -1.442695, %v4097_v42  ;;  %v4068_v41 = vrot.slane %v12582_v46, 7  ;;  %v15020_v15 = vld [vmem:[#allocation25_spill] sm:$0xff] }
 0xff8   :  { %9393 = vpow2.f32 %v8481_v49  ;;  %v4098_v11 = vadd.f32 %v4067_v43, %v15020_v15  ;;  %v4100_v1 = vadd.f32 %v12582_v46, %v15022_v59  ;;  %v4392_v46 = vrot.slane %v12436_v58, 7 }
 0xff9   :  { %9395 = vpow2.f32 %v8483_v7  ;;  %v4099_v23 = vadd.f32 %v4068_v41, %v15021_v13  ;;  %v4391_v7 = vrot.slane %v12432_v19, 7  ;;  %v4394_v41 = vrot.slane %v12455_v51, 7 }
 0xffa   :  { %9397 = vpow2.f32 %v8484_v9  ;;  %v8488_v44 = vmul.f32 -1.442695, %v4098_v11  ;;  %v4395_v19 = vrot.slane %v12469_v26, 7 }
 0xffb   :  { %v9380_v24 = vpop.eup %9379  ;;  %9399 = vpow2.f32 %v8485_v2  ;;  %v8489_v42 = vmul.f32 -1.442695, %v4099_v23  ;;  %v15023_v2 = vld [vmem:[#allocation38_spill] sm:$0xff] }
 0xffc   :  { %v9382_v31 = vpop.eup %9381  ;;  %v4156_v33 = vadd.f32 1.0, %v9380_v24  ;;  %9401 = vpow2.f32 %v8486_v27  ;;  %v4197_v27 = vadd.f32 %v15023_v2, %v12579_v62  ;;  %v12619_v58 = vadd.f32 %v15023_v2, %v12588_v0 }
 0xffd   :  { %v9384_v61 = vpop.eup %9383  ;;  %v4149_v57 = vadd.f32 1.0, %v9382_v31  ;;  %9403 = vpow2.f32 %v8487_v40  ;;  %v8490_v40 = vmul.f32 -1.442695, %v4100_v1  ;;  %v4393_v31 = vrot.slane %v12445_v32, 7 }
 0xffe   :  { %v9386_v14 = vpop.eup %9385  ;;  %v4150_v18 = vadd.f32 1.0, %v9384_v61  ;;  %9405 = vrcp.f32 %v4156_v33  ;;  %v4202_v51 = vrot.slane %v4197_v27, 2  ;;  %v4201_v11 = vrot.slane %v4197_v27, 1 }
 0xfff   :  { %v9388_v17 = vpop.eup %9387  ;;  %v4151_v16 = vadd.f32 1.0, %v9386_v14  ;;  %9407 = vrcp.f32 %v4149_v57  ;;  %v4400_v57 = vrot.slane %v12463_v36, 7  ;;  %v4204_v13 = vrot.slane %v4197_v27, 4 }
0x1000   :  { %v9390_v48 = vpop.eup %9389  ;;  %v4152_v49 = vadd.f32 1.0, %v9388_v17  ;;  %9409 = vrcp.f32 %v4150_v18  ;;  %v4396_v18 = vrot.slane %v12483_v21, 7  ;;  %v4203_v21 = vrot.slane %v4197_v27, 3 }
0x1001   :  { %v9392_v47 = vpop.eup %9391  ;;  %v4153_v35 = vadd.f32 1.0, %v9390_v48  ;;  %9411 = vrcp.f32 %v4151_v16  ;;  %v4211_v26 = vrot.slane %v12619_v58, 4 }
0x1002   :  { %v9394_v55 = vpop.eup %9393  ;;  %v4154_v3 = vadd.f32 1.0, %v9392_v47  ;;  %9413 = vrcp.f32 %v4152_v49  ;;  %v4206_v47 = vrot.slane %v4197_v27, 6 }
0x1003   :  { %v9396_v39 = vpop.eup %9395  ;;  %v4155_v34 = vadd.f32 1.0, %v9394_v55  ;;  %9415 = vrcp.f32 %v4153_v35  ;;  %v4205_v35 = vrot.slane %v4197_v27, 5 }
0x1004   :  { %v9398_v9 = vpop.eup %9397  ;;  %9417 = vrcp.f32 %v4154_v3  ;;  %v4157_v24 = vadd.f32 1.0, %v9396_v39  ;;  %v15024_v3 = vld [vmem:[#allocation29_spill] sm:$0xff] }
0x1005   :  { %v9400_v43 = vpop.eup %9399  ;;  %9419 = vrcp.f32 %v4155_v34  ;;  %v4158_v61 = vadd.f32 1.0, %v9398_v9 }
0x1006   :  { %v9402_v33 = vpop.eup %9401  ;;  %9421 = vpow2.f32 %v8488_v44  ;;  %v4159_v62 = vadd.f32 1.0, %v9400_v43 }
0x1007   :  { %v9404_v14 = vpop.eup %9403  ;;  %9423 = vpow2.f32 %v8489_v42  ;;  %v4160_v32 = vadd.f32 1.0, %v9402_v33 }
0x1008   :  { %v12622_v15 = vpop.eup %9405  ;;  %9425 = vpow2.f32 %v8490_v40  ;;  %v4161_v16 = vadd.f32 1.0, %v9404_v14  ;;  %v4207_v40 = vrot.slane %v4197_v27, 7 }
0x1009   :  { %v12624_v17 = vpop.eup %9407  ;;  %9427 = vrcp.f32 %v4157_v24  ;;  %v12627_v23 = vmul.f32 %v12622_v15, %v4197_v27  ;;  %v15026_v24 = vld [vmem:[#allocation31_spill] sm:$0xff] }
0x100a   :  { %v12629_v48 = vpop.eup %9409  ;;  %9429 = vrcp.f32 %v4158_v61  ;;  %v4231_v0 = vmul.f32 %v12624_v17, %v4201_v11  ;;  %v12633_v49 = vmul.f32 %v12624_v17, %v4391_v7  ;;  %v15025_v7 = vld [vmem:[#allocation30_spill] sm:$0xff]  ;;  %v4399_v11 = vrot.slane %v12503_v8, 7 }
0x100b   :  { %v12635_v59 = vpop.eup %9411  ;;  %9431 = vrcp.f32 %v4159_v62  ;;  %v4232_v1 = vmul.f32 %v12629_v48, %v4202_v51  ;;  %v12643_v34 = vmul.f32 %v12629_v48, %v4392_v46  ;;  %v15027_v62 = vld [vmem:[#allocation32_spill] sm:$0xff] }
0x100c   :  { %v12638_v55 = vpop.eup %9413  ;;  %9433 = vrcp.f32 %v4160_v32  ;;  %v4247_v44 = vadd.f32 %v4231_v0, %v15024_v3  ;;  %v4233_v39 = vmul.f32 %v12635_v59, %v4203_v21  ;;  %v4397_v0 = vrot.slane %v12533_v54, 7 }
0x100d   :  { %v12645_v42 = vpop.eup %9415  ;;  %9435 = vrcp.f32 %v4161_v16  ;;  %v4248_v9 = vadd.f32 %v4232_v1, %v15025_v7  ;;  %v4234_v2 = vmul.f32 %v12638_v55, %v4204_v13  ;;  %v12654_v14 = vmul.f32 %v12638_v55, %v4394_v41 }
0x100e   :  { %v12649_v43 = vpop.eup %9417  ;;  %9437 = vtanh.f32 %v4247_v44  ;;  %v4249_v33 = vadd.f32 %v4233_v39, %v15026_v24  ;;  %v4235_v61 = vmul.f32 %v12645_v42, %v4205_v35  ;;  %v12663_v13 = vmul.f32 %v12635_v59, %v4393_v31 }
0x100f   :  { %v12656_v46 = vpop.eup %9419  ;;  %9439 = vtanh.f32 %v4248_v9  ;;  %v4250_v32 = vadd.f32 %v4234_v2, %v15027_v62  ;;  %v4236_v51 = vmul.f32 %v12649_v43, %v4206_v47  ;;  %v4402_v41 = vrot.slane %v12498_v37, 7 }
0x1010   :  { %v9422_v27 = vpop.eup %9421  ;;  %v4237_v16 = vmul.f32 %v12656_v46, %v4207_v40  ;;  %9441 = vtanh.f32 %v4249_v33  ;;  %v4209_v35 = vrot.slane %v12619_v58, 2  ;;  %v4208_v3 = vrot.slane %v12619_v58, 1 }
0x1011   :  { %v9424_v21 = vpop.eup %9423  ;;  %v4162_v1 = vadd.f32 1.0, %v9422_v27  ;;  %9443 = vtanh.f32 %v4250_v32  ;;  %v4251_v8 = vadd.f32 %v4235_v61, %v15007_v52  ;;  %v12671_v39 = vmul.f32 %v12649_v43, %v4396_v18 }
0x1012   :  { %v9426_v47 = vpop.eup %9425  ;;  %v4163_v44 = vadd.f32 1.0, %v9424_v21  ;;  %v4252_v37 = vadd.f32 %v4236_v51, %v14991_v60  ;;  %v12679_v7 = vmul.f32 %v12645_v42, %v4395_v19  ;;  %v4210_v52 = vrot.slane %v12619_v58, 3 }
0x1013   :  { %v12673_v31 = vpop.eup %9427  ;;  %v4164_v54 = vadd.f32 1.0, %v9426_v47  ;;  %9445 = vrcp.f32 %v4162_v1  ;;  %v12686_v18 = vmul.f32 %v12656_v46, %v4397_v0  ;;  %v4253_v33 = vadd.f32 %v4237_v16, %v15011_v45 }
0x1014   :  { %v12681_v9 = vpop.eup %9429  ;;  %9447 = vrcp.f32 %v4163_v44  ;;  %v4239_v2 = vmul.f32 %v12673_v31, %v4208_v3  ;;  %v4212_v62 = vrot.slane %v12619_v58, 5  ;;  %v4254_v51 = vadd.f32 %v12627_v23, %v15010_v20 }
0x1015   :  { %v12688_v40 = vpop.eup %9431  ;;  %9449 = vrcp.f32 %v4164_v54  ;;  %v4240_v60 = vmul.f32 %v12681_v9, %v4209_v35  ;;  %v12695_v19 = vmul.f32 %v12681_v9, %v4400_v57  ;;  %v12708_v57 = vmul.f32 %v12673_v31, %v4399_v11 }
0x1016   :  { %v12697_v24 = vpop.eup %9433  ;;  %9451 = vtanh.f32 %v4251_v8  ;;  %v4241_v61 = vmul.f32 %v12688_v40, %v4210_v52  ;;  %v4401_v45 = vrot.slane %v12476_v63, 7  ;;  %v4403_v1 = vrot.slane %v12514_v6, 7  ;;  %v15029_v52 = vld [vmem:[#allocation36_spill] sm:$0xff] }
0x1017   :  { %v12702_v32 = vpop.eup %9435  ;;  %9453 = vtanh.f32 %v4252_v37  ;;  %v4242_v36 = vmul.f32 %v12697_v24, %v4211_v26  ;;  %v12714_v21 = vmul.f32 %v12697_v24, %v4402_v41  ;;  %v4255_v20 = vadd.f32 %v4239_v2, %v15009_v10 }
0x1018   :  { %v9438_v27 = vpop.eup %9437  ;;  %v4243_v0 = vmul.f32 %v12702_v32, %v4212_v62  ;;  %9455 = vtanh.f32 %v4253_v33  ;;  %v12720_v23 = vmul.f32 %v12688_v40, %v4401_v45  ;;  %v4256_v63 = vadd.f32 %v4240_v60, %v15008_v56  ;;  %v15028_v56 = vld [vmem:[#allocation35_spill] sm:$0xff] }
0x1019   :  { %v9440_v16 = vpop.eup %9439  ;;  %4311 = vrot.lane.b32.xlu1 %v9438_v27, %s9745_s4  ;;  %9457 = vtanh.f32 %v4254_v51  ;;  %v12724_v35 = vmul.f32 %v12702_v32, %v4403_v1  ;;  %v4213_v41 = vrot.slane %v12619_v58, 6  ;;  %v4404_v6 = vrot.slane %v12529_v5, 7 }
0x101a   :  { %4313 = vrot.lane.b32.xlu0 %v9440_v16, %s9745_s4  ;;  %v9442_v11 = vpop.eup %9441  ;;  %v4214_v10 = vrot.slane %v12619_v58, 7  ;;  %v4405_v44 = vrot.slane %v12561_v29, 7  ;;  %9459 = vtanh.f32 %v4255_v20  ;;  %v4257_v54 = vadd.f32 %v4241_v61, %v15028_v56  ;;  %v15037_v56 = vld [vmem:[#allocation49_spill] sm:$0xff] }
0x101b   :  { %v9444_v3 = vpop.eup %9443  ;;  %9461 = vtanh.f32 %v4256_v63  ;;  %v4258_v60 = vadd.f32 %v4242_v36, %v15029_v52  ;;  %v4259_v36 = vadd.f32 %v4243_v0, %v14967_v38  ;;  %v4280_v52 = vsub.f32 1.0, %v12629_v48 }
0x101c   :  { %9463 = vtanh.f32 %v4257_v54  ;;  %v15038_v54 = vld [vmem:[#allocation42_spill] sm:$0xff] }
0x101d   :  { %v12728_v47 = vpop.eup %9445  ;;  %4315 = vrot.lane.b32.xlu1 %v9442_v11, %s9745_s4  ;;  %9465 = vtanh.f32 %v4258_v60  ;;  %v4398_v11 = vrot.slane %v12519_v25, 7  ;;  %v15035_v25 = vld [vmem:[#allocation40_spill] sm:$0xff] }
0x101e   :  { %v12733_v8 = vpop.eup %9447  ;;  %4317 = vrot.lane.b32.xlu0 %v9444_v3, %s9745_s4  ;;  %v4244_v37 = vmul.f32 %v12728_v47, %v4213_v41  ;;  %v12739_v2 = vmul.f32 %v12728_v47, %v4404_v6  ;;  %9467 = vtanh.f32 %v4259_v36  ;;  %v15030_v3 = vld [vmem:[#allocation46_spill] sm:$0xff]  ;;  %v15031_v41 = vld [vmem:[#allocation47_spill] sm:$0xff]  ;;  %v15032_v6 = vld [vmem:[#allocation17_spill] sm:$0xff]  ;;  %v4281_v36 = vsub.f32 1.0, %v12635_v59 }
0x101f   :  { %v12741_v5 = vpop.eup %9449  ;;  %v4245_v26 = vmul.f32 %v12733_v8, %v4214_v10  ;;  %v12746_v29 = vmul.f32 %v12733_v8, %v4405_v44  ;;  %v4586_v63 = vsel %vm826_vm7, %v4398_v11, %v12547_v28  ;;  %v15033_v10 = vld [vmem:[#allocation48_spill] sm:$0xff]  ;;  %v15036_v28 = vld [vmem:[#allocation14_spill] sm:$0xff]  ;;  %v4284_v59 = vsub.f32 1.0, %v12649_v43 }
0x1020   :  { %v9452_v33 = vpop.eup %9451  ;;  %v4246_v62 = vmul.f32 %v12741_v5, %v12619_v58  ;;  %v12753_v61 = vmul.f32 %v12741_v5, %v4406_v22  ;;  %v4260_v27 = vadd.f32 %v4244_v37, %v14884_v30  ;;  %v15034_v44 = vld [vmem:[#allocation16_spill] sm:$0xff]  ;;  %v4279_v37 = vsub.f32 1.0, %v12624_v17 }
0x1021   :  { %v9454_v51 = vpop.eup %9453  ;;  %4319 = vrot.lane.b32.xlu1 %v9452_v33, %s9745_s4  ;;  %v4261_v12 = vadd.f32 %v4245_v26, %v14916_v53 }
0x1022   :  { %4321 = vrot.lane.b32.xlu0 %v9454_v51, %s9745_s4  ;;  %v9456_v45 = vpop.eup %9455  ;;  %9469 = vtanh.f32 %v4260_v27  ;;  %v4262_v22 = vadd.f32 %v4246_v62, %v14939_v4 }
0x1023   :  { %v9458_v16 = vpop.eup %9457  ;;  %9471 = vtanh.f32 %v4261_v12 }
0x1024   :  { %v9460_v58 = vpop.eup %9459  ;;  %9473 = vtanh.f32 %v4262_v22 }
0x1025   :  { %4323 = vrot.lane.b32.xlu1 %v9456_v45, %s9745_s4  ;;  %v9462_v1 = vpop.eup %9461  ;;  %v4282_v45 = vsub.f32 1.0, %v12638_v55 }
0x1026   :  { %4325 = vrot.lane.b32.xlu0 %v9458_v16, %s9745_s4  ;;  %v9464_v30 = vpop.eup %9463 }
0x1027   :  { %v9466_v38 = vpop.eup %9465 }
0x1028   :  { %v9468_v0 = vpop.eup %9467 }
0x1029   :  { %4327 = vrot.lane.b32.xlu1 %v9460_v58, %s9745_s4 }
0x102a   :  { %4329 = vrot.lane.b32.xlu0 %v9462_v1, %s9745_s4 }
0x102c   :  { %v9470_v20 = vpop.eup %9469 }
0x102d   :  { %4331 = vrot.lane.b32.xlu1 %v9464_v30, %s9745_s4  ;;  %v9472_v53 = vpop.eup %9471  ;;  %v4283_v30 = vsub.f32 1.0, %v12645_v42 }
0x102e   :  { %4333 = vrot.lane.b32.xlu0 %v9466_v38, %s9745_s4  ;;  %v9474_v4 = vpop.eup %9473 }
0x1031   :  { %4335 = vrot.lane.b32.xlu1 %v9468_v0, %s9745_s4 }
0x1032   :  { %4337 = vrot.lane.b32.xlu0 %v9470_v20, %s9745_s4 }
0x1035   :  { %4339 = vrot.lane.b32.xlu1 %v9472_v53, %s9745_s4 }
0x1036   :  { %4341 = vrot.lane.b32.xlu0 %v9474_v4, %s9745_s4 }
0x1039   :  { %4568 = vrot.lane.b32.xlu1 %v15030_v3, %s9745_s4 }
0x103a   :  { %4600 = vrot.lane.b32.xlu0 %v4586_v63, %s9745_s4 }
0x103d   :  { %4634 = vrot.lane.b32.xlu1 %v15031_v41, %s9745_s4  ;;  %v4286_v41 = vsub.f32 1.0, %v12622_v15 }
0x103e   :  { %4666 = vrot.lane.b32.xlu0 %v15032_v6, %s9745_s4 }
0x1041   :  { %4484 = vrot.lane.b32.xlu1 %v15033_v10, %s9745_s4 }
0x1045   :  { %4700 = vrot.lane.b32.xlu1 %v15034_v44, %s9745_s4 }
0x1049   :  { %4570 = vrot.lane.b32.xlu1 %v15035_v25, %s9745_s4 }
0x104d   :  { %4636 = vrot.lane.b32.xlu1 %v15036_v28, %s9745_s4 }
0x1051   :  { %4486 = vrot.lane.b32.xlu1 %v15037_v56, %s9745_s4 }
0x1055   :  { %4702 = vrot.lane.b32.xlu1 %v15038_v54, %s9745_s4  ;;  %v4287_v54 = vsub.f32 1.0, %v12673_v31 }
0x108b   :  { %v4312_v60 = vpop.permute.xlu1 %4311 }
0x108c   :  { %v4314_v26 = vpop.permute.xlu0 %4313  ;;  %v4359_v33 = vmul.f32 %v4312_v60, %v4279_v37 }
0x108d   :  { %v4360_v62 = vmul.f32 %v4314_v26, %v4280_v52 }
0x108e   :  { %v4439_v51 = vadd.f32 %v12633_v49, %v4359_v33 }
0x108f   :  { %v4440_v27 = vadd.f32 %v12643_v34, %v4360_v62  ;;  %v4316_v16 = vpop.permute.xlu1 %4315 }
0x1090   :  { %v4506_v12 = vrot.slane %v4439_v51, 7  ;;  %v4318_v22 = vpop.permute.xlu0 %4317  ;;  %v4361_v58 = vmul.f32 %v4316_v16, %v4281_v36 }
0x1091   :  { %v4507_v1 = vrot.slane %v4440_v27, 6  ;;  %v4362_v17 = vmul.f32 %v4318_v22, %v4282_v45 }
0x1092   :  { %v4441_v48 = vadd.f32 %v12663_v13, %v4361_v58  ;;  %v4285_v13 = vsub.f32 1.0, %v12656_v46  ;;  %v4430_v46 = vmul.f32 %v12622_v15, %v4398_v11  ;;  %v4290_v15 = vsub.f32 1.0, %v12697_v24 }
0x1093   :  { %v4508_v38 = vsel %vm808_vm1, %v4507_v1, %v4506_v12  ;;  %v4442_v49 = vadd.f32 %v12654_v14, %v4362_v17  ;;  %v4320_v0 = vpop.permute.xlu1 %4319  ;;  %v4292_v24 = vsub.f32 1.0, %v12728_v47 }
0x1094   :  { %v4509_v34 = vrot.slane %v4441_v48, 5  ;;  %v4322_v20 = vpop.permute.xlu0 %4321  ;;  %v4363_v55 = vmul.f32 %v4320_v0, %v4283_v30 }
0x1095   :  { %v4511_v53 = vrot.slane %v4442_v49, 4  ;;  %v4364_v4 = vmul.f32 %v4322_v20, %v4284_v59  ;;  %v15039_v49 = vld [vmem:[#allocation44_spill] sm:$0xff] }
0x1096   :  { %v4510_v63 = vsel %vm811_vm2, %v4509_v34, %v4508_v38  ;;  %v4443_v3 = vadd.f32 %v12679_v7, %v4363_v55 }
0x1097   :  { %v4444_v42 = vadd.f32 %v12671_v39, %v4364_v4  ;;  %v4324_v6 = vpop.permute.xlu1 %4323  ;;  %v4512_v14 = vsel %vm814_vm3, %v4511_v53, %v4510_v63  ;;  %v4288_v39 = vsub.f32 1.0, %v12681_v9 }
0x1098   :  { %v4513_v43 = vrot.slane %v4443_v3, 3  ;;  %v4326_v10 = vpop.permute.xlu0 %4325  ;;  %v4365_v44 = vmul.f32 %v4324_v6, %v4285_v13  ;;  %v8685_v6 = vld [vmem:[#allocation7] sm:$0xff]  }
0x1099   :  { %v4515_v25 = vrot.slane %v4444_v42, 2  ;;  %v4366_v28 = vmul.f32 %v4326_v10, %v4286_v41  ;;  %v15040_v41 = vld [vmem:[#allocation19_spill] sm:$0xff]  ;;  %8558 = vmatprep.subr.bf16.mxu0 %v8685_v6  ;;  %v8688_v10 = vld [vmem:[#allocation7 + $0x18] sm:$0xff]  }
0x109a   :  { %v4445_v56 = vadd.f32 %v12686_v18, %v4365_v44  ;;  %v4514_v7 = vsel %vm817_vm4, %v4513_v43, %v4512_v14  ;;  %v4289_v18 = vsub.f32 1.0, %v12688_v40  ;;  %v4291_v40 = vsub.f32 1.0, %v12702_v32  ;;  %8559 = vmatpush3.bf16.msra.mxu0 %v8685_v6  ;;  %v8687_v43 = vld [vmem:[#allocation7 + $0x10] sm:$0xff]  }
0x109b   :  { %v4328_v37 = vpop.permute.xlu1 %4327  ;;  %v4516_v52 = vsel %vm820_vm5, %v4515_v25, %v4514_v7  ;;  %v4446_v62 = vadd.f32 %v4430_v46, %v4366_v28  ;;  %v4293_v32 = vsub.f32 1.0, %v12733_v8  ;;  %v15042_v44 = vlaneseq }
0x109c   :  { %v4517_v60 = vrot.slane %v4445_v56, 1  ;;  %v4330_v26 = vpop.permute.xlu0 %4329  ;;  %v4367_v33 = vmul.f32 %v4328_v37, %v4287_v54  ;;  %v9748_v28 = vmov 1966171168   ;;  %v15044_v37 = vld [vmem:[#allocation12_spill] sm:$0xff] }
0x109d   :  { %v4368_v51 = vmul.f32 %v4330_v26, %v4288_v39  ;;  %v12850_v25 = vand.u32 127, %v15042_v44  ;;  %v4752_v56 = vunpack.c.l.s4 %v9748_v28 }
0x109e   :  { %v4447_v36 = vadd.f32 %v12708_v57, %v4367_v33  ;;  %v4518_v31 = vsel %vm823_vm6, %v4517_v60, %v4516_v52 }
0x109f   :  { %v4448_v27 = vadd.f32 %v12695_v19, %v4368_v51  ;;  %v4332_v11 = vpop.permute.xlu1 %4331  ;;  %v4519_v9 = vsel %vm826_vm7, %v4446_v62, %v4518_v31  ;;  %15043 = vst [vmem:[#allocation45_spill] sm:$0xff] %v12850_v25  ;;  %vm4457_vm8 = vcmp.lt.s32.totalorder %v12850_v25, 32  ;;  %v4753_v7 = vunpack.c.0.s8 %v4752_v56 }
0x10a0   :  { %v4520_v45 = vrot.slane %v4447_v36, 7  ;;  %v4334_v16 = vpop.permute.xlu0 %4333  ;;  %v4369_v12 = vmul.f32 %v4332_v11, %v4289_v18  ;;  %4534 = vrot.lane.b32.xlu0 %v4519_v9, %s9745_s4 }
0x10a1   :  { %v4521_v22 = vrot.slane %v4448_v27, 6  ;;  %v4370_v58 = vmul.f32 %v4334_v16, %v4290_v15  ;;  %v12856_v52 = vsub.s32 %v4753_v7, %v15044_v37 }
0x10a2   :  { %v4449_v57 = vadd.f32 %v12720_v23, %v4369_v12 }
0x10a3   :  { %v4522_v1 = vsel %vm808_vm1, %v4521_v22, %v4520_v45  ;;  %v4450_v19 = vadd.f32 %v12714_v21, %v4370_v58  ;;  %v4336_v17 = vpop.permute.xlu1 %4335  ;;  %v4294_v21 = vsub.f32 1.0, %v12741_v5 }
0x10a4   :  { %v4523_v48 = vrot.slane %v4449_v57, 5  ;;  %v4338_v30 = vpop.permute.xlu0 %4337  ;;  %v4371_v38 = vmul.f32 %v4336_v17, %v4291_v40  ;;  %4732 = vrot.lane.b32.xlu0 %v15039_v49, %s9745_s4 }
0x10a5   :  { %v4525_v59 = vrot.slane %v4450_v19, 4  ;;  %v4372_v0 = vmul.f32 %v4338_v30, %v4292_v24 }
0x10a6   :  { %v4524_v34 = vsel %vm811_vm2, %v4523_v48, %v4522_v1  ;;  %v4451_v23 = vadd.f32 %v12724_v35, %v4371_v38 }
0x10a7   :  { %v4452_v20 = vadd.f32 %v12739_v2, %v4372_v0  ;;  %v4340_v47 = vpop.permute.xlu1 %4339  ;;  %v4526_v55 = vsel %vm814_vm3, %v4525_v59, %v4524_v34 }
0x10a8   :  { %v4527_v53 = vrot.slane %v4451_v23, 3  ;;  %v4342_v4 = vpop.permute.xlu0 %4341  ;;  %v4373_v63 = vmul.f32 %v4340_v47, %v4293_v32  ;;  %4602 = vrot.lane.b32.xlu0 %v12573_v50, %s9745_s4  ;;  %v8686_v50 = vld [vmem:[#allocation7 + $0x8] sm:$0xff]  }
0x10a9   :  { %v4529_v3 = vrot.slane %v4452_v20, 2  ;;  %v4374_v13 = vmul.f32 %v4342_v4, %v4294_v21  ;;  %8560 = vmatprep.subr.bf16.mxu0 %v8686_v50 }
0x10aa   :  { %v4453_v42 = vadd.f32 %v12746_v29, %v4373_v63  ;;  %v4528_v35 = vsel %vm817_vm4, %v4527_v53, %v4526_v55  ;;  %8561 = vmatpush3.bf16.msra.mxu0 %v8686_v50  ;;  %v15047_v55 = vld [vmem:[#allocation13_spill] sm:$0xff] }
0x10ab   :  { %v4454_v8 = vadd.f32 %v12753_v61, %v4374_v13  ;;  %v4530_v2 = vsel %vm820_vm5, %v4529_v3, %v4528_v35  ;;  %v15041_v61 = vld [vmem:[#allocation15_spill] sm:$0xff]  ;;  %8562 = vmatprep.subr.bf16.mxu0 %v8687_v43  ;;  %v4569_v46 = vpop.permute.xlu1 %4568 }
0x10ac   :  { %v4531_v5 = vrot.slane %v4453_v42, 1  ;;  %4668 = vrot.lane.b32.xlu0 %v15040_v41, %s9745_s4  ;;  %v4601_v54 = vpop.permute.xlu0 %4600 }
0x10ad   :  { %v4606_v39 = vsel %vm4457_vm8, %v4569_v46, %v4601_v54  ;;  %v4744_v60 = vsel %vm4457_vm8, %v4601_v54, %v4569_v46 }
0x10ae   :  { %v4532_v14 = vsel %vm823_vm6, %v4531_v5, %v4530_v2  ;;  %8563 = vmatpush3.bf16.msra.mxu0 %v8687_v43  ;;  %v4866_v26 = vcombine.high %v4606_v39, %v4606_v39  ;;  %v4873_v33 = vrot.slane %v4606_v39, %v12856_v52  ;;  %v5366_v62 = vcombine.high %v4744_v60, %v4744_v60 }
0x10af   :  { %v4533_v29 = vsel %vm826_vm7, %v4454_v8, %v4532_v14  ;;  %8564 = vmatprep.subr.bf16.mxu0 %v8688_v10  ;;  %v5373_v36 = vrot.slane %v4744_v60, %v12856_v52  ;;  %v4635_v31 = vpop.permute.xlu1 %4634 }
0x10b0   :  { %4536 = vrot.lane.b32.xlu0 %v4533_v29, %s9745_s4  ;;  %v4880_v51 = vrot.slane %v4866_v26, %v12856_v52  ;;  %v4667_v18 = vpop.permute.xlu0 %4666  ;;  %v4881_v27 = vcombine.high %v4873_v33, %v4873_v33  ;;  %v5380_v15 = vrot.slane %v5366_v62, %v12856_v52  ;;  %v12867_v16 = vrot.slane %v4873_v33, %v12856_v52 }
0x10b1   :  { %v5381_v9 = vcombine.high %v5373_v36, %v5373_v36  ;;  %v4672_v45 = vsel %vm4457_vm8, %v4635_v31, %v4667_v18  ;;  %v4742_v58 = vsel %vm4457_vm8, %v4667_v18, %v4635_v31  ;;  %v12878_v40 = vrot.slane %v5373_v36, %v12856_v52 }
0x10b2   :  { %8565 = vmatpush3.bf16.msra.mxu0 %v8688_v10  ;;  %v4882_v11 = vcombine.high %v4880_v51, %v4880_v51  ;;  %v12870_v12 = vrot.slane %v4881_v27, %v12856_v52  ;;  %v5382_v22 = vcombine.high %v5380_v15, %v5380_v15  ;;  %v12875_v57 = vrot.slane %v4880_v51, %v12856_v52 }
0x10b3   :  { %v4966_v1 = vcombine.high %v4672_v45, %v4672_v45  ;;  %v12884_v24 = vrot.slane %v5380_v15, %v12856_v52  ;;  %v12887_v17 = vrot.slane %v5381_v9, %v12856_v52  ;;  %v4911_v48 = vcombine.high %v12867_v16, %v12867_v16  ;;  %v4485_v60 = vpop.permute.xlu1 %4484 }
0x10b4   :  { %4734 = vrot.lane.b32.xlu0 %v15041_v61, %s9745_s4  ;;  %v12881_v19 = vrot.slane %v4882_v11, %v12856_v52  ;;  %v4973_v30 = vrot.slane %v4672_v45, %v12856_v52  ;;  %v5266_v38 = vcombine.high %v4742_v58, %v4742_v58  ;;  %v4913_v49 = vcombine.high %v12870_v12, %v12870_v12 }
0x10b5   :  { %15045 = vst [vmem:[#allocation37_spill] sm:$0xff] %v12884_v24  ;;  %v12895_v59 = vrot.slane %v5382_v22, %v12856_v52  ;;  %v4912_v0 = vcombine.high %v12875_v57, %v12875_v57  ;;  %v5411_v34 = vcombine.high %v12878_v40, %v12878_v40  ;;  %v4980_v23 = vrot.slane %v4966_v1, %v12856_v52 }
0x10b6   :  { %v5273_v32 = vrot.slane %v4742_v58, %v12856_v52  ;;  %v4914_v20 = vcombine.high %v12881_v19, %v12881_v19  ;;  %v5412_v21 = vcombine.high %v12884_v24, %v12884_v24  ;;  %v5413_v47 = vcombine.high %v12887_v17, %v12887_v17 }
0x10b7   :  { %15046 = vst [vmem:[#allocation34_spill] sm:$0xff] %v12895_v59  ;;  %v5567_v53 = vrot.slane %v12867_v16, %v15047_v55  ;;  %v12914_v63 = vrot.slane %v4911_v48, %v15047_v55  ;;  %v4981_v3 = vcombine.high %v4973_v30, %v4973_v30  ;;  %v5280_v13 = vrot.slane %v5266_v38, %v12856_v52 }
0x10b8   :  { %v5414_v42 = vcombine.high %v12895_v59, %v12895_v59  ;;  %v12920_v35 = vrot.slane %v4913_v49, %v15047_v55  ;;  %v12927_v5 = vrot.slane %v4912_v0, %v15047_v55  ;;  %v4982_v6 = vcombine.high %v4980_v23, %v4980_v23 }
0x10b9   :  { %v5281_v14 = vcombine.high %v5273_v32, %v5273_v32  ;;  %v12932_v50 = vrot.slane %v4914_v20, %v15047_v55  ;;  %v12937_v43 = vrot.slane %v5411_v34, %v15047_v55  ;;  %v12940_v61 = vrot.slane %v5413_v47, %v15047_v55 }
0x10ba   :  { %v12945_v44 = vrot.slane %v4973_v30, %v12856_v52  ;;  %v12948_v28 = vrot.slane %v4981_v3, %v12856_v52  ;;  %v5282_v56 = vcombine.high %v5280_v13, %v5280_v13  ;;  %v12953_v7 = vrot.slane %v4980_v23, %v12856_v52 }
0x10bb   :  { %v12956_v46 = vrot.slane %v5273_v32, %v12856_v52  ;;  %v12959_v39 = vrot.slane %v5280_v13, %v12856_v52  ;;  %v12962_v33 = vrot.slane %v4982_v6, %v12856_v52  ;;  %v12965_v62 = vrot.slane %v5281_v14, %v12856_v52 }
0x10bc   :  { %v12974_v11 = vrot.slane %v5412_v21, %v15047_v55  ;;  %v5011_v9 = vcombine.high %v12945_v44, %v12945_v44  ;;  %v5013_v45 = vcombine.high %v12948_v28, %v12948_v28  ;;  %v12981_v22 = vrot.slane %v5282_v56, %v12856_v52 }
0x10bd   :  { %v12984_v58 = vrot.slane %v5414_v42, %v15047_v55  ;;  %v5012_v1 = vcombine.high %v12953_v7, %v12953_v7  ;;  %v5311_v48 = vcombine.high %v12956_v46, %v12956_v46  ;;  %v5014_v38 = vcombine.high %v12962_v33, %v12962_v33 }
0x10be   :  { %15048 = vst [vmem:[#allocation39_spill] sm:$0xff] %v12974_v11  ;;  %v5312_v49 = vcombine.high %v12959_v39, %v12959_v39  ;;  %v5313_v0 = vcombine.high %v12965_v62, %v12965_v62  ;;  %v5314_v47 = vcombine.high %v12981_v22, %v12981_v22  ;;  %v13005_v3 = vrot.slane %v5011_v9, %v15047_v55 }
0x10bf   :  { %15049 = vst [vmem:[#allocation33_spill] sm:$0xff] %v12984_v58  ;;  %v13008_v13 = vrot.slane %v5013_v45, %v15047_v55  ;;  %v13015_v14 = vrot.slane %v5012_v1, %v15047_v55  ;;  %v15055_v16 = vrot.slane %v12870_v12, %v15047_v55  ;;  %v15056_v8 = vrot.slane %v12875_v57, %v15047_v55 }
0x10c0   :  { %v13037_v10 = vrot.slane %v5313_v0, %v15047_v55 }
0x1112   :  { %v4535_v26 = vpop.permute.xlu0 %4534 }
0x1113   :  { %v4540_v51 = vsel %vm4457_vm8, %v4485_v60, %v4535_v26  ;;  %v4746_v36 = vsel %vm4457_vm8, %v4535_v26, %v4485_v60  ;;  %v13020_v26 = vrot.slane %v5014_v38, %v15047_v55  ;;  %v13034_v38 = vrot.slane %v5311_v48, %v15047_v55 }
0x1114   :  { %v4750_v18 = vcombine.high %v4540_v51, %v4540_v51  ;;  %v4757_v31 = vrot.slane %v4540_v51, %v12856_v52  ;;  %v5466_v27 = vcombine.high %v4746_v36, %v4746_v36  ;;  %v5473_v15 = vrot.slane %v4746_v36, %v12856_v52 }
0x1116   :  { %v4764_v30 = vrot.slane %v4750_v18, %v12856_v52  ;;  %v4765_v32 = vcombine.high %v4757_v31, %v4757_v31  ;;  %v5480_v20 = vrot.slane %v5466_v27, %v12856_v52  ;;  %v5481_v21 = vcombine.high %v5473_v15, %v5473_v15  ;;  %v4733_v27 = vpop.permute.xlu0 %4732 }
0x1117   :  { %v4773_v36 = vrot.slane %v4757_v31, %v12856_v52  ;;  %v13026_v18 = vrot.slane %v5473_v15, %v12856_v52  ;;  %v4701_v15 = vpop.permute.xlu1 %4700 }
0x1118   :  { %v4766_v60 = vcombine.high %v4764_v30, %v4764_v30  ;;  %v4780_v9 = vrot.slane %v4764_v30, %v12856_v52  ;;  %v4787_v45 = vrot.slane %v4765_v32, %v12856_v52  ;;  %v5482_v1 = vcombine.high %v5480_v20, %v5480_v20 }
0x1119   :  { %v13031_v54 = vrot.slane %v5481_v21, %v12856_v52  ;;  %v13042_v29 = vrot.slane %v5480_v20, %v12856_v52  ;;  %v13047_v32 = vrot.slane %v5312_v49, %v15047_v55  ;;  %v4738_v0 = vsel %vm4457_vm8, %v4701_v15, %v4733_v27 }
0x111a   :  { %v4794_v48 = vrot.slane %v4766_v60, %v12856_v52  ;;  %v13053_v21 = vrot.slane %v5314_v47, %v15047_v55  ;;  %v4795_v31 = vcombine.high %v4773_v36, %v4773_v36  ;;  %v5511_v20 = vcombine.high %v13026_v18, %v13026_v18  ;;  %v4603_v4 = vpop.permute.xlu0 %4602 }
0x111b   :  { %15050 = vst [vmem:[#allocation43_spill] sm:$0xff] %v13042_v29  ;;  %15051 = vst [vmem:[#allocation41_spill] sm:$0xff] %v13047_v32  ;;  %v4740_v41 = vsel %vm4457_vm8, %v4733_v27, %v4701_v15  ;;  %v4796_v30 = vcombine.high %v4780_v9, %v4780_v9  ;;  %v4797_v51 = vcombine.high %v4787_v45, %v4787_v45 }
0x111c   :  { %15052 = vst [vmem:[#allocation18_spill] sm:$0xff] %v13053_v21  ;;  %v13060_v49 = vrot.slane %v5482_v1, %v12856_v52  ;;  %v5513_v60 = vcombine.high %v13031_v54, %v13031_v54  ;;  %v5512_v56 = vcombine.high %v13042_v29, %v13042_v29  ;;  %v5066_v42 = vcombine.high %v4738_v0, %v4738_v0 }
0x111d   :  { %v4798_v23 = vcombine.high %v4794_v48, %v4794_v48  ;;  %v5073_v27 = vrot.slane %v4738_v0, %v12856_v52  ;;  %v5166_v15 = vcombine.high %v4740_v41, %v4740_v41  ;;  %v5173_v1 = vrot.slane %v4740_v41, %v12856_v52 }
0x111e   :  { %15053 = vst [vmem:[#allocation20_spill] sm:$0xff] %v13060_v49  ;;  %v13073_v34 = vrot.slane %v5511_v20, %v15047_v55  ;;  %v6125_v47 = vsel %vm6124_vm9, %v4773_v36, %v5567_v53  ;;  %v5080_v6 = vrot.slane %v5066_v42, %v12856_v52  ;;  %v13085_v0 = vrot.slane %v5513_v60, %v15047_v55  ;;  %v4571_v36 = vpop.permute.xlu1 %4570 }
0x111f   :  { %v5081_v41 = vcombine.high %v5073_v27, %v5073_v27  ;;  %v5180_v20 = vrot.slane %v5166_v15, %v12856_v52  ;;  %v13091_v37 = vrot.slane %v5512_v56, %v15047_v55  ;;  %v6126_v53 = vsel %vm6124_vm9, %v4787_v45, %v15055_v16 }
0x1120   :  { %v5082_v42 = vcombine.high %v5080_v6, %v5080_v6  ;;  %v6127_v60 = vsel %vm6124_vm9, %v4795_v31, %v12914_v63  ;;  %v6128_v15 = vsel %vm6124_vm9, %v4797_v51, %v12920_v35  ;;  %v6129_v2 = vsel %vm6124_vm9, %v4780_v9, %v15056_v8 }
0x1121   :  { %15054 = vst [vmem:[#allocation21_spill] sm:$0xff] %v13091_v37  ;;  %v5181_v56 = vcombine.high %v5173_v1, %v5173_v1  ;;  %v15057_v37 = vrot.slane %v12881_v19, %v15047_v55  ;;  %v5089_v45 = vrot.slane %v5073_v27, %v12856_v52  ;;  %v5182_v16 = vcombine.high %v5180_v20, %v5180_v20 }
0x1122   :  { %v4607_v63 = vsel %vm4457_vm8, %v4571_v36, %v4603_v4  ;;  %v6131_v35 = vsel %vm6124_vm9, %v4796_v30, %v12927_v5  ;;  %v6132_v57 = vsel %vm6124_vm9, %v4798_v23, %v12932_v50  ;;  %v5096_v8 = vrot.slane %v5080_v6, %v12856_v52 }
0x1123   :  { %v6130_v12 = vsel %vm6124_vm9, %v4794_v48, %v15057_v37  ;;  %v5103_v51 = vrot.slane %v5081_v41, %v12856_v52  ;;  %v15058_v19 = vrot.slane %v12945_v44, %v15047_v55  ;;  %v15059_v9 = vrot.slane %v12948_v28, %v15047_v55 }
0x1124   :  { %v5110_v5 = vrot.slane %v5082_v42, %v12856_v52  ;;  %v5189_v30 = vrot.slane %v5173_v1, %v12856_v52  ;;  %v6144_v50 = vsel %vm6141_vm10, %v6127_v60, %v13005_v3  ;;  %v13131_v23 = vrot.slane %v5180_v20, %v12856_v52 }
0x1125   :  { %v6142_v37 = vsel %vm6141_vm10, %v6125_v47, %v15058_v19  ;;  %v6143_v31 = vsel %vm6141_vm10, %v6126_v53, %v15059_v9  ;;  %v5203_v44 = vrot.slane %v5181_v56, %v12856_v52  ;;  %v4915_v6 = vcombine.high %v4607_v63, %v4607_v63 }
0x1126   :  { %v6145_v48 = vsel %vm6141_vm10, %v6128_v15, %v13008_v13  ;;  %v15060_v28 = vrot.slane %v12953_v7, %v15047_v55  ;;  %v5111_v27 = vcombine.high %v5089_v45, %v5089_v45  ;;  %v13141_v1 = vrot.slane %v5182_v16, %v12856_v52 }
0x1127   :  { %v15061_v3 = vrot.slane %v12962_v33, %v15047_v55  ;;  %v6148_v20 = vsel %vm6141_vm10, %v6131_v35, %v13015_v14  ;;  %v5112_v53 = vcombine.high %v5096_v8, %v5096_v8  ;;  %v5113_v13 = vcombine.high %v5103_v51, %v5103_v51 }
0x1128   :  { %v6146_v47 = vsel %vm6141_vm10, %v6129_v2, %v15060_v28  ;;  %v13151_v7 = vsel %vm6141_vm10, %v6132_v57, %v13020_v26  ;;  %v5114_v2 = vcombine.high %v5110_v5, %v5110_v5  ;;  %v5211_v42 = vcombine.high %v5189_v30, %v5189_v30 }
0x1129   :  { %v6147_v41 = vsel %vm6141_vm10, %v6130_v12, %v15061_v3  ;;  %15062 = vst [vmem:[#allocation22_spill] sm:$0xff] %v13151_v7  ;;  %v4745_v60 = vsel %vm4457_vm8, %v4603_v4, %v4571_v36  ;;  %v5212_v33 = vcombine.high %v13131_v23, %v13131_v23  ;;  %v5213_v15 = vcombine.high %v5203_v44, %v5203_v44 }
0x112a   :  { %v4922_v56 = vrot.slane %v4607_v63, %v12856_v52  ;;  %v4929_v14 = vrot.slane %v4915_v6, %v12856_v52  ;;  %v5214_v12 = vcombine.high %v13141_v1, %v13141_v1  ;;  %v5727_v16 = vrot.slane %v5089_v45, %v15047_v55 }
0x112b   :  { %v5731_v26 = vrot.slane %v5103_v51, %v15047_v55  ;;  %v5735_v35 = vrot.slane %v5111_v27, %v15047_v55  ;;  %v5739_v4 = vrot.slane %v5113_v13, %v15047_v55  ;;  %v5743_v36 = vrot.slane %v5096_v8, %v15047_v55 }
0x112c   :  { %v5747_v57 = vrot.slane %v5110_v5, %v15047_v55  ;;  %v5751_v63 = vrot.slane %v5112_v53, %v15047_v55  ;;  %v13169_v19 = vrot.slane %v5114_v2, %v15047_v55  ;;  %v5807_v9 = vrot.slane %v5189_v30, %v15047_v55 }
0x112d   :  { %v5811_v45 = vrot.slane %v5203_v44, %v15047_v55  ;;  %v5815_v51 = vrot.slane %v5211_v42, %v15047_v55  ;;  %v5819_v6 = vrot.slane %v5213_v15, %v15047_v55  ;;  %v5823_v28 = vrot.slane %v13131_v23, %v15047_v55  ;;  %v4669_v42 = vpop.permute.xlu0 %4668 }
0x112e   :  { %15063 = vst [vmem:[#allocation23_spill] sm:$0xff] %v13169_v19  ;;  %v4930_v27 = vcombine.high %v4922_v56, %v4922_v56  ;;  %v5415_v8 = vcombine.high %v4745_v60, %v4745_v60  ;;  %v13180_v3 = vrot.slane %v5212_v33, %v15047_v55  ;;  %v6161_v53 = vsel %vm6158_vm11, %v6144_v50, %v5735_v35 }
0x112f   :  { %v5422_v30 = vrot.slane %v4745_v60, %v12856_v52  ;;  %v13185_v44 = vrot.slane %v5214_v12, %v15047_v55  ;;  %v6159_v13 = vsel %vm6158_vm11, %v6142_v37, %v5727_v16  ;;  %v6160_v2 = vsel %vm6158_vm11, %v6143_v31, %v5731_v26  ;;  %v4637_v60 = vpop.permute.xlu1 %4636 }
0x1130   :  { %15064 = vst [vmem:[#allocation24_spill] sm:$0xff] %v13180_v3  ;;  %v4931_v23 = vcombine.high %v4929_v14, %v4929_v14  ;;  %v6162_v15 = vsel %vm6158_vm11, %v6145_v48, %v5739_v4  ;;  %v6163_v5 = vsel %vm6158_vm11, %v6146_v47, %v5743_v36  ;;  %v13192_v33 = vsel %vm6158_vm11, %v6147_v41, %v5747_v57 }
0x1131   :  { %15065 = vst [vmem:[#allocation25_spill] sm:$0xff] %v13185_v44  ;;  %v13195_v50 = vrot.slane %v4922_v56, %v12856_v52  ;;  %v6178_v12 = vsel %vm6175_vm12, %v6161_v53, %v5815_v51  ;;  %v13199_v35 = vrot.slane %v4929_v14, %v12856_v52  ;;  %v13202_v37 = vrot.slane %v4930_v27, %v12856_v52 }
0x1132   :  { %v5429_v31 = vrot.slane %v5415_v8, %v12856_v52  ;;  %v13206_v48 = vsel %vm6158_vm11, %v6148_v20, %v5751_v63  ;;  %v13209_v47 = vsel %vm6175_vm12, %v6159_v13, %v5807_v9  ;;  %v5430_v41 = vcombine.high %v5422_v30, %v5422_v30 }
0x1133   :  { %15066 = vst [vmem:[#allocation26_spill] sm:$0xff] %v13206_v48  ;;  %v4673_v56 = vsel %vm4457_vm8, %v4637_v60, %v4669_v42  ;;  %v13214_v16 = vsel %vm6175_vm12, %v6160_v2, %v5811_v45  ;;  %v13217_v14 = vsel %vm6175_vm12, %v6162_v15, %v5819_v6  ;;  %v13220_v26 = vrot.slane %v4931_v23, %v12856_v52  ;;  %v4487_v23 = vpop.permute.xlu1 %4486 }
0x1134   :  { %v4743_v20 = vsel %vm4457_vm8, %v4669_v42, %v4637_v60  ;;  %v13225_v4 = vsel %vm6175_vm12, %v6163_v5, %v5823_v28  ;;  %v13229_v36 = vsel %vm6192_vm13, %v6178_v12, %v13034_v38  ;;  %v4960_v57 = vcombine.high %v13195_v50, %v13195_v50  ;;  %v4537_v5 = vpop.permute.xlu0 %4536 }
0x1135   :  { %v13234_v63 = vrot.slane %v5422_v30, %v12856_v52  ;;  %v4961_v9 = vcombine.high %v13199_v35, %v13199_v35  ;;  %v4962_v45 = vcombine.high %v13202_v37, %v13202_v37  ;;  %v5431_v51 = vcombine.high %v5429_v31, %v5429_v31 }
0x1136   :  { %v5015_v6 = vcombine.high %v4673_v56, %v4673_v56  ;;  %v13241_v28 = vrot.slane %v5430_v41, %v12856_v52  ;;  %v5022_v27 = vrot.slane %v4673_v56, %v12856_v52  ;;  %v5315_v8 = vcombine.high %v4743_v20, %v4743_v20 }
0x1137   :  { %15067 = vst [vmem:[#allocation27_spill] sm:$0xff] %v13234_v63  ;;  %v4963_v53 = vcombine.high %v13220_v26, %v13220_v26  ;;  %v13249_v30 = vrot.slane %v5429_v31, %v12856_v52  ;;  %v5322_v2 = vrot.slane %v4743_v20, %v12856_v52  ;;  %v5460_v42 = vcombine.high %v13234_v63, %v13234_v63 }
0x1138   :  { %15068 = vst [vmem:[#allocation38_spill] sm:$0xff] %v13241_v28  ;;  %v5029_v13 = vrot.slane %v5015_v6, %v12856_v52  ;;  %v13258_v60 = vrot.slane %v4960_v57, %v15047_v55  ;;  %v5030_v12 = vcombine.high %v5022_v27, %v5022_v27  ;;  %v13261_v41 = vrot.slane %v5431_v51, %v12856_v52 }
0x1139   :  { %15069 = vst [vmem:[#allocation29_spill] sm:$0xff] %v13249_v30  ;;  %v13264_v31 = vrot.slane %v4962_v45, %v15047_v55  ;;  %v5329_v20 = vrot.slane %v5315_v8, %v12856_v52  ;;  %v5462_v6 = vcombine.high %v13241_v28, %v13241_v28  ;;  %v4541_v38 = vsel %vm4457_vm8, %v4487_v23, %v4537_v5 }
0x113a   :  { %15070 = vst [vmem:[#allocation30_spill] sm:$0xff] %v13261_v41  ;;  %v5031_v57 = vcombine.high %v5029_v13, %v5029_v13  ;;  %v13276_v51 = vrot.slane %v4961_v9, %v15047_v55  ;;  %v13279_v45 = vrot.slane %v4963_v53, %v15047_v55  ;;  %v5330_v8 = vcombine.high %v5322_v2, %v5322_v2  ;;  %v4735_v9 = vpop.permute.xlu0 %4734 }
0x113b   :  { %v13284_v11 = vrot.slane %v5022_v27, %v12856_v52  ;;  %v13287_v58 = vrot.slane %v5029_v13, %v12856_v52  ;;  %v13290_v15 = vrot.slane %v5030_v12, %v12856_v52  ;;  %v13293_v21 = vrot.slane %v5322_v2, %v12856_v52  ;;  %v4703_v27 = vpop.permute.xlu1 %4702 }
0x113c   :  { %v5331_v32 = vcombine.high %v5329_v20, %v5329_v20  ;;  %v13298_v56 = vrot.slane %v5329_v20, %v12856_v52  ;;  %v4799_v63 = vcombine.high %v4541_v38, %v4541_v38  ;;  %v13301_v44 = vrot.slane %v5460_v42, %v15047_v55 }
0x113d   :  { %v13304_v13 = vrot.slane %v5462_v6, %v15047_v55  ;;  %v13309_v12 = vrot.slane %v5031_v57, %v12856_v52  ;;  %v13314_v20 = vrot.slane %v5330_v8, %v12856_v52  ;;  %v4747_v28 = vsel %vm4457_vm8, %v4537_v5, %v4487_v23 }
0x113e   :  { %15071 = vst [vmem:[#allocation31_spill] sm:$0xff] %v13298_v56  ;;  %15072 = vst [vmem:[#allocation32_spill] sm:$0xff] %v13301_v44  ;;  %v4739_v42 = vsel %vm4457_vm8, %v4703_v27, %v4735_v9  ;;  %v5060_v6 = vcombine.high %v13284_v11, %v13284_v11  ;;  %v5061_v2 = vcombine.high %v13287_v58, %v13287_v58 }
0x113f   :  { %15073 = vst [vmem:[#allocation35_spill] sm:$0xff] %v13304_v13  ;;  %v5062_v57 = vcombine.high %v13290_v15, %v13290_v15  ;;  %v5360_v53 = vcombine.high %v13293_v21, %v13293_v21  ;;  %v13329_v8 = vrot.slane %v5331_v32, %v12856_v52  ;;  %v4806_v23 = vrot.slane %v4541_v38, %v12856_v52 }
0x1140   :  { %v4813_v30 = vrot.slane %v4799_v63, %v12856_v52  ;;  %v5063_v44 = vcombine.high %v13309_v12, %v13309_v12  ;;  %v5679_v41 = vrot.slane %v13284_v11, %v15047_v55  ;;  %v5515_v13 = vcombine.high %v4747_v28, %v4747_v28 }
0x1141   :  { %v5522_v48 = vrot.slane %v4747_v28, %v12856_v52  ;;  %v5362_v32 = vcombine.high %v13314_v20, %v13314_v20  ;;  %v5683_v3 = vrot.slane %v13290_v15, %v15047_v55  ;;  %v4814_v5 = vcombine.high %v4806_v23, %v4806_v23 }
0x1142   :  { %v4815_v49 = vcombine.high %v4813_v30, %v4813_v30  ;;  %v5687_v38 = vrot.slane %v5060_v6, %v15047_v55  ;;  %v5691_v63 = vrot.slane %v5062_v57, %v15047_v55  ;;  %v5529_v29 = vrot.slane %v5515_v13, %v12856_v52 }
0x1143   :  { %v5530_v7 = vcombine.high %v5522_v48, %v5522_v48  ;;  %v5695_v11 = vrot.slane %v13287_v58, %v15047_v55  ;;  %v5699_v28 = vrot.slane %v13309_v12, %v15047_v55  ;;  %v4822_v19 = vrot.slane %v4806_v23, %v12856_v52 }
0x1144   :  { %v4836_v59 = vrot.slane %v4814_v5, %v12856_v52  ;;  %v13354_v15 = vrot.slane %v5061_v2, %v15047_v55  ;;  %v5707_v6 = vrot.slane %v5063_v44, %v15047_v55  ;;  %v4829_v13 = vrot.slane %v4813_v30, %v12856_v52 }
0x1145   :  { %v13363_v24 = vrot.slane %v5360_v53, %v15047_v55  ;;  %v4843_v12 = vrot.slane %v4815_v49, %v12856_v52  ;;  %v13367_v5 = vrot.slane %v5522_v48, %v12856_v52  ;;  %v13370_v2 = vrot.slane %v5362_v32, %v15047_v55 }
0x1146   :  { %15074 = vst [vmem:[#allocation36_spill] sm:$0xff] %v13354_v15  ;;  %v5531_v23 = vcombine.high %v5529_v29, %v5529_v29  ;;  %v13375_v30 = vrot.slane %v5530_v7, %v12856_v52  ;;  %v4844_v53 = vcombine.high %v4822_v19, %v4822_v19  ;;  %v4846_v57 = vcombine.high %v4836_v59, %v4836_v59 }
0x1147   :  { %15075 = vst [vmem:[#allocation46_spill] sm:$0xff] %v13363_v24  ;;  %v4741_v49 = vsel %vm4457_vm8, %v4735_v9, %v4703_v27  ;;  %v4845_v48 = vcombine.high %v4829_v13, %v4829_v13  ;;  %v13382_v15 = vrot.slane %v5529_v29, %v12856_v52  ;;  %v5115_v32 = vcombine.high %v4739_v42, %v4739_v42 }
0x1148   :  { %v5122_v24 = vrot.slane %v4739_v42, %v12856_v52  ;;  %v4847_v44 = vcombine.high %v4843_v12, %v4843_v12  ;;  %v15076_v58 = vrot.slane %v13195_v50, %v15047_v55  ;;  %v13394_v9 = vrot.slane %v5531_v23, %v12856_v52 }
0x1149   :  { %v6083_v27 = vrot.slane %v13375_v30, %v15047_v55  ;;  %v15077_v42 = vrot.slane %v13202_v37, %v15047_v55  ;;  %v6135_v56 = vsel %vm6124_vm9, %v4844_v53, %v13258_v60  ;;  %v15078_v50 = vrot.slane %v13199_v35, %v15047_v55 }
0x114a   :  { %v6133_v25 = vsel %vm6124_vm9, %v4822_v19, %v15076_v58  ;;  %v6136_v19 = vsel %vm6124_vm9, %v4846_v57, %v13264_v31  ;;  %v15079_v23 = vrot.slane %v13220_v26, %v15047_v55  ;;  %v13418_v37 = vsel %vm6124_vm9, %v4845_v48, %v13276_v51 }
0x114b   :  { %v6134_v7 = vsel %vm6124_vm9, %v4836_v59, %v15077_v42  ;;  %v6137_v58 = vsel %vm6124_vm9, %v4829_v13, %v15078_v50  ;;  %v5129_v59 = vrot.slane %v5115_v32, %v12856_v52  ;;  %v5130_v60 = vcombine.high %v5122_v24, %v5122_v24 }
0x114c   :  { %v6138_v29 = vsel %vm6124_vm9, %v4843_v12, %v15079_v23  ;;  %v5138_v53 = vrot.slane %v5122_v24, %v12856_v52  ;;  %v6140_v31 = vsel %vm6124_vm9, %v4847_v44, %v13279_v45  ;;  %v6150_v35 = vsel %vm6141_vm10, %v6133_v25, %v5679_v41 }
0x114d   :  { %v5215_v57 = vcombine.high %v4741_v49, %v4741_v49  ;;  %v5222_v13 = vrot.slane %v4741_v49, %v12856_v52  ;;  %v6151_v26 = vsel %vm6141_vm10, %v6134_v7, %v5683_v3  ;;  %v6152_v12 = vsel %vm6141_vm10, %v6135_v56, %v5687_v38 }
0x114e   :  { %v5131_v42 = vcombine.high %v5129_v59, %v5129_v59  ;;  %v5152_v51 = vrot.slane %v5130_v60, %v12856_v52  ;;  %v6153_v48 = vsel %vm6141_vm10, %v6136_v19, %v5691_v63  ;;  %v13433_v25 = vrot.slane %v5129_v59, %v12856_v52 }
0x114f   :  { %v5229_v24 = vrot.slane %v5215_v57, %v12856_v52  ;;  %v5230_v32 = vcombine.high %v5222_v13, %v5222_v13  ;;  %v5238_v45 = vrot.slane %v5222_v13, %v12856_v52  ;;  %v5160_v3 = vcombine.high %v5138_v53, %v5138_v53 }
0x1150   :  { %v5159_v41 = vrot.slane %v5131_v42, %v12856_v52  ;;  %v5162_v44 = vcombine.high %v5152_v51, %v5152_v51  ;;  %v6154_v56 = vsel %vm6141_vm10, %v6137_v58, %v5695_v11  ;;  %v6155_v38 = vsel %vm6141_vm10, %v6138_v29, %v5699_v28 }
0x1151   :  { %v5231_v49 = vcombine.high %v5229_v24, %v5229_v24  ;;  %v5252_v63 = vrot.slane %v5230_v32, %v12856_v52  ;;  %v13440_v7 = vsel %vm6141_vm10, %v6140_v31, %v5707_v6  ;;  %v13443_v50 = vrot.slane %v5229_v24, %v12856_v52 }
0x1152   :  { %v5163_v19 = vcombine.high %v5159_v41, %v5159_v41  ;;  %v5759_v23 = vrot.slane %v5138_v53, %v15047_v55  ;;  %v5260_v60 = vcombine.high %v5238_v45, %v5238_v45  ;;  %v15080_v11 = vrot.slane %v12956_v46, %v15047_v55 }
0x1153   :  { %v13447_v59 = vrot.slane %v5231_v49, %v12856_v52  ;;  %v5262_v57 = vcombine.high %v5252_v63, %v5252_v63  ;;  %v5763_v6 = vrot.slane %v5152_v51, %v15047_v55  ;;  %v5767_v29 = vrot.slane %v5160_v3, %v15047_v55 }
0x1154   :  { %v6193_v28 = vsel %vm6192_vm13, %v13209_v47, %v15080_v11  ;;  %v5771_v58 = vrot.slane %v5162_v44, %v15047_v55  ;;  %v5775_v53 = vrot.slane %v13433_v25, %v15047_v55  ;;  %v5161_v52 = vcombine.high %v13433_v25, %v13433_v25 }
0x1155   :  { %v5779_v31 = vrot.slane %v5159_v41, %v15047_v55  ;;  %v5839_v13 = vrot.slane %v5238_v45, %v15047_v55  ;;  %v15081_v46 = vrot.slane %v12965_v62, %v15047_v55  ;;  %v5261_v42 = vcombine.high %v13443_v50, %v13443_v50 }
0x1156   :  { %v13471_v51 = vrot.slane %v5163_v19, %v15047_v55  ;;  %v5843_v24 = vrot.slane %v5252_v63, %v15047_v55  ;;  %v6167_v32 = vsel %vm6158_vm11, %v6150_v35, %v5759_v23  ;;  %v5847_v25 = vrot.slane %v5260_v60, %v15047_v55 }
0x1157   :  { %v6194_v47 = vsel %vm6192_vm13, %v13214_v16, %v15081_v46  ;;  %v5851_v45 = vrot.slane %v5262_v57, %v15047_v55  ;;  %v5855_v62 = vrot.slane %v13443_v50, %v15047_v55  ;;  %v5859_v16 = vrot.slane %v13447_v59, %v15047_v55 }
0x1158   :  { %v6168_v41 = vsel %vm6158_vm11, %v6151_v26, %v5763_v6  ;;  %v6169_v3 = vsel %vm6158_vm11, %v6152_v12, %v5767_v29  ;;  %v6170_v44 = vsel %vm6158_vm11, %v6153_v48, %v5771_v58  ;;  %v6171_v49 = vsel %vm6158_vm11, %v6154_v56, %v5775_v53  ;;  %v15091_v29 = vld [vmem:[#allocation34_spill] sm:$0xff]  ;;  %v15093_v58 = vld [vmem:[#allocation23_spill] sm:$0xff] }
0x1159   :  { %v6172_v35 = vsel %vm6158_vm11, %v6155_v38, %v5779_v31  ;;  %v6184_v63 = vsel %vm6175_vm12, %v6167_v32, %v5839_v13  ;;  %v15082_v19 = vrot.slane %v12878_v40, %v15047_v55  ;;  %v15083_v60 = vrot.slane %v12887_v17, %v15047_v55  ;;  %v15094_v53 = vld [vmem:[#allocation22_spill] sm:$0xff]  ;;  %v15095_v31 = vld [vmem:[#allocation43_spill] sm:$0xff] }
0x115a   :  { %v15084_v12 = vrot.slane %v13026_v18, %v15047_v55  ;;  %v15085_v56 = vrot.slane %v13031_v54, %v15047_v55  ;;  %v6196_v40 = vsel %vm6192_vm13, %v13217_v14, %v13037_v10  ;;  %v6212_v17 = vsel %vm6209_vm14, %v13229_v36, %v12937_v43 }
0x115b   :  { %v6210_v23 = vsel %vm6209_vm14, %v6193_v28, %v15082_v19  ;;  %v6211_v26 = vsel %vm6209_vm14, %v6194_v47, %v15083_v60  ;;  %v6185_v57 = vsel %vm6175_vm12, %v6168_v41, %v5843_v24  ;;  %v6213_v11 = vsel %vm6209_vm14, %v6196_v40, %v12940_v61  ;;  %v15097_v47 = vld [vmem:[#allocation20_spill] sm:$0xff]  ;;  %v15100_v19 = vld [vmem:[#allocation26_spill] sm:$0xff]  ;;  %v15101_v60 = vld [vmem:[#allocation25_spill] sm:$0xff] }
0x115c   :  { %v13499_v48 = vsel %vm6226_vm15, %v6210_v23, %v15084_v12  ;;  %v13505_v38 = vsel %vm6226_vm15, %v6211_v26, %v15085_v56  ;;  %v15086_v54 = vrot.slane %v13141_v1, %v15047_v55  ;;  %v13525_v10 = vsel %vm6226_vm15, %v6212_v17, %v13073_v34  ;;  %v15099_v41 = vld [vmem:[#allocation24_spill] sm:$0xff]  ;;  %v15102_v56 = vld [vmem:[#allocation41_spill] sm:$0xff]  ;;  %v15103_v17 = vld [vmem:[#allocation18_spill] sm:$0xff] }
0x115d   :  { %v6243_v18 = vpack.c.bf16 %v13505_v38, %v13499_v48  ;;  %v13529_v43 = vsel %vm6226_vm15, %v6213_v11, %v13085_v0  ;;  %v15087_v14 = vrot.slane %v12959_v39, %v15047_v55  ;;  %v15088_v1 = vrot.slane %v12981_v22, %v15047_v55 }
0x115e   :  { %v6181_v28 = vsel %vm6175_vm12, %v13192_v33, %v15086_v54  ;;  %v6244_v34 = vpack.c.bf16 %v13529_v43, %v13525_v10  ;;  %v15089_v33 = vld [vmem:[#allocation37_spill] sm:$0xff]  ;;  %v15092_v39 = vrot.slane %v15091_v29, %v15047_v55  ;;  %v6166_v22 = vsel %vm6158_vm11, %v15094_v53, %v15093_v58  ;;  %v15110_v29 = vld [vmem:[#allocation39_spill] sm:$0xff] }
0x115f   :  { %v6197_v61 = vsel %vm6192_vm13, %v13225_v4, %v15087_v14  ;;  %v6198_v36 = vsel %vm6192_vm13, %v6181_v28, %v15088_v1  ;;  %8566 = vmatprep.mubr.msk.bf16.mxu0 %vm14832_vm0, %v6243_v18  ;;  %v15090_v0 = vrot.slane %v15089_v33, %v15047_v55  ;;  %v15096_v13 = vrot.slane %v15095_v31, %v15047_v55  ;;  %v15108_v33 = vld [vmem:[#allocation27_spill] sm:$0xff] }
0x1160   :  { %v6215_v4 = vsel %vm6209_vm14, %v6198_v36, %v15092_v39  ;;  %v15098_v24 = vrot.slane %v15097_v47, %v15047_v55  ;;  %v6182_v23 = vsel %vm6175_vm12, %v15100_v19, %v15099_v41  ;;  %v6183_v26 = vsel %vm6175_vm12, %v6166_v22, %v15101_v60  ;;  %8567 = vmatmul.mubr.msk.bf16.vlgmr.msra.gmra.mrb[48].mxu0 %vm14832_vm0, %v6244_v34  ;;  %v15118_v19 = vld [vmem:[#allocation31_spill] sm:$0xff] }
0x1161   :  { %v6214_v6 = vsel %vm6209_vm14, %v6197_v61, %v15090_v0  ;;  %v6199_v40 = vsel %vm6192_vm13, %v6182_v23, %v15102_v56  ;;  %v6200_v18 = vsel %vm6192_vm13, %v6183_v26, %v15103_v17  ;;  %v15104_v11 = vrot.slane %v13293_v21, %v15047_v55  ;;  %v15106_v61 = vld [vmem:[#allocation33_spill] sm:$0xff] }
0x1162   :  { %v13558_v46 = vsel %vm6226_vm15, %v6214_v6, %v15096_v13  ;;  %v13564_v32 = vsel %vm6226_vm15, %v6215_v4, %v15098_v24  ;;  %v15105_v28 = vcombine.high %v15097_v47, %v15097_v47  ;;  %v6217_v1 = vsel %vm6209_vm14, %v6200_v18, %v15106_v61  ;;  %v15111_v4 = vld [vmem:[#allocation38_spill] sm:$0xff]  ;;  %v15114_v13 = vld [vmem:[#allocation21_spill] sm:$0xff] }
0x1163   :  { %v6245_v12 = vpack.c.bf16 %v13564_v32, %v13558_v46  ;;  %v6201_v54 = vsel %vm6192_vm13, %v6184_v63, %v15104_v11  ;;  %v15107_v36 = vrot.slane %v13314_v20, %v15047_v55  ;;  %v15109_v0 = vrot.slane %v15108_v33, %v15047_v55 }
0x1164   :  { %v6075_v14 = vrot.slane %v15105_v28, %v15047_v55  ;;  %v5263_v63 = vcombine.high %v13447_v59, %v13447_v59  ;;  %v6186_v6 = vsel %vm6175_vm12, %v6169_v3, %v5847_v25  ;;  %v6216_v39 = vsel %vm6209_vm14, %v6199_v40, %v15110_v29  ;;  %v15121_v40 = vld [vmem:[#allocation30_spill] sm:$0xff]  ;;  %v15123_v28 = vld [vmem:[#allocation36_spill] sm:$0xff] }
0x1165   :  { %v6202_v34 = vsel %vm6192_vm13, %v6185_v57, %v15107_v36  ;;  %v6218_v21 = vsel %vm6209_vm14, %v6201_v54, %v15109_v0  ;;  %8570 = vmatprep.mubr.msk.bf16.mxu0 %vm14832_vm0, %v6245_v12  ;;  %v15112_v20 = vrot.slane %v15111_v4, %v15047_v55  ;;  %v6188_v58 = vsel %vm6175_vm12, %v6171_v49, %v5855_v62  ;;  %v15126_v36 = vld [vmem:[#allocation29_spill] sm:$0xff] }
0x1166   :  { %v13608_v53 = vsel %vm6226_vm15, %v6217_v1, %v6075_v14  ;;  %v6187_v25 = vsel %vm6175_vm12, %v6170_v44, %v5851_v45  ;;  %v5783_v3 = vrot.slane %v5161_v52, %v15047_v55  ;;  %v15113_v22 = vrot.slane %v13367_v5, %v15047_v55  ;;  %v15115_v45 = vld [vmem:[#allocation46_spill] sm:$0xff]  ;;  %v15124_v14 = vld [vmem:[#allocation32_spill] sm:$0xff] }
0x1167   :  { %v6219_v57 = vsel %vm6209_vm14, %v6202_v34, %v15112_v20  ;;  %v6204_v62 = vsel %vm6192_vm13, %v6187_v25, %v13370_v2  ;;  %v6189_v49 = vsel %vm6175_vm12, %v6172_v35, %v5859_v16  ;;  %v13629_v47 = vsel %vm6226_vm15, %v6216_v39, %v15114_v13  ;;  %v15117_v16 = vld [vmem:[#allocation35_spill] sm:$0xff] }
0x1168   :  { %v13614_v59 = vsel %vm6226_vm15, %v6219_v57, %v6083_v27  ;;  %v13622_v31 = vsel %vm6226_vm15, %v6218_v21, %v15113_v22  ;;  %v6203_v52 = vsel %vm6192_vm13, %v6186_v6, %v15115_v45  ;;  %v15116_v44 = vrot.slane %v13329_v8, %v15047_v55 }
0x1169   :  { %v6247_v27 = vpack.c.bf16 %v13614_v59, %v13622_v31  ;;  %v5867_v41 = vrot.slane %v5263_v63, %v15047_v55  ;;  %v6246_v2 = vpack.c.bf16 %v13608_v53, %v13629_v47  ;;  %v6221_v35 = vsel %vm6209_vm14, %v6204_v62, %v15117_v16 }
0x116a   :  { %v6206_v24 = vsel %vm6192_vm13, %v6189_v49, %v15116_v44  ;;  %v15119_v23 = vrot.slane %v15118_v19, %v15047_v55  ;;  %v5363_v26 = vcombine.high %v13329_v8, %v13329_v8  ;;  %v15120_v12 = vcombine.high %v13375_v30, %v13375_v30 }
0x116b   :  { %v15122_v17 = vrot.slane %v15121_v40, %v15047_v55  ;;  %v6174_v11 = vsel %vm6158_vm11, %v13440_v7, %v13471_v51  ;;  %v6099_v54 = vrot.slane %v13394_v9, %v15047_v55  ;;  %v6156_v8 = vsel %vm6141_vm10, %v13418_v37, %v15123_v28  ;;  %8571 = vmatmul.mubr.msk.bf16.gmra.mrb[52].mxu0 %vm14832_vm0, %v6246_v2 }
0x116c   :  { %v6205_v60 = vsel %vm6192_vm13, %v6188_v58, %v15119_v23  ;;  %v6091_v56 = vrot.slane %v15120_v12, %v15047_v55  ;;  %v5863_v30 = vrot.slane %v5261_v42, %v15047_v55  ;;  %v6220_v61 = vsel %vm6209_vm14, %v6203_v52, %v15124_v14  ;;  %8574 = vmatprep.mubr.msk.bf16.mxu0 %vm14832_vm0, %v6247_v27 }
0x116d   :  { %v6223_v18 = vsel %vm6209_vm14, %v6206_v24, %v15122_v17  ;;  %v15125_v7 = vcombine.high %v13367_v5, %v13367_v5  ;;  %v6173_v1 = vsel %vm6158_vm11, %v6156_v8, %v5783_v3  ;;  %v15127_v50 = vrot.slane %v15126_v36, %v15047_v55 }
0x116e   :  { %v13680_v37 = vsel %vm6226_vm15, %v6221_v35, %v6091_v56  ;;  %v5463_v34 = vcombine.high %v15121_v40, %v15121_v40  ;;  %v6095_v33 = vrot.slane %v13382_v15, %v15047_v55  ;;  %v13691_v5 = vsel %vm6226_vm15, %v6223_v18, %v6099_v54 }
0x116f   :  { %v6087_v51 = vrot.slane %v15125_v7, %v15047_v55  ;;  %v6222_v42 = vsel %vm6209_vm14, %v6205_v60, %v15127_v50  ;;  %v6191_v0 = vsel %vm6175_vm12, %v6174_v11, %v5867_v41  ;;  %v5947_v21 = vrot.slane %v5363_v26, %v15047_v55  ;;  %v13738_v60 = vld [vmem:[%s14709_s7] ss:$0 sm:$0xff] }
0x1170   :  { %v5461_v6 = vcombine.high %v15126_v36, %v15126_v36  ;;  %v13703_v39 = vsel %vm6226_vm15, %v6222_v42, %v6095_v33  ;;  %v6190_v4 = vsel %vm6175_vm12, %v6173_v1, %v5863_v30  ;;  %v15128_v20 = vcombine.high %v15118_v19, %v15118_v19 }
0x1171   :  { %v13696_v63 = vsel %vm6226_vm15, %v6220_v61, %v6087_v51  ;;  %v5563_v58 = vcombine.high %v13394_v9, %v13394_v9  ;;  %v6249_v25 = vpack.c.bf16 %v13691_v5, %v13703_v39  ;;  %v6208_v3 = vsel %vm6192_vm13, %v6191_v0, %v5947_v21 }
0x1172   :  { %v6248_v29 = vpack.c.bf16 %v13680_v37, %v13696_v63  ;;  %v5943_v57 = vrot.slane %v15128_v20, %v15047_v55  ;;  %v6027_v22 = vrot.slane %v5463_v34, %v15047_v55  ;;  %v5561_v62 = vcombine.high %v13382_v15, %v13382_v15 }
0x1173   :  { %v6023_v13 = vrot.slane %v5461_v6, %v15047_v55  ;;  %v6107_v9 = vrot.slane %v5563_v58, %v15047_v55  ;;  %vm6593_vm10 = vcmask 64512  }
0x1174   :  { %v6207_v49 = vsel %vm6192_vm13, %v6190_v4, %v5943_v57  ;;  %8575 = vmatmul.mubr.msk.bf16.gmra.mrb[56].mxu0 %vm14832_vm0, %v6248_v29  ;;  %v6225_v27 = vsel %vm6209_vm14, %v6208_v3, %v6027_v22  ;;  %v6103_v52 = vrot.slane %v5561_v62, %v15047_v55 }
0x1175   :  { %8578 = vmatprep.mubr.msk.bf16.mxu0 %vm14832_vm0, %v6249_v25  ;;  %v6224_v45 = vsel %vm6209_vm14, %v6207_v49, %v6023_v13  ;;  %v13727_v44 = vsel %vm6226_vm15, %v6225_v27, %v6107_v9  ;;  %vm7341_vm14 = vcmask 261120  }
0x1176   :  { %v13730_v15 = vsel %vm6226_vm15, %v6224_v45, %v6103_v52 }
0x1177   :  { %v6250_v24 = vpack.c.bf16 %v13727_v44, %v13730_v15 }
0x117c   :  { %8579 = vmatmul.mubr.msk.bf16.gmra.mrb[60].mxu0 %vm14832_vm0, %v6250_v24 }
0x1233   :  { %v8568_v41 = vpop.f32.mrb[48].mxu0 }
0x1234   :  { %9475 = vtanh.f32 %v8568_v41  ;;  %v6341_v2 = vpop.f32.mrb[49].mxu0 }
0x1235   :  { %9477 = vtanh.f32 %v6341_v2  ;;  %v8569_v16 = vpop.f32.mrb[50].mxu0 }
0x1236   :  { %9479 = vtanh.f32 %v8569_v16  ;;  %v6344_v35 = vpop.f32.mrb[51].mxu0 }
0x1237   :  { %9481 = vtanh.f32 %v6344_v35 }
0x123e   :  { %v8572_v19 = vpop.f32.mrb[52].mxu0  ;;  %v9476_v12 = vpop.eup %9475 }
0x123f   :  { %9483 = vtanh.f32 %v8572_v19  ;;  %v6357_v23 = vpop.f32.mrb[53].mxu0  ;;  %v9478_v40 = vpop.eup %9477  ;;  %v6429_v17 = vmul.f32 %v9476_v12, %v13738_v60 }
0x1240   :  { %9485 = vtanh.f32 %v6357_v23  ;;  %v8573_v26 = vpop.f32.mrb[54].mxu0  ;;  %v9480_v18 = vpop.eup %9479  ;;  %v6427_v11 = vmul.f32 %v9478_v40, %v13738_v60 }
0x1241   :  { %9487 = vtanh.f32 %v8573_v26  ;;  %v6360_v56 = vpop.f32.mrb[55].mxu0  ;;  %v9482_v54 = vpop.eup %9481  ;;  %v6449_v28 = vsel %vm14832_vm0, %v6429_v17, 0.0  ;;  %v6430_v14 = vmul.f32 %v9480_v18, %v13738_v60 }
0x1242   :  { %9489 = vtanh.f32 %v6360_v56  ;;  %6450 = vadd.xlane.f32.xlu0 %v6449_v28  ;;  %v6443_v8 = vsel %vm14832_vm0, %v6427_v11, 0.0  ;;  %v6428_v30 = vmul.f32 %v9482_v54, %v13738_v60 }
0x1243   :  { %6444 = vadd.xlane.f32.xlu1 %v6443_v8  ;;  %v6452_v42 = vsel %vm14832_vm0, %v6430_v14, 0.0 }
0x1244   :  { %v6446_v51 = vsel %vm14832_vm0, %v6428_v30, 0.0 }
0x1246   :  { %6447 = vadd.xlane.f32.xlu0 %v6446_v51  ;;  %v15130_v51 = vld [vmem:[#allocation45_spill] sm:$0xff] }
0x1247   :  { %v8576_v61 = vpop.f32.mrb[56].mxu0  ;;  %6453 = vadd.xlane.f32.xlu1 %v6452_v42 }
0x1248   :  { %9491 = vtanh.f32 %v8576_v61  ;;  %v6373_v7 = vpop.f32.mrb[57].mxu0 }
0x1249   :  { %9493 = vtanh.f32 %v6373_v7  ;;  %v8577_v1 = vpop.f32.mrb[58].mxu0  ;;  %v9484_v36 = vpop.eup %9483  ;;  %v15129_v7 = vld [vmem:[#allocation12_spill] sm:$0xff] }
0x124a   :  { %9495 = vtanh.f32 %v8577_v1  ;;  %v6376_v50 = vpop.f32.mrb[59].mxu0  ;;  %v9486_v34 = vpop.eup %9485  ;;  %v6433_v4 = vmul.f32 %v9484_v36, %v13738_v60  ;;  %v6513_v1 = vsub.s32 %v15130_v51, %v15129_v7 }
0x124b   :  { %9497 = vtanh.f32 %v6376_v50  ;;  %v9488_v33 = vpop.eup %9487  ;;  %v6431_v0 = vmul.f32 %v9486_v34, %v13738_v60 }
0x124c   :  { %v9490_v21 = vpop.eup %9489  ;;  %v6434_v25 = vmul.f32 %v9488_v33, %v13738_v60  ;;  %v6461_v49 = vsel %vm14832_vm0, %v6433_v4, 0.0 }
0x124d   :  { %v6455_v6 = vsel %vm14832_vm0, %v6431_v0, 0.0  ;;  %v6432_v29 = vmul.f32 %v9490_v21, %v13738_v60 }
0x124e   :  { %6456 = vadd.xlane.f32.xlu0 %v6455_v6  ;;  %v6464_v45 = vsel %vm14832_vm0, %v6434_v25, 0.0 }
0x124f   :  { %v8580_v20 = vpop.f32.mrb[60].mxu0  ;;  %v6458_v58 = vsel %vm14832_vm0, %v6432_v29, 0.0 }
0x1250   :  { %9499 = vtanh.f32 %v8580_v20  ;;  %v6389_v57 = vpop.f32.mrb[61].mxu0  ;;  %6459 = vadd.xlane.f32.xlu1 %v6458_v58 }
0x1251   :  { %9501 = vtanh.f32 %v6389_v57  ;;  %v8581_v3 = vpop.f32.mrb[62].mxu0 }
0x1252   :  { %v9492_v22 = vpop.eup %9491  ;;  %9503 = vtanh.f32 %v8581_v3  ;;  %v6392_v62 = vpop.f32.mrb[63].mxu0  ;;  %6462 = vadd.xlane.f32.xlu0 %v6461_v49 }
0x1253   :  { %v9494_v13 = vpop.eup %9493  ;;  %9505 = vtanh.f32 %v6392_v62  ;;  %v6437_v27 = vmul.f32 %v9492_v22, %v13738_v60  ;;  %v6491_v22 = vld [vmem:[%s14703_s1] sm:$0xff] }
0x1254   :  { %v9496_v9 = vpop.eup %9495  ;;  %6465 = vadd.xlane.f32.xlu1 %v6464_v45  ;;  %v6435_v2 = vmul.f32 %v9494_v13, %v13738_v60  ;;  %vm6493_vm8 = vcmp.gt.f32.partialorder %v6491_v22, 0.0 }
0x1255   :  { %v9498_v52 = vpop.eup %9497  ;;  %v6473_v24 = vsel %vm14832_vm0, %v6437_v27, 0.0  ;;  %v6438_v41 = vmul.f32 %v9496_v9, %v13738_v60 }
0x1256   :  { %6474 = vadd.xlane.f32.xlu0 %v6473_v24  ;;  %v6436_v35 = vmul.f32 %v9498_v52, %v13738_v60  ;;  %v6467_v23 = vsel %vm14832_vm0, %v6435_v2, 0.0 }
0x1257   :  { %v6476_v16 = vsel %vm14832_vm0, %v6438_v41, 0.0 }
0x1258   :  { %6477 = vadd.xlane.f32.xlu1 %v6476_v16  ;;  %v6470_v56 = vsel %vm14832_vm0, %v6436_v35, 0.0 }
0x125a   :  { %v9500_v19 = vpop.eup %9499  ;;  %6468 = vadd.xlane.f32.xlu0 %v6467_v23 }
0x125b   :  { %v9502_v26 = vpop.eup %9501  ;;  %v6441_v54 = vmul.f32 %v9500_v19, %v13738_v60 }
0x125c   :  { %v9504_v12 = vpop.eup %9503  ;;  %v6439_v40 = vmul.f32 %v9502_v26, %v13738_v60  ;;  %6471 = vadd.xlane.f32.xlu1 %v6470_v56 }
0x125d   :  { %v9506_v17 = vpop.eup %9505  ;;  %v6442_v8 = vmul.f32 %v9504_v12, %v13738_v60  ;;  %v6485_v30 = vsel %vm14832_vm0, %v6441_v54, 0.0 }
0x125e   :  { %v6479_v18 = vsel %vm14832_vm0, %v6439_v40, 0.0  ;;  %v6440_v11 = vmul.f32 %v9506_v17, %v13738_v60 }
0x125f   :  { %6480 = vadd.xlane.f32.xlu0 %v6479_v18  ;;  %v6488_v14 = vsel %vm14832_vm0, %v6442_v8, 0.0 }
0x1260   :  { %v6482_v28 = vsel %vm14832_vm0, %v6440_v11, 0.0 }
0x1261   :  { %6483 = vadd.xlane.f32.xlu1 %v6482_v28 }
0x1263   :  { %6486 = vadd.xlane.f32.xlu0 %v6485_v30 }
0x1265   :  { %6489 = vadd.xlane.f32.xlu1 %v6488_v14  ;;  %v6492_v14 = vld [vmem:[%s14703_s1 + $0x8] sm:$0xff] }
0x1266   :  { %vm6494_vm11 = vcmp.gt.f32.partialorder %v6492_v14, 0.0 }
0x12cf   :  { %v6451_v61 = vpop.xlane.xlu0 %6450 }
0x12d0   :  { %v6445_v36 = vpop.xlane.xlu1 %6444  ;;  %v6522_v0 = vrot.slane %v6451_v61, %v6513_v1 }
0x12d1   :  { %v6514_v42 = vrot.slane %v6445_v36, %v6513_v1 }
0x12d3   :  { %v6448_v50 = vpop.xlane.xlu0 %6447 }
0x12d4   :  { %v6518_v34 = vrot.slane %v6448_v50, %v6513_v1  ;;  %v6454_v33 = vpop.xlane.xlu1 %6453 }
0x12d5   :  { %v6526_v60 = vrot.slane %v6454_v33, %v6513_v1 }
0x12d6   :  { %v6575_v21 = vsel %vm808_vm1, %v6518_v34, %v6514_v42 }
0x12d7   :  { %v6576_v6 = vsel %vm811_vm2, %v6522_v0, %v6575_v21 }
0x12d8   :  { %v6577_v20 = vsel %vm814_vm3, %v6526_v60, %v6576_v6 }
0x12db   :  { %v6457_v29 = vpop.xlane.xlu0 %6456 }
0x12dc   :  { %v6530_v4 = vrot.slane %v6457_v29, %v6513_v1 }
0x12dd   :  { %v6460_v57 = vpop.xlane.xlu1 %6459 }
0x12de   :  { %v6578_v58 = vsel %vm817_vm4, %v6530_v4, %v6577_v20  ;;  %v6534_v25 = vrot.slane %v6460_v57, %v6513_v1 }
0x12df   :  { %v6463_v3 = vpop.xlane.xlu0 %6462 }
0x12e0   :  { %v6579_v62 = vsel %vm820_vm5, %v6534_v25, %v6578_v58  ;;  %v6538_v49 = vrot.slane %v6463_v3, %v6513_v1 }
0x12e1   :  { %v6466_v13 = vpop.xlane.xlu1 %6465 }
0x12e2   :  { %v6580_v27 = vsel %vm823_vm6, %v6538_v49, %v6579_v62  ;;  %v6542_v9 = vrot.slane %v6466_v13, %v6513_v1 }
0x12e3   :  { %v6475_v45 = vpop.xlane.xlu0 %6474 }
0x12e4   :  { %v6581_v52 = vsel %vm826_vm7, %v6542_v9, %v6580_v27  ;;  %v6554_v26 = vrot.slane %v6475_v45, %v6513_v1  ;;  %v15131_v45 = vld [vmem:[#allocation28_spill] sm:$0xff] }
0x12e5   :  { %v6478_v24 = vpop.xlane.xlu1 %6477  ;;  %v6591_v41 = vsel %vm6493_vm8, %v6581_v52, -1e+30 }
0x12e6   :  { %v6594_v2 = vsel %vm6593_vm10, %v6591_v41, -inf  ;;  %v6558_v56 = vrot.slane %v6478_v24, %v6513_v1  ;;  %v13801_v24 = vsub.s32 3, %v15129_v7 }
0x12e7   :  { %v6469_v16 = vpop.xlane.xlu0 %6468  ;;  %6595 = vmax.xlane.f32.xlu0 %v6594_v2 }
0x12e8   :  { %v6546_v19 = vrot.slane %v6469_v16, %v6513_v1 }
0x12e9   :  { %v6472_v35 = vpop.xlane.xlu1 %6471 }
0x12ea   :  { %v6550_v23 = vrot.slane %v6472_v35, %v6513_v1  ;;  %v13812_v35 = vsub.s32 4, %v15129_v7 }
0x12ec   :  { %v6481_v12 = vpop.xlane.xlu0 %6480  ;;  %v6582_v40 = vsel %vm808_vm1, %v6550_v23, %v6546_v19 }
0x12ed   :  { %v6562_v17 = vrot.slane %v6481_v12, %v6513_v1  ;;  %v6583_v18 = vsel %vm811_vm2, %v6554_v26, %v6582_v40  ;;  %v13817_v26 = vsub.s32 7, %v15129_v7  ;;  %v13820_v12 = vsub.s32 6, %v15129_v7 }
0x12ee   :  { %v6484_v11 = vpop.xlane.xlu1 %6483  ;;  %v6584_v54 = vsel %vm814_vm3, %v6558_v56, %v6583_v18 }
0x12ef   :  { %v6566_v28 = vrot.slane %v6484_v11, %v6513_v1  ;;  %v6585_v8 = vsel %vm817_vm4, %v6562_v17, %v6584_v54 }
0x12f0   :  { %v6487_v30 = vpop.xlane.xlu0 %6486 }
0x12f1   :  { %v6586_v61 = vsel %vm820_vm5, %v6566_v28, %v6585_v8  ;;  %v6570_v51 = vrot.slane %v6487_v30, %v6513_v1  ;;  %v8689_v30 = vld [vmem:[%s14710_s8] sm:$0xff]  }
0x12f2   :  { %v6490_v36 = vpop.xlane.xlu1 %6489  ;;  %7066 = vmatpush1.bf16.msra.mxu1 %v8689_v30 }
0x12f3   :  { %v6587_v50 = vsel %vm823_vm6, %v6570_v51, %v6586_v61  ;;  %v6574_v42 = vrot.slane %v6490_v36, %v6513_v1  ;;  %v8690_v51 = vld [vmem:[%s14710_s8 + $0x8] sm:$0xff]   ;;  %v15132_v36 = vmov 0  }
0x12f4   :  { %7067 = vmatprep.subr.bf16.mxu1 %v15132_v36 }
0x12f5   :  { %v6588_v34 = vsel %vm826_vm7, %v6574_v42, %v6587_v50 }
0x12f6   :  { %v6592_v33 = vsel %vm6494_vm11, %v6588_v34, -1e+30  ;;  %7068 = vmatpush1.bf16.msra.mxu1 %v8690_v51  ;;  %v8691_v34 = vld [vmem:[%s14710_s8 + $0x10] sm:$0xff]  }
0x12f7   :  { %v6597_v0 = vsel %vm6593_vm10, %v6592_v33, -inf  ;;  %7069 = vmatprep.subr.bf16.mxu1 %v15132_v36 }
0x12f8   :  { %6598 = vmax.xlane.f32.xlu1 %v6597_v0  ;;  %v8693_v0 = vld [vmem:[%s14710_s8 + $0x20] sm:$0xff]  }
0x12fa   :  { %7070 = vmatpush1.bf16.msra.mxu1 %v8691_v34 }
0x12fb   :  { %7071 = vmatprep.subr.bf16.mxu1 %v15132_v36 }
0x1374   :  { %v6596_v21 = vpop.xlane.xlu0 %6595 }
0x1375   :  { %v6600_v60 = vsub.f32 %v6591_v41, %v6596_v21  ;;  %v13804_v41 = vsub.s32 2, %v15129_v7  ;;  %v8694_v21 = vld [vmem:[%s14710_s8 + $0x28] sm:$0xff]  }
0x1377   :  { %v6602_v6 = vmul.f32 1.442695, %v6600_v60  ;;  %v8695_v60 = vld [vmem:[%s14710_s8 + $0x30] sm:$0xff]  }
0x1379   :  { %9507 = vpow2.f32 %v6602_v6  ;;  %v8696_v6 = vld [vmem:[%s14710_s8 + $0x38] sm:$0xff]  }
0x1383   :  { %v9508_v29 = vpop.eup %9507 }
0x1384   :  { %v6606_v20 = vsel %vm6593_vm10, %v9508_v29, 0.0 }
0x1385   :  { %v6599_v4 = vpop.xlane.xlu1 %6598  ;;  %6607 = vadd.xlane.f32.xlu0 %v6606_v20  ;;  %v8699_v20 = vld [vmem:[%s14710_s8 + $0x50] sm:$0xff]  }
0x1386   :  { %v6601_v57 = vsub.f32 %v6592_v33, %v6599_v4  ;;  %v8692_v33 = vld [vmem:[%s14710_s8 + $0x18] sm:$0xff]   ;;  %v8698_v4 = vld [vmem:[%s14710_s8 + $0x48] sm:$0xff]  }
0x1387   :  { %7072 = vmatpush1.bf16.msra.mxu1 %v8692_v33 }
0x1388   :  { %v6604_v58 = vmul.f32 1.442695, %v6601_v57  ;;  %7073 = vmatprep.subr.bf16.mxu1 %v15132_v36  ;;  %v8700_v57 = vld [vmem:[%s14710_s8 + $0x58] sm:$0xff]  }
0x138a   :  { %9509 = vpow2.f32 %v6604_v58 }
0x138b   :  { %7074 = vmatpush1.bf16.msra.mxu1 %v8693_v0 }
0x138c   :  { %7075 = vmatprep.subr.bf16.mxu1 %v15132_v36 }
0x138f   :  { %7076 = vmatpush1.bf16.msra.mxu1 %v8694_v21 }
0x1390   :  { %7077 = vmatprep.subr.bf16.mxu1 %v15132_v36 }
0x1393   :  { %7078 = vmatpush1.bf16.msra.mxu1 %v8695_v60 }
0x1394   :  { %v9510_v1 = vpop.eup %9509  ;;  %7079 = vmatprep.subr.bf16.mxu1 %v15132_v36 }
0x1395   :  { %v6609_v25 = vsel %vm6593_vm10, %v9510_v1, 0.0 }
0x1396   :  { %6610 = vadd.xlane.f32.xlu1 %v6609_v25 }
0x1397   :  { %7080 = vmatpush1.bf16.msra.mxu1 %v8696_v6 }
0x1398   :  { %7081 = vmatprep.subr.bf16.mxu1 %v15132_v36 }
0x1412   :  { %v6608_v3 = vpop.xlane.xlu0 %6607 }
0x1413   :  { %9511 = vrcp.f32 %v6608_v3 }
0x141d   :  { %v9512_v62 = vpop.eup %9511 }
0x141e   :  { %v6613_v49 = vmul.f32 %v9512_v62, %v9508_v29  ;;  %v8697_v29 = vld [vmem:[%s14710_s8 + $0x40] sm:$0xff]  }
0x141f   :  { %7082 = vmatpush1.bf16.msra.mxu1 %v8697_v29 }
0x1420   :  { %v6616_v13 = vmul.f32 %v6613_v49, %v6491_v22  ;;  %v13809_v22 = vsub.s32 5, %v15129_v7  ;;  %7083 = vmatprep.subr.bf16.mxu1 %v15132_v36 }
0x1422   :  { %v6621_v9 = vrot.slane %v6616_v13, %v15047_v55  ;;  %v6628_v52 = vrot.slane %v6616_v13, %v15131_v45  ;;  %v6642_v2 = vrot.slane %v6616_v13, %v13801_v24  ;;  %v6635_v16 = vrot.slane %v6616_v13, %v13804_v41 }
0x1423   :  { %v6611_v27 = vpop.xlane.xlu1 %6610  ;;  %v6656_v19 = vrot.slane %v6616_v13, %v13809_v22  ;;  %v6649_v23 = vrot.slane %v6616_v13, %v13812_v35  ;;  %v6670_v17 = vrot.slane %v6616_v13, %v13817_v26  ;;  %v6663_v18 = vrot.slane %v6616_v13, %v13820_v12  ;;  %7084 = vmatpush1.bf16.msra.mxu1 %v8698_v4 }
0x1424   :  { %9513 = vrcp.f32 %v6611_v27  ;;  %6623 = vbcast.lane.b32.xlu0 %v6621_v9, 256  ;;  %6630 = vbcast.lane.b32.xlu1 %v6628_v52, 256 }
0x1425   :  { %7085 = vmatprep.subr.bf16.mxu1 %v15132_v36 }
0x1427   :  { %7086 = vmatpush1.bf16.msra.mxu1 %v8699_v20 }
0x1428   :  { %6644 = vbcast.lane.b32.xlu0 %v6642_v2, 256  ;;  %6637 = vbcast.lane.b32.xlu1 %v6635_v16, 256 }
0x1429   :  { %7087 = vmatprep.subr.bf16.mxu1 %v15132_v36 }
0x142b   :  { %7088 = vmatpush1.bf16.msra.mxu1 %v8700_v57 }
0x142c   :  { %6658 = vbcast.lane.b32.xlu0 %v6656_v19, 256  ;;  %6651 = vbcast.lane.b32.xlu1 %v6649_v23, 256 }
0x142e   :  { %v9514_v56 = vpop.eup %9513 }
0x142f   :  { %v6615_v40 = vmul.f32 %v9514_v56, %v9510_v1 }
0x1430   :  { %6672 = vbcast.lane.b32.xlu0 %v6670_v17, 256  ;;  %6665 = vbcast.lane.b32.xlu1 %v6663_v18, 256 }
0x1431   :  { %v6617_v11 = vmul.f32 %v6615_v40, %v6492_v14 }
0x1433   :  { %v6684_v54 = vrot.slane %v6617_v11, %v15131_v45  ;;  %v6677_v28 = vrot.slane %v6617_v11, %v15047_v55  ;;  %v6698_v7 = vrot.slane %v6617_v11, %v13801_v24  ;;  %v6691_v8 = vrot.slane %v6617_v11, %v13804_v41 }
0x1434   :  { %v6712_v14 = vrot.slane %v6617_v11, %v13809_v22  ;;  %v6705_v61 = vrot.slane %v6617_v11, %v13812_v35  ;;  %v6726_v50 = vrot.slane %v6617_v11, %v13817_v26  ;;  %v6719_v42 = vrot.slane %v6617_v11, %v13820_v12 }
0x1435   :  { %6686 = vbcast.lane.b32.xlu0 %v6684_v54, 256  ;;  %6679 = vbcast.lane.b32.xlu1 %v6677_v28, 256 }
0x1439   :  { %6700 = vbcast.lane.b32.xlu0 %v6698_v7, 256  ;;  %6693 = vbcast.lane.b32.xlu1 %v6691_v8, 256 }
0x143d   :  { %6714 = vbcast.lane.b32.xlu0 %v6712_v14, 256  ;;  %6707 = vbcast.lane.b32.xlu1 %v6705_v61, 256 }
0x1441   :  { %6728 = vbcast.lane.b32.xlu0 %v6726_v50, 256  ;;  %6721 = vbcast.lane.b32.xlu1 %v6719_v42, 256 }
0x1496   :  { %v6624_v58 = vpop.permute.xlu0 %6623  ;;  %v6631_v1 = vpop.permute.xlu1 %6630 }
0x1497   :  { %v13880_v25 = vmul.f32 %v6624_v58, %v13499_v48  ;;  %v13883_v3 = vmul.f32 %v6631_v1, %v13505_v38 }
0x1499   :  { %v6810_v62 = vrot.slane %v13880_v25, 1  ;;  %v6811_v49 = vrot.slane %v13883_v3, 1  ;;  %v8611_v9 = vpack.i.bf16 %v13883_v3, %v13880_v25 }
0x149a   :  { %v6645_v13 = vpop.permute.xlu0 %6644  ;;  %v6638_v27 = vpop.permute.xlu1 %6637 }
0x149b   :  { %v6842_v52 = vsel %vm6226_vm15, %v6810_v62, 0.0  ;;  %v6843_v2 = vsel %vm6226_vm15, %v6811_v49, 0.0  ;;  %v13892_v16 = vmul.f32 %v6645_v13, %v13529_v43  ;;  %v13895_v48 = vmul.f32 %v6638_v27, %v13525_v10  ;;  %8612 = vrot.lane.b32.xlu1 %v8611_v9, %s9745_s4 }
0x149c   :  { %v6923_v38 = vpack.c.bf16 %v6843_v2, %v6842_v52 }
0x149d   :  { %v6813_v19 = vrot.slane %v13892_v16, 1  ;;  %v6812_v23 = vrot.slane %v13895_v48, 1  ;;  %v8616_v10 = vpack.i.bf16 %v13892_v16, %v13895_v48 }
0x149e   :  { %v6659_v56 = vpop.permute.xlu0 %6658  ;;  %8517 = vmatprep.mubr.msk.bf16.mxu1 %vm14832_vm0, %v6923_v38  ;;  %v6652_v40 = vpop.permute.xlu1 %6651 }
0x149f   :  { %v13902_v17 = vmul.f32 %v6659_v56, %v13564_v32  ;;  %v13905_v43 = vmul.f32 %v6652_v40, %v13558_v46  ;;  %v13910_v18 = vsel %vm6226_vm15, %v6813_v19, 0.0  ;;  %v13913_v11 = vsel %vm6226_vm15, %v6812_v23, 0.0  ;;  %8617 = vrot.lane.b32.xlu0 %v8616_v10, %s9745_s4 }
0x14a0   :  { %v6925_v8 = vpack.c.bf16 %v13910_v18, %v13913_v11 }
0x14a1   :  { %v6815_v54 = vrot.slane %v13902_v17, 1  ;;  %v6814_v28 = vrot.slane %v13905_v43, 1  ;;  %v8621_v46 = vpack.i.bf16 %v13902_v17, %v13905_v43 }
0x14a2   :  { %v6673_v32 = vpop.permute.xlu0 %6672  ;;  %v6666_v7 = vpop.permute.xlu1 %6665 }
0x14a3   :  { %v13923_v30 = vsel %vm6226_vm15, %v6815_v54, 0.0  ;;  %v13926_v14 = vsel %vm6226_vm15, %v6814_v28, 0.0  ;;  %v13929_v61 = vmul.f32 %v6673_v32, %v13608_v53  ;;  %v13932_v51 = vmul.f32 %v6666_v7, %v13629_v47  ;;  %8622 = vrot.lane.b32.xlu1 %v8621_v46, %s9745_s4 }
0x14a4   :  { %v6927_v36 = vpack.c.bf16 %v13923_v30, %v13926_v14 }
0x14a5   :  { %v6817_v50 = vrot.slane %v13929_v61, 1  ;;  %v6816_v42 = vrot.slane %v13932_v51, 1  ;;  %v8626_v47 = vpack.i.bf16 %v13929_v61, %v13932_v51  ;;  %v6769_v18 = vrot.slane %v13929_v61, 7 }
0x14a6   :  { %v6768_v11 = vrot.slane %v13932_v51, 7 }
0x14a7   :  { %v6687_v34 = vpop.permute.xlu0 %6686  ;;  %v6680_v33 = vpop.permute.xlu1 %6679  ;;  %v13948_v21 = vsel %vm6226_vm15, %v6817_v50, 0.0  ;;  %v13951_v60 = vsel %vm6226_vm15, %v6816_v42, 0.0  ;;  %8627 = vrot.lane.b32.xlu0 %v8626_v47, %s9745_s4 }
0x14a8   :  { %v13940_v0 = vmul.f32 %v6687_v34, %v13614_v59  ;;  %v13943_v53 = vmul.f32 %v6680_v33, %v13622_v31  ;;  %v6929_v20 = vpack.c.bf16 %v13948_v21, %v13951_v60  ;;  %v14023_v34 = vld [vmem:[%s14703_s1 + $0x28] sm:$0xff]  ;;  %v6800_v61 = vsel %vm6124_vm9, 0.0, %v6768_v11 }
0x14aa   :  { %v6819_v6 = vrot.slane %v13940_v0, 1  ;;  %v6818_v29 = vrot.slane %v13943_v53, 1  ;;  %v8631_v31 = vpack.i.bf16 %v13940_v0, %v13943_v53 }
0x14ab   :  { %v6701_v59 = vpop.permute.xlu0 %6700  ;;  %v6694_v4 = vpop.permute.xlu1 %6693 }
0x14ac   :  { %v13961_v57 = vsel %vm6226_vm15, %v6819_v6, 0.0  ;;  %v13964_v58 = vsel %vm6226_vm15, %v6818_v29, 0.0  ;;  %v13967_v1 = vmul.f32 %v6701_v59, %v13680_v37  ;;  %v13970_v62 = vmul.f32 %v6694_v4, %v13696_v63  ;;  %8632 = vrot.lane.b32.xlu1 %v8631_v31, %s9745_s4 }
0x14ad   :  { %v6931_v49 = vpack.c.bf16 %v13961_v57, %v13964_v58  ;;  %v7532_v29 = vrot.slane %v14023_v34, %v15047_v55 }
0x14ae   :  { %v6821_v13 = vrot.slane %v13967_v1, 1  ;;  %v6820_v27 = vrot.slane %v13970_v62, 1  ;;  %v8636_v63 = vpack.i.bf16 %v13967_v1, %v13970_v62 }
0x14af   :  { %v6715_v9 = vpop.permute.xlu0 %6714  ;;  %v6708_v52 = vpop.permute.xlu1 %6707 }
0x14b0   :  { %v13978_v2 = vmul.f32 %v6715_v9, %v13691_v5  ;;  %v13981_v37 = vmul.f32 %v6708_v52, %v13703_v39  ;;  %v13986_v38 = vsel %vm6226_vm15, %v6821_v13, 0.0  ;;  %v13989_v19 = vsel %vm6226_vm15, %v6820_v27, 0.0  ;;  %8637 = vrot.lane.b32.xlu0 %v8636_v63, %s9745_s4  ;;  %v13997_v5 = vld [vmem:[%s14703_s1 + $0x20] sm:$0xff]  ;;  %v8529_v27 = vld [vmem:[%s14703_s1 + $0x30] sm:$0xff]  ;;  %v8530_v63 = vld [vmem:[%s14703_s1 + $0x38] sm:$0xff] }
0x14b1   :  { %v6933_v54 = vpack.c.bf16 %v13986_v38, %v13989_v19  ;;  %v7476_v50 = vrot.slane %v13997_v5, %v15047_v55  ;;  %v7483_v59 = vrot.slane %v13997_v5, %v15131_v45  ;;  %v7490_v31 = vrot.slane %v13997_v5, %v13804_v41 }
0x14b2   :  { %v6823_v23 = vrot.slane %v13978_v2, 1  ;;  %v6822_v56 = vrot.slane %v13981_v37, 1  ;;  %v8641_v10 = vpack.i.bf16 %v13978_v2, %v13981_v37  ;;  %v7539_v13 = vrot.slane %v14023_v34, %v15131_v45 }
0x14b3   :  { %v6729_v39 = vpop.permute.xlu0 %6728  ;;  %v6722_v40 = vpop.permute.xlu1 %6721  ;;  %v7783_v9 = vrot.slane %v8529_v27, %v15047_v55  ;;  %v7546_v52 = vrot.slane %v14023_v34, %v13804_v41 }
0x14b4   :  { %v14004_v28 = vsel %vm6226_vm15, %v6823_v23, 0.0  ;;  %v14007_v32 = vsel %vm6226_vm15, %v6822_v56, 0.0  ;;  %v14010_v7 = vmul.f32 %v6729_v39, %v13727_v44  ;;  %v14013_v46 = vmul.f32 %v6722_v40, %v13730_v15  ;;  %8642 = vrot.lane.b32.xlu1 %v8641_v10, %s9745_s4 }
0x14b5   :  { %v6935_v42 = vpack.c.bf16 %v14004_v28, %v14007_v32  ;;  %v7839_v23 = vrot.slane %v8530_v63, %v15047_v55  ;;  %v7790_v56 = vrot.slane %v8529_v27, %v15131_v45  ;;  %v7497_v39 = vrot.slane %v13997_v5, %v13801_v24 }
0x14b6   :  { %v6825_v33 = vrot.slane %v14010_v7, 1  ;;  %v6824_v44 = vrot.slane %v14013_v46, 1  ;;  %v8646_v15 = vpack.i.bf16 %v14010_v7, %v14013_v46  ;;  %v7846_v40 = vrot.slane %v8530_v63, %v15131_v45 }
0x14b7   :  { %v7797_v10 = vrot.slane %v8529_v27, %v13804_v41 }
0x14b8   :  { %v14030_v47 = vsel %vm6226_vm15, %v6825_v33, 0.0  ;;  %v14033_v6 = vsel %vm6226_vm15, %v6824_v44, 0.0  ;;  %7478 = vbcast.lane.b32.xlu1 %v7476_v50, 256  ;;  %8647 = vrot.lane.b32.xlu0 %v8646_v15, %s9745_s4  ;;  %v7553_v50 = vrot.slane %v14023_v34, %v13801_v24  ;;  %v7504_v33 = vrot.slane %v13997_v5, %v13812_v35 }
0x14b9   :  { %v6937_v4 = vpack.c.bf16 %v14030_v47, %v14033_v6  ;;  %v7853_v44 = vrot.slane %v8530_v63, %v13804_v41  ;;  %v7804_v15 = vrot.slane %v8529_v27, %v13801_v24 }
0x14bc   :  { %7534 = vbcast.lane.b32.xlu1 %v7532_v29, 256  ;;  %7485 = vbcast.lane.b32.xlu0 %v7483_v59, 256  ;;  %v7560_v29 = vrot.slane %v14023_v34, %v13812_v35  ;;  %v7511_v59 = vrot.slane %v13997_v5, %v13809_v22 }
0x14c0   :  { %7492 = vbcast.lane.b32.xlu1 %v7490_v31, 256  ;;  %7541 = vbcast.lane.b32.xlu0 %v7539_v13, 256  ;;  %v7860_v31 = vrot.slane %v8530_v63, %v13801_v24  ;;  %v7811_v13 = vrot.slane %v8529_v27, %v13812_v35 }
0x14c4   :  { %7785 = vbcast.lane.b32.xlu1 %v7783_v9, 256  ;;  %7548 = vbcast.lane.b32.xlu0 %v7546_v52, 256  ;;  %v7567_v9 = vrot.slane %v14023_v34, %v13809_v22  ;;  %v7518_v52 = vrot.slane %v13997_v5, %v13820_v12 }
0x14c8   :  { %7841 = vbcast.lane.b32.xlu1 %v7839_v23, 256  ;;  %7792 = vbcast.lane.b32.xlu0 %v7790_v56, 256  ;;  %v7867_v23 = vrot.slane %v8530_v63, %v13812_v35  ;;  %v7818_v56 = vrot.slane %v8529_v27, %v13809_v22 }
0x14cc   :  { %7499 = vbcast.lane.b32.xlu1 %v7497_v39, 256  ;;  %7848 = vbcast.lane.b32.xlu0 %v7846_v40, 256  ;;  %v7574_v39 = vrot.slane %v14023_v34, %v13820_v12  ;;  %v7525_v40 = vrot.slane %v13997_v5, %v13817_v26  ;;  %v8525_v5 = vld [vmem:[%s14703_s1 + $0x10] sm:$0xff] }
0x14d0   :  { %7799 = vbcast.lane.b32.xlu1 %v7797_v10, 256  ;;  %7555 = vbcast.lane.b32.xlu0 %v7553_v50, 256  ;;  %v7874_v10 = vrot.slane %v8530_v63, %v13809_v22  ;;  %v7825_v50 = vrot.slane %v8529_v27, %v13820_v12 }
0x14d4   :  { %7506 = vbcast.lane.b32.xlu1 %v7504_v33, 256  ;;  %7855 = vbcast.lane.b32.xlu0 %v7853_v44, 256  ;;  %v7581_v33 = vrot.slane %v14023_v34, %v13817_v26  ;;  %v7832_v44 = vrot.slane %v8529_v27, %v13817_v26  ;;  %v14097_v34 = vld [vmem:[%s14703_s1 + $0x18] sm:$0xff] }
0x14d5   :  { %v7224_v27 = vrot.slane %v14097_v34, %v15047_v55 }
0x14d8   :  { %7806 = vbcast.lane.b32.xlu1 %v7804_v15, 256  ;;  %7562 = vbcast.lane.b32.xlu0 %v7560_v29, 256  ;;  %v7881_v15 = vrot.slane %v8530_v63, %v13820_v12  ;;  %v7168_v29 = vrot.slane %v8525_v5, %v15047_v55  ;;  %v7196_v55 = vrot.slane %v8525_v5, %v13812_v35 }
0x14dc   :  { %7513 = vbcast.lane.b32.xlu1 %v7511_v59, 256  ;;  %7862 = vbcast.lane.b32.xlu0 %v7860_v31, 256  ;;  %v7888_v59 = vrot.slane %v8530_v63, %v13817_v26  ;;  %v7175_v31 = vrot.slane %v8525_v5, %v15131_v45  ;;  %v7189_v63 = vrot.slane %v8525_v5, %v13801_v24 }
0x14e0   :  { %7813 = vbcast.lane.b32.xlu1 %v7811_v13, 256  ;;  %7569 = vbcast.lane.b32.xlu0 %v7567_v9, 256  ;;  %v7182_v13 = vrot.slane %v8525_v5, %v13804_v41  ;;  %v7231_v9 = vrot.slane %v14097_v34, %v15131_v45  ;;  %v7252_v45 = vrot.slane %v14097_v34, %v13812_v35  ;;  %v6765_v35 = vrot.slane %v13892_v16, 7 }
0x14e4   :  { %7520 = vbcast.lane.b32.xlu1 %v7518_v52, 256  ;;  %7869 = vbcast.lane.b32.xlu0 %v7867_v23, 256  ;;  %v7238_v52 = vrot.slane %v14097_v34, %v13804_v41  ;;  %v7245_v23 = vrot.slane %v14097_v34, %v13801_v24  ;;  %v7210_v41 = vrot.slane %v8525_v5, %v13820_v12 }
0x14e8   :  { %7820 = vbcast.lane.b32.xlu1 %v7818_v56, 256  ;;  %7576 = vbcast.lane.b32.xlu0 %v7574_v39, 256  ;;  %v7203_v56 = vrot.slane %v8525_v5, %v13809_v22  ;;  %v6762_v39 = vrot.slane %v13880_v25, 7  ;;  %v7217_v25 = vrot.slane %v8525_v5, %v13817_v26 }
0x14ec   :  { %7527 = vbcast.lane.b32.xlu1 %v7525_v40, 256  ;;  %7876 = vbcast.lane.b32.xlu0 %v7874_v10, 256  ;;  %v6763_v40 = vrot.slane %v13883_v3, 7  ;;  %v7259_v10 = vrot.slane %v14097_v34, %v13809_v22  ;;  %v6764_v3 = vrot.slane %v13895_v48, 7  ;;  %v7266_v22 = vrot.slane %v14097_v34, %v13820_v12 }
0x14ed   :  { %v6797_v48 = vsel %vm6124_vm9, 0.0, %v6765_v35  ;;  %v7273_v12 = vrot.slane %v14097_v34, %v13817_v26 }
0x14ee   :  { %v6796_v5 = vsel %vm6124_vm9, 0.0, %v6764_v3 }
0x14f0   :  { %7827 = vbcast.lane.b32.xlu1 %v7825_v50, 256  ;;  %7583 = vbcast.lane.b32.xlu0 %v7581_v33, 256 }
0x14f4   :  { %7834 = vbcast.lane.b32.xlu1 %v7832_v44, 256  ;;  %7883 = vbcast.lane.b32.xlu0 %v7881_v15, 256  ;;  %v6794_v44 = vsel %vm6124_vm9, 0.0, %v6762_v39  ;;  %v6795_v15 = vsel %vm6124_vm9, 0.0, %v6763_v40 }
0x14f8   :  { %7170 = vbcast.lane.b32.xlu1 %v7168_v29, 256  ;;  %7890 = vbcast.lane.b32.xlu0 %v7888_v59, 256 }
0x14fc   :  { %7226 = vbcast.lane.b32.xlu1 %v7224_v27, 256  ;;  %7177 = vbcast.lane.b32.xlu0 %v7175_v31, 256 }
0x1500   :  { %7184 = vbcast.lane.b32.xlu1 %v7182_v13, 256  ;;  %7233 = vbcast.lane.b32.xlu0 %v7231_v9, 256  ;;  %v6767_v13 = vrot.slane %v13902_v17, 7  ;;  %v6766_v9 = vrot.slane %v13905_v43, 7 }
0x1502   :  { %v6798_v39 = vsel %vm6124_vm9, 0.0, %v6766_v9 }
0x1504   :  { %7191 = vbcast.lane.b32.xlu1 %v7189_v63, 256  ;;  %7240 = vbcast.lane.b32.xlu0 %v7238_v52, 256 }
0x1508   :  { %7198 = vbcast.lane.b32.xlu1 %v7196_v55, 256  ;;  %7247 = vbcast.lane.b32.xlu0 %v7245_v23, 256 }
0x150c   :  { %7205 = vbcast.lane.b32.xlu1 %v7203_v56, 256  ;;  %7254 = vbcast.lane.b32.xlu0 %v7252_v45, 256  ;;  %v6799_v45 = vsel %vm6124_vm9, 0.0, %v6767_v13 }
0x150d   :  { %v8613_v50 = vpop.permute.xlu1 %8612 }
0x150e   :  { %v8615_v24 = vunpack.i.h.bf16 %v8613_v50  ;;  %v8614_v33 = vunpack.i.l.bf16 %v8613_v50 }
0x1510   :  { %7212 = vbcast.lane.b32.xlu1 %v7210_v41, 256  ;;  %v6907_v29 = vsel %vm14832_vm0, %v6795_v15, %v8615_v24  ;;  %v6906_v59 = vsel %vm14832_vm0, %v6794_v44, %v8614_v33  ;;  %7261 = vbcast.lane.b32.xlu0 %v7259_v10, 256  ;;  %v6771_v41 = vrot.slane %v13940_v0, 7  ;;  %v6770_v10 = vrot.slane %v13943_v53, 7 }
0x1511   :  { %v6922_v27 = vpack.c.bf16 %v6907_v29, %v6906_v59  ;;  %v8618_v31 = vpop.permute.xlu0 %8617  ;;  %v6801_v33 = vsel %vm6124_vm9, 0.0, %v6769_v18  ;;  %v6773_v29 = vrot.slane %v13967_v1, 7  ;;  %v6772_v59 = vrot.slane %v13970_v62, 7 }
0x1512   :  { %v8620_v16 = vunpack.i.h.bf16 %v8618_v31  ;;  %v8619_v63 = vunpack.i.l.bf16 %v8618_v31  ;;  %v6802_v3 = vsel %vm6124_vm9, 0.0, %v6770_v10  ;;  %v6774_v31 = vrot.slane %v13981_v37, 7 }
0x1513   :  { %7098 = vmatmul.mubr.bf16.vlgmr.msra.gmra.mrb[16].mxu1 %v6922_v27  ;;  %v6775_v27 = vrot.slane %v13978_v2, 7 }
0x1514   :  { %7219 = vbcast.lane.b32.xlu1 %v7217_v25, 256  ;;  %8518 = vmatprep.mubr.msk.bf16.mxu1 %vm14832_vm0, %v6925_v8  ;;  %v6908_v43 = vsel %vm14832_vm0, %v6796_v5, %v8619_v63  ;;  %v6909_v52 = vsel %vm14832_vm0, %v6797_v48, %v8620_v16  ;;  %v6803_v25 = vsel %vm6124_vm9, 0.0, %v6771_v41  ;;  %v6805_v16 = vsel %vm6124_vm9, 0.0, %v6773_v29 }
0x1515   :  { %7268 = vbcast.lane.b32.xlu0 %v7266_v22, 256  ;;  %v8623_v17 = vpop.permute.xlu1 %8622  ;;  %v6924_v56 = vpack.c.bf16 %v6909_v52, %v6908_v43  ;;  %v6804_v63 = vsel %vm6124_vm9, 0.0, %v6772_v59  ;;  %v6777_v43 = vrot.slane %v14010_v7, 7  ;;  %v6776_v52 = vrot.slane %v14013_v46, 7 }
0x1516   :  { %v8625_v55 = vunpack.i.h.bf16 %v8623_v17  ;;  %v8624_v23 = vunpack.i.l.bf16 %v8623_v17  ;;  %v6806_v17 = vsel %vm6124_vm9, 0.0, %v6774_v31 }
0x1518   :  { %v6910_v8 = vsel %vm14832_vm0, %v6798_v39, %v8624_v23  ;;  %v6911_v26 = vsel %vm14832_vm0, %v6799_v45, %v8625_v55  ;;  %v6809_v45 = vsel %vm6124_vm9, 0.0, %v6777_v43  ;;  %v6808_v39 = vsel %vm6124_vm9, 0.0, %v6776_v52 }
0x1519   :  { %7275 = vbcast.lane.b32.xlu0 %v7273_v12, 256  ;;  %v6926_v34 = vpack.c.bf16 %v6911_v26, %v6910_v8  ;;  %v8628_v40 = vpop.permute.xlu0 %8627  ;;  %v6807_v12 = vsel %vm6124_vm9, 0.0, %v6775_v27 }
0x151a   :  { %v8630_v50 = vunpack.i.h.bf16 %v8628_v40  ;;  %v8629_v24 = vunpack.i.l.bf16 %v8628_v40 }
0x151b   :  { %7106 = vmatmul.mubr.bf16.gmra.mrb[20].mxu1 %v6924_v56 }
0x151c   :  { %8519 = vmatprep.mubr.msk.bf16.mxu1 %vm14832_vm0, %v6927_v36  ;;  %v6912_v44 = vsel %vm14832_vm0, %v6800_v61, %v8629_v24  ;;  %v6913_v15 = vsel %vm14832_vm0, %v6801_v33, %v8630_v50 }
0x151d   :  { %v6928_v53 = vpack.c.bf16 %v6913_v15, %v6912_v44 }
0x151e   :  { %v8633_v51 = vpop.permute.xlu1 %8632 }
0x151f   :  { %v8635_v0 = vunpack.i.h.bf16 %v8633_v51  ;;  %v8634_v35 = vunpack.i.l.bf16 %v8633_v51 }
0x1521   :  { %v6914_v30 = vsel %vm14832_vm0, %v6802_v3, %v8634_v35  ;;  %v6915_v14 = vsel %vm14832_vm0, %v6803_v25, %v8635_v0 }
0x1522   :  { %v6930_v36 = vpack.c.bf16 %v6915_v14, %v6914_v30  ;;  %v8638_v22 = vpop.permute.xlu0 %8637  ;;  %v14259_v14 = vld [vmem:[%s14711_s9] ss:$0 sm:$0xff] }
0x1523   :  { %v8640_v13 = vunpack.i.h.bf16 %v8638_v22  ;;  %v8639_v9 = vunpack.i.l.bf16 %v8638_v22  ;;  %7114 = vmatmul.mubr.bf16.gmra.mrb[24].mxu1 %v6926_v34 }
0x1524   :  { %8520 = vmatprep.mubr.msk.bf16.mxu1 %vm14832_vm0, %v6929_v20 }
0x1525   :  { %v6916_v62 = vsel %vm14832_vm0, %v6804_v63, %v8639_v9  ;;  %v6917_v48 = vsel %vm14832_vm0, %v6805_v16, %v8640_v13 }
0x1526   :  { %v8643_v1 = vpop.permute.xlu1 %8642  ;;  %v6932_v37 = vpack.c.bf16 %v6917_v48, %v6916_v62 }
0x1527   :  { %v8645_v2 = vunpack.i.h.bf16 %v8643_v1  ;;  %v8644_v5 = vunpack.i.l.bf16 %v8643_v1 }
0x1529   :  { %v6918_v21 = vsel %vm14832_vm0, %v6806_v17, %v8644_v5  ;;  %v6919_v60 = vsel %vm14832_vm0, %v6807_v12, %v8645_v2 }
0x152a   :  { %v6934_v20 = vpack.c.bf16 %v6919_v60, %v6918_v21  ;;  %v8648_v55 = vpop.permute.xlu0 %8647  ;;  %v7479_v57 = vpop.permute.xlu1 %7478 }
0x152b   :  { %v8650_v23 = vunpack.i.h.bf16 %v8648_v55  ;;  %v8649_v56 = vunpack.i.l.bf16 %v8648_v55  ;;  %7122 = vmatmul.mubr.bf16.gmra.mrb[28].mxu1 %v6928_v53  ;;  %vm7585_vm9 = vcmp.gt.f32.partialorder %v7479_v57, 0.0 }
0x152c   :  { %8521 = vmatprep.mubr.msk.bf16.mxu1 %vm14832_vm0, %v6931_v49 }
0x152d   :  { %v6920_v7 = vsel %vm14832_vm0, %v6808_v39, %v8649_v56  ;;  %v6921_v46 = vsel %vm14832_vm0, %v6809_v45, %v8650_v23  ;;  %v8701_v39 = vld [vmem:[%s14712_s10] sm:$0xff]  }
0x152e   :  { %v6936_v18 = vpack.c.bf16 %v6921_v46, %v6920_v7  ;;  %v14198_v58 = vpop.permute.xlu1 %7534  ;;  %v7486_v49 = vpop.permute.xlu0 %7485 }
0x152f   :  { %vm7586_vm15 = vcmp.gt.f32.partialorder %v7486_v49, 0.0 }
0x1532   :  { %v14200_v38 = vpop.permute.xlu1 %7492  ;;  %v14202_v19 = vpop.permute.xlu0 %7541 }
0x1533   :  { %7130 = vmatmul.mubr.bf16.gmra.mrb[32].mxu1 %v6930_v36  ;;  %vm7587_vm11 = vcmp.gt.f32.partialorder %v14200_v38, 0.0  ;;  %v8703_v38 = vld [vmem:[%s14712_s10 + $0x10] sm:$0xff]  }
0x1534   :  { %8522 = vmatprep.mubr.msk.bf16.mxu1 %vm14832_vm0, %v6933_v54 }
0x1536   :  { %v7786_v54 = vpop.permute.xlu1 %7785  ;;  %v14204_v11 = vpop.permute.xlu0 %7548 }
0x1537   :  { %vm7892_vm12 = vcmp.gt.f32.partialorder %v7786_v54, 0.0 }
0x153a   :  { %v14206_v28 = vpop.permute.xlu1 %7841  ;;  %v7793_v32 = vpop.permute.xlu0 %7792 }
0x153b   :  { %7138 = vmatmul.mubr.bf16.gmra.mrb[36].mxu1 %v6932_v37  ;;  %vm7893_vm8 = vcmp.gt.f32.partialorder %v7793_v32, 0.0 }
0x153c   :  { %8523 = vmatprep.mubr.msk.bf16.mxu1 %vm14832_vm0, %v6935_v42 }
0x153e   :  { %v14208_v42 = vpop.permute.xlu1 %7499  ;;  %v14210_v47 = vpop.permute.xlu0 %7848 }
0x1542   :  { %v14212_v6 = vpop.permute.xlu1 %7799 }
0x1543   :  { %7146 = vmatmul.mubr.bf16.gmra.mrb[40].mxu1 %v6934_v20 }
0x1544   :  { %8524 = vmatprep.mubr.msk.bf16.mxu1 %vm14832_vm0, %v6937_v4  ;;  %v14214_v4 = vpop.permute.xlu0 %7555 }
0x1546   :  { %v14216_v8 = vpop.permute.xlu1 %7506 }
0x1548   :  { %v14218_v26 = vpop.permute.xlu0 %7855 }
0x154a   :  { %v14220_v34 = vpop.permute.xlu1 %7806 }
0x154b   :  { %7154 = vmatmul.mubr.bf16.gmra.mrb[44].mxu1 %v6936_v18 }
0x154c   :  { %v14222_v40 = vpop.permute.xlu0 %7562 }
0x154e   :  { %v14224_v41 = vpop.permute.xlu1 %7513 }
0x1550   :  { %v14226_v10 = vpop.permute.xlu0 %7862 }
0x1552   :  { %v14228_v50 = vpop.permute.xlu1 %7813 }
0x1554   :  { %v14230_v24 = vpop.permute.xlu0 %7569 }
0x1556   :  { %v14232_v33 = vpop.permute.xlu1 %7520 }
0x1558   :  { %v14234_v61 = vpop.permute.xlu0 %7869 }
0x155a   :  { %v14236_v51 = vpop.permute.xlu1 %7820 }
0x155c   :  { %v14238_v44 = vpop.permute.xlu0 %7576 }
0x155e   :  { %v14240_v15 = vpop.permute.xlu1 %7527 }
0x1560   :  { %v14242_v0 = vpop.permute.xlu0 %7876 }
0x1562   :  { %v14244_v35 = vpop.permute.xlu1 %7827 }
0x1564   :  { %v14246_v53 = vpop.permute.xlu0 %7583 }
0x1566   :  { %v14248_v25 = vpop.permute.xlu1 %7834 }
0x1567   :  { %vm7899_vm0 = vcmp.gt.f32.partialorder %v14248_v25, 0.0 }
0x1568   :  { %v14250_v3 = vpop.permute.xlu0 %7883 }
0x156a   :  { %v7171_v29 = vpop.permute.xlu1 %7170 }
0x156b   :  { %vm7277_vm13 = vcmp.gt.f32.partialorder %v7171_v29, 0.0 }
0x156c   :  { %v14252_v59 = vpop.permute.xlu0 %7890 }
0x156e   :  { %v14254_v30 = vpop.permute.xlu1 %7226 }
0x1570   :  { %v7178_v36 = vpop.permute.xlu0 %7177 }
0x1571   :  { %vm7278_vm10 = vcmp.gt.f32.partialorder %v7178_v36, 0.0 }
0x1572   :  { %v7185_v9 = vpop.permute.xlu1 %7184 }
0x1576   :  { %v14278_v57 = vpop.permute.xlu1 %7191 }
0x15e6   :  { %v7099_v22 = vpop.f32.mrb[16].mxu1 }
0x15e7   :  { %v7100_v27 = vadd.f32 %v14259_v14, %v7099_v22  ;;  %v7101_v31 = vpop.f32.mrb[17].mxu1  ;;  %v14833_v22 = vmov 0.0  }
0x15e8   :  { %v7102_v13 = vpop.f32.mrb[18].mxu1  ;;  %8582 = vmatprep.subr.bf16.mxu0 %v14833_v22 }
0x15e9   :  { %v7325_v16 = vsel %vm7277_vm13, %v7100_v27, -1e+30  ;;  %v7633_v63 = vsel %vm7585_vm9, %v7100_v27, -1e+30  ;;  %v7940_v1 = vsel %vm7892_vm12, %v7100_v27, -1e+30  ;;  %v7103_v62 = vadd.f32 %v14259_v14, %v7102_v13  ;;  %8583 = vmatpush3.bf16.msra.mxu0 %v8701_v39  ;;  %v14293_v39 = vpop.permute.xlu1 %7198 }
0x15ea   :  { %v7342_v48 = vsel %vm7341_vm14, %v7325_v16, -inf  ;;  %v7649_v2 = vsel %vm7341_vm14, %v7633_v63, -inf  ;;  %v7956_v5 = vsel %vm7341_vm14, %v7940_v1, -inf  ;;  %v7104_v37 = vpop.f32.mrb[19].mxu1  ;;  %vm7894_vm13 = vcmp.gt.f32.partialorder %v14212_v6, 0.0  ;;  %v8702_v63 = vld [vmem:[%s14712_s10 + $0x8] sm:$0xff]   ;;  %8584 = vmatprep.subr.bf16.mxu0 %v14833_v22 }
0x15eb   :  { %v7343_v12 = vrot.slane %v7342_v48, 4  ;;  %v7650_v17 = vrot.slane %v7649_v2, 4  ;;  %v7957_v43 = vrot.slane %v7956_v5, 4  ;;  %v7634_v52 = vsel %vm7586_vm15, %v7103_v62, -1e+30 }
0x15ec   :  { %v7656_v21 = vsel %vm7341_vm14, %v7634_v52, -inf  ;;  %v7941_v60 = vsel %vm7893_vm8, %v7103_v62, -1e+30  ;;  %v7326_v20 = vsel %vm7278_vm10, %v7103_v62, -1e+30  ;;  %vm7588_vm9 = vcmp.gt.f32.partialorder %v14208_v42, 0.0 }
0x15ed   :  { %v7344_v55 = vmax.f32 %v7342_v48, %v7343_v12  ;;  %v7651_v23 = vmax.f32 %v7649_v2, %v7650_v17  ;;  %v7958_v56 = vmax.f32 %v7956_v5, %v7957_v43  ;;  %v7657_v45 = vrot.slane %v7656_v21, 4  ;;  %8585 = vmatpush3.bf16.msra.mxu0 %v8702_v63 }
0x15ee   :  { %v7963_v7 = vsel %vm7341_vm14, %v7941_v60, -inf  ;;  %v7349_v46 = vsel %vm7341_vm14, %v7326_v20, -inf  ;;  %vm7279_vm12 = vcmp.gt.f32.partialorder %v7185_v9, 0.0  ;;  %v7107_v18 = vpop.f32.mrb[20].mxu1  ;;  %vm7895_vm15 = vcmp.gt.f32.partialorder %v14220_v34, 0.0  ;;  %8586 = vmatprep.subr.bf16.mxu0 %v14833_v22 }
0x15ef   :  { %v7345_v49 = vrot.slane %v7344_v55, 2  ;;  %v7652_v54 = vrot.slane %v7651_v23, 2  ;;  %v7959_v32 = vrot.slane %v7958_v56, 2  ;;  %v7658_v29 = vmax.f32 %v7656_v21, %v7657_v45  ;;  %v7109_v36 = vpop.f32.mrb[21].mxu1 }
0x15f0   :  { %v7964_v27 = vrot.slane %v7963_v7, 4  ;;  %v7350_v31 = vrot.slane %v7349_v46, 4  ;;  %v7108_v13 = vadd.f32 %v14259_v14, %v7107_v18  ;;  %v7110_v16 = vpop.f32.mrb[22].mxu1  ;;  %vm7280_vm8 = vcmp.gt.f32.partialorder %v14278_v57, 0.0 }
0x15f1   :  { %v7346_v1 = vmax.f32 %v7344_v55, %v7345_v49  ;;  %v7653_v62 = vmax.f32 %v7651_v23, %v7652_v54  ;;  %v7960_v48 = vmax.f32 %v7958_v56, %v7959_v32  ;;  %v7659_v2 = vrot.slane %v7658_v29, 2  ;;  %v7112_v5 = vpop.f32.mrb[23].mxu1  ;;  %8587 = vmatpush3.bf16.msra.mxu0 %v8703_v38  ;;  %v8705_v38 = vld [vmem:[%s14712_s10 + $0x20] sm:$0xff]  }
0x15f2   :  { %v7965_v37 = vmax.f32 %v7963_v7, %v7964_v27  ;;  %v7351_v12 = vmax.f32 %v7349_v46, %v7350_v31  ;;  %v7327_v17 = vsel %vm7279_vm12, %v7108_v13, -1e+30  ;;  %v7635_v43 = vsel %vm7587_vm11, %v7108_v13, -1e+30  ;;  %8588 = vmatprep.subr.bf16.mxu0 %v14833_v22 }
0x15f3   :  { %v7347_v52 = vrot.slane %v7346_v1, 1  ;;  %v7654_v21 = vrot.slane %v7653_v62, 1  ;;  %v7961_v60 = vrot.slane %v7960_v48, 1  ;;  %v7660_v20 = vmax.f32 %v7658_v29, %v7659_v2 }
0x15f4   :  { %v7966_v55 = vrot.slane %v7965_v37, 2  ;;  %v7352_v23 = vrot.slane %v7351_v12, 2  ;;  %v7356_v56 = vsel %vm7341_vm14, %v7327_v17, -inf  ;;  %v7663_v45 = vsel %vm7341_vm14, %v7635_v43, -inf }
0x15f5   :  { %v7348_v9 = vmax.f32 %v7346_v1, %v7347_v52  ;;  %v7655_v7 = vmax.f32 %v7653_v62, %v7654_v21  ;;  %v7962_v46 = vmax.f32 %v7960_v48, %v7961_v60  ;;  %v7661_v18 = vrot.slane %v7660_v20, 1 }
0x15f6   :  { %vm7281_vm10 = vcmp.gt.f32.partialorder %v14293_v39, 0.0  ;;  %v7967_v49 = vmax.f32 %v7965_v37, %v7966_v55  ;;  %v7353_v54 = vmax.f32 %v7351_v12, %v7352_v23  ;;  %v7357_v32 = vrot.slane %v7356_v56, 4  ;;  %v7115_v36 = vpop.f32.mrb[24].mxu1  ;;  %v8704_v37 = vld [vmem:[%s14712_s10 + $0x18] sm:$0xff]   ;;  %v14317_v23 = vpop.permute.xlu1 %7205 }
0x15f7   :  { %v7664_v29 = vrot.slane %v7663_v45, 4  ;;  %9515 = vtanh.f32 %v7348_v9  ;;  %v7662_v27 = vmax.f32 %v7660_v20, %v7661_v18  ;;  %v7942_v31 = vsel %vm7894_vm13, %v7108_v13, -1e+30  ;;  %v7117_v1 = vpop.f32.mrb[25].mxu1  ;;  %8589 = vmatpush3.bf16.msra.mxu0 %v8704_v37 }
0x15f8   :  { %v7111_v63 = vadd.f32 %v14259_v14, %v7110_v16  ;;  %vm7589_vm11 = vcmp.gt.f32.partialorder %v14216_v8, 0.0  ;;  %9517 = vtanh.f32 %v7655_v7  ;;  %v7968_v62 = vrot.slane %v7967_v49, 1  ;;  %v14304_v5 = vpop.f32.mrb[26].mxu1  ;;  %8590 = vmatprep.subr.bf16.mxu0 %v14833_v22 }
0x15f9   :  { %v7354_v48 = vrot.slane %v7353_v54, 1  ;;  %v7358_v2 = vmax.f32 %v7356_v56, %v7357_v32  ;;  %9519 = vtanh.f32 %v7962_v46  ;;  %v7665_v12 = vmax.f32 %v7663_v45, %v7664_v29  ;;  %v7120_v16 = vpop.f32.mrb[27].mxu1 }
0x15fa   :  { %v7970_v6 = vsel %vm7341_vm14, %v7942_v31, -inf  ;;  %v7636_v13 = vsel %vm7588_vm9, %v7111_v63, -1e+30  ;;  %vm7896_vm13 = vcmp.gt.f32.partialorder %v14228_v50, 0.0  ;;  %9521 = vtanh.f32 %v7662_v27 }
0x15fb   :  { %v7969_v17 = vmax.f32 %v7967_v49, %v7968_v62  ;;  %v7355_v43 = vmax.f32 %v7353_v54, %v7354_v48  ;;  %v7359_v52 = vrot.slane %v7358_v2, 2  ;;  %v7666_v21 = vrot.slane %v7665_v12, 2  ;;  %8591 = vmatpush3.bf16.msra.mxu0 %v8705_v38 }
0x15fc   :  { %v7971_v60 = vrot.slane %v7970_v6, 4  ;;  %v7670_v20 = vsel %vm7341_vm14, %v7636_v13, -inf  ;;  %v7943_v55 = vsel %vm7895_vm15, %v7111_v63, -1e+30  ;;  %v7328_v49 = vsel %vm7280_vm8, %v7111_v63, -1e+30  ;;  %8592 = vmatprep.subr.bf16.mxu0 %v14833_v22 }
0x15fd   :  { %9523 = vtanh.f32 %v7969_v17  ;;  %v7360_v42 = vmax.f32 %v7358_v2, %v7359_v52  ;;  %v7671_v56 = vrot.slane %v7670_v20, 4  ;;  %v7977_v45 = vsel %vm7341_vm14, %v7943_v55, -inf  ;;  %v14339_v17 = vpop.permute.xlu1 %7212 }
0x15fe   :  { %9525 = vtanh.f32 %v7355_v43  ;;  %v7667_v9 = vmax.f32 %v7665_v12, %v7666_v21  ;;  %v7972_v7 = vmax.f32 %v7970_v6, %v7971_v60  ;;  %v7978_v46 = vrot.slane %v7977_v45, 4  ;;  %v14327_v32 = vpop.f32.mrb[28].mxu1 }
0x15ff   :  { %v7361_v34 = vrot.slane %v7360_v42, 1  ;;  %v7672_v18 = vmax.f32 %v7670_v20, %v7671_v56  ;;  %v7116_v54 = vadd.f32 %v14259_v14, %v7115_v36  ;;  %vm7590_vm9 = vcmp.gt.f32.partialorder %v14224_v41, 0.0  ;;  %v7125_v62 = vpop.f32.mrb[29].mxu1 }
0x1600   :  { %vm7897_vm12 = vcmp.gt.f32.partialorder %v14236_v51, 0.0  ;;  %v7668_v29 = vrot.slane %v7667_v9, 1  ;;  %v7973_v27 = vrot.slane %v7972_v7, 2  ;;  %v7979_v31 = vmax.f32 %v7977_v45, %v7978_v46  ;;  %v14334_v63 = vpop.f32.mrb[30].mxu1 }
0x1601   :  { %v7363_v1 = vsel %vm7341_vm14, %v7328_v49, -inf  ;;  %v7362_v48 = vmax.f32 %v7360_v42, %v7361_v34  ;;  %v7673_v2 = vrot.slane %v7672_v18, 2  ;;  %v7329_v57 = vsel %vm7281_vm10, %v7116_v54, -1e+30  ;;  %v14336_v36 = vpop.eup %9515  ;;  %v7128_v43 = vpop.f32.mrb[31].mxu1 }
0x1602   :  { %v7364_v37 = vrot.slane %v7363_v1, 4  ;;  %v7669_v12 = vmax.f32 %v7667_v9, %v7668_v29  ;;  %v7974_v6 = vmax.f32 %v7972_v7, %v7973_v27  ;;  %v7980_v13 = vrot.slane %v7979_v31, 2  ;;  %v14342_v52 = vpop.eup %9517 }
0x1603   :  { %v7370_v16 = vsel %vm7341_vm14, %v7329_v57, -inf  ;;  %9527 = vtanh.f32 %v7362_v48  ;;  %v7674_v39 = vmax.f32 %v7672_v18, %v7673_v2  ;;  %vm7282_vm15 = vcmp.gt.f32.partialorder %v14317_v23, 0.0  ;;  %v14346_v20 = vpop.eup %9519 }
0x1604   :  { %v7365_v21 = vmax.f32 %v7363_v1, %v7364_v37  ;;  %v7371_v60 = vrot.slane %v7370_v16, 4  ;;  %vm7283_vm8 = vcmp.gt.f32.partialorder %v14339_v17, 0.0  ;;  %9529 = vtanh.f32 %v7669_v12  ;;  %v14350_v45 = vpop.eup %9521 }
0x1605   :  { %v7975_v55 = vrot.slane %v7974_v6, 1  ;;  %v7981_v42 = vmax.f32 %v7979_v31, %v7980_v13  ;;  %v7637_v56 = vsel %vm7589_vm11, %v7116_v54, -1e+30  ;;  %v7675_v38 = vrot.slane %v7674_v39, 1 }
0x1606   :  { %v7366_v9 = vrot.slane %v7365_v21, 2  ;;  %v7372_v7 = vmax.f32 %v7370_v16, %v7371_v60  ;;  %v7677_v46 = vsel %vm7341_vm14, %v7637_v56, -inf  ;;  %vm7591_vm10 = vcmp.gt.f32.partialorder %v14232_v33, 0.0  ;;  %v14359_v48 = vpop.f32.mrb[32].mxu1 }
0x1607   :  { %v7976_v34 = vmax.f32 %v7974_v6, %v7975_v55  ;;  %v7982_v18 = vrot.slane %v7981_v42, 1  ;;  %v7678_v49 = vrot.slane %v7677_v46, 4  ;;  %v7944_v29 = vsel %vm7896_vm13, %v7116_v54, -1e+30  ;;  %v14356_v27 = vpop.eup %9523  ;;  %v7133_v6 = vpop.f32.mrb[33].mxu1 }
0x1608   :  { %v7676_v31 = vmax.f32 %v7674_v39, %v7675_v38  ;;  %v7367_v8 = vmax.f32 %v7365_v21, %v7366_v9  ;;  %v7373_v1 = vrot.slane %v7372_v7, 2  ;;  %v7984_v62 = vsel %vm7341_vm14, %v7944_v29, -inf  ;;  %v14361_v2 = vpop.eup %9525  ;;  %v14366_v16 = vpop.f32.mrb[34].mxu1 }
0x1609   :  { %9531 = vtanh.f32 %v7976_v34  ;;  %v7983_v37 = vmax.f32 %v7981_v42, %v7982_v18  ;;  %v7679_v57 = vmax.f32 %v7677_v46, %v7678_v49  ;;  %v7985_v12 = vrot.slane %v7984_v62, 4  ;;  %v7136_v60 = vpop.f32.mrb[35].mxu1  ;;  %v14380_v29 = vpop.permute.xlu1 %7219 }
0x160a   :  { %vm7898_vm11 = vcmp.gt.f32.partialorder %v14244_v35, 0.0  ;;  %9533 = vtanh.f32 %v7676_v31  ;;  %v7368_v50 = vrot.slane %v7367_v8, 1  ;;  %v7374_v54 = vmax.f32 %v7372_v7, %v7373_v1 }
0x160b   :  { %v7119_v13 = vadd.f32 %v14259_v14, %v14304_v5  ;;  %9535 = vtanh.f32 %v7983_v37  ;;  %v7680_v43 = vrot.slane %v7679_v57, 2  ;;  %v7986_v39 = vmax.f32 %v7984_v62, %v7985_v12 }
0x160c   :  { %v7124_v21 = vadd.f32 %v14259_v14, %v14327_v32  ;;  %vm7592_vm13 = vcmp.gt.f32.partialorder %v14240_v15, 0.0  ;;  %v7369_v55 = vmax.f32 %v7367_v8, %v7368_v50  ;;  %v7375_v42 = vrot.slane %v7374_v54, 1 }
0x160d   :  { %v7638_v56 = vsel %vm7590_vm9, %v7119_v13, -1e+30  ;;  %v7945_v5 = vsel %vm7897_vm12, %v7119_v13, -1e+30  ;;  %v7681_v38 = vmax.f32 %v7679_v57, %v7680_v43  ;;  %v7987_v9 = vrot.slane %v7986_v39, 2  ;;  %v14378_v32 = vpop.eup %9527 }
0x160e   :  { %v7684_v7 = vsel %vm7341_vm14, %v7638_v56, -inf  ;;  %v7991_v46 = vsel %vm7341_vm14, %v7945_v5, -inf  ;;  %9537 = vtanh.f32 %v7369_v55  ;;  %v7376_v34 = vmax.f32 %v7374_v54, %v7375_v42  ;;  %v14382_v31 = vpop.eup %9529  ;;  %v14389_v12 = vpop.f32.mrb[36].mxu1 }
0x160f   :  { %v7685_v18 = vrot.slane %v7684_v7, 4  ;;  %v7992_v49 = vrot.slane %v7991_v46, 4  ;;  %v7682_v41 = vrot.slane %v7681_v38, 1  ;;  %v7988_v8 = vmax.f32 %v7986_v39, %v7987_v9  ;;  %v7141_v39 = vpop.f32.mrb[37].mxu1 }
0x1610   :  { %v7330_v51 = vsel %vm7282_vm15, %v7119_v13, -1e+30  ;;  %v7331_v1 = vsel %vm7283_vm8, %v7124_v21, -1e+30  ;;  %9539 = vtanh.f32 %v7376_v34  ;;  %vm7284_vm9 = vcmp.gt.f32.partialorder %v14380_v29, 0.0  ;;  %v14395_v55 = vpop.f32.mrb[38].mxu1 }
0x1611   :  { %v7686_v62 = vmax.f32 %v7684_v7, %v7685_v18  ;;  %v7993_v37 = vmax.f32 %v7991_v46, %v7992_v49  ;;  %v7377_v57 = vsel %vm7341_vm14, %v7330_v51, -inf  ;;  %v7683_v6 = vmax.f32 %v7681_v38, %v7682_v41  ;;  %v7144_v9 = vpop.f32.mrb[39].mxu1 }
0x1612   :  { %v7989_v50 = vrot.slane %v7988_v8, 1  ;;  %v7378_v54 = vrot.slane %v7377_v57, 4  ;;  %v7384_v43 = vsel %vm7341_vm14, %v7331_v1, -inf  ;;  %v7639_v17 = vsel %vm7591_vm10, %v7124_v21, -1e+30 }
0x1613   :  { %v7687_v23 = vrot.slane %v7686_v62, 2  ;;  %v7994_v13 = vrot.slane %v7993_v37, 2  ;;  %v7385_v60 = vrot.slane %v7384_v43, 4  ;;  %v14397_v42 = vpop.eup %9531  ;;  %9541 = vtanh.f32 %v7683_v6 }
0x1614   :  { %v7990_v56 = vmax.f32 %v7988_v8, %v7989_v50  ;;  %v7379_v5 = vmax.f32 %v7377_v57, %v7378_v54  ;;  %v7691_v38 = vsel %vm7341_vm14, %v7639_v17, -inf  ;;  %v14400_v7 = vpop.eup %9533  ;;  %v7946_v51 = vsel %vm7898_vm11, %v7124_v21, -1e+30 }
0x1615   :  { %v7688_v46 = vmax.f32 %v7686_v62, %v7687_v23  ;;  %v7995_v34 = vmax.f32 %v7993_v37, %v7994_v13  ;;  %v7386_v18 = vmax.f32 %v7384_v43, %v7385_v60  ;;  %v7692_v49 = vrot.slane %v7691_v38, 4  ;;  %v14402_v41 = vpop.eup %9535 }
0x1616   :  { %9543 = vtanh.f32 %v7990_v56  ;;  %v7380_v33 = vrot.slane %v7379_v5, 2  ;;  %v7127_v8 = vadd.f32 %v14259_v14, %v14334_v63  ;;  %vm7285_vm12 = vcmp.gt.f32.partialorder %v14254_v30, 0.0  ;;  %v14417_v13 = vpop.f32.mrb[40].mxu1 }
0x1617   :  { %v7689_v1 = vrot.slane %v7688_v46, 1  ;;  %v7996_v57 = vrot.slane %v7995_v34, 1  ;;  %v7387_v6 = vrot.slane %v7386_v18, 2  ;;  %v7693_v50 = vmax.f32 %v7691_v38, %v7692_v49 }
0x1618   :  { %v7381_v62 = vmax.f32 %v7379_v5, %v7380_v33  ;;  %v7998_v37 = vsel %vm7341_vm14, %v7946_v51, -inf  ;;  %v7640_v54 = vsel %vm7592_vm13, %v7127_v8, -1e+30  ;;  %v7947_v43 = vsel %vm7899_vm0, %v7127_v8, -1e+30  ;;  %v14414_v35 = vpop.eup %9537  ;;  %v7149_v5 = vpop.f32.mrb[41].mxu1 }
0x1619   :  { %vm7593_vm15 = vcmp.gt.f32.partialorder %v14198_v58, 0.0  ;;  %v7690_v63 = vmax.f32 %v7688_v46, %v7689_v1  ;;  %v7997_v21 = vmax.f32 %v7995_v34, %v7996_v57  ;;  %v7388_v39 = vmax.f32 %v7386_v18, %v7387_v6  ;;  %v14423_v33 = vpop.permute.xlu0 %7233  ;;  %v14425_v46 = vpop.f32.mrb[42].mxu1 }
0x161a   :  { %v7694_v23 = vrot.slane %v7693_v50, 2  ;;  %v7382_v60 = vrot.slane %v7381_v62, 1  ;;  %v7999_v17 = vrot.slane %v7998_v37, 4  ;;  %v7698_v56 = vsel %vm7341_vm14, %v7640_v54, -inf  ;;  %v14421_v38 = vpop.eup %9539  ;;  %v7152_v1 = vpop.f32.mrb[43].mxu1 }
0x161b   :  { %v8005_v15 = vsel %vm7341_vm14, %v7947_v43, -inf  ;;  %15133 = vst [vmem:[#allocation47_spill] sm:$0xff] %v14421_v38  ;;  %9545 = vtanh.f32 %v7690_v63  ;;  %v7389_v25 = vrot.slane %v7388_v39, 1  ;;  %v7699_v49 = vrot.slane %v7698_v56, 4 }
0x161c   :  { %v7695_v9 = vmax.f32 %v7693_v50, %v7694_v23  ;;  %vm7594_vm0 = vcmp.gt.f32.partialorder %v14202_v19, 0.0  ;;  %vm7900_vm8 = vcmp.gt.f32.partialorder %v14206_v28, 0.0  ;;  %9547 = vtanh.f32 %v7997_v21 }
0x161d   :  { %v7383_v34 = vmax.f32 %v7381_v62, %v7382_v60  ;;  %v8000_v18 = vmax.f32 %v7998_v37, %v7999_v17  ;;  %v8006_v51 = vrot.slane %v8005_v15, 4  ;;  %v7390_v57 = vmax.f32 %v7388_v39, %v7389_v25  ;;  %v14431_v43 = vpop.eup %9541  ;;  %v7241_v25 = vpop.permute.xlu0 %7240 }
0x161e   :  { %v7696_v6 = vrot.slane %v7695_v9, 1  ;;  %v7700_v54 = vmax.f32 %v7698_v56, %v7699_v49  ;;  %v7332_v50 = vsel %vm7284_vm9, %v7127_v8, -1e+30  ;;  %vm7286_vm10 = vcmp.gt.f32.partialorder %v14423_v33, 0.0  ;;  %v14446_v49 = vpop.f32.mrb[44].mxu1 }
0x161f   :  { %9549 = vtanh.f32 %v7383_v34  ;;  %v8001_v63 = vrot.slane %v8000_v18, 2  ;;  %v8007_v23 = vmax.f32 %v8005_v15, %v8006_v51  ;;  %v7391_v5 = vsel %vm7341_vm14, %v7332_v50, -inf }
0x1620   :  { %9551 = vtanh.f32 %v7390_v57  ;;  %v7697_v62 = vmax.f32 %v7695_v9, %v7696_v6  ;;  %v7701_v37 = vrot.slane %v7700_v54, 2  ;;  %v7392_v21 = vrot.slane %v7391_v5, 4  ;;  %v14435_v60 = vpop.eup %9543 }
0x1621   :  { %vm7901_vm11 = vcmp.gt.f32.partialorder %v14210_v47, 0.0  ;;  %v8002_v39 = vmax.f32 %v8000_v18, %v8001_v63  ;;  %v8008_v29 = vrot.slane %v8007_v23, 2  ;;  %v7132_v8 = vadd.f32 %v14259_v14, %v14359_v48 }
0x1622   :  { %v7135_v17 = vadd.f32 %v14259_v14, %v14366_v16  ;;  %9553 = vtanh.f32 %v7697_v62  ;;  %v7702_v56 = vmax.f32 %v7700_v54, %v7701_v37  ;;  %v7393_v15 = vmax.f32 %v7391_v5, %v7392_v21  ;;  %v7157_v16 = vpop.f32.mrb[45].mxu1 }
0x1623   :  { %v14444_v9 = vadd.f32 %v14259_v14, %v14389_v12  ;;  %v8003_v34 = vrot.slane %v8002_v39, 1  ;;  %v8009_v51 = vmax.f32 %v8007_v23, %v8008_v29  ;;  %v7333_v18 = vsel %vm7285_vm12, %v7132_v8, -1e+30  ;;  %v14454_v12 = vpop.f32.mrb[46].mxu1 }
0x1624   :  { %v7641_v48 = vsel %vm7593_vm15, %v7132_v8, -1e+30  ;;  %vm7287_vm13 = vcmp.gt.f32.partialorder %v7241_v25, 0.0  ;;  %v7703_v1 = vrot.slane %v7702_v56, 1  ;;  %v7394_v57 = vrot.slane %v7393_v15, 2  ;;  %v7160_v5 = vpop.f32.mrb[47].mxu1 }
0x1625   :  { %v7398_v6 = vsel %vm7341_vm14, %v7333_v18, -inf  ;;  %v7705_v54 = vsel %vm7341_vm14, %v7641_v48, -inf  ;;  %vm7595_vm9 = vcmp.gt.f32.partialorder %v14204_v11, 0.0  ;;  %v8004_v50 = vmax.f32 %v8002_v39, %v8003_v34  ;;  %v14457_v62 = vpop.eup %9545 }
0x1626   :  { %v8010_v63 = vrot.slane %v8009_v51, 1  ;;  %v7399_v23 = vrot.slane %v7398_v6, 4  ;;  %v7706_v30 = vrot.slane %v7705_v54, 4  ;;  %v7704_v58 = vmax.f32 %v7702_v56, %v7703_v1  ;;  %v14463_v18 = vpop.eup %9547 }
0x1627   :  { %v7395_v37 = vmax.f32 %v7393_v15, %v7394_v57  ;;  %v7948_v21 = vsel %vm7900_vm8, %v7132_v8, -1e+30  ;;  %v7642_v29 = vsel %vm7594_vm0, %v7135_v17, -1e+30  ;;  %9555 = vtanh.f32 %v8004_v50 }
0x1628   :  { %v8011_v48 = vmax.f32 %v8009_v51, %v8010_v63  ;;  %v7400_v16 = vmax.f32 %v7398_v6, %v7399_v23  ;;  %v7707_v39 = vmax.f32 %v7705_v54, %v7706_v30  ;;  %9557 = vtanh.f32 %v7704_v58  ;;  %v14476_v54 = vpop.permute.xlu0 %7247 }
0x1629   :  { %v7396_v34 = vrot.slane %v7395_v37, 1  ;;  %v8012_v5 = vsel %vm7341_vm14, %v7948_v21, -inf  ;;  %v7712_v22 = vsel %vm7341_vm14, %v7642_v29, -inf  ;;  %v14467_v56 = vpop.eup %9549  ;;  %vm7902_vm12 = vcmp.gt.f32.partialorder %v14218_v26, 0.0 }
0x162a   :  { %15134 = vst [vmem:[#allocation17_spill] sm:$0xff] %v14467_v56  ;;  %9559 = vtanh.f32 %v8011_v48  ;;  %v7401_v28 = vrot.slane %v7400_v16, 2  ;;  %v7708_v8 = vrot.slane %v7707_v39, 2  ;;  %v8013_v15 = vrot.slane %v8012_v5, 4  ;;  %v14469_v19 = vpop.eup %9551 }
0x162b   :  { %15135 = vst [vmem:[#allocation48_spill] sm:$0xff] %v14469_v19  ;;  %v7397_v1 = vmax.f32 %v7395_v37, %v7396_v34  ;;  %v7713_v51 = vrot.slane %v7712_v22, 4  ;;  %v7949_v57 = vsel %vm7901_vm11, %v7135_v17, -1e+30  ;;  %v7334_v6 = vsel %vm7286_vm10, %v7135_v17, -1e+30 }
0x162c   :  { %v7402_v50 = vmax.f32 %v7400_v16, %v7401_v28  ;;  %v7709_v63 = vmax.f32 %v7707_v39, %v7708_v8  ;;  %v8014_v23 = vmax.f32 %v8012_v5, %v8013_v15  ;;  %v8019_v30 = vsel %vm7341_vm14, %v7949_v57, -inf  ;;  %v14479_v58 = vpop.eup %9553  ;;  %v7255_v57 = vpop.permute.xlu0 %7254 }
0x162d   :  { %9561 = vtanh.f32 %v7397_v1  ;;  %v7714_v21 = vmax.f32 %v7712_v22, %v7713_v51  ;;  %v8020_v29 = vrot.slane %v8019_v30, 4  ;;  %v7405_v37 = vsel %vm7341_vm14, %v7334_v6, -inf }
0x162e   :  { %v7403_v48 = vrot.slane %v7402_v50, 1  ;;  %v7710_v47 = vrot.slane %v7709_v63, 1  ;;  %v8015_v34 = vrot.slane %v8014_v23, 2  ;;  %v7406_v19 = vrot.slane %v7405_v37, 4 }
0x162f   :  { %v7715_v33 = vrot.slane %v7714_v21, 2  ;;  %v8021_v17 = vmax.f32 %v8019_v30, %v8020_v29  ;;  %v7335_v16 = vsel %vm7287_vm13, %v14444_v9, -1e+30  ;;  %v7643_v39 = vsel %vm7595_vm9, %v14444_v9, -1e+30 }
0x1630   :  { %vm7596_vm15 = vcmp.gt.f32.partialorder %v14214_v4, 0.0  ;;  %vm7903_vm0 = vcmp.gt.f32.partialorder %v14226_v10, 0.0  ;;  %v7404_v22 = vmax.f32 %v7402_v50, %v7403_v48  ;;  %v7711_v5 = vmax.f32 %v7709_v63, %v7710_v47 }
0x1631   :  { %v8016_v28 = vmax.f32 %v8014_v23, %v8015_v34  ;;  %v7407_v8 = vmax.f32 %v7405_v37, %v7406_v19  ;;  %vm7288_vm8 = vcmp.gt.f32.partialorder %v14476_v54, 0.0  ;;  %v7716_v15 = vmax.f32 %v7714_v21, %v7715_v33  ;;  %v14492_v6 = vpop.eup %9555 }
0x1632   :  { %v8022_v1 = vrot.slane %v8021_v17, 2  ;;  %v7412_v51 = vsel %vm7341_vm14, %v7335_v16, -inf  ;;  %v7719_v25 = vsel %vm7341_vm14, %v7643_v39, -inf  ;;  %9563 = vtanh.f32 %v7404_v22  ;;  %v14494_v50 = vpop.eup %9557 }
0x1633   :  { %v8017_v11 = vrot.slane %v8016_v28, 1  ;;  %v7408_v30 = vrot.slane %v7407_v8, 2  ;;  %v7413_v29 = vrot.slane %v7412_v51, 4  ;;  %vm7289_vm10 = vcmp.gt.f32.partialorder %v7255_v57, 0.0 }
0x1634   :  { %9565 = vtanh.f32 %v7711_v5  ;;  %v7717_v19 = vrot.slane %v7716_v15, 1  ;;  %v8023_v63 = vmax.f32 %v8021_v17, %v8022_v1  ;;  %v7720_v23 = vrot.slane %v7719_v25, 4  ;;  %v14496_v21 = vpop.eup %9559 }
0x1635   :  { %v8018_v37 = vmax.f32 %v8016_v28, %v8017_v11  ;;  %v7409_v48 = vmax.f32 %v7407_v8, %v7408_v30  ;;  %v7414_v47 = vmax.f32 %v7412_v51, %v7413_v29  ;;  %v7950_v34 = vsel %vm7902_vm12, %v14444_v9, -1e+30 }
0x1636   :  { %v7718_v33 = vmax.f32 %v7716_v15, %v7717_v19  ;;  %v8024_v16 = vrot.slane %v8023_v63, 1  ;;  %v7721_v39 = vmax.f32 %v7719_v25, %v7720_v23  ;;  %v8026_v22 = vsel %vm7341_vm14, %v7950_v34, -inf  ;;  %v14510_v25 = vpop.permute.xlu0 %7261 }
0x1637   :  { %9567 = vtanh.f32 %v8018_v37  ;;  %v7410_v56 = vrot.slane %v7409_v48, 1  ;;  %v7415_v5 = vrot.slane %v7414_v47, 2  ;;  %v8027_v38 = vrot.slane %v8026_v22, 4  ;;  %v14502_v17 = vpop.eup %9561 }
0x1638   :  { %vm7597_vm11 = vcmp.gt.f32.partialorder %v14222_v40, 0.0  ;;  %vm7904_vm13 = vcmp.gt.f32.partialorder %v14234_v61, 0.0  ;;  %9569 = vtanh.f32 %v7718_v33  ;;  %v8025_v28 = vmax.f32 %v8023_v63, %v8024_v16 }
0x1639   :  { %v7722_v8 = vrot.slane %v7721_v39, 2  ;;  %v7143_v26 = vadd.f32 %v14259_v14, %v14395_v55  ;;  %v7411_v9 = vmax.f32 %v7409_v48, %v7410_v56  ;;  %v7416_v15 = vmax.f32 %v7414_v47, %v7415_v5 }
0x163a   :  { %v8028_v1 = vmax.f32 %v8026_v22, %v8027_v38  ;;  %v7148_v51 = vadd.f32 %v14259_v14, %v14417_v13  ;;  %9571 = vtanh.f32 %v8025_v28  ;;  %vm7598_vm9 = vcmp.gt.f32.partialorder %v14230_v24, 0.0 }
0x163b   :  { %v7723_v11 = vmax.f32 %v7721_v39, %v7722_v8  ;;  %v7644_v30 = vsel %vm7596_vm15, %v7143_v26, -1e+30  ;;  %v7951_v29 = vsel %vm7903_vm0, %v7143_v26, -1e+30  ;;  %9573 = vtanh.f32 %v7411_v9  ;;  %v7269_v8 = vpop.permute.xlu0 %7268 }
0x163c   :  { %v7417_v19 = vrot.slane %v7416_v15, 1  ;;  %v8029_v63 = vrot.slane %v8028_v1, 2  ;;  %v7726_v55 = vsel %vm7341_vm14, %v7644_v30, -inf  ;;  %v8033_v23 = vsel %vm7341_vm14, %v7951_v29, -inf  ;;  %v14520_v37 = vpop.eup %9563 }
0x163d   :  { %v7724_v56 = vrot.slane %v7723_v11, 1  ;;  %v7727_v38 = vrot.slane %v7726_v55, 4  ;;  %v7336_v13 = vsel %vm7288_vm8, %v7143_v26, -1e+30  ;;  %v8034_v47 = vrot.slane %v8033_v23, 4 }
0x163e   :  { %v7418_v48 = vmax.f32 %v7416_v15, %v7417_v19  ;;  %v8030_v4 = vmax.f32 %v8028_v1, %v8029_v63  ;;  %v7419_v10 = vsel %vm7341_vm14, %v7336_v13, -inf  ;;  %v14523_v34 = vpop.eup %9565  ;;  %vm7905_vm12 = vcmp.gt.f32.partialorder %v14242_v0, 0.0 }
0x163f   :  { %v7725_v33 = vmax.f32 %v7723_v11, %v7724_v56  ;;  %v7728_v16 = vmax.f32 %v7726_v55, %v7727_v38  ;;  %v7420_v39 = vrot.slane %v7419_v10, 4  ;;  %v7337_v22 = vsel %vm7289_vm10, %v7148_v51, -1e+30 }
0x1640   :  { %9575 = vtanh.f32 %v7418_v48  ;;  %v8031_v54 = vrot.slane %v8030_v4, 1  ;;  %v8035_v5 = vmax.f32 %v8033_v23, %v8034_v47  ;;  %v7426_v28 = vsel %vm7341_vm14, %v7337_v22, -inf }
0x1641   :  { %9577 = vtanh.f32 %v7725_v33  ;;  %v7729_v26 = vrot.slane %v7728_v16, 2  ;;  %v7421_v9 = vmax.f32 %v7419_v10, %v7420_v39  ;;  %v7427_v15 = vrot.slane %v7426_v28, 4  ;;  %v14530_v1 = vpop.eup %9567 }
0x1642   :  { %vm7290_vm15 = vcmp.gt.f32.partialorder %v14510_v25, 0.0  ;;  %vm7291_vm0 = vcmp.gt.f32.partialorder %v7269_v8, 0.0  ;;  %v8032_v11 = vmax.f32 %v8030_v4, %v8031_v54  ;;  %v8036_v30 = vrot.slane %v8035_v5, 2  ;;  %v14536_v19 = vpop.eup %9569 }
0x1643   :  { %v7645_v57 = vsel %vm7597_vm11, %v7148_v51, -1e+30  ;;  %v7952_v29 = vsel %vm7904_vm13, %v7148_v51, -1e+30  ;;  %v7730_v63 = vmax.f32 %v7728_v16, %v7729_v26  ;;  %v7422_v55 = vrot.slane %v7421_v9, 2 }
0x1644   :  { %v7428_v56 = vmax.f32 %v7426_v28, %v7427_v15  ;;  %v7733_v38 = vsel %vm7341_vm14, %v7645_v57, -inf  ;;  %9579 = vtanh.f32 %v8032_v11  ;;  %v8037_v23 = vmax.f32 %v8035_v5, %v8036_v30  ;;  %v14540_v4 = vpop.eup %9571 }
0x1645   :  { %v7734_v13 = vrot.slane %v7733_v38, 4  ;;  %v8040_v48 = vsel %vm7341_vm14, %v7952_v29, -inf  ;;  %v7731_v47 = vrot.slane %v7730_v63, 1  ;;  %v7423_v40 = vmax.f32 %v7421_v9, %v7422_v55  ;;  %v14542_v61 = vpop.eup %9573 }
0x1646   :  { %v7429_v10 = vrot.slane %v7428_v56, 2  ;;  %v8041_v33 = vrot.slane %v8040_v48, 4  ;;  %vm7599_vm8 = vcmp.gt.f32.partialorder %v14238_v44, 0.0  ;;  %v8038_v51 = vrot.slane %v8037_v23, 1 }
0x1647   :  { %v7735_v16 = vmax.f32 %v7733_v38, %v7734_v13  ;;  %v7151_v39 = vadd.f32 %v14259_v14, %v14425_v46  ;;  %v7156_v22 = vadd.f32 %v14259_v14, %v14446_v49  ;;  %vm7906_vm10 = vcmp.gt.f32.partialorder %v14250_v3, 0.0 }
0x1648   :  { %v7732_v54 = vmax.f32 %v7730_v63, %v7731_v47  ;;  %v7424_v5 = vrot.slane %v7423_v40, 1  ;;  %v7430_v28 = vmax.f32 %v7428_v56, %v7429_v10  ;;  %v8042_v26 = vmax.f32 %v8040_v48, %v8041_v33 }
0x1649   :  { %v8039_v9 = vmax.f32 %v8037_v23, %v8038_v51  ;;  %v7736_v15 = vrot.slane %v7735_v16, 2  ;;  %v7646_v11 = vsel %vm7598_vm9, %v7151_v39, -1e+30  ;;  %v7953_v30 = vsel %vm7905_vm12, %v7151_v39, -1e+30  ;;  %v14561_v23 = vpop.permute.xlu0 %7275 }
0x164a   :  { %9581 = vtanh.f32 %v7732_v54  ;;  %v7425_v57 = vmax.f32 %v7423_v40, %v7424_v5  ;;  %v7431_v46 = vrot.slane %v7430_v28, 1  ;;  %v8043_v29 = vrot.slane %v8042_v26, 2  ;;  %v14554_v55 = vpop.eup %9575 }
0x164b   :  { %9583 = vtanh.f32 %v8039_v9  ;;  %v7737_v14 = vmax.f32 %v7735_v16, %v7736_v15  ;;  %v7740_v49 = vsel %vm7341_vm14, %v7646_v11, -inf  ;;  %v8047_v63 = vsel %vm7341_vm14, %v7953_v30, -inf  ;;  %v14558_v56 = vpop.eup %9577 }
0x164c   :  { %vm7600_vm11 = vcmp.gt.f32.partialorder %v14246_v53, 0.0  ;;  %9585 = vtanh.f32 %v7425_v57  ;;  %v7432_v24 = vmax.f32 %v7430_v28, %v7431_v46  ;;  %v8044_v0 = vmax.f32 %v8042_v26, %v8043_v29 }
0x164d   :  { %v7741_v38 = vrot.slane %v7740_v49, 4  ;;  %vm7907_vm13 = vcmp.gt.f32.partialorder %v14252_v59, 0.0  ;;  %v7738_v13 = vrot.slane %v7737_v14, 1  ;;  %v8048_v48 = vrot.slane %v8047_v63, 4 }
0x164e   :  { %v7338_v47 = vsel %vm7290_vm15, %v7151_v39, -1e+30  ;;  %v7339_v40 = vsel %vm7291_vm0, %v7156_v22, -1e+30  ;;  %9587 = vtanh.f32 %v7432_v24  ;;  %v8045_v10 = vrot.slane %v8044_v0, 1  ;;  %v14568_v16 = vpop.eup %9579 }
0x164f   :  { %v7742_v33 = vmax.f32 %v7740_v49, %v7741_v38  ;;  %v7433_v51 = vsel %vm7341_vm14, %v7338_v47, -inf  ;;  %v7739_v54 = vmax.f32 %v7737_v14, %v7738_v13  ;;  %v8049_v5 = vmax.f32 %v8047_v63, %v8048_v48  ;;  %v9645_v24 = vld [vmem:[%s14711_s9] ss:$0 sm:$0xff] }
0x1650   :  { %v7434_v28 = vrot.slane %v7433_v51, 4  ;;  %v7440_v26 = vsel %vm7341_vm14, %v7339_v40, -inf  ;;  %vm7292_vm9 = vcmp.gt.f32.partialorder %v14561_v23, 0.0  ;;  %v8046_v9 = vmax.f32 %v8044_v0, %v8045_v10 }
0x1651   :  { %v7743_v15 = vrot.slane %v7742_v33, 2  ;;  %v7441_v25 = vrot.slane %v7440_v26, 4  ;;  %v7647_v8 = vsel %vm7599_vm8, %v7156_v22, -1e+30  ;;  %9589 = vtanh.f32 %v7739_v54 }
0x1652   :  { %v8050_v39 = vrot.slane %v8049_v5, 2  ;;  %v7435_v11 = vmax.f32 %v7433_v51, %v7434_v28  ;;  %v7747_v30 = vsel %vm7341_vm14, %v7647_v8, -inf  ;;  %9591 = vtanh.f32 %v8046_v9 }
0x1653   :  { %v7744_v57 = vmax.f32 %v7742_v33, %v7743_v15  ;;  %v7442_v46 = vmax.f32 %v7440_v26, %v7441_v25  ;;  %v7748_v29 = vrot.slane %v7747_v30, 4  ;;  %v7954_v63 = vsel %vm7906_vm10, %v7156_v22, -1e+30 }
0x1654   :  { %v8051_v14 = vmax.f32 %v8049_v5, %v8050_v39  ;;  %v7436_v49 = vrot.slane %v7435_v11, 2  ;;  %v7159_v44 = vadd.f32 %v9645_v24, %v14454_v12  ;;  %v14581_v0 = vpop.eup %9581  ;;  %v8054_v47 = vsel %vm7341_vm14, %v7954_v63, -inf }
0x1655   :  { %v7745_v38 = vrot.slane %v7744_v57, 1  ;;  %v7443_v13 = vrot.slane %v7442_v46, 2  ;;  %v7749_v48 = vmax.f32 %v7747_v30, %v7748_v29  ;;  %v9584_v40 = vpop.eup %9583  ;;  %v8055_v51 = vrot.slane %v8054_v47, 4 }
0x1656   :  { %v8052_v10 = vrot.slane %v8051_v14, 1  ;;  %v7437_v33 = vmax.f32 %v7435_v11, %v7436_v49  ;;  %v7648_v3 = vsel %vm7600_vm11, %v7159_v44, -1e+30  ;;  %v14586_v22 = vpop.eup %9585  ;;  %v7955_v53 = vsel %vm7907_vm13, %v7159_v44, -1e+30 }
0x1657   :  { %v7746_v54 = vmax.f32 %v7744_v57, %v7745_v38  ;;  %v7444_v5 = vmax.f32 %v7442_v46, %v7443_v13  ;;  %v7750_v28 = vrot.slane %v7749_v48, 2  ;;  %v7754_v12 = vsel %vm7341_vm14, %v7648_v3, -inf }
0x1658   :  { %v8053_v26 = vmax.f32 %v8051_v14, %v8052_v10  ;;  %v7438_v9 = vrot.slane %v7437_v33, 1  ;;  %v8056_v15 = vmax.f32 %v8054_v47, %v8055_v51  ;;  %v7755_v25 = vrot.slane %v7754_v12, 4  ;;  %v14589_v8 = vpop.eup %9587 }
0x1659   :  { %9593 = vtanh.f32 %v7746_v54  ;;  %v7445_v39 = vrot.slane %v7444_v5, 1  ;;  %v7751_v11 = vmax.f32 %v7749_v48, %v7750_v28  ;;  %v8061_v63 = vsel %vm7341_vm14, %v7955_v53, -inf }
0x165a   :  { %9595 = vtanh.f32 %v8053_v26  ;;  %v7439_v30 = vmax.f32 %v7437_v33, %v7438_v9  ;;  %v8057_v29 = vrot.slane %v8056_v15, 2  ;;  %v7756_v57 = vmax.f32 %v7754_v12, %v7755_v25 }
0x165b   :  { %v7446_v46 = vmax.f32 %v7444_v5, %v7445_v39  ;;  %v7752_v49 = vrot.slane %v7751_v11, 1  ;;  %v7340_v14 = vsel %vm7292_vm9, %v7159_v44, -1e+30  ;;  %v9590_v24 = vpop.eup %9589  ;;  %v8062_v47 = vrot.slane %v8061_v63, 4 }
0x165c   :  { %9597 = vtanh.f32 %v7439_v30  ;;  %v8058_v38 = vmax.f32 %v8056_v15, %v8057_v29  ;;  %v7757_v13 = vrot.slane %v7756_v57, 2  ;;  %v9592_v48 = vpop.eup %9591  ;;  %v7447_v10 = vsel %vm7341_vm14, %v7340_v14, -inf }
0x165d   :  { %9599 = vtanh.f32 %v7446_v46  ;;  %v7753_v59 = vmax.f32 %v7751_v11, %v7752_v49  ;;  %v8168_v33 = vsel %vm808_vm1, %v14356_v27, %v14346_v20  ;;  %v8063_v54 = vmax.f32 %v8061_v63, %v8062_v47  ;;  %v15136_v47 = vld [vmem:[#allocation47_spill] sm:$0xff] }
0x165e   :  { %v8059_v51 = vrot.slane %v8058_v38, 1  ;;  %v7758_v3 = vmax.f32 %v7756_v57, %v7757_v13  ;;  %v7448_v5 = vrot.slane %v7447_v10, 4  ;;  %v8169_v23 = vsel %vm811_vm2, %v14397_v42, %v8168_v33  ;;  %v15138_v33 = vld [vmem:[#allocation48_spill] sm:$0xff] }
0x165f   :  { %9601 = vtanh.f32 %v7753_v59  ;;  %v8175_v44 = vsel %vm808_vm1, %v14540_v4, %v14530_v1  ;;  %v8132_v28 = vsel %vm808_vm1, %v14350_v45, %v14342_v52  ;;  %v8064_v9 = vrot.slane %v8063_v54, 2  ;;  %v15137_v59 = vld [vmem:[#allocation17_spill] sm:$0xff] }
0x1660   :  { %v8060_v12 = vmax.f32 %v8058_v38, %v8059_v51  ;;  %v7759_v26 = vrot.slane %v7758_v3, 1  ;;  %v7449_v20 = vmax.f32 %v7447_v10, %v7448_v5  ;;  %v8170_v27 = vsel %vm814_vm3, %v14402_v41, %v8169_v23  ;;  %v8706_v10 = vld [vmem:[%s14712_s10 + $0x28] sm:$0xff]   ;;  %s9751_s10 = smov 32  }
0x1661   :  { %v8176_v15 = vsel %vm811_vm2, %v14568_v16, %v8175_v44  ;;  %v8133_v42 = vsel %vm811_vm2, %v14382_v31, %v8132_v28  ;;  %v8139_v1 = vsel %vm808_vm1, %v14536_v19, %v14523_v34  ;;  %v8065_v52 = vmax.f32 %v8063_v54, %v8064_v9  ;;  %8593 = vmatpush3.bf16.msra.mxu0 %v8706_v10 }
0x1662   :  { %9603 = vtanh.f32 %v8060_v12  ;;  %v7760_v4 = vmax.f32 %v7758_v3, %v7759_v26  ;;  %v7450_v45 = vrot.slane %v7449_v20, 2  ;;  %v8171_v39 = vsel %vm817_vm4, %v14435_v60, %v8170_v27 }
0x1663   :  { %v9594_v25 = vpop.eup %9593  ;;  %v8177_v41 = vsel %vm814_vm3, %v9584_v40, %v8176_v15  ;;  %v8134_v16 = vsel %vm814_vm3, %v14400_v7, %v8133_v42  ;;  %v8140_v31 = vsel %vm811_vm2, %v14558_v56, %v8139_v1  ;;  %v8066_v53 = vrot.slane %v8065_v52, 1 }
0x1664   :  { %v9596_v11 = vpop.eup %9595  ;;  %9605 = vtanh.f32 %v7760_v4  ;;  %v7451_v34 = vmax.f32 %v7449_v20, %v7450_v45  ;;  %v8172_v19 = vsel %vm820_vm5, %v14463_v18, %v8171_v39  ;;  %v8178_v60 = vsel %vm817_vm4, %v9592_v48, %v8177_v41  ;;  %v8531_v41 = vld [vmem:[%s14713_s11] ss:$0 sm:$0xff]  ;;  %s9752_s11 = smov [#allocation8]  }
0x1665   :  { %v8173_v30 = vsel %vm823_vm6, %v14492_v6, %v8172_v19  ;;  %v8135_v40 = vsel %vm817_vm4, %v14431_v43, %v8134_v16  ;;  %v8141_v7 = vsel %vm814_vm3, %v14581_v0, %v8140_v31  ;;  %v8067_v56 = vmax.f32 %v8065_v52, %v8066_v53 }
0x1666   :  { %v9598_v29 = vpop.eup %9597  ;;  %v7452_v57 = vrot.slane %v7451_v34, 1  ;;  %v8174_v46 = vsel %vm826_vm7, %v14496_v21, %v8173_v30  ;;  %v8179_v49 = vsel %vm820_vm5, %v9596_v11, %v8178_v60  ;;  %v8136_v6 = vsel %vm820_vm5, %v14457_v62, %v8135_v40 }
0x1667   :  { %v9600_v18 = vpop.eup %9599  ;;  %v8142_v63 = vsel %vm817_vm4, %v9590_v24, %v8141_v7  ;;  %v8107_v43 = vsel %vm808_vm1, %v14542_v61, %v14520_v37  ;;  %v8100_v0 = vsel %vm808_vm1, %v14361_v2, %v14336_v36  ;;  %9607 = vtanh.f32 %v8067_v56 }
0x1668   :  { %v7453_v14 = vmax.f32 %v7451_v34, %v7452_v57  ;;  %v8137_v21 = vsel %vm823_vm6, %v14479_v58, %v8136_v6  ;;  %v8143_v38 = vsel %vm820_vm5, %v9594_v25, %v8142_v63  ;;  %v8108_v24 = vsel %vm811_vm2, %v14554_v55, %v8107_v43 }
0x1669   :  { %v9602_v13 = vpop.eup %9601  ;;  %v8138_v62 = vsel %vm826_vm7, %v14494_v50, %v8137_v21  ;;  %v8101_v37 = vsel %vm811_vm2, %v14378_v32, %v8100_v0  ;;  %v8109_v2 = vsel %vm814_vm3, %v14586_v22, %v8108_v24  ;;  %vm9750_vm1 = vmmov 0  }
0x166a   :  { %9609 = vtanh.f32 %v7453_v14  ;;  %v8144_v36 = vsel %vm823_vm6, %v9602_v13, %v8143_v38  ;;  %v8102_v58 = vsel %vm814_vm3, %v14414_v35, %v8101_v37  ;;  %v8110_v61 = vsel %vm817_vm4, %v14589_v8, %v8109_v2 }
0x166b   :  { %v8103_v50 = vsel %vm817_vm4, %v15136_v47, %v8102_v58  ;;  %v8111_v55 = vsel %vm820_vm5, %v9598_v29, %v8110_v61  ;;  %v15139_v51 = vmov 0.0   ;;  %vm15140_vm2 = vcmask 523264  }
0x166c   :  { %v9604_v48 = vpop.eup %9603  ;;  %v8104_v32 = vsel %vm820_vm5, %v15137_v59, %v8103_v50  ;;  %v8112_v35 = vsel %vm823_vm6, %v9600_v18, %v8111_v55  ;;  %8594 = vmatprep.mubr.msk.bf16.mxu0 %vm9750_vm1, %v15139_v51  ;;  %vm15141_vm3 = vmmov %vm15140_vm2  ;;  %vm8248_vm4 = vcmask 785408  }
0x166d   :  { %v8180_v22 = vsel %vm823_vm6, %v9604_v48, %v8179_v49  ;;  %v8105_v8 = vsel %vm823_vm6, %v15138_v33, %v8104_v32 }
0x166e   :  { %v9606_v3 = vpop.eup %9605  ;;  %v8106_v54 = vsel %vm826_vm7, %v14502_v17, %v8105_v8 }
0x166f   :  { %v8145_v5 = vsel %vm826_vm7, %v9606_v3, %v8144_v36 }
0x1670   :  { %v8651_v23 = vpack.i.bf16 %v8145_v5, %v8138_v62 }
0x1671   :  { %v9608_v44 = vpop.eup %9607 }
0x1672   :  { %8652 = vrot.lane.b32.xlu1 %v8651_v23, %s9751_s10  ;;  %v8181_v28 = vsel %vm826_vm7, %v9608_v44, %v8180_v22 }
0x1673   :  { %v8656_v26 = vpack.i.bf16 %v8181_v28, %v8174_v46 }
0x1674   :  { %v9610_v12 = vpop.eup %9609 }
0x1675   :  { %v8113_v9 = vsel %vm826_vm7, %v9610_v12, %v8112_v35  ;;  %8657 = vrot.lane.b32.xlu0 %v8656_v26, %s9745_s4  ;;  %s8318_s4 = sshll.u32 %s9752_s11, 4  ;;  %s8319_s4 = int_to_ptr.vmem [resolvable:$true] %s8318_s4 }
0x1676   :  { %s9712_s28 = scalar_lea.vmem %s8319_s4, 256  ;;  %p9717_p11 = scmp.lt.s32.totalorder %s8319_s4, %s8319_s4 }
0x1677   :  { %p9713_p10 = scmp.ne.s32.totalorder %s8319_s4, %s9712_s28  ;;  %p9718_p12 = scmp.lt.s32.totalorder %s9712_s28, %s9712_s28 }
0x1679   :  { %p9719_p13 = por %p9718_p12, %p9717_p11 }
0x167b   :  { %p9720_p0 = pnand %p9719_p13, %p9713_p10 }
0x16e4   :  { %v8653_v20 = vpop.permute.xlu1 %8652 }
0x16e5   :  { %v8655_v27 = vunpack.i.h.bf16 %v8653_v20  ;;  %v8654_v15 = vunpack.i.l.bf16 %v8653_v20 }
0x16e7   :  { %v8658_v42 = vpop.permute.xlu0 %8657  ;;  %v8189_v17 = vsel %vm7341_vm14, %v8113_v9, %v8655_v27  ;;  %v8188_v1 = vsel %vm7341_vm14, %v8106_v54, %v8654_v15 }
0x16e8   :  { %v8660_v4 = vunpack.i.h.bf16 %v8658_v42  ;;  %v8659_v52 = vunpack.i.l.bf16 %v8658_v42 }
0x16ea   :  { %v8191_v45 = vsel %vm15140_vm2, %v8189_v17, %v8660_v4  ;;  %v8190_v25 = vsel %vm15141_vm3, %v8188_v1, %v8659_v52 }
0x16eb   :  { %v8192_v39 = vpack.c.bf16 %v8191_v45, %v8190_v25 }
0x16ed   :  { %8595 = vmatmul.mubr.msk.bf16.vlgmr.msra.gmra.mrb[64].mxu0 %vm8248_vm4, %v8192_v39 }
0x17c0   :  { %v8286_v16 = vpop.f32.mrb[64].mxu0 }
0x17c1   :  { %v8287_v31 = vadd.f32 %v8531_v41, %v8286_v16  ;;  %v8596_v11 = vpop.f32.mrb[65].mxu0 }
0x17c2   :  { %v8289_v53 = vpop.f32.mrb[66].mxu0 }
0x17c3   :  { %v8290_v34 = vadd.f32 %v8531_v41, %v8289_v53  ;;  %8293 = vmax.xlane.f32.xlu1 %v8287_v31  ;;  %v8597_v19 = vpop.f32.mrb[67].mxu0 }
0x17c5   :  { %8295 = vmax.xlane.f32.xlu0 %v8290_v34 }
0x1850   :  { %v8294_v30 = vpop.xlane.xlu1 %8293 }
0x1851   :  { %v8297_v60 = vsub.f32 %v8287_v31, %v8294_v30 }
0x1852   :  { %v8296_v40 = vpop.xlane.xlu0 %8295 }
0x1853   :  { %v8299_v7 = vmul.f32 1.442695, %v8297_v60  ;;  %v8298_v29 = vsub.f32 %v8290_v34, %v8296_v40 }
0x1855   :  { %9611 = vpow2.f32 %v8299_v7  ;;  %v8301_v56 = vmul.f32 1.442695, %v8298_v29 }
0x1857   :  { %9613 = vpow2.f32 %v8301_v56 }
0x185f   :  { %v9612_v57 = vpop.eup %9611 }
0x1860   :  { %8303 = vadd.xlane.f32.xlu0 %v9612_v57 }
0x1861   :  { %v9614_v46 = vpop.eup %9613 }
0x1862   :  { %8305 = vadd.xlane.f32.xlu1 %v9614_v46 }
0x18ed   :  { %v8304_v49 = vpop.xlane.xlu0 %8303 }
0x18ee   :  { %9615 = vrcp.f32 %v8304_v49 }
0x18ef   :  { %v8306_v18 = vpop.xlane.xlu1 %8305 }
0x18f0   :  { %9617 = vrcp.f32 %v8306_v18 }
0x18f8   :  { %v9616_v6 = vpop.eup %9615 }
0x18f9   :  { %v8308_v63 = vmul.f32 %v9616_v6, %v9612_v57 }
0x18fa   :  { %v9618_v43 = vpop.eup %9617 }
0x18fb   :  { %v8310_v0 = vmul.f32 %v9618_v43, %v9614_v46  ;;  %8311 = vst [vmem:[#allocation8] sm:$0xff] %v8308_v63 }
0x18fd   :  { %8312 = vst [vmem:[#allocation8 + $0x8] sm:$0xff] %v8310_v0 }
0x18fe   :  { %9723 = shalt.err (!%p9720_p0)
}
0x18ff   :  { %s9724_s6 = scalar_lea.hbm %s14714_s12, 256 }
0x1900   :  { %p9725_p1 = scmp.ne.s32.totalorder %s14714_s12, %s9724_s6  ;;  %p9728_p2 = scmp.lt.u32.totalorder %s9724_s6, %s14714_s12 }
0x1902   :  { %p9730_p3 = pnand %p9728_p2, %p9725_p1 }
0x1904   :  { %9733 = shalt.err (!%p9730_p3)
}
0x1905   :  { %8324 = dma.vmem_to_hbm [thread:$0]  %s8319_s4, 256, %s14714_s12, [#allocation4], %s9742_s5, %s9742_s5, %s9743_s22  }
0x1906   :  { %9738 = dma.done.wait [#allocation4], 256  }
0x1907   :  { %9739 = vsyncadd [#allocation4], 4294967040 }
0x1908   :  { %8328 = vsyncpa [#allocation3], 1 }
0x1909   :  { %8329 = vsyncpa [#allocation6], 1 }
0x190a   :  { %8330 = vsyncpa [#allocation4], 1 }

</bundles_post_ra>
